<compile_context>
chip_gen: v7x
topology: tpu7x:2x2x1
jax: 0.10.0
libtpu: 0.0.40
codegen_flags: <defaults>
</compile_context>

<pallas_src>
import math

import numpy as np
import jax
import jax.numpy as jnp
from jax import lax
from jax.experimental import pallas as pl
from jax.experimental.pallas import tpu as pltpu

_BN_EPS = 1e-5


# ---------------- host-side geometry helpers (numpy, trace-time constants) ---

def _make_tap_sel(n, h, w, ksz, stride, pad):
    """Gather matrices implementing im2col row-gather for a ksz x ksz conv.

    Returns (tap_ids, sel, (oh, ow), m_out, blk_rows) where `sel` stacks one
    [blk_rows, m_in] 0/1 matrix per *valid* tap (blk_rows = m_out rounded up
    to a multiple of 8 so in-kernel slices stay sublane-aligned).  All-zero
    rows encode zero padding.  Flat index convention: n*H*W + y*W + x.
    """
    oh = (h + 2 * pad - ksz) // stride + 1
    ow = (w + 2 * pad - ksz) // stride + 1
    m_in, m_out = n * h * w, n * oh * ow
    blk = ((m_out + 7) // 8) * 8
    tap_ids, mats = [], []
    for dh in range(ksz):
        for dw in range(ksz):
            s = np.zeros((blk, m_in), np.float32)
            valid = False
            for b in range(n):
                for y in range(oh):
                    for xx in range(ow):
                        iy = y * stride + dh - pad
                        ix = xx * stride + dw - pad
                        if 0 <= iy < h and 0 <= ix < w:
                            s[b * oh * ow + y * ow + xx,
                              b * h * w + iy * w + ix] = 1.0
                            valid = True
            if valid:
                tap_ids.append(dh * ksz + dw)
                mats.append(s)
    return tap_ids, np.concatenate(mats, axis=0), (oh, ow), m_out, blk


def _make_subsample_sel(n, h, w, stride):
    """Row-selection matrix for a 1x1 stride-`stride` conv (shortcut path)."""
    oh, ow = (h - 1) // stride + 1, (w - 1) // stride + 1
    s = np.zeros((n * oh * ow, n * h * w), np.float32)
    for b in range(n):
        for y in range(oh):
            for xx in range(ow):
                s[b * oh * ow + y * ow + xx,
                  b * h * w + (y * stride) * w + xx * stride] = 1.0
    return s


def im2col(x, kh, kw, stride, pad):
    """x: [N, H, W, C] -> ([N*OH*OW, kh*kw*C], (N, OH, OW)).  XLA glue at the
    HBM boundary only (used for the stem; every other conv is in-kernel)."""
    N, H, W, C = x.shape
    OH = (H + 2 * pad - kh) // stride + 1
    OW = (W + 2 * pad - kw) // stride + 1
    xp = jnp.pad(x, ((0, 0), (pad, pad), (pad, pad), (0, 0)))
    cols = [xp[:, i:i + stride * (OH - 1) + 1:stride,
                  j:j + stride * (OW - 1) + 1:stride, :]
            for i in range(kh) for j in range(kw)]
    a = jnp.concatenate(cols, axis=-1).reshape(N * OH * OW, kh * kw * C)
    return a, (N, OH, OW)


# ---------------- deterministic parameter init ----------------

def _conv_w(key, kh, kw, cin, cout):
    fan_in = kh * kw * cin
    w = jax.random.normal(key, (kh, kw, cin, cout), jnp.float32)
    w = w * math.sqrt(2.0 / fan_in)
    # matmul layout [kh*kw*cin, cout]; rows tap-major, matching the gathers
    return w.reshape(kh * kw * cin, cout)


def _gb(c):
    # row 0 = gamma (ones), row 1 = beta (zeros)
    return jnp.concatenate([jnp.ones((1, c), jnp.float32),
                            jnp.zeros((1, c), jnp.float32)], axis=0)


def _init_task_params(key, in_ch, base):
    ks = iter(jax.random.split(key, 32))
    p = {'stem_w': _conv_w(next(ks), 7, 7, in_ch, base), 'stem_gb': _gb(base)}
    widths = [base, base * 2, base * 4, base * 8]
    cin = base
    layers = []
    for li, cout in enumerate(widths):
        blocks = []
        for bi in range(2):
            stride = (1 if li == 0 else 2) if bi == 0 else 1
            c_in = cin if bi == 0 else cout
            bp = {'w1': _conv_w(next(ks), 3, 3, c_in, cout), 'gb1': _gb(cout),
                  'w2': _conv_w(next(ks), 3, 3, cout, cout), 'gb2': _gb(cout)}
            if stride != 1 or c_in != cout:
                bp['wd'] = _conv_w(next(ks), 1, 1, c_in, cout)
                bp['gbd'] = _gb(cout)
            blocks.append(bp)
        layers.append(blocks)
        cin = cout
    p['layers'] = layers
    return p


def _blockdiag_taps(w_list, n_taps, cin, cout):
    """Per-tap block-diagonal combination of per-task conv weights:
    T x [n_taps*cin, cout]  ->  [n_taps*(T*cin), T*cout]."""
    T = len(w_list)
    out = jnp.zeros((n_taps, T, cin, T, cout), jnp.float32)
    for j, wj in enumerate(w_list):
        out = out.at[:, j, :, j, :].set(wj.reshape(n_taps, cin, cout))
    return out.reshape(n_taps * T * cin, T * cout)


def _init_params(key, in_ch, base, task_num):
    per_task = [_init_task_params(k, in_ch, base)
                for k in jax.random.split(key, task_num)]
    widths = [base, base * 2, base * 4, base * 8]
    p = {'stem_w': jnp.concatenate([tp['stem_w'] for tp in per_task], axis=1),
         'stem_gb': jnp.concatenate([tp['stem_gb'] for tp in per_task], axis=1)}
    layers = []
    cin = base
    for li, cout in enumerate(widths):
        blocks = []
        for bi in range(2):
            c_in = cin if bi == 0 else cout
            tbs = [tp['layers'][li][bi] for tp in per_task]
            bp = {'w1': _blockdiag_taps([tb['w1'] for tb in tbs], 9, c_in, cout),
                  'gb1': jnp.concatenate([tb['gb1'] for tb in tbs], axis=1),
                  'w2': _blockdiag_taps([tb['w2'] for tb in tbs], 9, cout, cout),
                  'gb2': jnp.concatenate([tb['gb2'] for tb in tbs], axis=1)}
            if 'wd' in tbs[0]:
                bp['wd'] = _blockdiag_taps([tb['wd'] for tb in tbs], 1, c_in, cout)
                bp['gbd'] = jnp.concatenate([tb['gbd'] for tb in tbs], axis=1)
            blocks.append(bp)
        layers.append(blocks)
        cin = cout
    p['layers'] = layers
    return p


# ---------------- in-kernel helpers ----------------

def _bn_train(y, gamma, beta):
    """Train-mode BatchNorm over axis 0 (batch stats, biased variance),
    refactored as y*scale + shift.  y: [M, C] f32; gamma/beta: [1, C]."""
    inv_m = 1.0 / y.shape[0]
    mean = jnp.sum(y, axis=0, keepdims=True) * inv_m
    var = jnp.sum(y * y, axis=0, keepdims=True) * inv_m - mean * mean
    var = jnp.maximum(var, 0.0)          # guard cancellation
    scale = gamma * lax.rsqrt(var + _BN_EPS)
    return y * scale + (beta - mean * scale)


def _conv_taps(x, sel, tap_ids, blk_rows, w_ref, ccin, m_out):
    """3x3 conv as sum_k (Sel_k @ x) @ W_k.  `sel` stacks per-tap gather
    matrices (row-blocks of height blk_rows, zero rows = zero padding);
    `w_ref` is the block-diagonal weight ref [9*ccin, ccout]."""
    g = jnp.dot(sel, x, preferred_element_type=jnp.float32)   # [n_taps*blk, ccin]
    acc = None
    for j, k in enumerate(tap_ids):
        a = g[j * blk_rows:j * blk_rows + m_out, :]
        wk = w_ref[k * ccin:(k + 1) * ccin, :]
        d = jnp.dot(a, wk, preferred_element_type=jnp.float32)
        acc = d if acc is None else acc + d
    return acc


# ---------------- the single whole-forward kernel ----------------

def _make_kernel(plan):
    blocks = plan['blocks']

    def kernel(*refs):
        it = iter(refs[:-1])
        o_ref = refs[-1]
        a0_ref, selp_ref, wst_ref, gbst_ref = next(it), next(it), next(it), next(it)
        ents = []
        for blk in blocks:
            e = {'sel1': next(it), 'sel2': next(it)}
            if blk['has_stitch']:
                e['mix'] = next(it)
            if blk['has_down']:
                e['ss'] = next(it)
            e['w1'], e['gb1'], e['w2'], e['gb2'] = next(it), next(it), next(it), next(it)
            if blk['has_down']:
                e['wd'], e['gbd'] = next(it), next(it)
            ents.append(e)

        # ---- stem: conv7x7/s2 (im2col'd LHS) + BN + ReLU (all tasks in one dot) ----
        y = jnp.dot(a0_ref[...], wst_ref[...], preferred_element_type=jnp.float32)
        gb = gbst_ref[...]
        y = jnp.maximum(_bn_train(y, gb[0:1, :], gb[1:2, :]), 0.0)

        # ---- fused maxpool 3x3/s2/p1: gather taps + elementwise max ----
        # (zero-filled padded taps are exact because y >= 0 post-ReLU)
        g = jnp.dot(selp_ref[...], y, preferred_element_type=jnp.float32)
        mp, pblk = plan['m_pool'], plan['pool_blk']
        feat = g[0:mp, :]
        for j in range(1, plan['n_pool_taps']):
            feat = jnp.maximum(feat, g[j * pblk:j * pblk + mp, :])

        # ---- 4 layers x 2 BasicBlocks, all activations VMEM-resident ----
        for blk, e in zip(blocks, ents):
            xin = feat
            if blk['has_stitch']:
                # cross-stitch: one dot with kron(cross_unit.T, I_C)
                xin = jnp.dot(xin, e['mix'][...], preferred_element_type=jnp.float32)
            h1 = _conv_taps(xin, e['sel1'][...], blk['tap1'], blk['blk1'],
                            e['w1'], blk['ccin'], blk['m_out'])
            gb1 = e['gb1'][...]
            h1 = jnp.maximum(_bn_train(h1, gb1[0:1, :], gb1[1:2, :]), 0.0)
            y2 = _conv_taps(h1, e['sel2'][...], blk['tap2'], blk['blk2'],
                            e['w2'], blk['ccout'], blk['m_out'])
            gb2 = e['gb2'][...]
            y2 = _bn_train(y2, gb2[0:1, :], gb2[1:2, :])
            if blk['has_down']:
                sc = jnp.dot(e['ss'][...], xin, preferred_element_type=jnp.float32)
                sc = jnp.dot(sc, e['wd'][...], preferred_element_type=jnp.float32)
                gbd = e['gbd'][...]
                sc = _bn_train(sc, gbd[0:1, :], gbd[1:2, :])
            else:
                sc = xin
            feat = jnp.maximum(y2 + sc, 0.0)

        # lane-dense [M, T*C_final] store (128 lanes at base=8, T=2)
        o_ref[...] = feat

    return kernel


# ---------------- module wrapper ----------------

class TransformResnetCross:
    """JAX/Pallas port of _transform_resnet_cross (cross-stitch ResNet),
    forward only.  The whole forward pass is a single pallas_call."""

    def __init__(self, task_name, key, in_ch=3, base=8):
        self.task_name = task_name
        self.task_num = len(task_name)
        self.in_ch = in_ch
        self.base = base
        self.params = _init_params(key, in_ch, base, self.task_num)
        # nn.Parameter(torch.ones(4, task_num, task_num)); index 3 unused,
        # matching the reference (cross_unit[i-1] for i in 1..3).
        self.cross_unit = jnp.ones((4, self.task_num, self.task_num), jnp.float32)

    def __call__(self, inputs_nchw):
        T = self.task_num
        base = self.base
        widths = [base, base * 2, base * 4, base * 8]
        N = inputs_nchw.shape[0]
        x = jnp.transpose(inputs_nchw, (0, 2, 3, 1)).astype(jnp.float32)  # NCHW->NHWC

        # stem im2col at the HBM boundary (pure XLA indexing glue)
        a0, (_, H1, W1) = im2col(x, 7, 7, 2, 3)

        # maxpool gather matrices
        pool_taps, pool_sel, (Hp, Wp), m_pool, pool_blk = _make_tap_sel(N, H1, W1, 3, 2, 1)

        args = [a0, jnp.asarray(pool_sel),
                self.params['stem_w'], self.params['stem_gb']]

        blocks_plan = []
        h, w, cin = Hp, Wp, base
        for li, cout in enumerate(widths):
            for bi in range(2):
                stride = (1 if li == 0 else 2) if bi == 0 else 1
                c_in = cin if bi == 0 else cout
                bp = self.params['layers'][li][bi]
                has_down = 'wd' in bp
                has_stitch = (li > 0 and bi == 0)
                tap1, sel1, (oh, ow), m_out, blk1 = _make_tap_sel(N, h, w, 3, stride, 1)
                tap2, sel2, _, _, blk2 = _make_tap_sel(N, oh, ow, 3, 1, 1)

                args += [jnp.asarray(sel1), jnp.asarray(sel2)]
                if has_stitch:
                    mix = jnp.kron(jnp.transpose(self.cross_unit[li - 1]),
                                   jnp.eye(c_in, dtype=jnp.float32))
                    args.append(mix)
                if has_down:
                    args.append(jnp.asarray(_make_subsample_sel(N, h, w, stride)))
                args += [bp['w1'], bp['gb1'], bp['w2'], bp['gb2']]
                if has_down:
                    args += [bp['wd'], bp['gbd']]

                blocks_plan.append(dict(ccin=T * c_in, ccout=T * cout,
                                        m_out=m_out, tap1=tap1, blk1=blk1,
                                        tap2=tap2, blk2=blk2,
                                        has_down=has_down, has_stitch=has_stitch))
                h, w = oh, ow
            cin = cout

        plan = dict(n_pool_taps=len(pool_taps), m_pool=m_pool,
                    pool_blk=pool_blk, blocks=blocks_plan)

        c_f = widths[-1]
        m_f = N * h * w
        out = pl.pallas_call(
            _make_kernel(plan),
            out_shape=jax.ShapeDtypeStruct((m_f, T * c_f), jnp.float32),
            in_specs=[pl.BlockSpec(memory_space=pltpu.MemorySpace.VMEM)
                      for _ in args],
            out_specs=pl.BlockSpec(memory_space=pltpu.MemorySpace.VMEM),
            compiler_params=pltpu.CompilerParams(
                vmem_limit_bytes=32 * 1024 * 1024),
        )(*args)

        # ss_rep[3]: per-task features back to NCHW
        outs = []
        for t in range(T):
            f = out[:, t * c_f:(t + 1) * c_f].reshape(N, h, w, c_f)
            outs.append(jnp.transpose(f, (0, 3, 1, 2)))
        return outs


if __name__ == "__main__":
    key = jax.random.PRNGKey(0)
    k_param, k_in = jax.random.split(key)
    task_name = ["seg", "depth"]
    model = TransformResnetCross(task_name, k_param, in_ch=3, base=8)
    x = jax.random.normal(k_in, (2, 3, 16, 16), jnp.float32)  # NCHW like PyTorch
    fwd = jax.jit(model.__call__)
    outs = fwd(x)
    outs = [jax.block_until_ready(o) for o in outs]
    for o in outs:
        assert o.shape == (2, 64, 1, 1), o.shape
        assert bool(jnp.all(jnp.isfinite(o)))
    print("KERNEL_OK")
</pallas_src>

<mosaic_0001>
module attributes {stable_mosaic.version = 11 : i64} {
  func.func @kernel(%arg0: memref<128x147xf32, #tpu.memory_space<vmem>>, %arg1: memref<288x128xf32, #tpu.memory_space<vmem>>, %arg2: memref<147x16xf32, #tpu.memory_space<vmem>>, %arg3: memref<2x16xf32, #tpu.memory_space<vmem>>, %arg4: memref<288x32xf32, #tpu.memory_space<vmem>>, %arg5: memref<288x32xf32, #tpu.memory_space<vmem>>, %arg6: memref<144x16xf32, #tpu.memory_space<vmem>>, %arg7: memref<2x16xf32, #tpu.memory_space<vmem>>, %arg8: memref<144x16xf32, #tpu.memory_space<vmem>>, %arg9: memref<2x16xf32, #tpu.memory_space<vmem>>, %arg10: memref<288x32xf32, #tpu.memory_space<vmem>>, %arg11: memref<288x32xf32, #tpu.memory_space<vmem>>, %arg12: memref<144x16xf32, #tpu.memory_space<vmem>>, %arg13: memref<2x16xf32, #tpu.memory_space<vmem>>, %arg14: memref<144x16xf32, #tpu.memory_space<vmem>>, %arg15: memref<2x16xf32, #tpu.memory_space<vmem>>, %arg16: memref<72x32xf32, #tpu.memory_space<vmem>>, %arg17: memref<72x8xf32, #tpu.memory_space<vmem>>, %arg18: memref<16x16xf32, #tpu.memory_space<vmem>>, %arg19: memref<8x32xf32, #tpu.memory_space<vmem>>, %arg20: memref<144x32xf32, #tpu.memory_space<vmem>>, %arg21: memref<2x32xf32, #tpu.memory_space<vmem>>, %arg22: memref<288x32xf32, #tpu.memory_space<vmem>>, %arg23: memref<2x32xf32, #tpu.memory_space<vmem>>, %arg24: memref<16x32xf32, #tpu.memory_space<vmem>>, %arg25: memref<2x32xf32, #tpu.memory_space<vmem>>, %arg26: memref<72x8xf32, #tpu.memory_space<vmem>>, %arg27: memref<72x8xf32, #tpu.memory_space<vmem>>, %arg28: memref<288x32xf32, #tpu.memory_space<vmem>>, %arg29: memref<2x32xf32, #tpu.memory_space<vmem>>, %arg30: memref<288x32xf32, #tpu.memory_space<vmem>>, %arg31: memref<2x32xf32, #tpu.memory_space<vmem>>, %arg32: memref<32x8xf32, #tpu.memory_space<vmem>>, %arg33: memref<8x2xf32, #tpu.memory_space<vmem>>, %arg34: memref<32x32xf32, #tpu.memory_space<vmem>>, %arg35: memref<2x8xf32, #tpu.memory_space<vmem>>, %arg36: memref<288x64xf32, #tpu.memory_space<vmem>>, %arg37: memref<2x64xf32, #tpu.memory_space<vmem>>, %arg38: memref<576x64xf32, #tpu.memory_space<vmem>>, %arg39: memref<2x64xf32, #tpu.memory_space<vmem>>, %arg40: memref<32x64xf32, #tpu.memory_space<vmem>>, %arg41: memref<2x64xf32, #tpu.memory_space<vmem>>, %arg42: memref<8x2xf32, #tpu.memory_space<vmem>>, %arg43: memref<8x2xf32, #tpu.memory_space<vmem>>, %arg44: memref<576x64xf32, #tpu.memory_space<vmem>>, %arg45: memref<2x64xf32, #tpu.memory_space<vmem>>, %arg46: memref<576x64xf32, #tpu.memory_space<vmem>>, %arg47: memref<2x64xf32, #tpu.memory_space<vmem>>, %arg48: memref<8x2xf32, #tpu.memory_space<vmem>>, %arg49: memref<8x2xf32, #tpu.memory_space<vmem>>, %arg50: memref<64x64xf32, #tpu.memory_space<vmem>>, %arg51: memref<2x2xf32, #tpu.memory_space<vmem>>, %arg52: memref<576x128xf32, #tpu.memory_space<vmem>>, %arg53: memref<2x128xf32, #tpu.memory_space<vmem>>, %arg54: memref<1152x128xf32, #tpu.memory_space<vmem>>, %arg55: memref<2x128xf32, #tpu.memory_space<vmem>>, %arg56: memref<64x128xf32, #tpu.memory_space<vmem>>, %arg57: memref<2x128xf32, #tpu.memory_space<vmem>>, %arg58: memref<8x2xf32, #tpu.memory_space<vmem>>, %arg59: memref<8x2xf32, #tpu.memory_space<vmem>>, %arg60: memref<1152x128xf32, #tpu.memory_space<vmem>>, %arg61: memref<2x128xf32, #tpu.memory_space<vmem>>, %arg62: memref<1152x128xf32, #tpu.memory_space<vmem>>, %arg63: memref<2x128xf32, #tpu.memory_space<vmem>>, %arg64: memref<2x128xf32, #tpu.memory_space<vmem>>) attributes {dimension_semantics = [], scalar_prefetch = 0 : i64, scratch_operands = 0 : i64, tpu.core_type = #tpu.core_type<tc>} {
    %c0 = arith.constant 0 : index
    %c0_0 = arith.constant 0 : index
    %0 = vector.load %arg0[%c0, %c0_0] : memref<128x147xf32, #tpu.memory_space<vmem>>, vector<128x147xf32>
    %c0_1 = arith.constant 0 : index
    %c0_2 = arith.constant 0 : index
    %1 = vector.load %arg2[%c0_1, %c0_2] : memref<147x16xf32, #tpu.memory_space<vmem>>, vector<147x16xf32>
    %cst = arith.constant dense<0.000000e+00> : vector<128x16xf32>
    %2 = tpu.matmul %0, %1, %cst {dimension_numbers = #tpu.dot_dimension_numbers<[1], [0], [0], [1], [0, 0, 1, 1], [], []>} : vector<128x147xf32>, vector<147x16xf32>, vector<128x16xf32> -> vector<128x16xf32>
    %c0_3 = arith.constant 0 : index
    %c0_4 = arith.constant 0 : index
    %3 = vector.load %arg3[%c0_3, %c0_4] : memref<2x16xf32, #tpu.memory_space<vmem>>, vector<2x16xf32>
    %4 = vector.extract_strided_slice %3 {offsets = [0, 0], sizes = [1, 16], strides = [1, 1]} : vector<2x16xf32> to vector<1x16xf32>
    %5 = vector.extract_strided_slice %3 {offsets = [1, 0], sizes = [1, 16], strides = [1, 1]} : vector<2x16xf32> to vector<1x16xf32>
    %cst_5 = arith.constant dense<0.000000e+00> : vector<16xf32>
    %6 = vector.multi_reduction <add>, %2, %cst_5 [0] : vector<128x16xf32> to vector<16xf32>
    %7 = vector.shape_cast %6 : vector<16xf32> to vector<1x16xf32>
    %cst_6 = arith.constant 7.812500e-03 : f32
    %8 = vector.broadcast %cst_6 : f32 to vector<1x16xf32>
    %9 = arith.mulf %7, %8 : vector<1x16xf32>
    %10 = arith.mulf %2, %2 : vector<128x16xf32>
    %cst_7 = arith.constant dense<0.000000e+00> : vector<16xf32>
    %11 = vector.multi_reduction <add>, %10, %cst_7 [0] : vector<128x16xf32> to vector<16xf32>
    %12 = vector.shape_cast %11 : vector<16xf32> to vector<1x16xf32>
    %cst_8 = arith.constant 7.812500e-03 : f32
    %13 = vector.broadcast %cst_8 : f32 to vector<1x16xf32>
    %14 = arith.mulf %12, %13 : vector<1x16xf32>
    %15 = arith.mulf %9, %9 : vector<1x16xf32>
    %16 = arith.subf %14, %15 : vector<1x16xf32>
    %cst_9 = arith.constant 0.000000e+00 : f32
    %17 = vector.broadcast %cst_9 : f32 to vector<1x16xf32>
    %18 = arith.maximumf %16, %17 : vector<1x16xf32>
    %cst_10 = arith.constant 9.99999974E-6 : f32
    %19 = vector.broadcast %cst_10 : f32 to vector<1x16xf32>
    %20 = arith.addf %18, %19 : vector<1x16xf32>
    %21 = math.rsqrt %20 : vector<1x16xf32>
    %22 = arith.mulf %4, %21 : vector<1x16xf32>
    %23 = vector.broadcast %22 : vector<1x16xf32> to vector<128x16xf32>
    %24 = arith.mulf %2, %23 : vector<128x16xf32>
    %25 = arith.mulf %9, %22 : vector<1x16xf32>
    %26 = arith.subf %5, %25 : vector<1x16xf32>
    %27 = vector.broadcast %26 : vector<1x16xf32> to vector<128x16xf32>
    %28 = arith.addf %24, %27 : vector<128x16xf32>
    %cst_11 = arith.constant 0.000000e+00 : f32
    %29 = vector.broadcast %cst_11 : f32 to vector<128x16xf32>
    %30 = arith.maximumf %28, %29 : vector<128x16xf32>
    %c0_12 = arith.constant 0 : index
    %c0_13 = arith.constant 0 : index
    %31 = vector.load %arg1[%c0_12, %c0_13] : memref<288x128xf32, #tpu.memory_space<vmem>>, vector<288x128xf32>
    %cst_14 = arith.constant dense<0.000000e+00> : vector<288x16xf32>
    %32 = tpu.matmul %31, %30, %cst_14 {dimension_numbers = #tpu.dot_dimension_numbers<[1], [0], [0], [1], [0, 0, 1, 1], [], []>} : vector<288x128xf32>, vector<128x16xf32>, vector<288x16xf32> -> vector<288x16xf32>
    %33 = vector.extract_strided_slice %32 {offsets = [0, 0], sizes = [32, 16], strides = [1, 1]} : vector<288x16xf32> to vector<32x16xf32>
    %34 = vector.extract_strided_slice %32 {offsets = [32, 0], sizes = [32, 16], strides = [1, 1]} : vector<288x16xf32> to vector<32x16xf32>
    %35 = arith.maximumf %33, %34 : vector<32x16xf32>
    %36 = vector.extract_strided_slice %32 {offsets = [64, 0], sizes = [32, 16], strides = [1, 1]} : vector<288x16xf32> to vector<32x16xf32>
    %37 = arith.maximumf %35, %36 : vector<32x16xf32>
    %38 = vector.extract_strided_slice %32 {offsets = [96, 0], sizes = [32, 16], strides = [1, 1]} : vector<288x16xf32> to vector<32x16xf32>
    %39 = arith.maximumf %37, %38 : vector<32x16xf32>
    %40 = vector.extract_strided_slice %32 {offsets = [128, 0], sizes = [32, 16], strides = [1, 1]} : vector<288x16xf32> to vector<32x16xf32>
    %41 = arith.maximumf %39, %40 : vector<32x16xf32>
    %42 = vector.extract_strided_slice %32 {offsets = [160, 0], sizes = [32, 16], strides = [1, 1]} : vector<288x16xf32> to vector<32x16xf32>
    %43 = arith.maximumf %41, %42 : vector<32x16xf32>
    %44 = vector.extract_strided_slice %32 {offsets = [192, 0], sizes = [32, 16], strides = [1, 1]} : vector<288x16xf32> to vector<32x16xf32>
    %45 = arith.maximumf %43, %44 : vector<32x16xf32>
    %46 = vector.extract_strided_slice %32 {offsets = [224, 0], sizes = [32, 16], strides = [1, 1]} : vector<288x16xf32> to vector<32x16xf32>
    %47 = arith.maximumf %45, %46 : vector<32x16xf32>
    %48 = vector.extract_strided_slice %32 {offsets = [256, 0], sizes = [32, 16], strides = [1, 1]} : vector<288x16xf32> to vector<32x16xf32>
    %49 = arith.maximumf %47, %48 : vector<32x16xf32>
    %c0_15 = arith.constant 0 : index
    %c0_16 = arith.constant 0 : index
    %50 = vector.load %arg4[%c0_15, %c0_16] : memref<288x32xf32, #tpu.memory_space<vmem>>, vector<288x32xf32>
    %cst_17 = arith.constant dense<0.000000e+00> : vector<288x16xf32>
    %51 = tpu.matmul %50, %49, %cst_17 {dimension_numbers = #tpu.dot_dimension_numbers<[1], [0], [0], [1], [0, 0, 1, 1], [], []>} : vector<288x32xf32>, vector<32x16xf32>, vector<288x16xf32> -> vector<288x16xf32>
    %52 = vector.extract_strided_slice %51 {offsets = [0, 0], sizes = [32, 16], strides = [1, 1]} : vector<288x16xf32> to vector<32x16xf32>
    %c0_18 = arith.constant 0 : index
    %c0_19 = arith.constant 0 : index
    %53 = vector.load %arg6[%c0_18, %c0_19] : memref<144x16xf32, #tpu.memory_space<vmem>>, vector<16x16xf32>
    %cst_20 = arith.constant dense<0.000000e+00> : vector<32x16xf32>
    %54 = tpu.matmul %52, %53, %cst_20 {dimension_numbers = #tpu.dot_dimension_numbers<[1], [0], [0], [1], [0, 0, 1, 1], [], []>} : vector<32x16xf32>, vector<16x16xf32>, vector<32x16xf32> -> vector<32x16xf32>
    %55 = vector.extract_strided_slice %51 {offsets = [32, 0], sizes = [32, 16], strides = [1, 1]} : vector<288x16xf32> to vector<32x16xf32>
    %c16 = arith.constant 16 : index
    %c0_21 = arith.constant 0 : index
    %56 = vector.load %arg6[%c16, %c0_21] : memref<144x16xf32, #tpu.memory_space<vmem>>, vector<16x16xf32>
    %cst_22 = arith.constant dense<0.000000e+00> : vector<32x16xf32>
    %57 = tpu.matmul %55, %56, %cst_22 {dimension_numbers = #tpu.dot_dimension_numbers<[1], [0], [0], [1], [0, 0, 1, 1], [], []>} : vector<32x16xf32>, vector<16x16xf32>, vector<32x16xf32> -> vector<32x16xf32>
    %58 = arith.addf %54, %57 : vector<32x16xf32>
    %59 = vector.extract_strided_slice %51 {offsets = [64, 0], sizes = [32, 16], strides = [1, 1]} : vector<288x16xf32> to vector<32x16xf32>
    %c32 = arith.constant 32 : index
    %c0_23 = arith.constant 0 : index
    %60 = vector.load %arg6[%c32, %c0_23] : memref<144x16xf32, #tpu.memory_space<vmem>>, vector<16x16xf32>
    %cst_24 = arith.constant dense<0.000000e+00> : vector<32x16xf32>
    %61 = tpu.matmul %59, %60, %cst_24 {dimension_numbers = #tpu.dot_dimension_numbers<[1], [0], [0], [1], [0, 0, 1, 1], [], []>} : vector<32x16xf32>, vector<16x16xf32>, vector<32x16xf32> -> vector<32x16xf32>
    %62 = arith.addf %58, %61 : vector<32x16xf32>
    %63 = vector.extract_strided_slice %51 {offsets = [96, 0], sizes = [32, 16], strides = [1, 1]} : vector<288x16xf32> to vector<32x16xf32>
    %c48 = arith.constant 48 : index
    %c0_25 = arith.constant 0 : index
    %64 = vector.load %arg6[%c48, %c0_25] : memref<144x16xf32, #tpu.memory_space<vmem>>, vector<16x16xf32>
    %cst_26 = arith.constant dense<0.000000e+00> : vector<32x16xf32>
    %65 = tpu.matmul %63, %64, %cst_26 {dimension_numbers = #tpu.dot_dimension_numbers<[1], [0], [0], [1], [0, 0, 1, 1], [], []>} : vector<32x16xf32>, vector<16x16xf32>, vector<32x16xf32> -> vector<32x16xf32>
    %66 = arith.addf %62, %65 : vector<32x16xf32>
    %67 = vector.extract_strided_slice %51 {offsets = [128, 0], sizes = [32, 16], strides = [1, 1]} : vector<288x16xf32> to vector<32x16xf32>
    %c64 = arith.constant 64 : index
    %c0_27 = arith.constant 0 : index
    %68 = vector.load %arg6[%c64, %c0_27] : memref<144x16xf32, #tpu.memory_space<vmem>>, vector<16x16xf32>
    %cst_28 = arith.constant dense<0.000000e+00> : vector<32x16xf32>
    %69 = tpu.matmul %67, %68, %cst_28 {dimension_numbers = #tpu.dot_dimension_numbers<[1], [0], [0], [1], [0, 0, 1, 1], [], []>} : vector<32x16xf32>, vector<16x16xf32>, vector<32x16xf32> -> vector<32x16xf32>
    %70 = arith.addf %66, %69 : vector<32x16xf32>
    %71 = vector.extract_strided_slice %51 {offsets = [160, 0], sizes = [32, 16], strides = [1, 1]} : vector<288x16xf32> to vector<32x16xf32>
    %c80 = arith.constant 80 : index
    %c0_29 = arith.constant 0 : index
    %72 = vector.load %arg6[%c80, %c0_29] : memref<144x16xf32, #tpu.memory_space<vmem>>, vector<16x16xf32>
    %cst_30 = arith.constant dense<0.000000e+00> : vector<32x16xf32>
    %73 = tpu.matmul %71, %72, %cst_30 {dimension_numbers = #tpu.dot_dimension_numbers<[1], [0], [0], [1], [0, 0, 1, 1], [], []>} : vector<32x16xf32>, vector<16x16xf32>, vector<32x16xf32> -> vector<32x16xf32>
    %74 = arith.addf %70, %73 : vector<32x16xf32>
    %75 = vector.extract_strided_slice %51 {offsets = [192, 0], sizes = [32, 16], strides = [1, 1]} : vector<288x16xf32> to vector<32x16xf32>
    %c96 = arith.constant 96 : index
    %c0_31 = arith.constant 0 : index
    %76 = vector.load %arg6[%c96, %c0_31] : memref<144x16xf32, #tpu.memory_space<vmem>>, vector<16x16xf32>
    %cst_32 = arith.constant dense<0.000000e+00> : vector<32x16xf32>
    %77 = tpu.matmul %75, %76, %cst_32 {dimension_numbers = #tpu.dot_dimension_numbers<[1], [0], [0], [1], [0, 0, 1, 1], [], []>} : vector<32x16xf32>, vector<16x16xf32>, vector<32x16xf32> -> vector<32x16xf32>
    %78 = arith.addf %74, %77 : vector<32x16xf32>
    %79 = vector.extract_strided_slice %51 {offsets = [224, 0], sizes = [32, 16], strides = [1, 1]} : vector<288x16xf32> to vector<32x16xf32>
    %c112 = arith.constant 112 : index
    %c0_33 = arith.constant 0 : index
    %80 = vector.load %arg6[%c112, %c0_33] : memref<144x16xf32, #tpu.memory_space<vmem>>, vector<16x16xf32>
    %cst_34 = arith.constant dense<0.000000e+00> : vector<32x16xf32>
    %81 = tpu.matmul %79, %80, %cst_34 {dimension_numbers = #tpu.dot_dimension_numbers<[1], [0], [0], [1], [0, 0, 1, 1], [], []>} : vector<32x16xf32>, vector<16x16xf32>, vector<32x16xf32> -> vector<32x16xf32>
    %82 = arith.addf %78, %81 : vector<32x16xf32>
    %83 = vector.extract_strided_slice %51 {offsets = [256, 0], sizes = [32, 16], strides = [1, 1]} : vector<288x16xf32> to vector<32x16xf32>
    %c128 = arith.constant 128 : index
    %c0_35 = arith.constant 0 : index
    %84 = vector.load %arg6[%c128, %c0_35] : memref<144x16xf32, #tpu.memory_space<vmem>>, vector<16x16xf32>
    %cst_36 = arith.constant dense<0.000000e+00> : vector<32x16xf32>
    %85 = tpu.matmul %83, %84, %cst_36 {dimension_numbers = #tpu.dot_dimension_numbers<[1], [0], [0], [1], [0, 0, 1, 1], [], []>} : vector<32x16xf32>, vector<16x16xf32>, vector<32x16xf32> -> vector<32x16xf32>
    %86 = arith.addf %82, %85 : vector<32x16xf32>
    %c0_37 = arith.constant 0 : index
    %c0_38 = arith.constant 0 : index
    %87 = vector.load %arg7[%c0_37, %c0_38] : memref<2x16xf32, #tpu.memory_space<vmem>>, vector<2x16xf32>
    %88 = vector.extract_strided_slice %87 {offsets = [0, 0], sizes = [1, 16], strides = [1, 1]} : vector<2x16xf32> to vector<1x16xf32>
    %89 = vector.extract_strided_slice %87 {offsets = [1, 0], sizes = [1, 16], strides = [1, 1]} : vector<2x16xf32> to vector<1x16xf32>
    %cst_39 = arith.constant dense<0.000000e+00> : vector<16xf32>
    %90 = vector.multi_reduction <add>, %86, %cst_39 [0] : vector<32x16xf32> to vector<16xf32>
    %91 = vector.shape_cast %90 : vector<16xf32> to vector<1x16xf32>
    %cst_40 = arith.constant 3.125000e-02 : f32
    %92 = vector.broadcast %cst_40 : f32 to vector<1x16xf32>
    %93 = arith.mulf %91, %92 : vector<1x16xf32>
    %94 = arith.mulf %86, %86 : vector<32x16xf32>
    %cst_41 = arith.constant dense<0.000000e+00> : vector<16xf32>
    %95 = vector.multi_reduction <add>, %94, %cst_41 [0] : vector<32x16xf32> to vector<16xf32>
    %96 = vector.shape_cast %95 : vector<16xf32> to vector<1x16xf32>
    %cst_42 = arith.constant 3.125000e-02 : f32
    %97 = vector.broadcast %cst_42 : f32 to vector<1x16xf32>
    %98 = arith.mulf %96, %97 : vector<1x16xf32>
    %99 = arith.mulf %93, %93 : vector<1x16xf32>
    %100 = arith.subf %98, %99 : vector<1x16xf32>
    %cst_43 = arith.constant 0.000000e+00 : f32
    %101 = vector.broadcast %cst_43 : f32 to vector<1x16xf32>
    %102 = arith.maximumf %100, %101 : vector<1x16xf32>
    %cst_44 = arith.constant 9.99999974E-6 : f32
    %103 = vector.broadcast %cst_44 : f32 to vector<1x16xf32>
    %104 = arith.addf %102, %103 : vector<1x16xf32>
    %105 = math.rsqrt %104 : vector<1x16xf32>
    %106 = arith.mulf %88, %105 : vector<1x16xf32>
    %107 = vector.broadcast %106 : vector<1x16xf32> to vector<32x16xf32>
    %108 = arith.mulf %86, %107 : vector<32x16xf32>
    %109 = arith.mulf %93, %106 : vector<1x16xf32>
    %110 = arith.subf %89, %109 : vector<1x16xf32>
    %111 = vector.broadcast %110 : vector<1x16xf32> to vector<32x16xf32>
    %112 = arith.addf %108, %111 : vector<32x16xf32>
    %cst_45 = arith.constant 0.000000e+00 : f32
    %113 = vector.broadcast %cst_45 : f32 to vector<32x16xf32>
    %114 = arith.maximumf %112, %113 : vector<32x16xf32>
    %c0_46 = arith.constant 0 : index
    %c0_47 = arith.constant 0 : index
    %115 = vector.load %arg5[%c0_46, %c0_47] : memref<288x32xf32, #tpu.memory_space<vmem>>, vector<288x32xf32>
    %cst_48 = arith.constant dense<0.000000e+00> : vector<288x16xf32>
    %116 = tpu.matmul %115, %114, %cst_48 {dimension_numbers = #tpu.dot_dimension_numbers<[1], [0], [0], [1], [0, 0, 1, 1], [], []>} : vector<288x32xf32>, vector<32x16xf32>, vector<288x16xf32> -> vector<288x16xf32>
    %117 = vector.extract_strided_slice %116 {offsets = [0, 0], sizes = [32, 16], strides = [1, 1]} : vector<288x16xf32> to vector<32x16xf32>
    %c0_49 = arith.constant 0 : index
    %c0_50 = arith.constant 0 : index
    %118 = vector.load %arg8[%c0_49, %c0_50] : memref<144x16xf32, #tpu.memory_space<vmem>>, vector<16x16xf32>
    %cst_51 = arith.constant dense<0.000000e+00> : vector<32x16xf32>
    %119 = tpu.matmul %117, %118, %cst_51 {dimension_numbers = #tpu.dot_dimension_numbers<[1], [0], [0], [1], [0, 0, 1, 1], [], []>} : vector<32x16xf32>, vector<16x16xf32>, vector<32x16xf32> -> vector<32x16xf32>
    %120 = vector.extract_strided_slice %116 {offsets = [32, 0], sizes = [32, 16], strides = [1, 1]} : vector<288x16xf32> to vector<32x16xf32>
    %c16_52 = arith.constant 16 : index
    %c0_53 = arith.constant 0 : index
    %121 = vector.load %arg8[%c16_52, %c0_53] : memref<144x16xf32, #tpu.memory_space<vmem>>, vector<16x16xf32>
    %cst_54 = arith.constant dense<0.000000e+00> : vector<32x16xf32>
    %122 = tpu.matmul %120, %121, %cst_54 {dimension_numbers = #tpu.dot_dimension_numbers<[1], [0], [0], [1], [0, 0, 1, 1], [], []>} : vector<32x16xf32>, vector<16x16xf32>, vector<32x16xf32> -> vector<32x16xf32>
    %123 = arith.addf %119, %122 : vector<32x16xf32>
    %124 = vector.extract_strided_slice %116 {offsets = [64, 0], sizes = [32, 16], strides = [1, 1]} : vector<288x16xf32> to vector<32x16xf32>
    %c32_55 = arith.constant 32 : index
    %c0_56 = arith.constant 0 : index
    %125 = vector.load %arg8[%c32_55, %c0_56] : memref<144x16xf32, #tpu.memory_space<vmem>>, vector<16x16xf32>
    %cst_57 = arith.constant dense<0.000000e+00> : vector<32x16xf32>
    %126 = tpu.matmul %124, %125, %cst_57 {dimension_numbers = #tpu.dot_dimension_numbers<[1], [0], [0], [1], [0, 0, 1, 1], [], []>} : vector<32x16xf32>, vector<16x16xf32>, vector<32x16xf32> -> vector<32x16xf32>
    %127 = arith.addf %123, %126 : vector<32x16xf32>
    %128 = vector.extract_strided_slice %116 {offsets = [96, 0], sizes = [32, 16], strides = [1, 1]} : vector<288x16xf32> to vector<32x16xf32>
    %c48_58 = arith.constant 48 : index
    %c0_59 = arith.constant 0 : index
    %129 = vector.load %arg8[%c48_58, %c0_59] : memref<144x16xf32, #tpu.memory_space<vmem>>, vector<16x16xf32>
    %cst_60 = arith.constant dense<0.000000e+00> : vector<32x16xf32>
    %130 = tpu.matmul %128, %129, %cst_60 {dimension_numbers = #tpu.dot_dimension_numbers<[1], [0], [0], [1], [0, 0, 1, 1], [], []>} : vector<32x16xf32>, vector<16x16xf32>, vector<32x16xf32> -> vector<32x16xf32>
    %131 = arith.addf %127, %130 : vector<32x16xf32>
    %132 = vector.extract_strided_slice %116 {offsets = [128, 0], sizes = [32, 16], strides = [1, 1]} : vector<288x16xf32> to vector<32x16xf32>
    %c64_61 = arith.constant 64 : index
    %c0_62 = arith.constant 0 : index
    %133 = vector.load %arg8[%c64_61, %c0_62] : memref<144x16xf32, #tpu.memory_space<vmem>>, vector<16x16xf32>
    %cst_63 = arith.constant dense<0.000000e+00> : vector<32x16xf32>
    %134 = tpu.matmul %132, %133, %cst_63 {dimension_numbers = #tpu.dot_dimension_numbers<[1], [0], [0], [1], [0, 0, 1, 1], [], []>} : vector<32x16xf32>, vector<16x16xf32>, vector<32x16xf32> -> vector<32x16xf32>
    %135 = arith.addf %131, %134 : vector<32x16xf32>
    %136 = vector.extract_strided_slice %116 {offsets = [160, 0], sizes = [32, 16], strides = [1, 1]} : vector<288x16xf32> to vector<32x16xf32>
    %c80_64 = arith.constant 80 : index
    %c0_65 = arith.constant 0 : index
    %137 = vector.load %arg8[%c80_64, %c0_65] : memref<144x16xf32, #tpu.memory_space<vmem>>, vector<16x16xf32>
    %cst_66 = arith.constant dense<0.000000e+00> : vector<32x16xf32>
    %138 = tpu.matmul %136, %137, %cst_66 {dimension_numbers = #tpu.dot_dimension_numbers<[1], [0], [0], [1], [0, 0, 1, 1], [], []>} : vector<32x16xf32>, vector<16x16xf32>, vector<32x16xf32> -> vector<32x16xf32>
    %139 = arith.addf %135, %138 : vector<32x16xf32>
    %140 = vector.extract_strided_slice %116 {offsets = [192, 0], sizes = [32, 16], strides = [1, 1]} : vector<288x16xf32> to vector<32x16xf32>
    %c96_67 = arith.constant 96 : index
    %c0_68 = arith.constant 0 : index
    %141 = vector.load %arg8[%c96_67, %c0_68] : memref<144x16xf32, #tpu.memory_space<vmem>>, vector<16x16xf32>
    %cst_69 = arith.constant dense<0.000000e+00> : vector<32x16xf32>
    %142 = tpu.matmul %140, %141, %cst_69 {dimension_numbers = #tpu.dot_dimension_numbers<[1], [0], [0], [1], [0, 0, 1, 1], [], []>} : vector<32x16xf32>, vector<16x16xf32>, vector<32x16xf32> -> vector<32x16xf32>
    %143 = arith.addf %139, %142 : vector<32x16xf32>
    %144 = vector.extract_strided_slice %116 {offsets = [224, 0], sizes = [32, 16], strides = [1, 1]} : vector<288x16xf32> to vector<32x16xf32>
    %c112_70 = arith.constant 112 : index
    %c0_71 = arith.constant 0 : index
    %145 = vector.load %arg8[%c112_70, %c0_71] : memref<144x16xf32, #tpu.memory_space<vmem>>, vector<16x16xf32>
    %cst_72 = arith.constant dense<0.000000e+00> : vector<32x16xf32>
    %146 = tpu.matmul %144, %145, %cst_72 {dimension_numbers = #tpu.dot_dimension_numbers<[1], [0], [0], [1], [0, 0, 1, 1], [], []>} : vector<32x16xf32>, vector<16x16xf32>, vector<32x16xf32> -> vector<32x16xf32>
    %147 = arith.addf %143, %146 : vector<32x16xf32>
    %148 = vector.extract_strided_slice %116 {offsets = [256, 0], sizes = [32, 16], strides = [1, 1]} : vector<288x16xf32> to vector<32x16xf32>
    %c128_73 = arith.constant 128 : index
    %c0_74 = arith.constant 0 : index
    %149 = vector.load %arg8[%c128_73, %c0_74] : memref<144x16xf32, #tpu.memory_space<vmem>>, vector<16x16xf32>
    %cst_75 = arith.constant dense<0.000000e+00> : vector<32x16xf32>
    %150 = tpu.matmul %148, %149, %cst_75 {dimension_numbers = #tpu.dot_dimension_numbers<[1], [0], [0], [1], [0, 0, 1, 1], [], []>} : vector<32x16xf32>, vector<16x16xf32>, vector<32x16xf32> -> vector<32x16xf32>
    %151 = arith.addf %147, %150 : vector<32x16xf32>
    %c0_76 = arith.constant 0 : index
    %c0_77 = arith.constant 0 : index
    %152 = vector.load %arg9[%c0_76, %c0_77] : memref<2x16xf32, #tpu.memory_space<vmem>>, vector<2x16xf32>
    %153 = vector.extract_strided_slice %152 {offsets = [0, 0], sizes = [1, 16], strides = [1, 1]} : vector<2x16xf32> to vector<1x16xf32>
    %154 = vector.extract_strided_slice %152 {offsets = [1, 0], sizes = [1, 16], strides = [1, 1]} : vector<2x16xf32> to vector<1x16xf32>
    %cst_78 = arith.constant dense<0.000000e+00> : vector<16xf32>
    %155 = vector.multi_reduction <add>, %151, %cst_78 [0] : vector<32x16xf32> to vector<16xf32>
    %156 = vector.shape_cast %155 : vector<16xf32> to vector<1x16xf32>
    %cst_79 = arith.constant 3.125000e-02 : f32
    %157 = vector.broadcast %cst_79 : f32 to vector<1x16xf32>
    %158 = arith.mulf %156, %157 : vector<1x16xf32>
    %159 = arith.mulf %151, %151 : vector<32x16xf32>
    %cst_80 = arith.constant dense<0.000000e+00> : vector<16xf32>
    %160 = vector.multi_reduction <add>, %159, %cst_80 [0] : vector<32x16xf32> to vector<16xf32>
    %161 = vector.shape_cast %160 : vector<16xf32> to vector<1x16xf32>
    %cst_81 = arith.constant 3.125000e-02 : f32
    %162 = vector.broadcast %cst_81 : f32 to vector<1x16xf32>
    %163 = arith.mulf %161, %162 : vector<1x16xf32>
    %164 = arith.mulf %158, %158 : vector<1x16xf32>
    %165 = arith.subf %163, %164 : vector<1x16xf32>
    %cst_82 = arith.constant 0.000000e+00 : f32
    %166 = vector.broadcast %cst_82 : f32 to vector<1x16xf32>
    %167 = arith.maximumf %165, %166 : vector<1x16xf32>
    %cst_83 = arith.constant 9.99999974E-6 : f32
    %168 = vector.broadcast %cst_83 : f32 to vector<1x16xf32>
    %169 = arith.addf %167, %168 : vector<1x16xf32>
    %170 = math.rsqrt %169 : vector<1x16xf32>
    %171 = arith.mulf %153, %170 : vector<1x16xf32>
    %172 = vector.broadcast %171 : vector<1x16xf32> to vector<32x16xf32>
    %173 = arith.mulf %151, %172 : vector<32x16xf32>
    %174 = arith.mulf %158, %171 : vector<1x16xf32>
    %175 = arith.subf %154, %174 : vector<1x16xf32>
    %176 = vector.broadcast %175 : vector<1x16xf32> to vector<32x16xf32>
    %177 = arith.addf %173, %176 : vector<32x16xf32>
    %178 = arith.addf %177, %49 : vector<32x16xf32>
    %cst_84 = arith.constant 0.000000e+00 : f32
    %179 = vector.broadcast %cst_84 : f32 to vector<32x16xf32>
    %180 = arith.maximumf %178, %179 : vector<32x16xf32>
    %c0_85 = arith.constant 0 : index
    %c0_86 = arith.constant 0 : index
    %181 = vector.load %arg10[%c0_85, %c0_86] : memref<288x32xf32, #tpu.memory_space<vmem>>, vector<288x32xf32>
    %cst_87 = arith.constant dense<0.000000e+00> : vector<288x16xf32>
    %182 = tpu.matmul %181, %180, %cst_87 {dimension_numbers = #tpu.dot_dimension_numbers<[1], [0], [0], [1], [0, 0, 1, 1], [], []>} : vector<288x32xf32>, vector<32x16xf32>, vector<288x16xf32> -> vector<288x16xf32>
    %183 = vector.extract_strided_slice %182 {offsets = [0, 0], sizes = [32, 16], strides = [1, 1]} : vector<288x16xf32> to vector<32x16xf32>
    %c0_88 = arith.constant 0 : index
    %c0_89 = arith.constant 0 : index
    %184 = vector.load %arg12[%c0_88, %c0_89] : memref<144x16xf32, #tpu.memory_space<vmem>>, vector<16x16xf32>
    %cst_90 = arith.constant dense<0.000000e+00> : vector<32x16xf32>
    %185 = tpu.matmul %183, %184, %cst_90 {dimension_numbers = #tpu.dot_dimension_numbers<[1], [0], [0], [1], [0, 0, 1, 1], [], []>} : vector<32x16xf32>, vector<16x16xf32>, vector<32x16xf32> -> vector<32x16xf32>
    %186 = vector.extract_strided_slice %182 {offsets = [32, 0], sizes = [32, 16], strides = [1, 1]} : vector<288x16xf32> to vector<32x16xf32>
    %c16_91 = arith.constant 16 : index
    %c0_92 = arith.constant 0 : index
    %187 = vector.load %arg12[%c16_91, %c0_92] : memref<144x16xf32, #tpu.memory_space<vmem>>, vector<16x16xf32>
    %cst_93 = arith.constant dense<0.000000e+00> : vector<32x16xf32>
    %188 = tpu.matmul %186, %187, %cst_93 {dimension_numbers = #tpu.dot_dimension_numbers<[1], [0], [0], [1], [0, 0, 1, 1], [], []>} : vector<32x16xf32>, vector<16x16xf32>, vector<32x16xf32> -> vector<32x16xf32>
    %189 = arith.addf %185, %188 : vector<32x16xf32>
    %190 = vector.extract_strided_slice %182 {offsets = [64, 0], sizes = [32, 16], strides = [1, 1]} : vector<288x16xf32> to vector<32x16xf32>
    %c32_94 = arith.constant 32 : index
    %c0_95 = arith.constant 0 : index
    %191 = vector.load %arg12[%c32_94, %c0_95] : memref<144x16xf32, #tpu.memory_space<vmem>>, vector<16x16xf32>
    %cst_96 = arith.constant dense<0.000000e+00> : vector<32x16xf32>
    %192 = tpu.matmul %190, %191, %cst_96 {dimension_numbers = #tpu.dot_dimension_numbers<[1], [0], [0], [1], [0, 0, 1, 1], [], []>} : vector<32x16xf32>, vector<16x16xf32>, vector<32x16xf32> -> vector<32x16xf32>
    %193 = arith.addf %189, %192 : vector<32x16xf32>
    %194 = vector.extract_strided_slice %182 {offsets = [96, 0], sizes = [32, 16], strides = [1, 1]} : vector<288x16xf32> to vector<32x16xf32>
    %c48_97 = arith.constant 48 : index
    %c0_98 = arith.constant 0 : index
    %195 = vector.load %arg12[%c48_97, %c0_98] : memref<144x16xf32, #tpu.memory_space<vmem>>, vector<16x16xf32>
    %cst_99 = arith.constant dense<0.000000e+00> : vector<32x16xf32>
    %196 = tpu.matmul %194, %195, %cst_99 {dimension_numbers = #tpu.dot_dimension_numbers<[1], [0], [0], [1], [0, 0, 1, 1], [], []>} : vector<32x16xf32>, vector<16x16xf32>, vector<32x16xf32> -> vector<32x16xf32>
    %197 = arith.addf %193, %196 : vector<32x16xf32>
    %198 = vector.extract_strided_slice %182 {offsets = [128, 0], sizes = [32, 16], strides = [1, 1]} : vector<288x16xf32> to vector<32x16xf32>
    %c64_100 = arith.constant 64 : index
    %c0_101 = arith.constant 0 : index
    %199 = vector.load %arg12[%c64_100, %c0_101] : memref<144x16xf32, #tpu.memory_space<vmem>>, vector<16x16xf32>
    %cst_102 = arith.constant dense<0.000000e+00> : vector<32x16xf32>
    %200 = tpu.matmul %198, %199, %cst_102 {dimension_numbers = #tpu.dot_dimension_numbers<[1], [0], [0], [1], [0, 0, 1, 1], [], []>} : vector<32x16xf32>, vector<16x16xf32>, vector<32x16xf32> -> vector<32x16xf32>
    %201 = arith.addf %197, %200 : vector<32x16xf32>
    %202 = vector.extract_strided_slice %182 {offsets = [160, 0], sizes = [32, 16], strides = [1, 1]} : vector<288x16xf32> to vector<32x16xf32>
    %c80_103 = arith.constant 80 : index
    %c0_104 = arith.constant 0 : index
    %203 = vector.load %arg12[%c80_103, %c0_104] : memref<144x16xf32, #tpu.memory_space<vmem>>, vector<16x16xf32>
    %cst_105 = arith.constant dense<0.000000e+00> : vector<32x16xf32>
    %204 = tpu.matmul %202, %203, %cst_105 {dimension_numbers = #tpu.dot_dimension_numbers<[1], [0], [0], [1], [0, 0, 1, 1], [], []>} : vector<32x16xf32>, vector<16x16xf32>, vector<32x16xf32> -> vector<32x16xf32>
    %205 = arith.addf %201, %204 : vector<32x16xf32>
    %206 = vector.extract_strided_slice %182 {offsets = [192, 0], sizes = [32, 16], strides = [1, 1]} : vector<288x16xf32> to vector<32x16xf32>
    %c96_106 = arith.constant 96 : index
    %c0_107 = arith.constant 0 : index
    %207 = vector.load %arg12[%c96_106, %c0_107] : memref<144x16xf32, #tpu.memory_space<vmem>>, vector<16x16xf32>
    %cst_108 = arith.constant dense<0.000000e+00> : vector<32x16xf32>
    %208 = tpu.matmul %206, %207, %cst_108 {dimension_numbers = #tpu.dot_dimension_numbers<[1], [0], [0], [1], [0, 0, 1, 1], [], []>} : vector<32x16xf32>, vector<16x16xf32>, vector<32x16xf32> -> vector<32x16xf32>
    %209 = arith.addf %205, %208 : vector<32x16xf32>
    %210 = vector.extract_strided_slice %182 {offsets = [224, 0], sizes = [32, 16], strides = [1, 1]} : vector<288x16xf32> to vector<32x16xf32>
    %c112_109 = arith.constant 112 : index
    %c0_110 = arith.constant 0 : index
    %211 = vector.load %arg12[%c112_109, %c0_110] : memref<144x16xf32, #tpu.memory_space<vmem>>, vector<16x16xf32>
    %cst_111 = arith.constant dense<0.000000e+00> : vector<32x16xf32>
    %212 = tpu.matmul %210, %211, %cst_111 {dimension_numbers = #tpu.dot_dimension_numbers<[1], [0], [0], [1], [0, 0, 1, 1], [], []>} : vector<32x16xf32>, vector<16x16xf32>, vector<32x16xf32> -> vector<32x16xf32>
    %213 = arith.addf %209, %212 : vector<32x16xf32>
    %214 = vector.extract_strided_slice %182 {offsets = [256, 0], sizes = [32, 16], strides = [1, 1]} : vector<288x16xf32> to vector<32x16xf32>
    %c128_112 = arith.constant 128 : index
    %c0_113 = arith.constant 0 : index
    %215 = vector.load %arg12[%c128_112, %c0_113] : memref<144x16xf32, #tpu.memory_space<vmem>>, vector<16x16xf32>
    %cst_114 = arith.constant dense<0.000000e+00> : vector<32x16xf32>
    %216 = tpu.matmul %214, %215, %cst_114 {dimension_numbers = #tpu.dot_dimension_numbers<[1], [0], [0], [1], [0, 0, 1, 1], [], []>} : vector<32x16xf32>, vector<16x16xf32>, vector<32x16xf32> -> vector<32x16xf32>
    %217 = arith.addf %213, %216 : vector<32x16xf32>
    %c0_115 = arith.constant 0 : index
    %c0_116 = arith.constant 0 : index
    %218 = vector.load %arg13[%c0_115, %c0_116] : memref<2x16xf32, #tpu.memory_space<vmem>>, vector<2x16xf32>
    %219 = vector.extract_strided_slice %218 {offsets = [0, 0], sizes = [1, 16], strides = [1, 1]} : vector<2x16xf32> to vector<1x16xf32>
    %220 = vector.extract_strided_slice %218 {offsets = [1, 0], sizes = [1, 16], strides = [1, 1]} : vector<2x16xf32> to vector<1x16xf32>
    %cst_117 = arith.constant dense<0.000000e+00> : vector<16xf32>
    %221 = vector.multi_reduction <add>, %217, %cst_117 [0] : vector<32x16xf32> to vector<16xf32>
    %222 = vector.shape_cast %221 : vector<16xf32> to vector<1x16xf32>
    %cst_118 = arith.constant 3.125000e-02 : f32
    %223 = vector.broadcast %cst_118 : f32 to vector<1x16xf32>
    %224 = arith.mulf %222, %223 : vector<1x16xf32>
    %225 = arith.mulf %217, %217 : vector<32x16xf32>
    %cst_119 = arith.constant dense<0.000000e+00> : vector<16xf32>
    %226 = vector.multi_reduction <add>, %225, %cst_119 [0] : vector<32x16xf32> to vector<16xf32>
    %227 = vector.shape_cast %226 : vector<16xf32> to vector<1x16xf32>
    %cst_120 = arith.constant 3.125000e-02 : f32
    %228 = vector.broadcast %cst_120 : f32 to vector<1x16xf32>
    %229 = arith.mulf %227, %228 : vector<1x16xf32>
    %230 = arith.mulf %224, %224 : vector<1x16xf32>
    %231 = arith.subf %229, %230 : vector<1x16xf32>
    %cst_121 = arith.constant 0.000000e+00 : f32
    %232 = vector.broadcast %cst_121 : f32 to vector<1x16xf32>
    %233 = arith.maximumf %231, %232 : vector<1x16xf32>
    %cst_122 = arith.constant 9.99999974E-6 : f32
    %234 = vector.broadcast %cst_122 : f32 to vector<1x16xf32>
    %235 = arith.addf %233, %234 : vector<1x16xf32>
    %236 = math.rsqrt %235 : vector<1x16xf32>
    %237 = arith.mulf %219, %236 : vector<1x16xf32>
    %238 = vector.broadcast %237 : vector<1x16xf32> to vector<32x16xf32>
    %239 = arith.mulf %217, %238 : vector<32x16xf32>
    %240 = arith.mulf %224, %237 : vector<1x16xf32>
    %241 = arith.subf %220, %240 : vector<1x16xf32>
    %242 = vector.broadcast %241 : vector<1x16xf32> to vector<32x16xf32>
    %243 = arith.addf %239, %242 : vector<32x16xf32>
    %cst_123 = arith.constant 0.000000e+00 : f32
    %244 = vector.broadcast %cst_123 : f32 to vector<32x16xf32>
    %245 = arith.maximumf %243, %244 : vector<32x16xf32>
    %c0_124 = arith.constant 0 : index
    %c0_125 = arith.constant 0 : index
    %246 = vector.load %arg11[%c0_124, %c0_125] : memref<288x32xf32, #tpu.memory_space<vmem>>, vector<288x32xf32>
    %cst_126 = arith.constant dense<0.000000e+00> : vector<288x16xf32>
    %247 = tpu.matmul %246, %245, %cst_126 {dimension_numbers = #tpu.dot_dimension_numbers<[1], [0], [0], [1], [0, 0, 1, 1], [], []>} : vector<288x32xf32>, vector<32x16xf32>, vector<288x16xf32> -> vector<288x16xf32>
    %248 = vector.extract_strided_slice %247 {offsets = [0, 0], sizes = [32, 16], strides = [1, 1]} : vector<288x16xf32> to vector<32x16xf32>
    %c0_127 = arith.constant 0 : index
    %c0_128 = arith.constant 0 : index
    %249 = vector.load %arg14[%c0_127, %c0_128] : memref<144x16xf32, #tpu.memory_space<vmem>>, vector<16x16xf32>
    %cst_129 = arith.constant dense<0.000000e+00> : vector<32x16xf32>
    %250 = tpu.matmul %248, %249, %cst_129 {dimension_numbers = #tpu.dot_dimension_numbers<[1], [0], [0], [1], [0, 0, 1, 1], [], []>} : vector<32x16xf32>, vector<16x16xf32>, vector<32x16xf32> -> vector<32x16xf32>
    %251 = vector.extract_strided_slice %247 {offsets = [32, 0], sizes = [32, 16], strides = [1, 1]} : vector<288x16xf32> to vector<32x16xf32>
    %c16_130 = arith.constant 16 : index
    %c0_131 = arith.constant 0 : index
    %252 = vector.load %arg14[%c16_130, %c0_131] : memref<144x16xf32, #tpu.memory_space<vmem>>, vector<16x16xf32>
    %cst_132 = arith.constant dense<0.000000e+00> : vector<32x16xf32>
    %253 = tpu.matmul %251, %252, %cst_132 {dimension_numbers = #tpu.dot_dimension_numbers<[1], [0], [0], [1], [0, 0, 1, 1], [], []>} : vector<32x16xf32>, vector<16x16xf32>, vector<32x16xf32> -> vector<32x16xf32>
    %254 = arith.addf %250, %253 : vector<32x16xf32>
    %255 = vector.extract_strided_slice %247 {offsets = [64, 0], sizes = [32, 16], strides = [1, 1]} : vector<288x16xf32> to vector<32x16xf32>
    %c32_133 = arith.constant 32 : index
    %c0_134 = arith.constant 0 : index
    %256 = vector.load %arg14[%c32_133, %c0_134] : memref<144x16xf32, #tpu.memory_space<vmem>>, vector<16x16xf32>
    %cst_135 = arith.constant dense<0.000000e+00> : vector<32x16xf32>
    %257 = tpu.matmul %255, %256, %cst_135 {dimension_numbers = #tpu.dot_dimension_numbers<[1], [0], [0], [1], [0, 0, 1, 1], [], []>} : vector<32x16xf32>, vector<16x16xf32>, vector<32x16xf32> -> vector<32x16xf32>
    %258 = arith.addf %254, %257 : vector<32x16xf32>
    %259 = vector.extract_strided_slice %247 {offsets = [96, 0], sizes = [32, 16], strides = [1, 1]} : vector<288x16xf32> to vector<32x16xf32>
    %c48_136 = arith.constant 48 : index
    %c0_137 = arith.constant 0 : index
    %260 = vector.load %arg14[%c48_136, %c0_137] : memref<144x16xf32, #tpu.memory_space<vmem>>, vector<16x16xf32>
    %cst_138 = arith.constant dense<0.000000e+00> : vector<32x16xf32>
    %261 = tpu.matmul %259, %260, %cst_138 {dimension_numbers = #tpu.dot_dimension_numbers<[1], [0], [0], [1], [0, 0, 1, 1], [], []>} : vector<32x16xf32>, vector<16x16xf32>, vector<32x16xf32> -> vector<32x16xf32>
    %262 = arith.addf %258, %261 : vector<32x16xf32>
    %263 = vector.extract_strided_slice %247 {offsets = [128, 0], sizes = [32, 16], strides = [1, 1]} : vector<288x16xf32> to vector<32x16xf32>
    %c64_139 = arith.constant 64 : index
    %c0_140 = arith.constant 0 : index
    %264 = vector.load %arg14[%c64_139, %c0_140] : memref<144x16xf32, #tpu.memory_space<vmem>>, vector<16x16xf32>
    %cst_141 = arith.constant dense<0.000000e+00> : vector<32x16xf32>
    %265 = tpu.matmul %263, %264, %cst_141 {dimension_numbers = #tpu.dot_dimension_numbers<[1], [0], [0], [1], [0, 0, 1, 1], [], []>} : vector<32x16xf32>, vector<16x16xf32>, vector<32x16xf32> -> vector<32x16xf32>
    %266 = arith.addf %262, %265 : vector<32x16xf32>
    %267 = vector.extract_strided_slice %247 {offsets = [160, 0], sizes = [32, 16], strides = [1, 1]} : vector<288x16xf32> to vector<32x16xf32>
    %c80_142 = arith.constant 80 : index
    %c0_143 = arith.constant 0 : index
    %268 = vector.load %arg14[%c80_142, %c0_143] : memref<144x16xf32, #tpu.memory_space<vmem>>, vector<16x16xf32>
    %cst_144 = arith.constant dense<0.000000e+00> : vector<32x16xf32>
    %269 = tpu.matmul %267, %268, %cst_144 {dimension_numbers = #tpu.dot_dimension_numbers<[1], [0], [0], [1], [0, 0, 1, 1], [], []>} : vector<32x16xf32>, vector<16x16xf32>, vector<32x16xf32> -> vector<32x16xf32>
    %270 = arith.addf %266, %269 : vector<32x16xf32>
    %271 = vector.extract_strided_slice %247 {offsets = [192, 0], sizes = [32, 16], strides = [1, 1]} : vector<288x16xf32> to vector<32x16xf32>
    %c96_145 = arith.constant 96 : index
    %c0_146 = arith.constant 0 : index
    %272 = vector.load %arg14[%c96_145, %c0_146] : memref<144x16xf32, #tpu.memory_space<vmem>>, vector<16x16xf32>
    %cst_147 = arith.constant dense<0.000000e+00> : vector<32x16xf32>
    %273 = tpu.matmul %271, %272, %cst_147 {dimension_numbers = #tpu.dot_dimension_numbers<[1], [0], [0], [1], [0, 0, 1, 1], [], []>} : vector<32x16xf32>, vector<16x16xf32>, vector<32x16xf32> -> vector<32x16xf32>
    %274 = arith.addf %270, %273 : vector<32x16xf32>
    %275 = vector.extract_strided_slice %247 {offsets = [224, 0], sizes = [32, 16], strides = [1, 1]} : vector<288x16xf32> to vector<32x16xf32>
    %c112_148 = arith.constant 112 : index
    %c0_149 = arith.constant 0 : index
    %276 = vector.load %arg14[%c112_148, %c0_149] : memref<144x16xf32, #tpu.memory_space<vmem>>, vector<16x16xf32>
    %cst_150 = arith.constant dense<0.000000e+00> : vector<32x16xf32>
    %277 = tpu.matmul %275, %276, %cst_150 {dimension_numbers = #tpu.dot_dimension_numbers<[1], [0], [0], [1], [0, 0, 1, 1], [], []>} : vector<32x16xf32>, vector<16x16xf32>, vector<32x16xf32> -> vector<32x16xf32>
    %278 = arith.addf %274, %277 : vector<32x16xf32>
    %279 = vector.extract_strided_slice %247 {offsets = [256, 0], sizes = [32, 16], strides = [1, 1]} : vector<288x16xf32> to vector<32x16xf32>
    %c128_151 = arith.constant 128 : index
    %c0_152 = arith.constant 0 : index
    %280 = vector.load %arg14[%c128_151, %c0_152] : memref<144x16xf32, #tpu.memory_space<vmem>>, vector<16x16xf32>
    %cst_153 = arith.constant dense<0.000000e+00> : vector<32x16xf32>
    %281 = tpu.matmul %279, %280, %cst_153 {dimension_numbers = #tpu.dot_dimension_numbers<[1], [0], [0], [1], [0, 0, 1, 1], [], []>} : vector<32x16xf32>, vector<16x16xf32>, vector<32x16xf32> -> vector<32x16xf32>
    %282 = arith.addf %278, %281 : vector<32x16xf32>
    %c0_154 = arith.constant 0 : index
    %c0_155 = arith.constant 0 : index
    %283 = vector.load %arg15[%c0_154, %c0_155] : memref<2x16xf32, #tpu.memory_space<vmem>>, vector<2x16xf32>
    %284 = vector.extract_strided_slice %283 {offsets = [0, 0], sizes = [1, 16], strides = [1, 1]} : vector<2x16xf32> to vector<1x16xf32>
    %285 = vector.extract_strided_slice %283 {offsets = [1, 0], sizes = [1, 16], strides = [1, 1]} : vector<2x16xf32> to vector<1x16xf32>
    %cst_156 = arith.constant dense<0.000000e+00> : vector<16xf32>
    %286 = vector.multi_reduction <add>, %282, %cst_156 [0] : vector<32x16xf32> to vector<16xf32>
    %287 = vector.shape_cast %286 : vector<16xf32> to vector<1x16xf32>
    %cst_157 = arith.constant 3.125000e-02 : f32
    %288 = vector.broadcast %cst_157 : f32 to vector<1x16xf32>
    %289 = arith.mulf %287, %288 : vector<1x16xf32>
    %290 = arith.mulf %282, %282 : vector<32x16xf32>
    %cst_158 = arith.constant dense<0.000000e+00> : vector<16xf32>
    %291 = vector.multi_reduction <add>, %290, %cst_158 [0] : vector<32x16xf32> to vector<16xf32>
    %292 = vector.shape_cast %291 : vector<16xf32> to vector<1x16xf32>
    %cst_159 = arith.constant 3.125000e-02 : f32
    %293 = vector.broadcast %cst_159 : f32 to vector<1x16xf32>
    %294 = arith.mulf %292, %293 : vector<1x16xf32>
    %295 = arith.mulf %289, %289 : vector<1x16xf32>
    %296 = arith.subf %294, %295 : vector<1x16xf32>
    %cst_160 = arith.constant 0.000000e+00 : f32
    %297 = vector.broadcast %cst_160 : f32 to vector<1x16xf32>
    %298 = arith.maximumf %296, %297 : vector<1x16xf32>
    %cst_161 = arith.constant 9.99999974E-6 : f32
    %299 = vector.broadcast %cst_161 : f32 to vector<1x16xf32>
    %300 = arith.addf %298, %299 : vector<1x16xf32>
    %301 = math.rsqrt %300 : vector<1x16xf32>
    %302 = arith.mulf %284, %301 : vector<1x16xf32>
    %303 = vector.broadcast %302 : vector<1x16xf32> to vector<32x16xf32>
    %304 = arith.mulf %282, %303 : vector<32x16xf32>
    %305 = arith.mulf %289, %302 : vector<1x16xf32>
    %306 = arith.subf %285, %305 : vector<1x16xf32>
    %307 = vector.broadcast %306 : vector<1x16xf32> to vector<32x16xf32>
    %308 = arith.addf %304, %307 : vector<32x16xf32>
    %309 = arith.addf %308, %180 : vector<32x16xf32>
    %cst_162 = arith.constant 0.000000e+00 : f32
    %310 = vector.broadcast %cst_162 : f32 to vector<32x16xf32>
    %311 = arith.maximumf %309, %310 : vector<32x16xf32>
    %c0_163 = arith.constant 0 : index
    %c0_164 = arith.constant 0 : index
    %312 = vector.load %arg18[%c0_163, %c0_164] : memref<16x16xf32, #tpu.memory_space<vmem>>, vector<16x16xf32>
    %cst_165 = arith.constant dense<0.000000e+00> : vector<32x16xf32>
    %313 = tpu.matmul %311, %312, %cst_165 {dimension_numbers = #tpu.dot_dimension_numbers<[1], [0], [0], [1], [0, 0, 1, 1], [], []>} : vector<32x16xf32>, vector<16x16xf32>, vector<32x16xf32> -> vector<32x16xf32>
    %c0_166 = arith.constant 0 : index
    %c0_167 = arith.constant 0 : index
    %314 = vector.load %arg16[%c0_166, %c0_167] : memref<72x32xf32, #tpu.memory_space<vmem>>, vector<72x32xf32>
    %cst_168 = arith.constant dense<0.000000e+00> : vector<72x16xf32>
    %315 = tpu.matmul %314, %313, %cst_168 {dimension_numbers = #tpu.dot_dimension_numbers<[1], [0], [0], [1], [0, 0, 1, 1], [], []>} : vector<72x32xf32>, vector<32x16xf32>, vector<72x16xf32> -> vector<72x16xf32>
    %316 = vector.extract_strided_slice %315 {offsets = [0, 0], sizes = [8, 16], strides = [1, 1]} : vector<72x16xf32> to vector<8x16xf32>
    %c0_169 = arith.constant 0 : index
    %c0_170 = arith.constant 0 : index
    %317 = vector.load %arg20[%c0_169, %c0_170] : memref<144x32xf32, #tpu.memory_space<vmem>>, vector<16x32xf32>
    %cst_171 = arith.constant dense<0.000000e+00> : vector<8x32xf32>
    %318 = tpu.matmul %316, %317, %cst_171 {dimension_numbers = #tpu.dot_dimension_numbers<[1], [0], [0], [1], [0, 0, 1, 1], [], []>} : vector<8x16xf32>, vector<16x32xf32>, vector<8x32xf32> -> vector<8x32xf32>
    %319 = vector.extract_strided_slice %315 {offsets = [8, 0], sizes = [8, 16], strides = [1, 1]} : vector<72x16xf32> to vector<8x16xf32>
    %c16_172 = arith.constant 16 : index
    %c0_173 = arith.constant 0 : index
    %320 = vector.load %arg20[%c16_172, %c0_173] : memref<144x32xf32, #tpu.memory_space<vmem>>, vector<16x32xf32>
    %cst_174 = arith.constant dense<0.000000e+00> : vector<8x32xf32>
    %321 = tpu.matmul %319, %320, %cst_174 {dimension_numbers = #tpu.dot_dimension_numbers<[1], [0], [0], [1], [0, 0, 1, 1], [], []>} : vector<8x16xf32>, vector<16x32xf32>, vector<8x32xf32> -> vector<8x32xf32>
    %322 = arith.addf %318, %321 : vector<8x32xf32>
    %323 = vector.extract_strided_slice %315 {offsets = [16, 0], sizes = [8, 16], strides = [1, 1]} : vector<72x16xf32> to vector<8x16xf32>
    %c32_175 = arith.constant 32 : index
    %c0_176 = arith.constant 0 : index
    %324 = vector.load %arg20[%c32_175, %c0_176] : memref<144x32xf32, #tpu.memory_space<vmem>>, vector<16x32xf32>
    %cst_177 = arith.constant dense<0.000000e+00> : vector<8x32xf32>
    %325 = tpu.matmul %323, %324, %cst_177 {dimension_numbers = #tpu.dot_dimension_numbers<[1], [0], [0], [1], [0, 0, 1, 1], [], []>} : vector<8x16xf32>, vector<16x32xf32>, vector<8x32xf32> -> vector<8x32xf32>
    %326 = arith.addf %322, %325 : vector<8x32xf32>
    %327 = vector.extract_strided_slice %315 {offsets = [24, 0], sizes = [8, 16], strides = [1, 1]} : vector<72x16xf32> to vector<8x16xf32>
    %c48_178 = arith.constant 48 : index
    %c0_179 = arith.constant 0 : index
    %328 = vector.load %arg20[%c48_178, %c0_179] : memref<144x32xf32, #tpu.memory_space<vmem>>, vector<16x32xf32>
    %cst_180 = arith.constant dense<0.000000e+00> : vector<8x32xf32>
    %329 = tpu.matmul %327, %328, %cst_180 {dimension_numbers = #tpu.dot_dimension_numbers<[1], [0], [0], [1], [0, 0, 1, 1], [], []>} : vector<8x16xf32>, vector<16x32xf32>, vector<8x32xf32> -> vector<8x32xf32>
    %330 = arith.addf %326, %329 : vector<8x32xf32>
    %331 = vector.extract_strided_slice %315 {offsets = [32, 0], sizes = [8, 16], strides = [1, 1]} : vector<72x16xf32> to vector<8x16xf32>
    %c64_181 = arith.constant 64 : index
    %c0_182 = arith.constant 0 : index
    %332 = vector.load %arg20[%c64_181, %c0_182] : memref<144x32xf32, #tpu.memory_space<vmem>>, vector<16x32xf32>
    %cst_183 = arith.constant dense<0.000000e+00> : vector<8x32xf32>
    %333 = tpu.matmul %331, %332, %cst_183 {dimension_numbers = #tpu.dot_dimension_numbers<[1], [0], [0], [1], [0, 0, 1, 1], [], []>} : vector<8x16xf32>, vector<16x32xf32>, vector<8x32xf32> -> vector<8x32xf32>
    %334 = arith.addf %330, %333 : vector<8x32xf32>
    %335 = vector.extract_strided_slice %315 {offsets = [40, 0], sizes = [8, 16], strides = [1, 1]} : vector<72x16xf32> to vector<8x16xf32>
    %c80_184 = arith.constant 80 : index
    %c0_185 = arith.constant 0 : index
    %336 = vector.load %arg20[%c80_184, %c0_185] : memref<144x32xf32, #tpu.memory_space<vmem>>, vector<16x32xf32>
    %cst_186 = arith.constant dense<0.000000e+00> : vector<8x32xf32>
    %337 = tpu.matmul %335, %336, %cst_186 {dimension_numbers = #tpu.dot_dimension_numbers<[1], [0], [0], [1], [0, 0, 1, 1], [], []>} : vector<8x16xf32>, vector<16x32xf32>, vector<8x32xf32> -> vector<8x32xf32>
    %338 = arith.addf %334, %337 : vector<8x32xf32>
    %339 = vector.extract_strided_slice %315 {offsets = [48, 0], sizes = [8, 16], strides = [1, 1]} : vector<72x16xf32> to vector<8x16xf32>
    %c96_187 = arith.constant 96 : index
    %c0_188 = arith.constant 0 : index
    %340 = vector.load %arg20[%c96_187, %c0_188] : memref<144x32xf32, #tpu.memory_space<vmem>>, vector<16x32xf32>
    %cst_189 = arith.constant dense<0.000000e+00> : vector<8x32xf32>
    %341 = tpu.matmul %339, %340, %cst_189 {dimension_numbers = #tpu.dot_dimension_numbers<[1], [0], [0], [1], [0, 0, 1, 1], [], []>} : vector<8x16xf32>, vector<16x32xf32>, vector<8x32xf32> -> vector<8x32xf32>
    %342 = arith.addf %338, %341 : vector<8x32xf32>
    %343 = vector.extract_strided_slice %315 {offsets = [56, 0], sizes = [8, 16], strides = [1, 1]} : vector<72x16xf32> to vector<8x16xf32>
    %c112_190 = arith.constant 112 : index
    %c0_191 = arith.constant 0 : index
    %344 = vector.load %arg20[%c112_190, %c0_191] : memref<144x32xf32, #tpu.memory_space<vmem>>, vector<16x32xf32>
    %cst_192 = arith.constant dense<0.000000e+00> : vector<8x32xf32>
    %345 = tpu.matmul %343, %344, %cst_192 {dimension_numbers = #tpu.dot_dimension_numbers<[1], [0], [0], [1], [0, 0, 1, 1], [], []>} : vector<8x16xf32>, vector<16x32xf32>, vector<8x32xf32> -> vector<8x32xf32>
    %346 = arith.addf %342, %345 : vector<8x32xf32>
    %347 = vector.extract_strided_slice %315 {offsets = [64, 0], sizes = [8, 16], strides = [1, 1]} : vector<72x16xf32> to vector<8x16xf32>
    %c128_193 = arith.constant 128 : index
    %c0_194 = arith.constant 0 : index
    %348 = vector.load %arg20[%c128_193, %c0_194] : memref<144x32xf32, #tpu.memory_space<vmem>>, vector<16x32xf32>
    %cst_195 = arith.constant dense<0.000000e+00> : vector<8x32xf32>
    %349 = tpu.matmul %347, %348, %cst_195 {dimension_numbers = #tpu.dot_dimension_numbers<[1], [0], [0], [1], [0, 0, 1, 1], [], []>} : vector<8x16xf32>, vector<16x32xf32>, vector<8x32xf32> -> vector<8x32xf32>
    %350 = arith.addf %346, %349 : vector<8x32xf32>
    %c0_196 = arith.constant 0 : index
    %c0_197 = arith.constant 0 : index
    %351 = vector.load %arg21[%c0_196, %c0_197] : memref<2x32xf32, #tpu.memory_space<vmem>>, vector<2x32xf32>
    %352 = vector.extract_strided_slice %351 {offsets = [0, 0], sizes = [1, 32], strides = [1, 1]} : vector<2x32xf32> to vector<1x32xf32>
    %353 = vector.extract_strided_slice %351 {offsets = [1, 0], sizes = [1, 32], strides = [1, 1]} : vector<2x32xf32> to vector<1x32xf32>
    %cst_198 = arith.constant dense<0.000000e+00> : vector<32xf32>
    %354 = vector.multi_reduction <add>, %350, %cst_198 [0] : vector<8x32xf32> to vector<32xf32>
    %355 = vector.shape_cast %354 : vector<32xf32> to vector<1x32xf32>
    %cst_199 = arith.constant 1.250000e-01 : f32
    %356 = vector.broadcast %cst_199 : f32 to vector<1x32xf32>
    %357 = arith.mulf %355, %356 : vector<1x32xf32>
    %358 = arith.mulf %350, %350 : vector<8x32xf32>
    %cst_200 = arith.constant dense<0.000000e+00> : vector<32xf32>
    %359 = vector.multi_reduction <add>, %358, %cst_200 [0] : vector<8x32xf32> to vector<32xf32>
    %360 = vector.shape_cast %359 : vector<32xf32> to vector<1x32xf32>
    %cst_201 = arith.constant 1.250000e-01 : f32
    %361 = vector.broadcast %cst_201 : f32 to vector<1x32xf32>
    %362 = arith.mulf %360, %361 : vector<1x32xf32>
    %363 = arith.mulf %357, %357 : vector<1x32xf32>
    %364 = arith.subf %362, %363 : vector<1x32xf32>
    %cst_202 = arith.constant 0.000000e+00 : f32
    %365 = vector.broadcast %cst_202 : f32 to vector<1x32xf32>
    %366 = arith.maximumf %364, %365 : vector<1x32xf32>
    %cst_203 = arith.constant 9.99999974E-6 : f32
    %367 = vector.broadcast %cst_203 : f32 to vector<1x32xf32>
    %368 = arith.addf %366, %367 : vector<1x32xf32>
    %369 = math.rsqrt %368 : vector<1x32xf32>
    %370 = arith.mulf %352, %369 : vector<1x32xf32>
    %371 = vector.broadcast %370 : vector<1x32xf32> to vector<8x32xf32>
    %372 = arith.mulf %350, %371 : vector<8x32xf32>
    %373 = arith.mulf %357, %370 : vector<1x32xf32>
    %374 = arith.subf %353, %373 : vector<1x32xf32>
    %375 = vector.broadcast %374 : vector<1x32xf32> to vector<8x32xf32>
    %376 = arith.addf %372, %375 : vector<8x32xf32>
    %cst_204 = arith.constant 0.000000e+00 : f32
    %377 = vector.broadcast %cst_204 : f32 to vector<8x32xf32>
    %378 = arith.maximumf %376, %377 : vector<8x32xf32>
    %c0_205 = arith.constant 0 : index
    %c0_206 = arith.constant 0 : index
    %379 = vector.load %arg17[%c0_205, %c0_206] : memref<72x8xf32, #tpu.memory_space<vmem>>, vector<72x8xf32>
    %cst_207 = arith.constant dense<0.000000e+00> : vector<72x32xf32>
    %380 = tpu.matmul %379, %378, %cst_207 {dimension_numbers = #tpu.dot_dimension_numbers<[1], [0], [0], [1], [0, 0, 1, 1], [], []>} : vector<72x8xf32>, vector<8x32xf32>, vector<72x32xf32> -> vector<72x32xf32>
    %381 = vector.extract_strided_slice %380 {offsets = [0, 0], sizes = [8, 32], strides = [1, 1]} : vector<72x32xf32> to vector<8x32xf32>
    %c0_208 = arith.constant 0 : index
    %c0_209 = arith.constant 0 : index
    %382 = vector.load %arg22[%c0_208, %c0_209] : memref<288x32xf32, #tpu.memory_space<vmem>>, vector<32x32xf32>
    %cst_210 = arith.constant dense<0.000000e+00> : vector<8x32xf32>
    %383 = tpu.matmul %381, %382, %cst_210 {dimension_numbers = #tpu.dot_dimension_numbers<[1], [0], [0], [1], [0, 0, 1, 1], [], []>} : vector<8x32xf32>, vector<32x32xf32>, vector<8x32xf32> -> vector<8x32xf32>
    %384 = vector.extract_strided_slice %380 {offsets = [8, 0], sizes = [8, 32], strides = [1, 1]} : vector<72x32xf32> to vector<8x32xf32>
    %c32_211 = arith.constant 32 : index
    %c0_212 = arith.constant 0 : index
    %385 = vector.load %arg22[%c32_211, %c0_212] : memref<288x32xf32, #tpu.memory_space<vmem>>, vector<32x32xf32>
    %cst_213 = arith.constant dense<0.000000e+00> : vector<8x32xf32>
    %386 = tpu.matmul %384, %385, %cst_213 {dimension_numbers = #tpu.dot_dimension_numbers<[1], [0], [0], [1], [0, 0, 1, 1], [], []>} : vector<8x32xf32>, vector<32x32xf32>, vector<8x32xf32> -> vector<8x32xf32>
    %387 = arith.addf %383, %386 : vector<8x32xf32>
    %388 = vector.extract_strided_slice %380 {offsets = [16, 0], sizes = [8, 32], strides = [1, 1]} : vector<72x32xf32> to vector<8x32xf32>
    %c64_214 = arith.constant 64 : index
    %c0_215 = arith.constant 0 : index
    %389 = vector.load %arg22[%c64_214, %c0_215] : memref<288x32xf32, #tpu.memory_space<vmem>>, vector<32x32xf32>
    %cst_216 = arith.constant dense<0.000000e+00> : vector<8x32xf32>
    %390 = tpu.matmul %388, %389, %cst_216 {dimension_numbers = #tpu.dot_dimension_numbers<[1], [0], [0], [1], [0, 0, 1, 1], [], []>} : vector<8x32xf32>, vector<32x32xf32>, vector<8x32xf32> -> vector<8x32xf32>
    %391 = arith.addf %387, %390 : vector<8x32xf32>
    %392 = vector.extract_strided_slice %380 {offsets = [24, 0], sizes = [8, 32], strides = [1, 1]} : vector<72x32xf32> to vector<8x32xf32>
    %c96_217 = arith.constant 96 : index
    %c0_218 = arith.constant 0 : index
    %393 = vector.load %arg22[%c96_217, %c0_218] : memref<288x32xf32, #tpu.memory_space<vmem>>, vector<32x32xf32>
    %cst_219 = arith.constant dense<0.000000e+00> : vector<8x32xf32>
    %394 = tpu.matmul %392, %393, %cst_219 {dimension_numbers = #tpu.dot_dimension_numbers<[1], [0], [0], [1], [0, 0, 1, 1], [], []>} : vector<8x32xf32>, vector<32x32xf32>, vector<8x32xf32> -> vector<8x32xf32>
    %395 = arith.addf %391, %394 : vector<8x32xf32>
    %396 = vector.extract_strided_slice %380 {offsets = [32, 0], sizes = [8, 32], strides = [1, 1]} : vector<72x32xf32> to vector<8x32xf32>
    %c128_220 = arith.constant 128 : index
    %c0_221 = arith.constant 0 : index
    %397 = vector.load %arg22[%c128_220, %c0_221] : memref<288x32xf32, #tpu.memory_space<vmem>>, vector<32x32xf32>
    %cst_222 = arith.constant dense<0.000000e+00> : vector<8x32xf32>
    %398 = tpu.matmul %396, %397, %cst_222 {dimension_numbers = #tpu.dot_dimension_numbers<[1], [0], [0], [1], [0, 0, 1, 1], [], []>} : vector<8x32xf32>, vector<32x32xf32>, vector<8x32xf32> -> vector<8x32xf32>
    %399 = arith.addf %395, %398 : vector<8x32xf32>
    %400 = vector.extract_strided_slice %380 {offsets = [40, 0], sizes = [8, 32], strides = [1, 1]} : vector<72x32xf32> to vector<8x32xf32>
    %c160 = arith.constant 160 : index
    %c0_223 = arith.constant 0 : index
    %401 = vector.load %arg22[%c160, %c0_223] : memref<288x32xf32, #tpu.memory_space<vmem>>, vector<32x32xf32>
    %cst_224 = arith.constant dense<0.000000e+00> : vector<8x32xf32>
    %402 = tpu.matmul %400, %401, %cst_224 {dimension_numbers = #tpu.dot_dimension_numbers<[1], [0], [0], [1], [0, 0, 1, 1], [], []>} : vector<8x32xf32>, vector<32x32xf32>, vector<8x32xf32> -> vector<8x32xf32>
    %403 = arith.addf %399, %402 : vector<8x32xf32>
    %404 = vector.extract_strided_slice %380 {offsets = [48, 0], sizes = [8, 32], strides = [1, 1]} : vector<72x32xf32> to vector<8x32xf32>
    %c192 = arith.constant 192 : index
    %c0_225 = arith.constant 0 : index
    %405 = vector.load %arg22[%c192, %c0_225] : memref<288x32xf32, #tpu.memory_space<vmem>>, vector<32x32xf32>
    %cst_226 = arith.constant dense<0.000000e+00> : vector<8x32xf32>
    %406 = tpu.matmul %404, %405, %cst_226 {dimension_numbers = #tpu.dot_dimension_numbers<[1], [0], [0], [1], [0, 0, 1, 1], [], []>} : vector<8x32xf32>, vector<32x32xf32>, vector<8x32xf32> -> vector<8x32xf32>
    %407 = arith.addf %403, %406 : vector<8x32xf32>
    %408 = vector.extract_strided_slice %380 {offsets = [56, 0], sizes = [8, 32], strides = [1, 1]} : vector<72x32xf32> to vector<8x32xf32>
    %c224 = arith.constant 224 : index
    %c0_227 = arith.constant 0 : index
    %409 = vector.load %arg22[%c224, %c0_227] : memref<288x32xf32, #tpu.memory_space<vmem>>, vector<32x32xf32>
    %cst_228 = arith.constant dense<0.000000e+00> : vector<8x32xf32>
    %410 = tpu.matmul %408, %409, %cst_228 {dimension_numbers = #tpu.dot_dimension_numbers<[1], [0], [0], [1], [0, 0, 1, 1], [], []>} : vector<8x32xf32>, vector<32x32xf32>, vector<8x32xf32> -> vector<8x32xf32>
    %411 = arith.addf %407, %410 : vector<8x32xf32>
    %412 = vector.extract_strided_slice %380 {offsets = [64, 0], sizes = [8, 32], strides = [1, 1]} : vector<72x32xf32> to vector<8x32xf32>
    %c256 = arith.constant 256 : index
    %c0_229 = arith.constant 0 : index
    %413 = vector.load %arg22[%c256, %c0_229] : memref<288x32xf32, #tpu.memory_space<vmem>>, vector<32x32xf32>
    %cst_230 = arith.constant dense<0.000000e+00> : vector<8x32xf32>
    %414 = tpu.matmul %412, %413, %cst_230 {dimension_numbers = #tpu.dot_dimension_numbers<[1], [0], [0], [1], [0, 0, 1, 1], [], []>} : vector<8x32xf32>, vector<32x32xf32>, vector<8x32xf32> -> vector<8x32xf32>
    %415 = arith.addf %411, %414 : vector<8x32xf32>
    %c0_231 = arith.constant 0 : index
    %c0_232 = arith.constant 0 : index
    %416 = vector.load %arg23[%c0_231, %c0_232] : memref<2x32xf32, #tpu.memory_space<vmem>>, vector<2x32xf32>
    %417 = vector.extract_strided_slice %416 {offsets = [0, 0], sizes = [1, 32], strides = [1, 1]} : vector<2x32xf32> to vector<1x32xf32>
    %418 = vector.extract_strided_slice %416 {offsets = [1, 0], sizes = [1, 32], strides = [1, 1]} : vector<2x32xf32> to vector<1x32xf32>
    %cst_233 = arith.constant dense<0.000000e+00> : vector<32xf32>
    %419 = vector.multi_reduction <add>, %415, %cst_233 [0] : vector<8x32xf32> to vector<32xf32>
    %420 = vector.shape_cast %419 : vector<32xf32> to vector<1x32xf32>
    %cst_234 = arith.constant 1.250000e-01 : f32
    %421 = vector.broadcast %cst_234 : f32 to vector<1x32xf32>
    %422 = arith.mulf %420, %421 : vector<1x32xf32>
    %423 = arith.mulf %415, %415 : vector<8x32xf32>
    %cst_235 = arith.constant dense<0.000000e+00> : vector<32xf32>
    %424 = vector.multi_reduction <add>, %423, %cst_235 [0] : vector<8x32xf32> to vector<32xf32>
    %425 = vector.shape_cast %424 : vector<32xf32> to vector<1x32xf32>
    %cst_236 = arith.constant 1.250000e-01 : f32
    %426 = vector.broadcast %cst_236 : f32 to vector<1x32xf32>
    %427 = arith.mulf %425, %426 : vector<1x32xf32>
    %428 = arith.mulf %422, %422 : vector<1x32xf32>
    %429 = arith.subf %427, %428 : vector<1x32xf32>
    %cst_237 = arith.constant 0.000000e+00 : f32
    %430 = vector.broadcast %cst_237 : f32 to vector<1x32xf32>
    %431 = arith.maximumf %429, %430 : vector<1x32xf32>
    %cst_238 = arith.constant 9.99999974E-6 : f32
    %432 = vector.broadcast %cst_238 : f32 to vector<1x32xf32>
    %433 = arith.addf %431, %432 : vector<1x32xf32>
    %434 = math.rsqrt %433 : vector<1x32xf32>
    %435 = arith.mulf %417, %434 : vector<1x32xf32>
    %436 = vector.broadcast %435 : vector<1x32xf32> to vector<8x32xf32>
    %437 = arith.mulf %415, %436 : vector<8x32xf32>
    %438 = arith.mulf %422, %435 : vector<1x32xf32>
    %439 = arith.subf %418, %438 : vector<1x32xf32>
    %440 = vector.broadcast %439 : vector<1x32xf32> to vector<8x32xf32>
    %441 = arith.addf %437, %440 : vector<8x32xf32>
    %c0_239 = arith.constant 0 : index
    %c0_240 = arith.constant 0 : index
    %442 = vector.load %arg19[%c0_239, %c0_240] : memref<8x32xf32, #tpu.memory_space<vmem>>, vector<8x32xf32>
    %cst_241 = arith.constant dense<0.000000e+00> : vector<8x16xf32>
    %443 = tpu.matmul %442, %313, %cst_241 {dimension_numbers = #tpu.dot_dimension_numbers<[1], [0], [0], [1], [0, 0, 1, 1], [], []>} : vector<8x32xf32>, vector<32x16xf32>, vector<8x16xf32> -> vector<8x16xf32>
    %c0_242 = arith.constant 0 : index
    %c0_243 = arith.constant 0 : index
    %444 = vector.load %arg24[%c0_242, %c0_243] : memref<16x32xf32, #tpu.memory_space<vmem>>, vector<16x32xf32>
    %cst_244 = arith.constant dense<0.000000e+00> : vector<8x32xf32>
    %445 = tpu.matmul %443, %444, %cst_244 {dimension_numbers = #tpu.dot_dimension_numbers<[1], [0], [0], [1], [0, 0, 1, 1], [], []>} : vector<8x16xf32>, vector<16x32xf32>, vector<8x32xf32> -> vector<8x32xf32>
    %c0_245 = arith.constant 0 : index
    %c0_246 = arith.constant 0 : index
    %446 = vector.load %arg25[%c0_245, %c0_246] : memref<2x32xf32, #tpu.memory_space<vmem>>, vector<2x32xf32>
    %447 = vector.extract_strided_slice %446 {offsets = [0, 0], sizes = [1, 32], strides = [1, 1]} : vector<2x32xf32> to vector<1x32xf32>
    %448 = vector.extract_strided_slice %446 {offsets = [1, 0], sizes = [1, 32], strides = [1, 1]} : vector<2x32xf32> to vector<1x32xf32>
    %cst_247 = arith.constant dense<0.000000e+00> : vector<32xf32>
    %449 = vector.multi_reduction <add>, %445, %cst_247 [0] : vector<8x32xf32> to vector<32xf32>
    %450 = vector.shape_cast %449 : vector<32xf32> to vector<1x32xf32>
    %cst_248 = arith.constant 1.250000e-01 : f32
    %451 = vector.broadcast %cst_248 : f32 to vector<1x32xf32>
    %452 = arith.mulf %450, %451 : vector<1x32xf32>
    %453 = arith.mulf %445, %445 : vector<8x32xf32>
    %cst_249 = arith.constant dense<0.000000e+00> : vector<32xf32>
    %454 = vector.multi_reduction <add>, %453, %cst_249 [0] : vector<8x32xf32> to vector<32xf32>
    %455 = vector.shape_cast %454 : vector<32xf32> to vector<1x32xf32>
    %cst_250 = arith.constant 1.250000e-01 : f32
    %456 = vector.broadcast %cst_250 : f32 to vector<1x32xf32>
    %457 = arith.mulf %455, %456 : vector<1x32xf32>
    %458 = arith.mulf %452, %452 : vector<1x32xf32>
    %459 = arith.subf %457, %458 : vector<1x32xf32>
    %cst_251 = arith.constant 0.000000e+00 : f32
    %460 = vector.broadcast %cst_251 : f32 to vector<1x32xf32>
    %461 = arith.maximumf %459, %460 : vector<1x32xf32>
    %cst_252 = arith.constant 9.99999974E-6 : f32
    %462 = vector.broadcast %cst_252 : f32 to vector<1x32xf32>
    %463 = arith.addf %461, %462 : vector<1x32xf32>
    %464 = math.rsqrt %463 : vector<1x32xf32>
    %465 = arith.mulf %447, %464 : vector<1x32xf32>
    %466 = vector.broadcast %465 : vector<1x32xf32> to vector<8x32xf32>
    %467 = arith.mulf %445, %466 : vector<8x32xf32>
    %468 = arith.mulf %452, %465 : vector<1x32xf32>
    %469 = arith.subf %448, %468 : vector<1x32xf32>
    %470 = vector.broadcast %469 : vector<1x32xf32> to vector<8x32xf32>
    %471 = arith.addf %467, %470 : vector<8x32xf32>
    %472 = arith.addf %441, %471 : vector<8x32xf32>
    %cst_253 = arith.constant 0.000000e+00 : f32
    %473 = vector.broadcast %cst_253 : f32 to vector<8x32xf32>
    %474 = arith.maximumf %472, %473 : vector<8x32xf32>
    %c0_254 = arith.constant 0 : index
    %c0_255 = arith.constant 0 : index
    %475 = vector.load %arg26[%c0_254, %c0_255] : memref<72x8xf32, #tpu.memory_space<vmem>>, vector<72x8xf32>
    %cst_256 = arith.constant dense<0.000000e+00> : vector<72x32xf32>
    %476 = tpu.matmul %475, %474, %cst_256 {dimension_numbers = #tpu.dot_dimension_numbers<[1], [0], [0], [1], [0, 0, 1, 1], [], []>} : vector<72x8xf32>, vector<8x32xf32>, vector<72x32xf32> -> vector<72x32xf32>
    %477 = vector.extract_strided_slice %476 {offsets = [0, 0], sizes = [8, 32], strides = [1, 1]} : vector<72x32xf32> to vector<8x32xf32>
    %c0_257 = arith.constant 0 : index
    %c0_258 = arith.constant 0 : index
    %478 = vector.load %arg28[%c0_257, %c0_258] : memref<288x32xf32, #tpu.memory_space<vmem>>, vector<32x32xf32>
    %cst_259 = arith.constant dense<0.000000e+00> : vector<8x32xf32>
    %479 = tpu.matmul %477, %478, %cst_259 {dimension_numbers = #tpu.dot_dimension_numbers<[1], [0], [0], [1], [0, 0, 1, 1], [], []>} : vector<8x32xf32>, vector<32x32xf32>, vector<8x32xf32> -> vector<8x32xf32>
    %480 = vector.extract_strided_slice %476 {offsets = [8, 0], sizes = [8, 32], strides = [1, 1]} : vector<72x32xf32> to vector<8x32xf32>
    %c32_260 = arith.constant 32 : index
    %c0_261 = arith.constant 0 : index
    %481 = vector.load %arg28[%c32_260, %c0_261] : memref<288x32xf32, #tpu.memory_space<vmem>>, vector<32x32xf32>
    %cst_262 = arith.constant dense<0.000000e+00> : vector<8x32xf32>
    %482 = tpu.matmul %480, %481, %cst_262 {dimension_numbers = #tpu.dot_dimension_numbers<[1], [0], [0], [1], [0, 0, 1, 1], [], []>} : vector<8x32xf32>, vector<32x32xf32>, vector<8x32xf32> -> vector<8x32xf32>
    %483 = arith.addf %479, %482 : vector<8x32xf32>
    %484 = vector.extract_strided_slice %476 {offsets = [16, 0], sizes = [8, 32], strides = [1, 1]} : vector<72x32xf32> to vector<8x32xf32>
    %c64_263 = arith.constant 64 : index
    %c0_264 = arith.constant 0 : index
    %485 = vector.load %arg28[%c64_263, %c0_264] : memref<288x32xf32, #tpu.memory_space<vmem>>, vector<32x32xf32>
    %cst_265 = arith.constant dense<0.000000e+00> : vector<8x32xf32>
    %486 = tpu.matmul %484, %485, %cst_265 {dimension_numbers = #tpu.dot_dimension_numbers<[1], [0], [0], [1], [0, 0, 1, 1], [], []>} : vector<8x32xf32>, vector<32x32xf32>, vector<8x32xf32> -> vector<8x32xf32>
    %487 = arith.addf %483, %486 : vector<8x32xf32>
    %488 = vector.extract_strided_slice %476 {offsets = [24, 0], sizes = [8, 32], strides = [1, 1]} : vector<72x32xf32> to vector<8x32xf32>
    %c96_266 = arith.constant 96 : index
    %c0_267 = arith.constant 0 : index
    %489 = vector.load %arg28[%c96_266, %c0_267] : memref<288x32xf32, #tpu.memory_space<vmem>>, vector<32x32xf32>
    %cst_268 = arith.constant dense<0.000000e+00> : vector<8x32xf32>
    %490 = tpu.matmul %488, %489, %cst_268 {dimension_numbers = #tpu.dot_dimension_numbers<[1], [0], [0], [1], [0, 0, 1, 1], [], []>} : vector<8x32xf32>, vector<32x32xf32>, vector<8x32xf32> -> vector<8x32xf32>
    %491 = arith.addf %487, %490 : vector<8x32xf32>
    %492 = vector.extract_strided_slice %476 {offsets = [32, 0], sizes = [8, 32], strides = [1, 1]} : vector<72x32xf32> to vector<8x32xf32>
    %c128_269 = arith.constant 128 : index
    %c0_270 = arith.constant 0 : index
    %493 = vector.load %arg28[%c128_269, %c0_270] : memref<288x32xf32, #tpu.memory_space<vmem>>, vector<32x32xf32>
    %cst_271 = arith.constant dense<0.000000e+00> : vector<8x32xf32>
    %494 = tpu.matmul %492, %493, %cst_271 {dimension_numbers = #tpu.dot_dimension_numbers<[1], [0], [0], [1], [0, 0, 1, 1], [], []>} : vector<8x32xf32>, vector<32x32xf32>, vector<8x32xf32> -> vector<8x32xf32>
    %495 = arith.addf %491, %494 : vector<8x32xf32>
    %496 = vector.extract_strided_slice %476 {offsets = [40, 0], sizes = [8, 32], strides = [1, 1]} : vector<72x32xf32> to vector<8x32xf32>
    %c160_272 = arith.constant 160 : index
    %c0_273 = arith.constant 0 : index
    %497 = vector.load %arg28[%c160_272, %c0_273] : memref<288x32xf32, #tpu.memory_space<vmem>>, vector<32x32xf32>
    %cst_274 = arith.constant dense<0.000000e+00> : vector<8x32xf32>
    %498 = tpu.matmul %496, %497, %cst_274 {dimension_numbers = #tpu.dot_dimension_numbers<[1], [0], [0], [1], [0, 0, 1, 1], [], []>} : vector<8x32xf32>, vector<32x32xf32>, vector<8x32xf32> -> vector<8x32xf32>
    %499 = arith.addf %495, %498 : vector<8x32xf32>
    %500 = vector.extract_strided_slice %476 {offsets = [48, 0], sizes = [8, 32], strides = [1, 1]} : vector<72x32xf32> to vector<8x32xf32>
    %c192_275 = arith.constant 192 : index
    %c0_276 = arith.constant 0 : index
    %501 = vector.load %arg28[%c192_275, %c0_276] : memref<288x32xf32, #tpu.memory_space<vmem>>, vector<32x32xf32>
    %cst_277 = arith.constant dense<0.000000e+00> : vector<8x32xf32>
    %502 = tpu.matmul %500, %501, %cst_277 {dimension_numbers = #tpu.dot_dimension_numbers<[1], [0], [0], [1], [0, 0, 1, 1], [], []>} : vector<8x32xf32>, vector<32x32xf32>, vector<8x32xf32> -> vector<8x32xf32>
    %503 = arith.addf %499, %502 : vector<8x32xf32>
    %504 = vector.extract_strided_slice %476 {offsets = [56, 0], sizes = [8, 32], strides = [1, 1]} : vector<72x32xf32> to vector<8x32xf32>
    %c224_278 = arith.constant 224 : index
    %c0_279 = arith.constant 0 : index
    %505 = vector.load %arg28[%c224_278, %c0_279] : memref<288x32xf32, #tpu.memory_space<vmem>>, vector<32x32xf32>
    %cst_280 = arith.constant dense<0.000000e+00> : vector<8x32xf32>
    %506 = tpu.matmul %504, %505, %cst_280 {dimension_numbers = #tpu.dot_dimension_numbers<[1], [0], [0], [1], [0, 0, 1, 1], [], []>} : vector<8x32xf32>, vector<32x32xf32>, vector<8x32xf32> -> vector<8x32xf32>
    %507 = arith.addf %503, %506 : vector<8x32xf32>
    %508 = vector.extract_strided_slice %476 {offsets = [64, 0], sizes = [8, 32], strides = [1, 1]} : vector<72x32xf32> to vector<8x32xf32>
    %c256_281 = arith.constant 256 : index
    %c0_282 = arith.constant 0 : index
    %509 = vector.load %arg28[%c256_281, %c0_282] : memref<288x32xf32, #tpu.memory_space<vmem>>, vector<32x32xf32>
    %cst_283 = arith.constant dense<0.000000e+00> : vector<8x32xf32>
    %510 = tpu.matmul %508, %509, %cst_283 {dimension_numbers = #tpu.dot_dimension_numbers<[1], [0], [0], [1], [0, 0, 1, 1], [], []>} : vector<8x32xf32>, vector<32x32xf32>, vector<8x32xf32> -> vector<8x32xf32>
    %511 = arith.addf %507, %510 : vector<8x32xf32>
    %c0_284 = arith.constant 0 : index
    %c0_285 = arith.constant 0 : index
    %512 = vector.load %arg29[%c0_284, %c0_285] : memref<2x32xf32, #tpu.memory_space<vmem>>, vector<2x32xf32>
    %513 = vector.extract_strided_slice %512 {offsets = [0, 0], sizes = [1, 32], strides = [1, 1]} : vector<2x32xf32> to vector<1x32xf32>
    %514 = vector.extract_strided_slice %512 {offsets = [1, 0], sizes = [1, 32], strides = [1, 1]} : vector<2x32xf32> to vector<1x32xf32>
    %cst_286 = arith.constant dense<0.000000e+00> : vector<32xf32>
    %515 = vector.multi_reduction <add>, %511, %cst_286 [0] : vector<8x32xf32> to vector<32xf32>
    %516 = vector.shape_cast %515 : vector<32xf32> to vector<1x32xf32>
    %cst_287 = arith.constant 1.250000e-01 : f32
    %517 = vector.broadcast %cst_287 : f32 to vector<1x32xf32>
    %518 = arith.mulf %516, %517 : vector<1x32xf32>
    %519 = arith.mulf %511, %511 : vector<8x32xf32>
    %cst_288 = arith.constant dense<0.000000e+00> : vector<32xf32>
    %520 = vector.multi_reduction <add>, %519, %cst_288 [0] : vector<8x32xf32> to vector<32xf32>
    %521 = vector.shape_cast %520 : vector<32xf32> to vector<1x32xf32>
    %cst_289 = arith.constant 1.250000e-01 : f32
    %522 = vector.broadcast %cst_289 : f32 to vector<1x32xf32>
    %523 = arith.mulf %521, %522 : vector<1x32xf32>
    %524 = arith.mulf %518, %518 : vector<1x32xf32>
    %525 = arith.subf %523, %524 : vector<1x32xf32>
    %cst_290 = arith.constant 0.000000e+00 : f32
    %526 = vector.broadcast %cst_290 : f32 to vector<1x32xf32>
    %527 = arith.maximumf %525, %526 : vector<1x32xf32>
    %cst_291 = arith.constant 9.99999974E-6 : f32
    %528 = vector.broadcast %cst_291 : f32 to vector<1x32xf32>
    %529 = arith.addf %527, %528 : vector<1x32xf32>
    %530 = math.rsqrt %529 : vector<1x32xf32>
    %531 = arith.mulf %513, %530 : vector<1x32xf32>
    %532 = vector.broadcast %531 : vector<1x32xf32> to vector<8x32xf32>
    %533 = arith.mulf %511, %532 : vector<8x32xf32>
    %534 = arith.mulf %518, %531 : vector<1x32xf32>
    %535 = arith.subf %514, %534 : vector<1x32xf32>
    %536 = vector.broadcast %535 : vector<1x32xf32> to vector<8x32xf32>
    %537 = arith.addf %533, %536 : vector<8x32xf32>
    %cst_292 = arith.constant 0.000000e+00 : f32
    %538 = vector.broadcast %cst_292 : f32 to vector<8x32xf32>
    %539 = arith.maximumf %537, %538 : vector<8x32xf32>
    %c0_293 = arith.constant 0 : index
    %c0_294 = arith.constant 0 : index
    %540 = vector.load %arg27[%c0_293, %c0_294] : memref<72x8xf32, #tpu.memory_space<vmem>>, vector<72x8xf32>
    %cst_295 = arith.constant dense<0.000000e+00> : vector<72x32xf32>
    %541 = tpu.matmul %540, %539, %cst_295 {dimension_numbers = #tpu.dot_dimension_numbers<[1], [0], [0], [1], [0, 0, 1, 1], [], []>} : vector<72x8xf32>, vector<8x32xf32>, vector<72x32xf32> -> vector<72x32xf32>
    %542 = vector.extract_strided_slice %541 {offsets = [0, 0], sizes = [8, 32], strides = [1, 1]} : vector<72x32xf32> to vector<8x32xf32>
    %c0_296 = arith.constant 0 : index
    %c0_297 = arith.constant 0 : index
    %543 = vector.load %arg30[%c0_296, %c0_297] : memref<288x32xf32, #tpu.memory_space<vmem>>, vector<32x32xf32>
    %cst_298 = arith.constant dense<0.000000e+00> : vector<8x32xf32>
    %544 = tpu.matmul %542, %543, %cst_298 {dimension_numbers = #tpu.dot_dimension_numbers<[1], [0], [0], [1], [0, 0, 1, 1], [], []>} : vector<8x32xf32>, vector<32x32xf32>, vector<8x32xf32> -> vector<8x32xf32>
    %545 = vector.extract_strided_slice %541 {offsets = [8, 0], sizes = [8, 32], strides = [1, 1]} : vector<72x32xf32> to vector<8x32xf32>
    %c32_299 = arith.constant 32 : index
    %c0_300 = arith.constant 0 : index
    %546 = vector.load %arg30[%c32_299, %c0_300] : memref<288x32xf32, #tpu.memory_space<vmem>>, vector<32x32xf32>
    %cst_301 = arith.constant dense<0.000000e+00> : vector<8x32xf32>
    %547 = tpu.matmul %545, %546, %cst_301 {dimension_numbers = #tpu.dot_dimension_numbers<[1], [0], [0], [1], [0, 0, 1, 1], [], []>} : vector<8x32xf32>, vector<32x32xf32>, vector<8x32xf32> -> vector<8x32xf32>
    %548 = arith.addf %544, %547 : vector<8x32xf32>
    %549 = vector.extract_strided_slice %541 {offsets = [16, 0], sizes = [8, 32], strides = [1, 1]} : vector<72x32xf32> to vector<8x32xf32>
    %c64_302 = arith.constant 64 : index
    %c0_303 = arith.constant 0 : index
    %550 = vector.load %arg30[%c64_302, %c0_303] : memref<288x32xf32, #tpu.memory_space<vmem>>, vector<32x32xf32>
    %cst_304 = arith.constant dense<0.000000e+00> : vector<8x32xf32>
    %551 = tpu.matmul %549, %550, %cst_304 {dimension_numbers = #tpu.dot_dimension_numbers<[1], [0], [0], [1], [0, 0, 1, 1], [], []>} : vector<8x32xf32>, vector<32x32xf32>, vector<8x32xf32> -> vector<8x32xf32>
    %552 = arith.addf %548, %551 : vector<8x32xf32>
    %553 = vector.extract_strided_slice %541 {offsets = [24, 0], sizes = [8, 32], strides = [1, 1]} : vector<72x32xf32> to vector<8x32xf32>
    %c96_305 = arith.constant 96 : index
    %c0_306 = arith.constant 0 : index
    %554 = vector.load %arg30[%c96_305, %c0_306] : memref<288x32xf32, #tpu.memory_space<vmem>>, vector<32x32xf32>
    %cst_307 = arith.constant dense<0.000000e+00> : vector<8x32xf32>
    %555 = tpu.matmul %553, %554, %cst_307 {dimension_numbers = #tpu.dot_dimension_numbers<[1], [0], [0], [1], [0, 0, 1, 1], [], []>} : vector<8x32xf32>, vector<32x32xf32>, vector<8x32xf32> -> vector<8x32xf32>
    %556 = arith.addf %552, %555 : vector<8x32xf32>
    %557 = vector.extract_strided_slice %541 {offsets = [32, 0], sizes = [8, 32], strides = [1, 1]} : vector<72x32xf32> to vector<8x32xf32>
    %c128_308 = arith.constant 128 : index
    %c0_309 = arith.constant 0 : index
    %558 = vector.load %arg30[%c128_308, %c0_309] : memref<288x32xf32, #tpu.memory_space<vmem>>, vector<32x32xf32>
    %cst_310 = arith.constant dense<0.000000e+00> : vector<8x32xf32>
    %559 = tpu.matmul %557, %558, %cst_310 {dimension_numbers = #tpu.dot_dimension_numbers<[1], [0], [0], [1], [0, 0, 1, 1], [], []>} : vector<8x32xf32>, vector<32x32xf32>, vector<8x32xf32> -> vector<8x32xf32>
    %560 = arith.addf %556, %559 : vector<8x32xf32>
    %561 = vector.extract_strided_slice %541 {offsets = [40, 0], sizes = [8, 32], strides = [1, 1]} : vector<72x32xf32> to vector<8x32xf32>
    %c160_311 = arith.constant 160 : index
    %c0_312 = arith.constant 0 : index
    %562 = vector.load %arg30[%c160_311, %c0_312] : memref<288x32xf32, #tpu.memory_space<vmem>>, vector<32x32xf32>
    %cst_313 = arith.constant dense<0.000000e+00> : vector<8x32xf32>
    %563 = tpu.matmul %561, %562, %cst_313 {dimension_numbers = #tpu.dot_dimension_numbers<[1], [0], [0], [1], [0, 0, 1, 1], [], []>} : vector<8x32xf32>, vector<32x32xf32>, vector<8x32xf32> -> vector<8x32xf32>
    %564 = arith.addf %560, %563 : vector<8x32xf32>
    %565 = vector.extract_strided_slice %541 {offsets = [48, 0], sizes = [8, 32], strides = [1, 1]} : vector<72x32xf32> to vector<8x32xf32>
    %c192_314 = arith.constant 192 : index
    %c0_315 = arith.constant 0 : index
    %566 = vector.load %arg30[%c192_314, %c0_315] : memref<288x32xf32, #tpu.memory_space<vmem>>, vector<32x32xf32>
    %cst_316 = arith.constant dense<0.000000e+00> : vector<8x32xf32>
    %567 = tpu.matmul %565, %566, %cst_316 {dimension_numbers = #tpu.dot_dimension_numbers<[1], [0], [0], [1], [0, 0, 1, 1], [], []>} : vector<8x32xf32>, vector<32x32xf32>, vector<8x32xf32> -> vector<8x32xf32>
    %568 = arith.addf %564, %567 : vector<8x32xf32>
    %569 = vector.extract_strided_slice %541 {offsets = [56, 0], sizes = [8, 32], strides = [1, 1]} : vector<72x32xf32> to vector<8x32xf32>
    %c224_317 = arith.constant 224 : index
    %c0_318 = arith.constant 0 : index
    %570 = vector.load %arg30[%c224_317, %c0_318] : memref<288x32xf32, #tpu.memory_space<vmem>>, vector<32x32xf32>
    %cst_319 = arith.constant dense<0.000000e+00> : vector<8x32xf32>
    %571 = tpu.matmul %569, %570, %cst_319 {dimension_numbers = #tpu.dot_dimension_numbers<[1], [0], [0], [1], [0, 0, 1, 1], [], []>} : vector<8x32xf32>, vector<32x32xf32>, vector<8x32xf32> -> vector<8x32xf32>
    %572 = arith.addf %568, %571 : vector<8x32xf32>
    %573 = vector.extract_strided_slice %541 {offsets = [64, 0], sizes = [8, 32], strides = [1, 1]} : vector<72x32xf32> to vector<8x32xf32>
    %c256_320 = arith.constant 256 : index
    %c0_321 = arith.constant 0 : index
    %574 = vector.load %arg30[%c256_320, %c0_321] : memref<288x32xf32, #tpu.memory_space<vmem>>, vector<32x32xf32>
    %cst_322 = arith.constant dense<0.000000e+00> : vector<8x32xf32>
    %575 = tpu.matmul %573, %574, %cst_322 {dimension_numbers = #tpu.dot_dimension_numbers<[1], [0], [0], [1], [0, 0, 1, 1], [], []>} : vector<8x32xf32>, vector<32x32xf32>, vector<8x32xf32> -> vector<8x32xf32>
    %576 = arith.addf %572, %575 : vector<8x32xf32>
    %c0_323 = arith.constant 0 : index
    %c0_324 = arith.constant 0 : index
    %577 = vector.load %arg31[%c0_323, %c0_324] : memref<2x32xf32, #tpu.memory_space<vmem>>, vector<2x32xf32>
    %578 = vector.extract_strided_slice %577 {offsets = [0, 0], sizes = [1, 32], strides = [1, 1]} : vector<2x32xf32> to vector<1x32xf32>
    %579 = vector.extract_strided_slice %577 {offsets = [1, 0], sizes = [1, 32], strides = [1, 1]} : vector<2x32xf32> to vector<1x32xf32>
    %cst_325 = arith.constant dense<0.000000e+00> : vector<32xf32>
    %580 = vector.multi_reduction <add>, %576, %cst_325 [0] : vector<8x32xf32> to vector<32xf32>
    %581 = vector.shape_cast %580 : vector<32xf32> to vector<1x32xf32>
    %cst_326 = arith.constant 1.250000e-01 : f32
    %582 = vector.broadcast %cst_326 : f32 to vector<1x32xf32>
    %583 = arith.mulf %581, %582 : vector<1x32xf32>
    %584 = arith.mulf %576, %576 : vector<8x32xf32>
    %cst_327 = arith.constant dense<0.000000e+00> : vector<32xf32>
    %585 = vector.multi_reduction <add>, %584, %cst_327 [0] : vector<8x32xf32> to vector<32xf32>
    %586 = vector.shape_cast %585 : vector<32xf32> to vector<1x32xf32>
    %cst_328 = arith.constant 1.250000e-01 : f32
    %587 = vector.broadcast %cst_328 : f32 to vector<1x32xf32>
    %588 = arith.mulf %586, %587 : vector<1x32xf32>
    %589 = arith.mulf %583, %583 : vector<1x32xf32>
    %590 = arith.subf %588, %589 : vector<1x32xf32>
    %cst_329 = arith.constant 0.000000e+00 : f32
    %591 = vector.broadcast %cst_329 : f32 to vector<1x32xf32>
    %592 = arith.maximumf %590, %591 : vector<1x32xf32>
    %cst_330 = arith.constant 9.99999974E-6 : f32
    %593 = vector.broadcast %cst_330 : f32 to vector<1x32xf32>
    %594 = arith.addf %592, %593 : vector<1x32xf32>
    %595 = math.rsqrt %594 : vector<1x32xf32>
    %596 = arith.mulf %578, %595 : vector<1x32xf32>
    %597 = vector.broadcast %596 : vector<1x32xf32> to vector<8x32xf32>
    %598 = arith.mulf %576, %597 : vector<8x32xf32>
    %599 = arith.mulf %583, %596 : vector<1x32xf32>
    %600 = arith.subf %579, %599 : vector<1x32xf32>
    %601 = vector.broadcast %600 : vector<1x32xf32> to vector<8x32xf32>
    %602 = arith.addf %598, %601 : vector<8x32xf32>
    %603 = arith.addf %602, %474 : vector<8x32xf32>
    %cst_331 = arith.constant 0.000000e+00 : f32
    %604 = vector.broadcast %cst_331 : f32 to vector<8x32xf32>
    %605 = arith.maximumf %603, %604 : vector<8x32xf32>
    %c0_332 = arith.constant 0 : index
    %c0_333 = arith.constant 0 : index
    %606 = vector.load %arg34[%c0_332, %c0_333] : memref<32x32xf32, #tpu.memory_space<vmem>>, vector<32x32xf32>
    %cst_334 = arith.constant dense<0.000000e+00> : vector<8x32xf32>
    %607 = tpu.matmul %605, %606, %cst_334 {dimension_numbers = #tpu.dot_dimension_numbers<[1], [0], [0], [1], [0, 0, 1, 1], [], []>} : vector<8x32xf32>, vector<32x32xf32>, vector<8x32xf32> -> vector<8x32xf32>
    %c0_335 = arith.constant 0 : index
    %c0_336 = arith.constant 0 : index
    %608 = vector.load %arg32[%c0_335, %c0_336] : memref<32x8xf32, #tpu.memory_space<vmem>>, vector<32x8xf32>
    %cst_337 = arith.constant dense<0.000000e+00> : vector<32x32xf32>
    %609 = tpu.matmul %608, %607, %cst_337 {dimension_numbers = #tpu.dot_dimension_numbers<[1], [0], [0], [1], [0, 0, 1, 1], [], []>} : vector<32x8xf32>, vector<8x32xf32>, vector<32x32xf32> -> vector<32x32xf32>
    %610 = vector.extract_strided_slice %609 {offsets = [0, 0], sizes = [2, 32], strides = [1, 1]} : vector<32x32xf32> to vector<2x32xf32>
    %c128_338 = arith.constant 128 : index
    %c0_339 = arith.constant 0 : index
    %611 = vector.load %arg36[%c128_338, %c0_339] : memref<288x64xf32, #tpu.memory_space<vmem>>, vector<32x64xf32>
    %cst_340 = arith.constant dense<0.000000e+00> : vector<2x64xf32>
    %612 = tpu.matmul %610, %611, %cst_340 {dimension_numbers = #tpu.dot_dimension_numbers<[1], [0], [0], [1], [0, 0, 1, 1], [], []>} : vector<2x32xf32>, vector<32x64xf32>, vector<2x64xf32> -> vector<2x64xf32>
    %613 = vector.extract_strided_slice %609 {offsets = [8, 0], sizes = [2, 32], strides = [1, 1]} : vector<32x32xf32> to vector<2x32xf32>
    %c160_341 = arith.constant 160 : index
    %c0_342 = arith.constant 0 : index
    %614 = vector.load %arg36[%c160_341, %c0_342] : memref<288x64xf32, #tpu.memory_space<vmem>>, vector<32x64xf32>
    %cst_343 = arith.constant dense<0.000000e+00> : vector<2x64xf32>
    %615 = tpu.matmul %613, %614, %cst_343 {dimension_numbers = #tpu.dot_dimension_numbers<[1], [0], [0], [1], [0, 0, 1, 1], [], []>} : vector<2x32xf32>, vector<32x64xf32>, vector<2x64xf32> -> vector<2x64xf32>
    %616 = arith.addf %612, %615 : vector<2x64xf32>
    %617 = vector.extract_strided_slice %609 {offsets = [16, 0], sizes = [2, 32], strides = [1, 1]} : vector<32x32xf32> to vector<2x32xf32>
    %c224_344 = arith.constant 224 : index
    %c0_345 = arith.constant 0 : index
    %618 = vector.load %arg36[%c224_344, %c0_345] : memref<288x64xf32, #tpu.memory_space<vmem>>, vector<32x64xf32>
    %cst_346 = arith.constant dense<0.000000e+00> : vector<2x64xf32>
    %619 = tpu.matmul %617, %618, %cst_346 {dimension_numbers = #tpu.dot_dimension_numbers<[1], [0], [0], [1], [0, 0, 1, 1], [], []>} : vector<2x32xf32>, vector<32x64xf32>, vector<2x64xf32> -> vector<2x64xf32>
    %620 = arith.addf %616, %619 : vector<2x64xf32>
    %621 = vector.extract_strided_slice %609 {offsets = [24, 0], sizes = [2, 32], strides = [1, 1]} : vector<32x32xf32> to vector<2x32xf32>
    %c256_347 = arith.constant 256 : index
    %c0_348 = arith.constant 0 : index
    %622 = vector.load %arg36[%c256_347, %c0_348] : memref<288x64xf32, #tpu.memory_space<vmem>>, vector<32x64xf32>
    %cst_349 = arith.constant dense<0.000000e+00> : vector<2x64xf32>
    %623 = tpu.matmul %621, %622, %cst_349 {dimension_numbers = #tpu.dot_dimension_numbers<[1], [0], [0], [1], [0, 0, 1, 1], [], []>} : vector<2x32xf32>, vector<32x64xf32>, vector<2x64xf32> -> vector<2x64xf32>
    %624 = arith.addf %620, %623 : vector<2x64xf32>
    %c0_350 = arith.constant 0 : index
    %c0_351 = arith.constant 0 : index
    %625 = vector.load %arg37[%c0_350, %c0_351] : memref<2x64xf32, #tpu.memory_space<vmem>>, vector<2x64xf32>
    %626 = vector.extract_strided_slice %625 {offsets = [0, 0], sizes = [1, 64], strides = [1, 1]} : vector<2x64xf32> to vector<1x64xf32>
    %627 = vector.extract_strided_slice %625 {offsets = [1, 0], sizes = [1, 64], strides = [1, 1]} : vector<2x64xf32> to vector<1x64xf32>
    %cst_352 = arith.constant dense<0.000000e+00> : vector<64xf32>
    %628 = vector.multi_reduction <add>, %624, %cst_352 [0] : vector<2x64xf32> to vector<64xf32>
    %629 = vector.shape_cast %628 : vector<64xf32> to vector<1x64xf32>
    %cst_353 = arith.constant 5.000000e-01 : f32
    %630 = vector.broadcast %cst_353 : f32 to vector<1x64xf32>
    %631 = arith.mulf %629, %630 : vector<1x64xf32>
    %632 = arith.mulf %624, %624 : vector<2x64xf32>
    %cst_354 = arith.constant dense<0.000000e+00> : vector<64xf32>
    %633 = vector.multi_reduction <add>, %632, %cst_354 [0] : vector<2x64xf32> to vector<64xf32>
    %634 = vector.shape_cast %633 : vector<64xf32> to vector<1x64xf32>
    %cst_355 = arith.constant 5.000000e-01 : f32
    %635 = vector.broadcast %cst_355 : f32 to vector<1x64xf32>
    %636 = arith.mulf %634, %635 : vector<1x64xf32>
    %637 = arith.mulf %631, %631 : vector<1x64xf32>
    %638 = arith.subf %636, %637 : vector<1x64xf32>
    %cst_356 = arith.constant 0.000000e+00 : f32
    %639 = vector.broadcast %cst_356 : f32 to vector<1x64xf32>
    %640 = arith.maximumf %638, %639 : vector<1x64xf32>
    %cst_357 = arith.constant 9.99999974E-6 : f32
    %641 = vector.broadcast %cst_357 : f32 to vector<1x64xf32>
    %642 = arith.addf %640, %641 : vector<1x64xf32>
    %643 = math.rsqrt %642 : vector<1x64xf32>
    %644 = arith.mulf %626, %643 : vector<1x64xf32>
    %645 = vector.broadcast %644 : vector<1x64xf32> to vector<2x64xf32>
    %646 = arith.mulf %624, %645 : vector<2x64xf32>
    %647 = arith.mulf %631, %644 : vector<1x64xf32>
    %648 = arith.subf %627, %647 : vector<1x64xf32>
    %649 = vector.broadcast %648 : vector<1x64xf32> to vector<2x64xf32>
    %650 = arith.addf %646, %649 : vector<2x64xf32>
    %cst_358 = arith.constant 0.000000e+00 : f32
    %651 = vector.broadcast %cst_358 : f32 to vector<2x64xf32>
    %652 = arith.maximumf %650, %651 : vector<2x64xf32>
    %c0_359 = arith.constant 0 : index
    %c0_360 = arith.constant 0 : index
    %653 = vector.load %arg33[%c0_359, %c0_360] : memref<8x2xf32, #tpu.memory_space<vmem>>, vector<8x2xf32>
    %cst_361 = arith.constant dense<0.000000e+00> : vector<8x64xf32>
    %654 = tpu.matmul %653, %652, %cst_361 {dimension_numbers = #tpu.dot_dimension_numbers<[1], [0], [0], [1], [0, 0, 1, 1], [], []>} : vector<8x2xf32>, vector<2x64xf32>, vector<8x64xf32> -> vector<8x64xf32>
    %655 = vector.extract_strided_slice %654 {offsets = [0, 0], sizes = [2, 64], strides = [1, 1]} : vector<8x64xf32> to vector<2x64xf32>
    %c256_362 = arith.constant 256 : index
    %c0_363 = arith.constant 0 : index
    %656 = vector.load %arg38[%c256_362, %c0_363] : memref<576x64xf32, #tpu.memory_space<vmem>>, vector<64x64xf32>
    %cst_364 = arith.constant dense<0.000000e+00> : vector<2x64xf32>
    %657 = tpu.matmul %655, %656, %cst_364 {dimension_numbers = #tpu.dot_dimension_numbers<[1], [0], [0], [1], [0, 0, 1, 1], [], []>} : vector<2x64xf32>, vector<64x64xf32>, vector<2x64xf32> -> vector<2x64xf32>
    %c0_365 = arith.constant 0 : index
    %c0_366 = arith.constant 0 : index
    %658 = vector.load %arg39[%c0_365, %c0_366] : memref<2x64xf32, #tpu.memory_space<vmem>>, vector<2x64xf32>
    %659 = vector.extract_strided_slice %658 {offsets = [0, 0], sizes = [1, 64], strides = [1, 1]} : vector<2x64xf32> to vector<1x64xf32>
    %660 = vector.extract_strided_slice %658 {offsets = [1, 0], sizes = [1, 64], strides = [1, 1]} : vector<2x64xf32> to vector<1x64xf32>
    %cst_367 = arith.constant dense<0.000000e+00> : vector<64xf32>
    %661 = vector.multi_reduction <add>, %657, %cst_367 [0] : vector<2x64xf32> to vector<64xf32>
    %662 = vector.shape_cast %661 : vector<64xf32> to vector<1x64xf32>
    %cst_368 = arith.constant 5.000000e-01 : f32
    %663 = vector.broadcast %cst_368 : f32 to vector<1x64xf32>
    %664 = arith.mulf %662, %663 : vector<1x64xf32>
    %665 = arith.mulf %657, %657 : vector<2x64xf32>
    %cst_369 = arith.constant dense<0.000000e+00> : vector<64xf32>
    %666 = vector.multi_reduction <add>, %665, %cst_369 [0] : vector<2x64xf32> to vector<64xf32>
    %667 = vector.shape_cast %666 : vector<64xf32> to vector<1x64xf32>
    %cst_370 = arith.constant 5.000000e-01 : f32
    %668 = vector.broadcast %cst_370 : f32 to vector<1x64xf32>
    %669 = arith.mulf %667, %668 : vector<1x64xf32>
    %670 = arith.mulf %664, %664 : vector<1x64xf32>
    %671 = arith.subf %669, %670 : vector<1x64xf32>
    %cst_371 = arith.constant 0.000000e+00 : f32
    %672 = vector.broadcast %cst_371 : f32 to vector<1x64xf32>
    %673 = arith.maximumf %671, %672 : vector<1x64xf32>
    %cst_372 = arith.constant 9.99999974E-6 : f32
    %674 = vector.broadcast %cst_372 : f32 to vector<1x64xf32>
    %675 = arith.addf %673, %674 : vector<1x64xf32>
    %676 = math.rsqrt %675 : vector<1x64xf32>
    %677 = arith.mulf %659, %676 : vector<1x64xf32>
    %678 = vector.broadcast %677 : vector<1x64xf32> to vector<2x64xf32>
    %679 = arith.mulf %657, %678 : vector<2x64xf32>
    %680 = arith.mulf %664, %677 : vector<1x64xf32>
    %681 = arith.subf %660, %680 : vector<1x64xf32>
    %682 = vector.broadcast %681 : vector<1x64xf32> to vector<2x64xf32>
    %683 = arith.addf %679, %682 : vector<2x64xf32>
    %c0_373 = arith.constant 0 : index
    %c0_374 = arith.constant 0 : index
    %684 = vector.load %arg35[%c0_373, %c0_374] : memref<2x8xf32, #tpu.memory_space<vmem>>, vector<2x8xf32>
    %cst_375 = arith.constant dense<0.000000e+00> : vector<2x32xf32>
    %685 = tpu.matmul %684, %607, %cst_375 {dimension_numbers = #tpu.dot_dimension_numbers<[1], [0], [0], [1], [0, 0, 1, 1], [], []>} : vector<2x8xf32>, vector<8x32xf32>, vector<2x32xf32> -> vector<2x32xf32>
    %c0_376 = arith.constant 0 : index
    %c0_377 = arith.constant 0 : index
    %686 = vector.load %arg40[%c0_376, %c0_377] : memref<32x64xf32, #tpu.memory_space<vmem>>, vector<32x64xf32>
    %cst_378 = arith.constant dense<0.000000e+00> : vector<2x64xf32>
    %687 = tpu.matmul %685, %686, %cst_378 {dimension_numbers = #tpu.dot_dimension_numbers<[1], [0], [0], [1], [0, 0, 1, 1], [], []>} : vector<2x32xf32>, vector<32x64xf32>, vector<2x64xf32> -> vector<2x64xf32>
    %c0_379 = arith.constant 0 : index
    %c0_380 = arith.constant 0 : index
    %688 = vector.load %arg41[%c0_379, %c0_380] : memref<2x64xf32, #tpu.memory_space<vmem>>, vector<2x64xf32>
    %689 = vector.extract_strided_slice %688 {offsets = [0, 0], sizes = [1, 64], strides = [1, 1]} : vector<2x64xf32> to vector<1x64xf32>
    %690 = vector.extract_strided_slice %688 {offsets = [1, 0], sizes = [1, 64], strides = [1, 1]} : vector<2x64xf32> to vector<1x64xf32>
    %cst_381 = arith.constant dense<0.000000e+00> : vector<64xf32>
    %691 = vector.multi_reduction <add>, %687, %cst_381 [0] : vector<2x64xf32> to vector<64xf32>
    %692 = vector.shape_cast %691 : vector<64xf32> to vector<1x64xf32>
    %cst_382 = arith.constant 5.000000e-01 : f32
    %693 = vector.broadcast %cst_382 : f32 to vector<1x64xf32>
    %694 = arith.mulf %692, %693 : vector<1x64xf32>
    %695 = arith.mulf %687, %687 : vector<2x64xf32>
    %cst_383 = arith.constant dense<0.000000e+00> : vector<64xf32>
    %696 = vector.multi_reduction <add>, %695, %cst_383 [0] : vector<2x64xf32> to vector<64xf32>
    %697 = vector.shape_cast %696 : vector<64xf32> to vector<1x64xf32>
    %cst_384 = arith.constant 5.000000e-01 : f32
    %698 = vector.broadcast %cst_384 : f32 to vector<1x64xf32>
    %699 = arith.mulf %697, %698 : vector<1x64xf32>
    %700 = arith.mulf %694, %694 : vector<1x64xf32>
    %701 = arith.subf %699, %700 : vector<1x64xf32>
    %cst_385 = arith.constant 0.000000e+00 : f32
    %702 = vector.broadcast %cst_385 : f32 to vector<1x64xf32>
    %703 = arith.maximumf %701, %702 : vector<1x64xf32>
    %cst_386 = arith.constant 9.99999974E-6 : f32
    %704 = vector.broadcast %cst_386 : f32 to vector<1x64xf32>
    %705 = arith.addf %703, %704 : vector<1x64xf32>
    %706 = math.rsqrt %705 : vector<1x64xf32>
    %707 = arith.mulf %689, %706 : vector<1x64xf32>
    %708 = vector.broadcast %707 : vector<1x64xf32> to vector<2x64xf32>
    %709 = arith.mulf %687, %708 : vector<2x64xf32>
    %710 = arith.mulf %694, %707 : vector<1x64xf32>
    %711 = arith.subf %690, %710 : vector<1x64xf32>
    %712 = vector.broadcast %711 : vector<1x64xf32> to vector<2x64xf32>
    %713 = arith.addf %709, %712 : vector<2x64xf32>
    %714 = arith.addf %683, %713 : vector<2x64xf32>
    %cst_387 = arith.constant 0.000000e+00 : f32
    %715 = vector.broadcast %cst_387 : f32 to vector<2x64xf32>
    %716 = arith.maximumf %714, %715 : vector<2x64xf32>
    %c0_388 = arith.constant 0 : index
    %c0_389 = arith.constant 0 : index
    %717 = vector.load %arg42[%c0_388, %c0_389] : memref<8x2xf32, #tpu.memory_space<vmem>>, vector<8x2xf32>
    %cst_390 = arith.constant dense<0.000000e+00> : vector<8x64xf32>
    %718 = tpu.matmul %717, %716, %cst_390 {dimension_numbers = #tpu.dot_dimension_numbers<[1], [0], [0], [1], [0, 0, 1, 1], [], []>} : vector<8x2xf32>, vector<2x64xf32>, vector<8x64xf32> -> vector<8x64xf32>
    %719 = vector.extract_strided_slice %718 {offsets = [0, 0], sizes = [2, 64], strides = [1, 1]} : vector<8x64xf32> to vector<2x64xf32>
    %c256_391 = arith.constant 256 : index
    %c0_392 = arith.constant 0 : index
    %720 = vector.load %arg44[%c256_391, %c0_392] : memref<576x64xf32, #tpu.memory_space<vmem>>, vector<64x64xf32>
    %cst_393 = arith.constant dense<0.000000e+00> : vector<2x64xf32>
    %721 = tpu.matmul %719, %720, %cst_393 {dimension_numbers = #tpu.dot_dimension_numbers<[1], [0], [0], [1], [0, 0, 1, 1], [], []>} : vector<2x64xf32>, vector<64x64xf32>, vector<2x64xf32> -> vector<2x64xf32>
    %c0_394 = arith.constant 0 : index
    %c0_395 = arith.constant 0 : index
    %722 = vector.load %arg45[%c0_394, %c0_395] : memref<2x64xf32, #tpu.memory_space<vmem>>, vector<2x64xf32>
    %723 = vector.extract_strided_slice %722 {offsets = [0, 0], sizes = [1, 64], strides = [1, 1]} : vector<2x64xf32> to vector<1x64xf32>
    %724 = vector.extract_strided_slice %722 {offsets = [1, 0], sizes = [1, 64], strides = [1, 1]} : vector<2x64xf32> to vector<1x64xf32>
    %cst_396 = arith.constant dense<0.000000e+00> : vector<64xf32>
    %725 = vector.multi_reduction <add>, %721, %cst_396 [0] : vector<2x64xf32> to vector<64xf32>
    %726 = vector.shape_cast %725 : vector<64xf32> to vector<1x64xf32>
    %cst_397 = arith.constant 5.000000e-01 : f32
    %727 = vector.broadcast %cst_397 : f32 to vector<1x64xf32>
    %728 = arith.mulf %726, %727 : vector<1x64xf32>
    %729 = arith.mulf %721, %721 : vector<2x64xf32>
    %cst_398 = arith.constant dense<0.000000e+00> : vector<64xf32>
    %730 = vector.multi_reduction <add>, %729, %cst_398 [0] : vector<2x64xf32> to vector<64xf32>
    %731 = vector.shape_cast %730 : vector<64xf32> to vector<1x64xf32>
    %cst_399 = arith.constant 5.000000e-01 : f32
    %732 = vector.broadcast %cst_399 : f32 to vector<1x64xf32>
    %733 = arith.mulf %731, %732 : vector<1x64xf32>
    %734 = arith.mulf %728, %728 : vector<1x64xf32>
    %735 = arith.subf %733, %734 : vector<1x64xf32>
    %cst_400 = arith.constant 0.000000e+00 : f32
    %736 = vector.broadcast %cst_400 : f32 to vector<1x64xf32>
    %737 = arith.maximumf %735, %736 : vector<1x64xf32>
    %cst_401 = arith.constant 9.99999974E-6 : f32
    %738 = vector.broadcast %cst_401 : f32 to vector<1x64xf32>
    %739 = arith.addf %737, %738 : vector<1x64xf32>
    %740 = math.rsqrt %739 : vector<1x64xf32>
    %741 = arith.mulf %723, %740 : vector<1x64xf32>
    %742 = vector.broadcast %741 : vector<1x64xf32> to vector<2x64xf32>
    %743 = arith.mulf %721, %742 : vector<2x64xf32>
    %744 = arith.mulf %728, %741 : vector<1x64xf32>
    %745 = arith.subf %724, %744 : vector<1x64xf32>
    %746 = vector.broadcast %745 : vector<1x64xf32> to vector<2x64xf32>
    %747 = arith.addf %743, %746 : vector<2x64xf32>
    %cst_402 = arith.constant 0.000000e+00 : f32
    %748 = vector.broadcast %cst_402 : f32 to vector<2x64xf32>
    %749 = arith.maximumf %747, %748 : vector<2x64xf32>
    %c0_403 = arith.constant 0 : index
    %c0_404 = arith.constant 0 : index
    %750 = vector.load %arg43[%c0_403, %c0_404] : memref<8x2xf32, #tpu.memory_space<vmem>>, vector<8x2xf32>
    %cst_405 = arith.constant dense<0.000000e+00> : vector<8x64xf32>
    %751 = tpu.matmul %750, %749, %cst_405 {dimension_numbers = #tpu.dot_dimension_numbers<[1], [0], [0], [1], [0, 0, 1, 1], [], []>} : vector<8x2xf32>, vector<2x64xf32>, vector<8x64xf32> -> vector<8x64xf32>
    %752 = vector.extract_strided_slice %751 {offsets = [0, 0], sizes = [2, 64], strides = [1, 1]} : vector<8x64xf32> to vector<2x64xf32>
    %c256_406 = arith.constant 256 : index
    %c0_407 = arith.constant 0 : index
    %753 = vector.load %arg46[%c256_406, %c0_407] : memref<576x64xf32, #tpu.memory_space<vmem>>, vector<64x64xf32>
    %cst_408 = arith.constant dense<0.000000e+00> : vector<2x64xf32>
    %754 = tpu.matmul %752, %753, %cst_408 {dimension_numbers = #tpu.dot_dimension_numbers<[1], [0], [0], [1], [0, 0, 1, 1], [], []>} : vector<2x64xf32>, vector<64x64xf32>, vector<2x64xf32> -> vector<2x64xf32>
    %c0_409 = arith.constant 0 : index
    %c0_410 = arith.constant 0 : index
    %755 = vector.load %arg47[%c0_409, %c0_410] : memref<2x64xf32, #tpu.memory_space<vmem>>, vector<2x64xf32>
    %756 = vector.extract_strided_slice %755 {offsets = [0, 0], sizes = [1, 64], strides = [1, 1]} : vector<2x64xf32> to vector<1x64xf32>
    %757 = vector.extract_strided_slice %755 {offsets = [1, 0], sizes = [1, 64], strides = [1, 1]} : vector<2x64xf32> to vector<1x64xf32>
    %cst_411 = arith.constant dense<0.000000e+00> : vector<64xf32>
    %758 = vector.multi_reduction <add>, %754, %cst_411 [0] : vector<2x64xf32> to vector<64xf32>
    %759 = vector.shape_cast %758 : vector<64xf32> to vector<1x64xf32>
    %cst_412 = arith.constant 5.000000e-01 : f32
    %760 = vector.broadcast %cst_412 : f32 to vector<1x64xf32>
    %761 = arith.mulf %759, %760 : vector<1x64xf32>
    %762 = arith.mulf %754, %754 : vector<2x64xf32>
    %cst_413 = arith.constant dense<0.000000e+00> : vector<64xf32>
    %763 = vector.multi_reduction <add>, %762, %cst_413 [0] : vector<2x64xf32> to vector<64xf32>
    %764 = vector.shape_cast %763 : vector<64xf32> to vector<1x64xf32>
    %cst_414 = arith.constant 5.000000e-01 : f32
    %765 = vector.broadcast %cst_414 : f32 to vector<1x64xf32>
    %766 = arith.mulf %764, %765 : vector<1x64xf32>
    %767 = arith.mulf %761, %761 : vector<1x64xf32>
    %768 = arith.subf %766, %767 : vector<1x64xf32>
    %cst_415 = arith.constant 0.000000e+00 : f32
    %769 = vector.broadcast %cst_415 : f32 to vector<1x64xf32>
    %770 = arith.maximumf %768, %769 : vector<1x64xf32>
    %cst_416 = arith.constant 9.99999974E-6 : f32
    %771 = vector.broadcast %cst_416 : f32 to vector<1x64xf32>
    %772 = arith.addf %770, %771 : vector<1x64xf32>
    %773 = math.rsqrt %772 : vector<1x64xf32>
    %774 = arith.mulf %756, %773 : vector<1x64xf32>
    %775 = vector.broadcast %774 : vector<1x64xf32> to vector<2x64xf32>
    %776 = arith.mulf %754, %775 : vector<2x64xf32>
    %777 = arith.mulf %761, %774 : vector<1x64xf32>
    %778 = arith.subf %757, %777 : vector<1x64xf32>
    %779 = vector.broadcast %778 : vector<1x64xf32> to vector<2x64xf32>
    %780 = arith.addf %776, %779 : vector<2x64xf32>
    %781 = arith.addf %780, %716 : vector<2x64xf32>
    %cst_417 = arith.constant 0.000000e+00 : f32
    %782 = vector.broadcast %cst_417 : f32 to vector<2x64xf32>
    %783 = arith.maximumf %781, %782 : vector<2x64xf32>
    %c0_418 = arith.constant 0 : index
    %c0_419 = arith.constant 0 : index
    %784 = vector.load %arg50[%c0_418, %c0_419] : memref<64x64xf32, #tpu.memory_space<vmem>>, vector<64x64xf32>
    %cst_420 = arith.constant dense<0.000000e+00> : vector<2x64xf32>
    %785 = tpu.matmul %783, %784, %cst_420 {dimension_numbers = #tpu.dot_dimension_numbers<[1], [0], [0], [1], [0, 0, 1, 1], [], []>} : vector<2x64xf32>, vector<64x64xf32>, vector<2x64xf32> -> vector<2x64xf32>
    %c0_421 = arith.constant 0 : index
    %c0_422 = arith.constant 0 : index
    %786 = vector.load %arg48[%c0_421, %c0_422] : memref<8x2xf32, #tpu.memory_space<vmem>>, vector<8x2xf32>
    %cst_423 = arith.constant dense<0.000000e+00> : vector<8x64xf32>
    %787 = tpu.matmul %786, %785, %cst_423 {dimension_numbers = #tpu.dot_dimension_numbers<[1], [0], [0], [1], [0, 0, 1, 1], [], []>} : vector<8x2xf32>, vector<2x64xf32>, vector<8x64xf32> -> vector<8x64xf32>
    %788 = vector.extract_strided_slice %787 {offsets = [0, 0], sizes = [2, 64], strides = [1, 1]} : vector<8x64xf32> to vector<2x64xf32>
    %c256_424 = arith.constant 256 : index
    %c0_425 = arith.constant 0 : index
    %789 = vector.load %arg52[%c256_424, %c0_425] : memref<576x128xf32, #tpu.memory_space<vmem>>, vector<64x128xf32>
    %cst_426 = arith.constant dense<0.000000e+00> : vector<2x128xf32>
    %790 = tpu.matmul %788, %789, %cst_426 {dimension_numbers = #tpu.dot_dimension_numbers<[1], [0], [0], [1], [0, 0, 1, 1], [], []>} : vector<2x64xf32>, vector<64x128xf32>, vector<2x128xf32> -> vector<2x128xf32>
    %c0_427 = arith.constant 0 : index
    %c0_428 = arith.constant 0 : index
    %791 = vector.load %arg53[%c0_427, %c0_428] : memref<2x128xf32, #tpu.memory_space<vmem>>, vector<2x128xf32>
    %792 = vector.extract_strided_slice %791 {offsets = [0, 0], sizes = [1, 128], strides = [1, 1]} : vector<2x128xf32> to vector<1x128xf32>
    %793 = vector.extract_strided_slice %791 {offsets = [1, 0], sizes = [1, 128], strides = [1, 1]} : vector<2x128xf32> to vector<1x128xf32>
    %cst_429 = arith.constant dense<0.000000e+00> : vector<128xf32>
    %794 = vector.multi_reduction <add>, %790, %cst_429 [0] : vector<2x128xf32> to vector<128xf32>
    %795 = vector.shape_cast %794 : vector<128xf32> to vector<1x128xf32>
    %cst_430 = arith.constant 5.000000e-01 : f32
    %796 = vector.broadcast %cst_430 : f32 to vector<1x128xf32>
    %797 = arith.mulf %795, %796 : vector<1x128xf32>
    %798 = arith.mulf %790, %790 : vector<2x128xf32>
    %cst_431 = arith.constant dense<0.000000e+00> : vector<128xf32>
    %799 = vector.multi_reduction <add>, %798, %cst_431 [0] : vector<2x128xf32> to vector<128xf32>
    %800 = vector.shape_cast %799 : vector<128xf32> to vector<1x128xf32>
    %cst_432 = arith.constant 5.000000e-01 : f32
    %801 = vector.broadcast %cst_432 : f32 to vector<1x128xf32>
    %802 = arith.mulf %800, %801 : vector<1x128xf32>
    %803 = arith.mulf %797, %797 : vector<1x128xf32>
    %804 = arith.subf %802, %803 : vector<1x128xf32>
    %cst_433 = arith.constant 0.000000e+00 : f32
    %805 = vector.broadcast %cst_433 : f32 to vector<1x128xf32>
    %806 = arith.maximumf %804, %805 : vector<1x128xf32>
    %cst_434 = arith.constant 9.99999974E-6 : f32
    %807 = vector.broadcast %cst_434 : f32 to vector<1x128xf32>
    %808 = arith.addf %806, %807 : vector<1x128xf32>
    %809 = math.rsqrt %808 : vector<1x128xf32>
    %810 = arith.mulf %792, %809 : vector<1x128xf32>
    %811 = vector.broadcast %810 : vector<1x128xf32> to vector<2x128xf32>
    %812 = arith.mulf %790, %811 : vector<2x128xf32>
    %813 = arith.mulf %797, %810 : vector<1x128xf32>
    %814 = arith.subf %793, %813 : vector<1x128xf32>
    %815 = vector.broadcast %814 : vector<1x128xf32> to vector<2x128xf32>
    %816 = arith.addf %812, %815 : vector<2x128xf32>
    %cst_435 = arith.constant 0.000000e+00 : f32
    %817 = vector.broadcast %cst_435 : f32 to vector<2x128xf32>
    %818 = arith.maximumf %816, %817 : vector<2x128xf32>
    %c0_436 = arith.constant 0 : index
    %c0_437 = arith.constant 0 : index
    %819 = vector.load %arg49[%c0_436, %c0_437] : memref<8x2xf32, #tpu.memory_space<vmem>>, vector<8x2xf32>
    %cst_438 = arith.constant dense<0.000000e+00> : vector<8x128xf32>
    %820 = tpu.matmul %819, %818, %cst_438 {dimension_numbers = #tpu.dot_dimension_numbers<[1], [0], [0], [1], [0, 0, 1, 1], [], []>} : vector<8x2xf32>, vector<2x128xf32>, vector<8x128xf32> -> vector<8x128xf32>
    %821 = vector.extract_strided_slice %820 {offsets = [0, 0], sizes = [2, 128], strides = [1, 1]} : vector<8x128xf32> to vector<2x128xf32>
    %c512 = arith.constant 512 : index
    %c0_439 = arith.constant 0 : index
    %822 = vector.load %arg54[%c512, %c0_439] : memref<1152x128xf32, #tpu.memory_space<vmem>>, vector<128x128xf32>
    %cst_440 = arith.constant dense<0.000000e+00> : vector<2x128xf32>
    %823 = tpu.matmul %821, %822, %cst_440 {dimension_numbers = #tpu.dot_dimension_numbers<[1], [0], [0], [1], [0, 0, 1, 1], [], []>} : vector<2x128xf32>, vector<128x128xf32>, vector<2x128xf32> -> vector<2x128xf32>
    %c0_441 = arith.constant 0 : index
    %c0_442 = arith.constant 0 : index
    %824 = vector.load %arg55[%c0_441, %c0_442] : memref<2x128xf32, #tpu.memory_space<vmem>>, vector<2x128xf32>
    %825 = vector.extract_strided_slice %824 {offsets = [0, 0], sizes = [1, 128], strides = [1, 1]} : vector<2x128xf32> to vector<1x128xf32>
    %826 = vector.extract_strided_slice %824 {offsets = [1, 0], sizes = [1, 128], strides = [1, 1]} : vector<2x128xf32> to vector<1x128xf32>
    %cst_443 = arith.constant dense<0.000000e+00> : vector<128xf32>
    %827 = vector.multi_reduction <add>, %823, %cst_443 [0] : vector<2x128xf32> to vector<128xf32>
    %828 = vector.shape_cast %827 : vector<128xf32> to vector<1x128xf32>
    %cst_444 = arith.constant 5.000000e-01 : f32
    %829 = vector.broadcast %cst_444 : f32 to vector<1x128xf32>
    %830 = arith.mulf %828, %829 : vector<1x128xf32>
    %831 = arith.mulf %823, %823 : vector<2x128xf32>
    %cst_445 = arith.constant dense<0.000000e+00> : vector<128xf32>
    %832 = vector.multi_reduction <add>, %831, %cst_445 [0] : vector<2x128xf32> to vector<128xf32>
    %833 = vector.shape_cast %832 : vector<128xf32> to vector<1x128xf32>
    %cst_446 = arith.constant 5.000000e-01 : f32
    %834 = vector.broadcast %cst_446 : f32 to vector<1x128xf32>
    %835 = arith.mulf %833, %834 : vector<1x128xf32>
    %836 = arith.mulf %830, %830 : vector<1x128xf32>
    %837 = arith.subf %835, %836 : vector<1x128xf32>
    %cst_447 = arith.constant 0.000000e+00 : f32
    %838 = vector.broadcast %cst_447 : f32 to vector<1x128xf32>
    %839 = arith.maximumf %837, %838 : vector<1x128xf32>
    %cst_448 = arith.constant 9.99999974E-6 : f32
    %840 = vector.broadcast %cst_448 : f32 to vector<1x128xf32>
    %841 = arith.addf %839, %840 : vector<1x128xf32>
    %842 = math.rsqrt %841 : vector<1x128xf32>
    %843 = arith.mulf %825, %842 : vector<1x128xf32>
    %844 = vector.broadcast %843 : vector<1x128xf32> to vector<2x128xf32>
    %845 = arith.mulf %823, %844 : vector<2x128xf32>
    %846 = arith.mulf %830, %843 : vector<1x128xf32>
    %847 = arith.subf %826, %846 : vector<1x128xf32>
    %848 = vector.broadcast %847 : vector<1x128xf32> to vector<2x128xf32>
    %849 = arith.addf %845, %848 : vector<2x128xf32>
    %c0_449 = arith.constant 0 : index
    %c0_450 = arith.constant 0 : index
    %850 = vector.load %arg51[%c0_449, %c0_450] : memref<2x2xf32, #tpu.memory_space<vmem>>, vector<2x2xf32>
    %cst_451 = arith.constant dense<0.000000e+00> : vector<2x64xf32>
    %851 = tpu.matmul %850, %785, %cst_451 {dimension_numbers = #tpu.dot_dimension_numbers<[1], [0], [0], [1], [0, 0, 1, 1], [], []>} : vector<2x2xf32>, vector<2x64xf32>, vector<2x64xf32> -> vector<2x64xf32>
    %c0_452 = arith.constant 0 : index
    %c0_453 = arith.constant 0 : index
    %852 = vector.load %arg56[%c0_452, %c0_453] : memref<64x128xf32, #tpu.memory_space<vmem>>, vector<64x128xf32>
    %cst_454 = arith.constant dense<0.000000e+00> : vector<2x128xf32>
    %853 = tpu.matmul %851, %852, %cst_454 {dimension_numbers = #tpu.dot_dimension_numbers<[1], [0], [0], [1], [0, 0, 1, 1], [], []>} : vector<2x64xf32>, vector<64x128xf32>, vector<2x128xf32> -> vector<2x128xf32>
    %c0_455 = arith.constant 0 : index
    %c0_456 = arith.constant 0 : index
    %854 = vector.load %arg57[%c0_455, %c0_456] : memref<2x128xf32, #tpu.memory_space<vmem>>, vector<2x128xf32>
    %855 = vector.extract_strided_slice %854 {offsets = [0, 0], sizes = [1, 128], strides = [1, 1]} : vector<2x128xf32> to vector<1x128xf32>
    %856 = vector.extract_strided_slice %854 {offsets = [1, 0], sizes = [1, 128], strides = [1, 1]} : vector<2x128xf32> to vector<1x128xf32>
    %cst_457 = arith.constant dense<0.000000e+00> : vector<128xf32>
    %857 = vector.multi_reduction <add>, %853, %cst_457 [0] : vector<2x128xf32> to vector<128xf32>
    %858 = vector.shape_cast %857 : vector<128xf32> to vector<1x128xf32>
    %cst_458 = arith.constant 5.000000e-01 : f32
    %859 = vector.broadcast %cst_458 : f32 to vector<1x128xf32>
    %860 = arith.mulf %858, %859 : vector<1x128xf32>
    %861 = arith.mulf %853, %853 : vector<2x128xf32>
    %cst_459 = arith.constant dense<0.000000e+00> : vector<128xf32>
    %862 = vector.multi_reduction <add>, %861, %cst_459 [0] : vector<2x128xf32> to vector<128xf32>
    %863 = vector.shape_cast %862 : vector<128xf32> to vector<1x128xf32>
    %cst_460 = arith.constant 5.000000e-01 : f32
    %864 = vector.broadcast %cst_460 : f32 to vector<1x128xf32>
    %865 = arith.mulf %863, %864 : vector<1x128xf32>
    %866 = arith.mulf %860, %860 : vector<1x128xf32>
    %867 = arith.subf %865, %866 : vector<1x128xf32>
    %cst_461 = arith.constant 0.000000e+00 : f32
    %868 = vector.broadcast %cst_461 : f32 to vector<1x128xf32>
    %869 = arith.maximumf %867, %868 : vector<1x128xf32>
    %cst_462 = arith.constant 9.99999974E-6 : f32
    %870 = vector.broadcast %cst_462 : f32 to vector<1x128xf32>
    %871 = arith.addf %869, %870 : vector<1x128xf32>
    %872 = math.rsqrt %871 : vector<1x128xf32>
    %873 = arith.mulf %855, %872 : vector<1x128xf32>
    %874 = vector.broadcast %873 : vector<1x128xf32> to vector<2x128xf32>
    %875 = arith.mulf %853, %874 : vector<2x128xf32>
    %876 = arith.mulf %860, %873 : vector<1x128xf32>
    %877 = arith.subf %856, %876 : vector<1x128xf32>
    %878 = vector.broadcast %877 : vector<1x128xf32> to vector<2x128xf32>
    %879 = arith.addf %875, %878 : vector<2x128xf32>
    %880 = arith.addf %849, %879 : vector<2x128xf32>
    %cst_463 = arith.constant 0.000000e+00 : f32
    %881 = vector.broadcast %cst_463 : f32 to vector<2x128xf32>
    %882 = arith.maximumf %880, %881 : vector<2x128xf32>
    %c0_464 = arith.constant 0 : index
    %c0_465 = arith.constant 0 : index
    %883 = vector.load %arg58[%c0_464, %c0_465] : memref<8x2xf32, #tpu.memory_space<vmem>>, vector<8x2xf32>
    %cst_466 = arith.constant dense<0.000000e+00> : vector<8x128xf32>
    %884 = tpu.matmul %883, %882, %cst_466 {dimension_numbers = #tpu.dot_dimension_numbers<[1], [0], [0], [1], [0, 0, 1, 1], [], []>} : vector<8x2xf32>, vector<2x128xf32>, vector<8x128xf32> -> vector<8x128xf32>
    %885 = vector.extract_strided_slice %884 {offsets = [0, 0], sizes = [2, 128], strides = [1, 1]} : vector<8x128xf32> to vector<2x128xf32>
    %c512_467 = arith.constant 512 : index
    %c0_468 = arith.constant 0 : index
    %886 = vector.load %arg60[%c512_467, %c0_468] : memref<1152x128xf32, #tpu.memory_space<vmem>>, vector<128x128xf32>
    %cst_469 = arith.constant dense<0.000000e+00> : vector<2x128xf32>
    %887 = tpu.matmul %885, %886, %cst_469 {dimension_numbers = #tpu.dot_dimension_numbers<[1], [0], [0], [1], [0, 0, 1, 1], [], []>} : vector<2x128xf32>, vector<128x128xf32>, vector<2x128xf32> -> vector<2x128xf32>
    %c0_470 = arith.constant 0 : index
    %c0_471 = arith.constant 0 : index
    %888 = vector.load %arg61[%c0_470, %c0_471] : memref<2x128xf32, #tpu.memory_space<vmem>>, vector<2x128xf32>
    %889 = vector.extract_strided_slice %888 {offsets = [0, 0], sizes = [1, 128], strides = [1, 1]} : vector<2x128xf32> to vector<1x128xf32>
    %890 = vector.extract_strided_slice %888 {offsets = [1, 0], sizes = [1, 128], strides = [1, 1]} : vector<2x128xf32> to vector<1x128xf32>
    %cst_472 = arith.constant dense<0.000000e+00> : vector<128xf32>
    %891 = vector.multi_reduction <add>, %887, %cst_472 [0] : vector<2x128xf32> to vector<128xf32>
    %892 = vector.shape_cast %891 : vector<128xf32> to vector<1x128xf32>
    %cst_473 = arith.constant 5.000000e-01 : f32
    %893 = vector.broadcast %cst_473 : f32 to vector<1x128xf32>
    %894 = arith.mulf %892, %893 : vector<1x128xf32>
    %895 = arith.mulf %887, %887 : vector<2x128xf32>
    %cst_474 = arith.constant dense<0.000000e+00> : vector<128xf32>
    %896 = vector.multi_reduction <add>, %895, %cst_474 [0] : vector<2x128xf32> to vector<128xf32>
    %897 = vector.shape_cast %896 : vector<128xf32> to vector<1x128xf32>
    %cst_475 = arith.constant 5.000000e-01 : f32
    %898 = vector.broadcast %cst_475 : f32 to vector<1x128xf32>
    %899 = arith.mulf %897, %898 : vector<1x128xf32>
    %900 = arith.mulf %894, %894 : vector<1x128xf32>
    %901 = arith.subf %899, %900 : vector<1x128xf32>
    %cst_476 = arith.constant 0.000000e+00 : f32
    %902 = vector.broadcast %cst_476 : f32 to vector<1x128xf32>
    %903 = arith.maximumf %901, %902 : vector<1x128xf32>
    %cst_477 = arith.constant 9.99999974E-6 : f32
    %904 = vector.broadcast %cst_477 : f32 to vector<1x128xf32>
    %905 = arith.addf %903, %904 : vector<1x128xf32>
    %906 = math.rsqrt %905 : vector<1x128xf32>
    %907 = arith.mulf %889, %906 : vector<1x128xf32>
    %908 = vector.broadcast %907 : vector<1x128xf32> to vector<2x128xf32>
    %909 = arith.mulf %887, %908 : vector<2x128xf32>
    %910 = arith.mulf %894, %907 : vector<1x128xf32>
    %911 = arith.subf %890, %910 : vector<1x128xf32>
    %912 = vector.broadcast %911 : vector<1x128xf32> to vector<2x128xf32>
    %913 = arith.addf %909, %912 : vector<2x128xf32>
    %cst_478 = arith.constant 0.000000e+00 : f32
    %914 = vector.broadcast %cst_478 : f32 to vector<2x128xf32>
    %915 = arith.maximumf %913, %914 : vector<2x128xf32>
    %c0_479 = arith.constant 0 : index
    %c0_480 = arith.constant 0 : index
    %916 = vector.load %arg59[%c0_479, %c0_480] : memref<8x2xf32, #tpu.memory_space<vmem>>, vector<8x2xf32>
    %cst_481 = arith.constant dense<0.000000e+00> : vector<8x128xf32>
    %917 = tpu.matmul %916, %915, %cst_481 {dimension_numbers = #tpu.dot_dimension_numbers<[1], [0], [0], [1], [0, 0, 1, 1], [], []>} : vector<8x2xf32>, vector<2x128xf32>, vector<8x128xf32> -> vector<8x128xf32>
    %918 = vector.extract_strided_slice %917 {offsets = [0, 0], sizes = [2, 128], strides = [1, 1]} : vector<8x128xf32> to vector<2x128xf32>
    %c512_482 = arith.constant 512 : index
    %c0_483 = arith.constant 0 : index
    %919 = vector.load %arg62[%c512_482, %c0_483] : memref<1152x128xf32, #tpu.memory_space<vmem>>, vector<128x128xf32>
    %cst_484 = arith.constant dense<0.000000e+00> : vector<2x128xf32>
    %920 = tpu.matmul %918, %919, %cst_484 {dimension_numbers = #tpu.dot_dimension_numbers<[1], [0], [0], [1], [0, 0, 1, 1], [], []>} : vector<2x128xf32>, vector<128x128xf32>, vector<2x128xf32> -> vector<2x128xf32>
    %c0_485 = arith.constant 0 : index
    %c0_486 = arith.constant 0 : index
    %921 = vector.load %arg63[%c0_485, %c0_486] : memref<2x128xf32, #tpu.memory_space<vmem>>, vector<2x128xf32>
    %922 = vector.extract_strided_slice %921 {offsets = [0, 0], sizes = [1, 128], strides = [1, 1]} : vector<2x128xf32> to vector<1x128xf32>
    %923 = vector.extract_strided_slice %921 {offsets = [1, 0], sizes = [1, 128], strides = [1, 1]} : vector<2x128xf32> to vector<1x128xf32>
    %cst_487 = arith.constant dense<0.000000e+00> : vector<128xf32>
    %924 = vector.multi_reduction <add>, %920, %cst_487 [0] : vector<2x128xf32> to vector<128xf32>
    %925 = vector.shape_cast %924 : vector<128xf32> to vector<1x128xf32>
    %cst_488 = arith.constant 5.000000e-01 : f32
    %926 = vector.broadcast %cst_488 : f32 to vector<1x128xf32>
    %927 = arith.mulf %925, %926 : vector<1x128xf32>
    %928 = arith.mulf %920, %920 : vector<2x128xf32>
    %cst_489 = arith.constant dense<0.000000e+00> : vector<128xf32>
    %929 = vector.multi_reduction <add>, %928, %cst_489 [0] : vector<2x128xf32> to vector<128xf32>
    %930 = vector.shape_cast %929 : vector<128xf32> to vector<1x128xf32>
    %cst_490 = arith.constant 5.000000e-01 : f32
    %931 = vector.broadcast %cst_490 : f32 to vector<1x128xf32>
    %932 = arith.mulf %930, %931 : vector<1x128xf32>
    %933 = arith.mulf %927, %927 : vector<1x128xf32>
    %934 = arith.subf %932, %933 : vector<1x128xf32>
    %cst_491 = arith.constant 0.000000e+00 : f32
    %935 = vector.broadcast %cst_491 : f32 to vector<1x128xf32>
    %936 = arith.maximumf %934, %935 : vector<1x128xf32>
    %cst_492 = arith.constant 9.99999974E-6 : f32
    %937 = vector.broadcast %cst_492 : f32 to vector<1x128xf32>
    %938 = arith.addf %936, %937 : vector<1x128xf32>
    %939 = math.rsqrt %938 : vector<1x128xf32>
    %940 = arith.mulf %922, %939 : vector<1x128xf32>
    %941 = vector.broadcast %940 : vector<1x128xf32> to vector<2x128xf32>
    %942 = arith.mulf %920, %941 : vector<2x128xf32>
    %943 = arith.mulf %927, %940 : vector<1x128xf32>
    %944 = arith.subf %923, %943 : vector<1x128xf32>
    %945 = vector.broadcast %944 : vector<1x128xf32> to vector<2x128xf32>
    %946 = arith.addf %942, %945 : vector<2x128xf32>
    %947 = arith.addf %946, %882 : vector<2x128xf32>
    %cst_493 = arith.constant 0.000000e+00 : f32
    %948 = vector.broadcast %cst_493 : f32 to vector<2x128xf32>
    %949 = arith.maximumf %947, %948 : vector<2x128xf32>
    %c0_494 = arith.constant 0 : index
    %c0_495 = arith.constant 0 : index
    %950 = vector.load %arg64[%c0_494, %c0_495] : memref<2x128xf32, #tpu.memory_space<vmem>>, vector<2x128xf32>
    tpu.vector_store %arg64[%c0_494, %c0_495], %949 {strides = array<i32>} : memref<2x128xf32, #tpu.memory_space<vmem>>, vector<2x128xf32>,
    return
  }
}

</mosaic_0001>

<bundles_post_ra>
// kernel: a_call__.1
= control target key start
LH: loop header
LB: loop body
LE: loop exit
PB: predicated region body
PF: predicated region fallthrough
CT: control target
= control target key end

     0   :  { %v16462_v0 = vmov 0.0|0.0   ;;  %s16463_s3 = smov 2   ;;  %vm313_vm0 = vcmask 154624   ;;  %v16464_v29 = vmov 0.0   ;;  %vm362_vm1 = vcmask 1042432   ;;  %s16465_s10 = smov 1   ;;  %s18388_s0 = inlined_call_operand.smem [shape: u32[65], index: -1, kind: input, shape index: {}] }
   0x1   :  { %15532 = vmatprep.subr.bf16.mxu0 %v16462_v0  ;;  %s16538_s6 = sld [smem:[%s18388_s0 + %s16463_s3]]   ;;  %vm512_vm2 = vcmask 130048   ;;  %s16466_s14 = smov 3   ;;  %vm1021_vm3 = vcmask 261120   ;;  %vm16480_vm4 = vmmov 0   ;;  %vm7458_vm5 = vcmask 64512  }
   0x2   :  { %s16543_s9 = sld [smem:[%s18388_s0]]   ;;  %s16467_s18 = smov 4   ;;  %vm10787_vm6 = vcmask 517120   ;;  %vm10832_vm7 = vcmask 1041408   ;;  %vm10828_vm8 = vcmask 15360   ;;  %vm10914_vm9 = vcmask 523264  }
   0x3   :  { %s16652_s13 = sld [smem:[%s18388_s0 + %s16465_s10]]   ;;  %s16468_s22 = smov 6  }
   0x4   :  { %s12707_s17 = sld [smem:[%s18388_s0 + %s16466_s14]]   ;;  %s16469_s26 = smov 5  }
   0x5   :  { %s16790_s21 = sld [smem:[%s18388_s0 + %s16467_s18]]   ;;  %s16470_s30 = smov 7  }
   0x6   :  { %s16879_s25 = sld [smem:[%s18388_s0 + %s16468_s22]]   ;;  %s16471_s4 = smov 8  }
   0x7   :  { %v294_v1 = vld [vmem:[%s16538_s6] sm:$0xff]  ;;  %v295_v2 = vld [vmem:[%s16538_s6 + $0x8] sm:$0xff]  ;;  %v296_v3 = vld [vmem:[%s16538_s6 + $0x10] sm:$0xff]  ;;  %s16938_s29 = sld [smem:[%s18388_s0 + %s16469_s26]]   ;;  %s16472_s8 = smov 10  }
   0x8   :  { %v15533_v4 = vpack.c.bf16 %v295_v2, %v294_v1  ;;  %v297_v5 = vld [vmem:[%s16538_s6 + $0x18] sm:$0xff]  ;;  %v298_v7 = vld [vmem:[%s16538_s6 + $0x20] sm:$0xff]  ;;  %v299_v8 = vld [vmem:[%s16538_s6 + $0x28] sm:$0xff]  ;;  %s12711_s3 = sld [smem:[%s18388_s0 + %s16470_s30]]   ;;  %s16473_s12 = smov 9  }
   0x9   :  { %v15536_v6 = vpack.c.bf16 %v297_v5, %v296_v3  ;;  %v263_v9 = vld [vmem:[%s16543_s9 + $0x8] sm:$0xff]  ;;  %v15539_v10 = vpack.c.bf16 %v299_v8, %v298_v7  ;;  %v300_v11 = vld [vmem:[%s16538_s6 + $0x30] sm:$0xff]  ;;  %v301_v12 = vld [vmem:[%s16538_s6 + $0x38] sm:$0xff]  ;;  %s17028_s7 = sld [smem:[%s18388_s0 + %s16471_s4]]   ;;  %s16474_s16 = smov 12  }
   0xa   :  { %15534 = vmatpush1.bf16.msra.mxu0 %v15533_v4  ;;  %12770 = vmatprep.mubr.msk.f32.mxu0 %vm313_vm0, %v263_v9  ;;  %v15542_v13 = vpack.c.bf16 %v301_v12, %v300_v11  ;;  %v302_v14 = vld [vmem:[%s16538_s6 + $0x40] sm:$0xff]  ;;  %v303_v15 = vld [vmem:[%s16538_s6 + $0x48] sm:$0xff]  ;;  %v304_v17 = vld [vmem:[%s16538_s6 + $0x50] sm:$0xff]  ;;  %s17087_s11 = sld [smem:[%s18388_s0 + %s16472_s8]]   ;;  %s16475_s20 = smov 11  }
   0xb   :  { %15535 = vmatprep.subr.bf16.mxu0 %v16462_v0  ;;  %v15545_v16 = vpack.c.bf16 %v303_v15, %v302_v14  ;;  %v305_v18 = vld [vmem:[%s16538_s6 + $0x58] sm:$0xff]  ;;  %v306_v20 = vld [vmem:[%s16538_s6 + $0x60] sm:$0xff]  ;;  %v307_v21 = vld [vmem:[%s16538_s6 + $0x68] sm:$0xff]  ;;  %s12713_s15 = sld [smem:[%s18388_s0 + %s16473_s12]]   ;;  %s16476_s24 = smov 13  }
   0xc   :  { %v15548_v19 = vpack.c.bf16 %v305_v18, %v304_v17  ;;  %v15551_v22 = vpack.c.bf16 %v307_v21, %v306_v20  ;;  %v308_v23 = vld [vmem:[%s16538_s6 + $0x70] sm:$0xff]  ;;  %v309_v24 = vld [vmem:[%s16538_s6 + $0x78] sm:$0xff]  ;;  %v310_v26 = vld [vmem:[%s16538_s6 + $0x80] sm:$0xff]  ;;  %s17201_s19 = sld [smem:[%s18388_s0 + %s16474_s16]]   ;;  %s16477_s28 = smov 14  }
   0xd   :  { %v15554_v25 = vpack.c.bf16 %v309_v24, %v308_v23  ;;  %v311_v27 = vld [vmem:[%s16538_s6 + $0x88] sm:$0xff]  ;;  %v312_v30 = vld [vmem:[%s16538_s6 + $0x90] sm:$0x7]  ;;  %v262_v31 = vld [vmem:[%s16543_s9] sm:$0xff]  ;;  %s17260_s23 = sld [smem:[%s18388_s0 + %s16475_s20]]   ;;  %s16478_s2 = smov 18  }
   0xe   :  { %15537 = vmatpush1.bf16.msra.mxu0 %v15536_v6  ;;  %v15557_v28 = vpack.c.bf16 %v311_v27, %v310_v26  ;;  %v265_v32 = vld [vmem:[%s16543_s9 + $0x18] sm:$0xff]  ;;  %v264_v33 = vld [vmem:[%s16543_s9 + $0x10] sm:$0xff]  ;;  %v267_v34 = vld [vmem:[%s16543_s9 + $0x28] sm:$0xff]  ;;  %s12717_s27 = sld [smem:[%s18388_s0 + %s16476_s24]]   ;;  %s16479_s6 = smov 15  }
   0xf   :  { %15538 = vmatprep.subr.bf16.mxu0 %v16462_v0  ;;  %v266_v35 = vld [vmem:[%s16543_s9 + $0x20] sm:$0xff]  ;;  %v269_v36 = vld [vmem:[%s16543_s9 + $0x38] sm:$0xff]  ;;  %v268_v37 = vld [vmem:[%s16543_s9 + $0x30] sm:$0xff]  ;;  %s17350_s1 = sld [smem:[%s18388_s0 + %s16477_s28]]   ;;  %s16481_s10 = smov 16  }
  0x10   :  { %v271_v38 = vld [vmem:[%s16543_s9 + $0x48] sm:$0xff]  ;;  %v270_v39 = vld [vmem:[%s16543_s9 + $0x40] sm:$0xff]  ;;  %v273_v40 = vld [vmem:[%s16543_s9 + $0x58] sm:$0xff]  ;;  %s12722_s5 = sld [smem:[%s18388_s0 + %s16478_s2]]   ;;  %s16482_s14 = smov 20  }
  0x11   :  { %v272_v41 = vld [vmem:[%s16543_s9 + $0x50] sm:$0xff]  ;;  %v275_v42 = vld [vmem:[%s16543_s9 + $0x68] sm:$0xff]  ;;  %v274_v43 = vld [vmem:[%s16543_s9 + $0x60] sm:$0xff]  ;;  %s16483_s18 = smov 22   ;;  %s16484_s22 = smov 21  }
  0x12   :  { %15540 = vmatpush1.bf16.msra.mxu0 %v15539_v10  ;;  %v277_v44 = vld [vmem:[%s16543_s9 + $0x78] sm:$0xff]  ;;  %v276_v45 = vld [vmem:[%s16543_s9 + $0x70] sm:$0xff]  ;;  %v279_v46 = vld [vmem:[%s16543_s9 + $0x88] sm:$0xff]  ;;  %s16485_s26 = smov 17   ;;  %s16486_s30 = smov 19  }
  0x13   :  { %15541 = vmatprep.subr.bf16.mxu0 %v16462_v0  ;;  %v278_v47 = vld [vmem:[%s16543_s9 + $0x80] sm:$0xff]  ;;  %v281_v48 = vld [vmem:[%s16543_s9 + $0x98] sm:$0xff]  ;;  %v280_v49 = vld [vmem:[%s16543_s9 + $0x90] sm:$0xff]  ;;  %s16487_s4 = smov 24   ;;  %s16488_s8 = smov 25  }
  0x14   :  { %v283_v50 = vld [vmem:[%s16543_s9 + $0xa8] sm:$0xff]  ;;  %v282_v51 = vld [vmem:[%s16543_s9 + $0xa0] sm:$0xff]  ;;  %v285_v52 = vld [vmem:[%s16543_s9 + $0xb8] sm:$0xff]  ;;  %s16489_s12 = smov 23   ;;  %s16490_s16 = smov 28  }
  0x15   :  { %v284_v53 = vld [vmem:[%s16543_s9 + $0xb0] sm:$0xff]  ;;  %v287_v54 = vld [vmem:[%s16543_s9 + $0xc8] sm:$0xff]  ;;  %v286_v55 = vld [vmem:[%s16543_s9 + $0xc0] sm:$0xff]  ;;  %s16491_s20 = smov 26   ;;  %s16492_s24 = smov 29  }
  0x16   :  { %15543 = vmatpush1.bf16.msra.mxu0 %v15542_v13  ;;  %v289_v56 = vld [vmem:[%s16543_s9 + $0xd8] sm:$0xff]  ;;  %v288_v57 = vld [vmem:[%s16543_s9 + $0xd0] sm:$0xff]  ;;  %v291_v58 = vld [vmem:[%s16543_s9 + $0xe8] sm:$0xff]  ;;  %s16493_s28 = smov 30   ;;  %s16494_s2 = smov 27  }
  0x17   :  { %15544 = vmatprep.subr.bf16.mxu0 %v16462_v0  ;;  %v290_v59 = vld [vmem:[%s16543_s9 + $0xe0] sm:$0xff]  ;;  %v293_v60 = vld [vmem:[%s16543_s9 + $0xf8] sm:$0xff]  ;;  %v292_v61 = vld [vmem:[%s16543_s9 + $0xf0] sm:$0xff]  ;;  %s12719_s9 = sld [smem:[%s18388_s0 + %s16479_s6]]   ;;  %s16495_s6 = smov 34  }
  0x1a   :  { %15546 = vmatpush1.bf16.msra.mxu0 %v15545_v16 }
  0x1b   :  { %15547 = vmatprep.subr.bf16.mxu0 %v16462_v0 }
  0x1e   :  { %15549 = vmatpush1.bf16.msra.mxu0 %v15548_v19 }
  0x1f   :  { %15550 = vmatprep.subr.bf16.mxu0 %v16462_v0 }
  0x22   :  { %15552 = vmatpush1.bf16.msra.mxu0 %v15551_v22 }
  0x23   :  { %15553 = vmatprep.subr.bf16.mxu0 %v16462_v0 }
  0x26   :  { %15555 = vmatpush1.bf16.msra.mxu0 %v15554_v25 }
  0x27   :  { %15556 = vmatprep.subr.bf16.mxu0 %v16462_v0 }
  0x2a   :  { %15558 = vmatpush1.bf16.msra.mxu0 %v15557_v28 }
  0x2b   :  { %402 = vmatprep.subr.mxu0 %v16464_v29 }
  0x2e   :  { %12769 = vmatpush1.msk.msra.mxu0 %vm362_vm1, %v312_v30 }
  0x2f   :  { %431 = vmatmul.mubr.f32.vlgmr.msra.gmra.mrb[0].mxu0 %v262_v31 }
  0x30   :  { %12771 = vmatprep.mubr.msk.f32.mxu0 %vm313_vm0, %v265_v32 }
  0x33   :  { %436 = vmatmul.mubr.f32.gmra.mrb[2].mxu0 %v264_v33 }
  0x34   :  { %12772 = vmatprep.mubr.msk.f32.mxu0 %vm313_vm0, %v267_v34 }
  0x37   :  { %441 = vmatmul.mubr.f32.gmra.mrb[4].mxu0 %v266_v35 }
  0x38   :  { %12773 = vmatprep.mubr.msk.f32.mxu0 %vm313_vm0, %v269_v36 }
  0x3b   :  { %446 = vmatmul.mubr.f32.gmra.mrb[6].mxu0 %v268_v37  ;;  %v672_v37 = vld [vmem:[%s16652_s13] sm:$0xff] }
  0x3c   :  { %12774 = vmatprep.mubr.msk.f32.mxu0 %vm313_vm0, %v271_v38  ;;  %14022 = vmatprep.mubr.f32.mxu1 %v672_v37 }
  0x3f   :  { %451 = vmatmul.mubr.f32.gmra.mrb[8].mxu0 %v270_v39 }
  0x40   :  { %12775 = vmatprep.mubr.msk.f32.mxu0 %vm313_vm0, %v273_v40 }
  0x43   :  { %456 = vmatmul.mubr.f32.gmra.mrb[10].mxu0 %v272_v41 }
  0x44   :  { %12776 = vmatprep.mubr.msk.f32.mxu0 %vm313_vm0, %v275_v42 }
  0x47   :  { %461 = vmatmul.mubr.f32.gmra.mrb[12].mxu0 %v274_v43 }
  0x48   :  { %12777 = vmatprep.mubr.msk.f32.mxu0 %vm313_vm0, %v277_v44 }
  0x4b   :  { %466 = vmatmul.mubr.f32.gmra.mrb[14].mxu0 %v276_v45 }
  0x4c   :  { %12778 = vmatprep.mubr.msk.f32.mxu0 %vm313_vm0, %v279_v46 }
  0x4f   :  { %471 = vmatmul.mubr.f32.gmra.mrb[16].mxu0 %v278_v47 }
  0x50   :  { %12779 = vmatprep.mubr.msk.f32.mxu0 %vm313_vm0, %v281_v48 }
  0x53   :  { %476 = vmatmul.mubr.f32.gmra.mrb[18].mxu0 %v280_v49 }
  0x54   :  { %12780 = vmatprep.mubr.msk.f32.mxu0 %vm313_vm0, %v283_v50 }
  0x57   :  { %481 = vmatmul.mubr.f32.gmra.mrb[20].mxu0 %v282_v51 }
  0x58   :  { %12781 = vmatprep.mubr.msk.f32.mxu0 %vm313_vm0, %v285_v52 }
  0x5b   :  { %486 = vmatmul.mubr.f32.gmra.mrb[22].mxu0 %v284_v53 }
  0x5c   :  { %12782 = vmatprep.mubr.msk.f32.mxu0 %vm313_vm0, %v287_v54 }
  0x5f   :  { %491 = vmatmul.mubr.f32.gmra.mrb[24].mxu0 %v286_v55 }
  0x60   :  { %12783 = vmatprep.mubr.msk.f32.mxu0 %vm313_vm0, %v289_v56 }
  0x63   :  { %496 = vmatmul.mubr.f32.gmra.mrb[26].mxu0 %v288_v57 }
  0x64   :  { %12784 = vmatprep.mubr.msk.f32.mxu0 %vm313_vm0, %v291_v58 }
  0x67   :  { %501 = vmatmul.mubr.f32.gmra.mrb[28].mxu0 %v290_v59 }
  0x68   :  { %12785 = vmatprep.mubr.msk.f32.mxu0 %vm313_vm0, %v293_v60 }
  0x6b   :  { %506 = vmatmul.mubr.f32.gmra.mrb[30].mxu0 %v292_v61 }
 0x102   :  { %v16621_v62 = vpop.f32.mrb[0].mxu0 }
 0x103   :  { %v434_v63 = vpop.f32.mrb[1].mxu0  ;;  %v551_v1 = vmul.f32 %v16621_v62, %v16621_v62  ;;  %v513_v3 = vsel %vm512_vm2, %v16621_v62, 0.0 }
 0x105   :  { %v567_v8 = vsel %vm512_vm2, %v551_v1, 0.0 }
 0x106   :  { %v16625_v2 = vpop.f32.mrb[2].mxu0 }
 0x107   :  { %v514_v4 = vsel %vm512_vm2, %v16625_v2, 0.0  ;;  %v552_v5 = vmul.f32 %v16625_v2, %v16625_v2  ;;  %v439_v6 = vpop.f32.mrb[3].mxu0 }
 0x108   :  { %v515_v7 = vadd.f32 %v514_v4, %v513_v3 }
 0x109   :  { %v568_v9 = vsel %vm512_vm2, %v552_v5, 0.0 }
 0x10a   :  { %v569_v10 = vadd.f32 %v568_v9, %v567_v8  ;;  %v16635_v11 = vpop.f32.mrb[4].mxu0 }
 0x10b   :  { %v516_v12 = vsel %vm512_vm2, %v16635_v11, 0.0  ;;  %v553_v13 = vmul.f32 %v16635_v11, %v16635_v11  ;;  %v444_v14 = vpop.f32.mrb[5].mxu0 }
 0x10c   :  { %v517_v15 = vadd.f32 %v516_v12, %v515_v7 }
 0x10d   :  { %v570_v16 = vsel %vm512_vm2, %v553_v13, 0.0 }
 0x10e   :  { %v571_v17 = vadd.f32 %v570_v16, %v569_v10  ;;  %v16642_v18 = vpop.f32.mrb[6].mxu0 }
 0x10f   :  { %v518_v19 = vsel %vm512_vm2, %v16642_v18, 0.0  ;;  %v554_v20 = vmul.f32 %v16642_v18, %v16642_v18  ;;  %v449_v21 = vpop.f32.mrb[7].mxu0 }
 0x110   :  { %v519_v22 = vadd.f32 %v518_v19, %v517_v15 }
 0x111   :  { %v572_v23 = vsel %vm512_vm2, %v554_v20, 0.0 }
 0x112   :  { %v573_v24 = vadd.f32 %v572_v23, %v571_v17  ;;  %v16654_v25 = vpop.f32.mrb[8].mxu0 }
 0x113   :  { %v520_v26 = vsel %vm512_vm2, %v16654_v25, 0.0  ;;  %v555_v27 = vmul.f32 %v16654_v25, %v16654_v25  ;;  %v454_v28 = vpop.f32.mrb[9].mxu0 }
 0x114   :  { %v521_v30 = vadd.f32 %v520_v26, %v519_v22 }
 0x115   :  { %v574_v31 = vsel %vm512_vm2, %v555_v27, 0.0 }
 0x116   :  { %v575_v32 = vadd.f32 %v574_v31, %v573_v24  ;;  %v16661_v33 = vpop.f32.mrb[10].mxu0 }
 0x117   :  { %v522_v34 = vsel %vm512_vm2, %v16661_v33, 0.0  ;;  %v556_v35 = vmul.f32 %v16661_v33, %v16661_v33  ;;  %v459_v36 = vpop.f32.mrb[11].mxu0 }
 0x118   :  { %v523_v38 = vadd.f32 %v522_v34, %v521_v30 }
 0x119   :  { %v576_v39 = vsel %vm512_vm2, %v556_v35, 0.0 }
 0x11a   :  { %v577_v40 = vadd.f32 %v576_v39, %v575_v32  ;;  %v16669_v41 = vpop.f32.mrb[12].mxu0 }
 0x11b   :  { %v524_v42 = vsel %vm512_vm2, %v16669_v41, 0.0  ;;  %v557_v43 = vmul.f32 %v16669_v41, %v16669_v41  ;;  %v464_v44 = vpop.f32.mrb[13].mxu0 }
 0x11c   :  { %v525_v45 = vadd.f32 %v524_v42, %v523_v38 }
 0x11d   :  { %v578_v46 = vsel %vm512_vm2, %v557_v43, 0.0 }
 0x11e   :  { %v579_v47 = vadd.f32 %v578_v46, %v577_v40  ;;  %v16676_v48 = vpop.f32.mrb[14].mxu0 }
 0x11f   :  { %v526_v49 = vsel %vm512_vm2, %v16676_v48, 0.0  ;;  %v558_v50 = vmul.f32 %v16676_v48, %v16676_v48  ;;  %v469_v51 = vpop.f32.mrb[15].mxu0 }
 0x120   :  { %v527_v52 = vadd.f32 %v526_v49, %v525_v45 }
 0x121   :  { %v580_v53 = vsel %vm512_vm2, %v558_v50, 0.0 }
 0x122   :  { %v581_v54 = vadd.f32 %v580_v53, %v579_v47  ;;  %v16683_v55 = vpop.f32.mrb[16].mxu0 }
 0x123   :  { %v528_v56 = vsel %vm512_vm2, %v16683_v55, 0.0  ;;  %v559_v57 = vmul.f32 %v16683_v55, %v16683_v55  ;;  %v474_v58 = vpop.f32.mrb[17].mxu0 }
 0x124   :  { %v529_v59 = vadd.f32 %v528_v56, %v527_v52 }
 0x125   :  { %v582_v60 = vsel %vm512_vm2, %v559_v57, 0.0 }
 0x126   :  { %v583_v61 = vadd.f32 %v582_v60, %v581_v54  ;;  %v16690_v63 = vpop.f32.mrb[18].mxu0 }
 0x127   :  { %v530_v1 = vsel %vm512_vm2, %v16690_v63, 0.0  ;;  %v560_v3 = vmul.f32 %v16690_v63, %v16690_v63  ;;  %v479_v4 = vpop.f32.mrb[19].mxu0 }
 0x128   :  { %v531_v5 = vadd.f32 %v530_v1, %v529_v59 }
 0x129   :  { %v584_v6 = vsel %vm512_vm2, %v560_v3, 0.0 }
 0x12a   :  { %v585_v7 = vadd.f32 %v584_v6, %v583_v61  ;;  %v16697_v8 = vpop.f32.mrb[20].mxu0 }
 0x12b   :  { %v532_v9 = vsel %vm512_vm2, %v16697_v8, 0.0  ;;  %v561_v10 = vmul.f32 %v16697_v8, %v16697_v8  ;;  %v484_v12 = vpop.f32.mrb[21].mxu0 }
 0x12c   :  { %v533_v13 = vadd.f32 %v532_v9, %v531_v5 }
 0x12d   :  { %v586_v14 = vsel %vm512_vm2, %v561_v10, 0.0 }
 0x12e   :  { %v587_v15 = vadd.f32 %v586_v14, %v585_v7  ;;  %v16704_v16 = vpop.f32.mrb[22].mxu0 }
 0x12f   :  { %v534_v17 = vsel %vm512_vm2, %v16704_v16, 0.0  ;;  %v562_v19 = vmul.f32 %v16704_v16, %v16704_v16  ;;  %v489_v20 = vpop.f32.mrb[23].mxu0 }
 0x130   :  { %v535_v21 = vadd.f32 %v534_v17, %v533_v13  ;;  %v611_v20 = vlaneseq }
 0x131   :  { %v588_v22 = vsel %vm512_vm2, %v562_v19, 0.0 }
 0x132   :  { %v589_v23 = vadd.f32 %v588_v22, %v587_v15  ;;  %v16711_v24 = vpop.f32.mrb[24].mxu0  ;;  %v511_v22 = vld [vmem:[%s12707_s17] sm:$0x3]  ;;  %s17492_s17 = sld [smem:[%s18388_s0 + %s16482_s14]]   ;;  %s16497_s14 = smov 32  }
 0x133   :  { %v536_v26 = vsel %vm512_vm2, %v16711_v24, 0.0  ;;  %v563_v27 = vmul.f32 %v16711_v24, %v16711_v24  ;;  %v494_v28 = vpop.f32.mrb[25].mxu0 }
 0x134   :  { %v537_v30 = vadd.f32 %v536_v26, %v535_v21  ;;  %v612_v21 = vshrl.u32 %v611_v20, 7 }
 0x135   :  { %v590_v31 = vsel %vm512_vm2, %v563_v27, 0.0 }
 0x136   :  { %v591_v32 = vadd.f32 %v590_v31, %v589_v23  ;;  %v16718_v34 = vpop.f32.mrb[26].mxu0  ;;  %v16732_v23 = vsub.s32 0, %v612_v21  ;;  %v16735_v31 = vsub.s32 1, %v612_v21 }
 0x137   :  { %v538_v35 = vsel %vm512_vm2, %v16718_v34, 0.0  ;;  %v564_v36 = vmul.f32 %v16718_v34, %v16718_v34  ;;  %v499_v37 = vpop.f32.mrb[27].mxu0 }
 0x138   :  { %v539_v38 = vadd.f32 %v538_v35, %v537_v30 }
 0x139   :  { %v592_v39 = vsel %vm512_vm2, %v564_v36, 0.0 }
 0x13a   :  { %v593_v40 = vadd.f32 %v592_v39, %v591_v32  ;;  %v502_v42 = vpop.f32.mrb[28].mxu0 }
 0x13b   :  { %v540_v43 = vsel %vm512_vm2, %v502_v42, 0.0  ;;  %v565_v44 = vmul.f32 %v502_v42, %v502_v42  ;;  %v504_v45 = vpop.f32.mrb[29].mxu0 }
 0x13c   :  { %v541_v46 = vadd.f32 %v540_v43, %v539_v38 }
 0x13d   :  { %v594_v47 = vsel %vm512_vm2, %v565_v44, 0.0 }
 0x13e   :  { %v595_v49 = vadd.f32 %v594_v47, %v593_v40  ;;  %v507_v50 = vpop.f32.mrb[30].mxu0 }
 0x13f   :  { %v542_v51 = vsel %vm512_vm2, %v507_v50, 0.0  ;;  %v566_v52 = vmul.f32 %v507_v50, %v507_v50  ;;  %v509_v53 = vpop.f32.mrb[31].mxu0 }
 0x140   :  { %v543_v54 = vadd.f32 %v542_v51, %v541_v46 }
 0x141   :  { %v596_v56 = vsel %vm512_vm2, %v566_v52, 0.0 }
 0x142   :  { %v544_v57 = vrot.slane %v543_v54, 4  ;;  %v597_v58 = vadd.f32 %v596_v56, %v595_v49 }
 0x144   :  { %v545_v59 = vadd.f32 %v544_v57, %v543_v54  ;;  %v598_v60 = vrot.slane %v597_v58, 4 }
 0x146   :  { %v546_v61 = vrot.slane %v545_v59, 2  ;;  %v599_v1 = vadd.f32 %v598_v60, %v597_v58 }
 0x148   :  { %v547_v3 = vadd.f32 %v546_v61, %v545_v59  ;;  %v600_v4 = vrot.slane %v599_v1, 2 }
 0x14a   :  { %v548_v5 = vrot.slane %v547_v3, 1  ;;  %v601_v6 = vadd.f32 %v600_v4, %v599_v1 }
 0x14c   :  { %v549_v7 = vadd.f32 %v548_v5, %v547_v3  ;;  %v602_v9 = vrot.slane %v601_v6, 1 }
 0x14e   :  { %v550_v10 = vmul.f32 0.0078125, %v549_v7  ;;  %v603_v12 = vadd.f32 %v602_v9, %v601_v6 }
 0x150   :  { %v604_v13 = vmul.f32 0.0078125, %v603_v12  ;;  %v605_v14 = vmul.f32 %v550_v10, %v550_v10 }
 0x152   :  { %v606_v15 = vsub.f32 %v604_v13, %v605_v14 }
 0x154   :  { %v607_v17 = vmax.f32 %v606_v15, 0.0 }
 0x156   :  { %v608_v19 = vadd.f32 1e-05, %v607_v17 }
 0x158   :  { %16422 = vrsqrt.f32 %v608_v19 }
 0x162   :  { %v16423_v26 = vpop.eup %16422 }
 0x163   :  { %v610_v27 = vmul.f32 %v16423_v26, %v511_v22 }
 0x165   :  { %v614_v28 = vrot.slane %v610_v27, %v16732_v23  ;;  %v631_v30 = vmul.f32 %v610_v27, %v550_v10 }
 0x167   :  { %v630_v32 = vmul.f32 %v614_v28, %v507_v50  ;;  %v633_v35 = vrot.slane %v631_v30, 7  ;;  %v615_v36 = vmul.f32 %v614_v28, %v16621_v62  ;;  %v616_v37 = vmul.f32 %v614_v28, %v16625_v2  ;;  %v673_v30 = vld [vmem:[%s16652_s13 + $0x8] sm:$0xff] }
 0x168   :  { %v617_v38 = vmul.f32 %v614_v28, %v16635_v11  ;;  %v618_v39 = vmul.f32 %v614_v28, %v16642_v18  ;;  %v619_v40 = vmul.f32 %v614_v28, %v16654_v25  ;;  %v620_v43 = vmul.f32 %v614_v28, %v16661_v33 }
 0x169   :  { %v635_v44 = vsub.f32 %v511_v22, %v633_v35  ;;  %v621_v45 = vmul.f32 %v614_v28, %v16669_v41  ;;  %v622_v46 = vmul.f32 %v614_v28, %v16676_v48  ;;  %v623_v47 = vmul.f32 %v614_v28, %v16683_v55  ;;  %v675_v35 = vld [vmem:[%s16652_s13 + $0x18] sm:$0xff] }
 0x16a   :  { %v624_v49 = vmul.f32 %v614_v28, %v16690_v63  ;;  %v625_v62 = vmul.f32 %v614_v28, %v16697_v8  ;;  %v626_v2 = vmul.f32 %v614_v28, %v16704_v16  ;;  %v627_v11 = vmul.f32 %v614_v28, %v16711_v24 }
 0x16b   :  { %v639_v18 = vrot.slane %v635_v44, %v16735_v31  ;;  %v628_v25 = vmul.f32 %v614_v28, %v16718_v34  ;;  %v629_v33 = vmul.f32 %v614_v28, %v502_v42  ;;  %v682_v44 = vld [vmem:[%s16652_s13 + $0x50] sm:$0xff] }
 0x16d   :  { %v655_v50 = vadd.f32 %v639_v18, %v630_v32  ;;  %v640_v51 = vadd.f32 %v639_v18, %v615_v36  ;;  %v641_v41 = vadd.f32 %v639_v18, %v616_v37  ;;  %v642_v52 = vadd.f32 %v639_v18, %v617_v38  ;;  %v674_v32 = vld [vmem:[%s16652_s13 + $0x10] sm:$0xff]  ;;  %v676_v36 = vld [vmem:[%s16652_s13 + $0x20] sm:$0xff]  ;;  %v677_v37 = vld [vmem:[%s16652_s13 + $0x28] sm:$0xff] }
 0x16e   :  { %v643_v48 = vadd.f32 %v639_v18, %v618_v39  ;;  %v644_v53 = vadd.f32 %v639_v18, %v619_v40  ;;  %v645_v55 = vadd.f32 %v639_v18, %v620_v43  ;;  %v646_v54 = vadd.f32 %v639_v18, %v621_v45  ;;  %v678_v38 = vld [vmem:[%s16652_s13 + $0x30] sm:$0xff]  ;;  %v679_v39 = vld [vmem:[%s16652_s13 + $0x38] sm:$0xff]  ;;  %v680_v40 = vld [vmem:[%s16652_s13 + $0x40] sm:$0xff] }
 0x16f   :  { %v656_v63 = vmax.f32 %v640_v51, 0.0  ;;  %v657_v56 = vmax.f32 %v641_v41, 0.0  ;;  %v658_v8 = vmax.f32 %v642_v52, 0.0  ;;  %v647_v57 = vadd.f32 %v639_v18, %v622_v46  ;;  %v681_v43 = vld [vmem:[%s16652_s13 + $0x48] sm:$0xff]  ;;  %v683_v45 = vld [vmem:[%s16652_s13 + $0x58] sm:$0xff]  ;;  %v684_v46 = vld [vmem:[%s16652_s13 + $0x60] sm:$0xff] }
 0x170   :  { %v659_v16 = vmax.f32 %v643_v48, 0.0  ;;  %v660_v58 = vmax.f32 %v644_v53, 0.0  ;;  %v661_v24 = vmax.f32 %v645_v55, 0.0  ;;  %v662_v59 = vmax.f32 %v646_v54, 0.0  ;;  %v694_v51 = vld [vmem:[%s16652_s13 + $0xb0] sm:$0xff]  ;;  %v695_v41 = vld [vmem:[%s16652_s13 + $0xb8] sm:$0xff] }
 0x171   :  { %v15559_v60 = vpack.c.bf16 %v657_v56, %v656_v63  ;;  %v663_v61 = vmax.f32 %v647_v57, 0.0  ;;  %v648_v34 = vadd.f32 %v639_v18, %v623_v47  ;;  %v649_v42 = vadd.f32 %v639_v18, %v624_v49  ;;  %v685_v47 = vld [vmem:[%s16652_s13 + $0x68] sm:$0xff]  ;;  %v686_v49 = vld [vmem:[%s16652_s13 + $0x70] sm:$0xff]  ;;  %v696_v52 = vld [vmem:[%s16652_s13 + $0xc0] sm:$0xff] }
 0x172   :  { %v15563_v1 = vpack.c.bf16 %v659_v16, %v658_v8  ;;  %v15567_v3 = vpack.c.bf16 %v661_v24, %v660_v58  ;;  %v650_v4 = vadd.f32 %v639_v18, %v625_v62  ;;  %v651_v5 = vadd.f32 %v639_v18, %v626_v2  ;;  %v687_v62 = vld [vmem:[%s16652_s13 + $0x78] sm:$0xff]  ;;  %v688_v2 = vld [vmem:[%s16652_s13 + $0x80] sm:$0xff]  ;;  %v697_v48 = vld [vmem:[%s16652_s13 + $0xc8] sm:$0xff] }
 0x173   :  { %15560 = vmatprep.subr.bf16.mxu1 %v15559_v60  ;;  %v15571_v6 = vpack.c.bf16 %v663_v61, %v662_v59  ;;  %v664_v7 = vmax.f32 %v648_v34, 0.0  ;;  %v665_v9 = vmax.f32 %v649_v42, 0.0  ;;  %v652_v10 = vadd.f32 %v639_v18, %v627_v11  ;;  %v689_v11 = vld [vmem:[%s16652_s13 + $0x88] sm:$0xff]  ;;  %v698_v53 = vld [vmem:[%s16652_s13 + $0xd0] sm:$0xff]  ;;  %v699_v55 = vld [vmem:[%s16652_s13 + $0xd8] sm:$0xff] }
 0x174   :  { %15562 = vmatpush3.bf16.msra.mxu1 %v15559_v60  ;;  %v666_v12 = vmax.f32 %v650_v4, 0.0  ;;  %v667_v13 = vmax.f32 %v651_v5, 0.0  ;;  %v653_v14 = vadd.f32 %v639_v18, %v628_v25  ;;  %v654_v15 = vadd.f32 %v639_v18, %v629_v33  ;;  %v690_v18 = vld [vmem:[%s16652_s13 + $0x90] sm:$0xff]  ;;  %v691_v25 = vld [vmem:[%s16652_s13 + $0x98] sm:$0xff]  ;;  %v692_v33 = vld [vmem:[%s16652_s13 + $0xa0] sm:$0xff] }
 0x175   :  { %15564 = vmatprep.subr.bf16.mxu1 %v15563_v1  ;;  %v15575_v17 = vpack.c.bf16 %v665_v9, %v664_v7  ;;  %v668_v19 = vmax.f32 %v652_v10, 0.0  ;;  %v671_v20 = vmax.f32 %v655_v50, 0.0  ;;  %v693_v50 = vld [vmem:[%s16652_s13 + $0xa8] sm:$0xff]  ;;  %v700_v54 = vld [vmem:[%s16652_s13 + $0xe0] sm:$0xff]  ;;  %v702_v56 = vld [vmem:[%s16652_s13 + $0xf0] sm:$0xff] }
 0x176   :  { %v15579_v21 = vpack.c.bf16 %v667_v13, %v666_v12  ;;  %v669_v22 = vmax.f32 %v653_v14, 0.0  ;;  %v670_v26 = vmax.f32 %v654_v15, 0.0  ;;  %v701_v63 = vld [vmem:[%s16652_s13 + $0xe8] sm:$0xff]  ;;  %v703_v8 = vld [vmem:[%s16652_s13 + $0xf8] sm:$0xff]  ;;  %v704_v57 = vld [vmem:[%s16652_s13 + $0x100] sm:$0xff] }
 0x177   :  { %v705_v16 = vld [vmem:[%s16652_s13 + $0x108] sm:$0xff]  ;;  %v706_v58 = vld [vmem:[%s16652_s13 + $0x110] sm:$0xff]  ;;  %v707_v24 = vld [vmem:[%s16652_s13 + $0x118] sm:$0xff]  ;;  %s17443_s13 = sld [smem:[%s18388_s0 + %s16481_s10]]   ;;  %s16496_s10 = smov 31  }
 0x178   :  { %15566 = vmatpush3.bf16.msra.mxu1 %v15563_v1  ;;  %v15583_v27 = vpack.c.bf16 %v669_v22, %v668_v19  ;;  %v15587_v28 = vpack.c.bf16 %v671_v20, %v670_v26  ;;  %v985_v59 = vld [vmem:[%s16790_s21] sm:$0xff] }
 0x179   :  { %15568 = vmatprep.subr.bf16.mxu1 %v15567_v3  ;;  %14084 = vmatprep.mubr.msk.f32.mxu0 %vm1021_vm3, %v985_v59 }
 0x17c   :  { %15570 = vmatpush3.bf16.msra.mxu1 %v15567_v3 }
 0x17d   :  { %15572 = vmatprep.subr.bf16.mxu1 %v15571_v6 }
 0x180   :  { %15574 = vmatpush3.bf16.msra.mxu1 %v15571_v6 }
 0x181   :  { %15576 = vmatprep.subr.bf16.mxu1 %v15575_v17 }
 0x184   :  { %15578 = vmatpush3.bf16.msra.mxu1 %v15575_v17 }
 0x185   :  { %15580 = vmatprep.subr.bf16.mxu1 %v15579_v21 }
 0x188   :  { %15582 = vmatpush3.bf16.msra.mxu1 %v15579_v21 }
 0x189   :  { %15584 = vmatprep.subr.bf16.mxu1 %v15583_v27 }
 0x18c   :  { %15586 = vmatpush3.bf16.msra.mxu1 %v15583_v27 }
 0x18d   :  { %15588 = vmatprep.subr.bf16.mxu1 %v15587_v28 }
 0x190   :  { %15590 = vmatpush3.bf16.msra.mxu1 %v15587_v28 }
 0x193   :  { %14023 = vmatmul.mubr.f32.vlgmr.msra.gmra.mrb[0].mxu1 %v673_v30 }
 0x194   :  { %14025 = vmatprep.mubr.f32.mxu1 %v674_v32 }
 0x197   :  { %14026 = vmatmul.mubr.f32.gmra.mrb[2].mxu1 %v675_v35 }
 0x198   :  { %14028 = vmatprep.mubr.f32.mxu1 %v676_v36 }
 0x19b   :  { %14029 = vmatmul.mubr.f32.gmra.mrb[4].mxu1 %v677_v37 }
 0x19c   :  { %14031 = vmatprep.mubr.f32.mxu1 %v678_v38 }
 0x19f   :  { %14032 = vmatmul.mubr.f32.gmra.mrb[6].mxu1 %v679_v39 }
 0x1a0   :  { %14034 = vmatprep.mubr.f32.mxu1 %v680_v40 }
 0x1a3   :  { %14035 = vmatmul.mubr.f32.gmra.mrb[8].mxu1 %v681_v43 }
 0x1a4   :  { %14037 = vmatprep.mubr.f32.mxu1 %v682_v44 }
 0x1a7   :  { %14038 = vmatmul.mubr.f32.gmra.mrb[10].mxu1 %v683_v45 }
 0x1a8   :  { %14040 = vmatprep.mubr.f32.mxu1 %v684_v46 }
 0x1ab   :  { %14041 = vmatmul.mubr.f32.gmra.mrb[12].mxu1 %v685_v47 }
 0x1ac   :  { %14043 = vmatprep.mubr.f32.mxu1 %v686_v49 }
 0x1af   :  { %14044 = vmatmul.mubr.f32.gmra.mrb[14].mxu1 %v687_v62 }
 0x1b0   :  { %14046 = vmatprep.mubr.f32.mxu1 %v688_v2 }
 0x1b3   :  { %14047 = vmatmul.mubr.f32.gmra.mrb[16].mxu1 %v689_v11 }
 0x1b4   :  { %14049 = vmatprep.mubr.f32.mxu1 %v690_v18 }
 0x1b7   :  { %14050 = vmatmul.mubr.f32.gmra.mrb[18].mxu1 %v691_v25 }
 0x1b8   :  { %14052 = vmatprep.mubr.f32.mxu1 %v692_v33 }
 0x1bb   :  { %14053 = vmatmul.mubr.f32.gmra.mrb[20].mxu1 %v693_v50 }
 0x1bc   :  { %14055 = vmatprep.mubr.f32.mxu1 %v694_v51 }
 0x1bf   :  { %14056 = vmatmul.mubr.f32.gmra.mrb[22].mxu1 %v695_v41 }
 0x1c0   :  { %14058 = vmatprep.mubr.f32.mxu1 %v696_v52 }
 0x1c3   :  { %14059 = vmatmul.mubr.f32.gmra.mrb[24].mxu1 %v697_v48 }
 0x1c4   :  { %14061 = vmatprep.mubr.f32.mxu1 %v698_v53 }
 0x1c7   :  { %14062 = vmatmul.mubr.f32.gmra.mrb[26].mxu1 %v699_v55 }
 0x1c8   :  { %14064 = vmatprep.mubr.f32.mxu1 %v700_v54 }
 0x1cb   :  { %14065 = vmatmul.mubr.f32.gmra.mrb[28].mxu1 %v701_v63 }
 0x1cc   :  { %14067 = vmatprep.mubr.f32.mxu1 %v702_v56 }
 0x1cf   :  { %14068 = vmatmul.mubr.f32.gmra.mrb[30].mxu1 %v703_v8 }
 0x1d0   :  { %14070 = vmatprep.mubr.f32.mxu1 %v704_v57 }
 0x1d3   :  { %14071 = vmatmul.mubr.f32.gmra.mrb[32].mxu1 %v705_v16 }
 0x1d4   :  { %14073 = vmatprep.mubr.f32.mxu1 %v706_v58 }
 0x1d7   :  { %14074 = vmatmul.mubr.f32.gmra.mrb[34].mxu1 %v707_v24 }
 0x266   :  { %v14024_v60 = vpop.f32.mrb[0].mxu1 }
 0x267   :  { %v774_v61 = vpop.f32.mrb[1].mxu1 }
 0x26a   :  { %v14027_v34 = vpop.f32.mrb[2].mxu1 }
 0x26b   :  { %v784_v42 = vpop.f32.mrb[3].mxu1 }
 0x26e   :  { %v14030_v1 = vpop.f32.mrb[4].mxu1 }
 0x26f   :  { %v954_v3 = vmax.f32 %v14024_v60, %v14030_v1  ;;  %v794_v4 = vpop.f32.mrb[5].mxu1 }
 0x270   :  { %v953_v5 = vmax.f32 %v774_v61, %v794_v4 }
 0x272   :  { %v14033_v6 = vpop.f32.mrb[6].mxu1 }
 0x273   :  { %v956_v7 = vmax.f32 %v14027_v34, %v14033_v6  ;;  %v804_v9 = vpop.f32.mrb[7].mxu1 }
 0x274   :  { %v955_v10 = vmax.f32 %v784_v42, %v804_v9  ;;  %v986_v9 = vld [vmem:[%s16790_s21 + $0x8] sm:$0xff] }
 0x276   :  { %v14036_v12 = vpop.f32.mrb[8].mxu1 }
 0x277   :  { %v958_v13 = vmax.f32 %v954_v3, %v14036_v12  ;;  %v814_v14 = vpop.f32.mrb[9].mxu1  ;;  %v988_v12 = vld [vmem:[%s16790_s21 + $0x18] sm:$0xff] }
 0x278   :  { %v957_v15 = vmax.f32 %v953_v5, %v814_v14  ;;  %v990_v14 = vld [vmem:[%s16790_s21 + $0x28] sm:$0xff] }
 0x27a   :  { %v14039_v17 = vpop.f32.mrb[10].mxu1 }
 0x27b   :  { %v960_v19 = vmax.f32 %v956_v7, %v14039_v17  ;;  %v824_v20 = vpop.f32.mrb[11].mxu1  ;;  %v992_v17 = vld [vmem:[%s16790_s21 + $0x38] sm:$0xff] }
 0x27c   :  { %v959_v21 = vmax.f32 %v955_v10, %v824_v20  ;;  %v987_v10 = vld [vmem:[%s16790_s21 + $0x10] sm:$0xff]  ;;  %v994_v20 = vld [vmem:[%s16790_s21 + $0x48] sm:$0xff] }
 0x27e   :  { %v14042_v22 = vpop.f32.mrb[12].mxu1 }
 0x27f   :  { %v962_v26 = vmax.f32 %v958_v13, %v14042_v22  ;;  %v834_v27 = vpop.f32.mrb[13].mxu1  ;;  %v989_v13 = vld [vmem:[%s16790_s21 + $0x20] sm:$0xff]  ;;  %v996_v22 = vld [vmem:[%s16790_s21 + $0x58] sm:$0xff] }
 0x280   :  { %v961_v28 = vmax.f32 %v957_v15, %v834_v27  ;;  %v991_v15 = vld [vmem:[%s16790_s21 + $0x30] sm:$0xff]  ;;  %v998_v27 = vld [vmem:[%s16790_s21 + $0x68] sm:$0xff] }
 0x282   :  { %v14045_v30 = vpop.f32.mrb[14].mxu1 }
 0x283   :  { %v964_v32 = vmax.f32 %v960_v19, %v14045_v30  ;;  %v844_v35 = vpop.f32.mrb[15].mxu1  ;;  %v993_v19 = vld [vmem:[%s16790_s21 + $0x40] sm:$0xff]  ;;  %v1000_v30 = vld [vmem:[%s16790_s21 + $0x78] sm:$0xff] }
 0x284   :  { %v963_v36 = vmax.f32 %v959_v21, %v844_v35  ;;  %v995_v21 = vld [vmem:[%s16790_s21 + $0x50] sm:$0xff]  ;;  %v1002_v35 = vld [vmem:[%s16790_s21 + $0x88] sm:$0xff] }
 0x286   :  { %v14048_v37 = vpop.f32.mrb[16].mxu1 }
 0x287   :  { %v966_v38 = vmax.f32 %v962_v26, %v14048_v37  ;;  %v854_v39 = vpop.f32.mrb[17].mxu1  ;;  %v997_v26 = vld [vmem:[%s16790_s21 + $0x60] sm:$0xff]  ;;  %v1004_v37 = vld [vmem:[%s16790_s21 + $0x98] sm:$0xff] }
 0x288   :  { %v965_v40 = vmax.f32 %v961_v28, %v854_v39  ;;  %v999_v28 = vld [vmem:[%s16790_s21 + $0x70] sm:$0xff]  ;;  %v1006_v39 = vld [vmem:[%s16790_s21 + $0xa8] sm:$0xff] }
 0x28a   :  { %v14051_v43 = vpop.f32.mrb[18].mxu1 }
 0x28b   :  { %v968_v44 = vmax.f32 %v964_v32, %v14051_v43  ;;  %v864_v45 = vpop.f32.mrb[19].mxu1  ;;  %v1001_v32 = vld [vmem:[%s16790_s21 + $0x80] sm:$0xff]  ;;  %v1008_v43 = vld [vmem:[%s16790_s21 + $0xb8] sm:$0xff] }
 0x28c   :  { %v967_v46 = vmax.f32 %v963_v36, %v864_v45  ;;  %v1003_v36 = vld [vmem:[%s16790_s21 + $0x90] sm:$0xff]  ;;  %v1010_v45 = vld [vmem:[%s16790_s21 + $0xc8] sm:$0xff] }
 0x28e   :  { %v14054_v47 = vpop.f32.mrb[20].mxu1 }
 0x28f   :  { %v970_v49 = vmax.f32 %v966_v38, %v14054_v47  ;;  %v874_v62 = vpop.f32.mrb[21].mxu1  ;;  %v1005_v38 = vld [vmem:[%s16790_s21 + $0xa0] sm:$0xff]  ;;  %v1012_v47 = vld [vmem:[%s16790_s21 + $0xd8] sm:$0xff] }
 0x290   :  { %v969_v2 = vmax.f32 %v965_v40, %v874_v62  ;;  %v1007_v40 = vld [vmem:[%s16790_s21 + $0xb0] sm:$0xff]  ;;  %v1014_v62 = vld [vmem:[%s16790_s21 + $0xe8] sm:$0xff] }
 0x292   :  { %v14057_v11 = vpop.f32.mrb[22].mxu1 }
 0x293   :  { %v972_v18 = vmax.f32 %v968_v44, %v14057_v11  ;;  %v884_v25 = vpop.f32.mrb[23].mxu1  ;;  %v1009_v44 = vld [vmem:[%s16790_s21 + $0xc0] sm:$0xff]  ;;  %v1016_v11 = vld [vmem:[%s16790_s21 + $0xf8] sm:$0xff] }
 0x294   :  { %v971_v33 = vmax.f32 %v967_v46, %v884_v25  ;;  %v1011_v46 = vld [vmem:[%s16790_s21 + $0xd0] sm:$0xff]  ;;  %v1018_v25 = vld [vmem:[%s16790_s21 + $0x108] sm:$0xff] }
 0x296   :  { %v14060_v50 = vpop.f32.mrb[24].mxu1 }
 0x297   :  { %v974_v51 = vmax.f32 %v970_v49, %v14060_v50  ;;  %v894_v41 = vpop.f32.mrb[25].mxu1  ;;  %v1013_v49 = vld [vmem:[%s16790_s21 + $0xe0] sm:$0xff]  ;;  %v1020_v50 = vld [vmem:[%s16790_s21 + $0x118] sm:$0xff] }
 0x298   :  { %v973_v52 = vmax.f32 %v969_v2, %v894_v41  ;;  %v1015_v2 = vld [vmem:[%s16790_s21 + $0xf0] sm:$0xff]  ;;  %v1378_v41 = vld [vmem:[%s16879_s25 + $0x18] sm:$0xff] }
 0x29a   :  { %v14063_v48 = vpop.f32.mrb[26].mxu1 }
 0x29b   :  { %v976_v53 = vmax.f32 %v972_v18, %v14063_v48  ;;  %v904_v55 = vpop.f32.mrb[27].mxu1  ;;  %v1017_v18 = vld [vmem:[%s16790_s21 + $0x100] sm:$0xff] }
 0x29c   :  { %v975_v54 = vmax.f32 %v971_v33, %v904_v55  ;;  %v1019_v33 = vld [vmem:[%s16790_s21 + $0x110] sm:$0xff]  ;;  %v1375_v48 = vld [vmem:[%s16879_s25] sm:$0xff]  ;;  %s17551_s21 = sld [smem:[%s18388_s0 + %s16483_s18]]   ;;  %s16498_s18 = smov 36  }
 0x29e   :  { %v14066_v63 = vpop.f32.mrb[28].mxu1 }
 0x29f   :  { %v978_v56 = vmax.f32 %v974_v51, %v14066_v63  ;;  %v914_v8 = vpop.f32.mrb[29].mxu1  ;;  %v1377_v51 = vld [vmem:[%s16879_s25 + $0x10] sm:$0xff] }
 0x2a0   :  { %v977_v57 = vmax.f32 %v973_v52, %v914_v8  ;;  %v15599_v52 = vpack.c.bf16 %v1378_v41, %v1377_v51 }
 0x2a2   :  { %v14069_v16 = vpop.f32.mrb[30].mxu1  ;;  %15600 = vmatprep.subr.bf16.mxu1 %v15599_v52 }
 0x2a3   :  { %v980_v58 = vmax.f32 %v976_v53, %v14069_v16  ;;  %v924_v24 = vpop.f32.mrb[31].mxu1  ;;  %15602 = vmatpush3.bf16.msra.mxu1 %v15599_v52  ;;  %v1376_v53 = vld [vmem:[%s16879_s25 + $0x8] sm:$0xff] }
 0x2a4   :  { %v979_v59 = vmax.f32 %v975_v54, %v924_v24  ;;  %v15603_v55 = vpack.c.bf16 %v1376_v53, %v1375_v48  ;;  %v1574_v16 = vld [vmem:[%s16879_s25 + $0x28] sm:$0xff] }
 0x2a6   :  { %v14072_v60 = vpop.f32.mrb[32].mxu1  ;;  %15604 = vmatprep.subr.bf16.mxu1 %v15603_v55 }
 0x2a7   :  { %v16794_v61 = vmax.f32 %v978_v56, %v14072_v60  ;;  %v934_v34 = vpop.f32.mrb[33].mxu1 }
 0x2a8   :  { %v16796_v42 = vmax.f32 %v977_v57, %v934_v34  ;;  %v1573_v57 = vld [vmem:[%s16879_s25 + $0x20] sm:$0xff] }
 0x2aa   :  { %v15591_v1 = vpack.c.bf16 %v16794_v61, %v16796_v42  ;;  %v14075_v3 = vpop.f32.mrb[34].mxu1 }
 0x2ab   :  { %v16800_v4 = vmax.f32 %v980_v58, %v14075_v3  ;;  %v944_v5 = vpop.f32.mrb[35].mxu1  ;;  %v1677_v3 = vld [vmem:[%s16879_s25 + $0x38] sm:$0xff] }
 0x2ac   :  { %v16802_v6 = vmax.f32 %v979_v59, %v944_v5  ;;  %15592 = vmatprep.subr.bf16.mxu0 %v15591_v1  ;;  %v15607_v59 = vpack.c.bf16 %v1574_v16, %v1573_v57 }
 0x2ad   :  { %15594 = vmatpush3.bf16.msra.mxu0 %v15591_v1  ;;  %v1676_v1 = vld [vmem:[%s16879_s25 + $0x30] sm:$0xff] }
 0x2ae   :  { %v15595_v7 = vpack.c.bf16 %v16800_v4, %v16802_v6 }
 0x2b0   :  { %15596 = vmatprep.subr.bf16.mxu0 %v15595_v7 }
 0x2b1   :  { %15598 = vmatpush3.bf16.msra.mxu0 %v15595_v7 }
 0x2b4   :  { %14085 = vmatmul.mubr.msk.f32.vlgmr.msra.gmra.mrb[32].mxu0 %vm1021_vm3, %v986_v9  ;;  %v15611_v9 = vpack.c.bf16 %v1677_v3, %v1676_v1 }
 0x2b5   :  { %14087 = vmatprep.mubr.msk.f32.mxu0 %vm1021_vm3, %v987_v10 }
 0x2b8   :  { %14088 = vmatmul.mubr.msk.f32.gmra.mrb[34].mxu0 %vm1021_vm3, %v988_v12 }
 0x2b9   :  { %14090 = vmatprep.mubr.msk.f32.mxu0 %vm1021_vm3, %v989_v13  ;;  %v1779_v13 = vld [vmem:[%s16879_s25 + $0x40] sm:$0xff] }
 0x2bc   :  { %14091 = vmatmul.mubr.msk.f32.gmra.mrb[36].mxu0 %vm1021_vm3, %v990_v14  ;;  %v1780_v14 = vld [vmem:[%s16879_s25 + $0x48] sm:$0xff] }
 0x2bd   :  { %14093 = vmatprep.mubr.msk.f32.mxu0 %vm1021_vm3, %v991_v15 }
 0x2c0   :  { %14094 = vmatmul.mubr.msk.f32.gmra.mrb[38].mxu0 %vm1021_vm3, %v992_v17 }
 0x2c1   :  { %14096 = vmatprep.mubr.msk.f32.mxu0 %vm1021_vm3, %v993_v19  ;;  %v15615_v19 = vpack.c.bf16 %v1780_v14, %v1779_v13 }
 0x2c4   :  { %14097 = vmatmul.mubr.msk.f32.gmra.mrb[40].mxu0 %vm1021_vm3, %v994_v20 }
 0x2c5   :  { %14099 = vmatprep.mubr.msk.f32.mxu0 %vm1021_vm3, %v995_v21 }
 0x2c8   :  { %14100 = vmatmul.mubr.msk.f32.gmra.mrb[42].mxu0 %vm1021_vm3, %v996_v22  ;;  %v1882_v22 = vld [vmem:[%s16879_s25 + $0x50] sm:$0xff] }
 0x2c9   :  { %14102 = vmatprep.mubr.msk.f32.mxu0 %vm1021_vm3, %v997_v26  ;;  %v1883_v26 = vld [vmem:[%s16879_s25 + $0x58] sm:$0xff] }
 0x2cc   :  { %14103 = vmatmul.mubr.msk.f32.gmra.mrb[44].mxu0 %vm1021_vm3, %v998_v27 }
 0x2cd   :  { %14105 = vmatprep.mubr.msk.f32.mxu0 %vm1021_vm3, %v999_v28 }
 0x2d0   :  { %14106 = vmatmul.mubr.msk.f32.gmra.mrb[46].mxu0 %vm1021_vm3, %v1000_v30  ;;  %v15619_v30 = vpack.c.bf16 %v1883_v26, %v1882_v22 }
 0x2d1   :  { %14108 = vmatprep.mubr.msk.f32.mxu0 %vm1021_vm3, %v1001_v32 }
 0x2d4   :  { %14109 = vmatmul.mubr.msk.f32.gmra.mrb[48].mxu0 %vm1021_vm3, %v1002_v35 }
 0x2d5   :  { %14111 = vmatprep.mubr.msk.f32.mxu0 %vm1021_vm3, %v1003_v36  ;;  %v1985_v36 = vld [vmem:[%s16879_s25 + $0x60] sm:$0xff] }
 0x2d8   :  { %14112 = vmatmul.mubr.msk.f32.gmra.mrb[50].mxu0 %vm1021_vm3, %v1004_v37  ;;  %v1986_v37 = vld [vmem:[%s16879_s25 + $0x68] sm:$0xff] }
 0x2d9   :  { %14114 = vmatprep.mubr.msk.f32.mxu0 %vm1021_vm3, %v1005_v38 }
 0x2dc   :  { %14115 = vmatmul.mubr.msk.f32.gmra.mrb[52].mxu0 %vm1021_vm3, %v1006_v39 }
 0x2dd   :  { %14117 = vmatprep.mubr.msk.f32.mxu0 %vm1021_vm3, %v1007_v40  ;;  %v15623_v40 = vpack.c.bf16 %v1986_v37, %v1985_v36 }
 0x2e0   :  { %14118 = vmatmul.mubr.msk.f32.gmra.mrb[54].mxu0 %vm1021_vm3, %v1008_v43 }
 0x2e1   :  { %14120 = vmatprep.mubr.msk.f32.mxu0 %vm1021_vm3, %v1009_v44 }
 0x2e4   :  { %14121 = vmatmul.mubr.msk.f32.gmra.mrb[56].mxu0 %vm1021_vm3, %v1010_v45  ;;  %v2088_v45 = vld [vmem:[%s16879_s25 + $0x70] sm:$0xff] }
 0x2e5   :  { %14123 = vmatprep.mubr.msk.f32.mxu0 %vm1021_vm3, %v1011_v46  ;;  %v2089_v46 = vld [vmem:[%s16879_s25 + $0x78] sm:$0xff] }
 0x2e8   :  { %14124 = vmatmul.mubr.msk.f32.gmra.mrb[58].mxu0 %vm1021_vm3, %v1012_v47 }
 0x2e9   :  { %14126 = vmatprep.mubr.msk.f32.mxu0 %vm1021_vm3, %v1013_v49 }
 0x2ec   :  { %14127 = vmatmul.mubr.msk.f32.gmra.mrb[60].mxu0 %vm1021_vm3, %v1014_v62  ;;  %v15627_v62 = vpack.c.bf16 %v2089_v46, %v2088_v45 }
 0x2ed   :  { %14129 = vmatprep.mubr.msk.f32.mxu0 %vm1021_vm3, %v1015_v2 }
 0x2f0   :  { %14130 = vmatmul.mubr.msk.f32.gmra.mrb[62].mxu0 %vm1021_vm3, %v1016_v11 }
 0x2f1   :  { %14132 = vmatprep.mubr.msk.f32.mxu0 %vm1021_vm3, %v1017_v18  ;;  %v2191_v18 = vld [vmem:[%s16879_s25 + $0x80] sm:$0xff] }
 0x2f4   :  { %14133 = vmatmul.mubr.msk.f32.gmra.mrb[64].mxu0 %vm1021_vm3, %v1018_v25  ;;  %v2192_v25 = vld [vmem:[%s16879_s25 + $0x88] sm:$0xff]  ;;  %s12725_s25 = sld [smem:[%s18388_s0 + %s16484_s22]]   ;;  %s16499_s22 = smov 35  }
 0x2f5   :  { %14135 = vmatprep.mubr.msk.f32.mxu0 %vm1021_vm3, %v1019_v33  ;;  %v15631_v51 = vpack.c.bf16 %v2192_v25, %v2191_v18 }
 0x2f8   :  { %14136 = vmatmul.mubr.msk.f32.gmra.mrb[66].mxu0 %vm1021_vm3, %v1020_v50 }
 0x387   :  { %v14086_v54 = vpop.f32.mrb[32].mxu0 }
 0x388   :  { %v1196_v63 = vpop.f32.mrb[33].mxu0 }
 0x38b   :  { %v14089_v56 = vpop.f32.mrb[34].mxu0 }
 0x38c   :  { %v1206_v8 = vpop.f32.mrb[35].mxu0 }
 0x38f   :  { %v14092_v58 = vpop.f32.mrb[36].mxu0 }
 0x390   :  { %v1216_v24 = vpop.f32.mrb[37].mxu0 }
 0x391   :  { %14142 = vmatprep.mubr.msk.f32.mxu1 %vm512_vm2, %v1216_v24 }
 0x392   :  { %14143 = vmatmul.mubr.msk.f32.vlgmr.msra.gmra.mrb[36].mxu1 %vm512_vm2, %v14092_v58 }
 0x393   :  { %v14095_v60 = vpop.f32.mrb[38].mxu0  ;;  %15606 = vmatpush3.bf16.msra.mxu1 %v15603_v55 }
 0x394   :  { %v1226_v34 = vpop.f32.mrb[39].mxu0  ;;  %15608 = vmatprep.subr.bf16.mxu1 %v15607_v59 }
 0x395   :  { %14145 = vmatprep.mubr.msk.f32.mxu1 %vm512_vm2, %v1226_v34 }
 0x396   :  { %14146 = vmatmul.mubr.msk.f32.gmra.mrb[38].mxu1 %vm512_vm2, %v14095_v60 }
 0x397   :  { %14152 = vmatprep.mubr.msk.f32.mxu1 %vm512_vm2, %v1196_v63  ;;  %v14098_v5 = vpop.f32.mrb[40].mxu0  ;;  %v2358_v63 = vld [vmem:[%s16938_s29] sm:$0xff] }
 0x398   :  { %v1236_v7 = vpop.f32.mrb[41].mxu0  ;;  %14236 = vmatprep.mubr.msk.f32.mxu0 %vm1021_vm3, %v2358_v63 }
 0x39a   :  { %14153 = vmatmul.mubr.msk.f32.vlgmr.msra.gmra.mrb[36].mxu1 %vm512_vm2, %v14086_v54 }
 0x39b   :  { %14155 = vmatprep.mubr.msk.f32.mxu1 %vm512_vm2, %v1206_v8  ;;  %15610 = vmatpush3.bf16.msra.mxu1 %v15607_v59  ;;  %v14101_v10 = vpop.f32.mrb[42].mxu0 }
 0x39c   :  { %v1246_v12 = vpop.f32.mrb[43].mxu0  ;;  %15612 = vmatprep.subr.bf16.mxu1 %v15611_v9 }
 0x39e   :  { %14156 = vmatmul.mubr.msk.f32.gmra.mrb[38].mxu1 %vm512_vm2, %v14089_v56 }
 0x39f   :  { %14162 = vmatprep.mubr.msk.f32.mxu1 %vm512_vm2, %v1236_v7  ;;  %v14104_v15 = vpop.f32.mrb[44].mxu0 }
 0x3a0   :  { %v1256_v17 = vpop.f32.mrb[45].mxu0 }
 0x3a2   :  { %14163 = vmatmul.mubr.msk.f32.vlgmr.msra.gmra.mrb[36].mxu1 %vm512_vm2, %v14098_v5 }
 0x3a3   :  { %14165 = vmatprep.mubr.msk.f32.mxu1 %vm512_vm2, %v1246_v12  ;;  %15614 = vmatpush3.bf16.msra.mxu1 %v15611_v9  ;;  %v14107_v20 = vpop.f32.mrb[46].mxu0 }
 0x3a4   :  { %v1266_v21 = vpop.f32.mrb[47].mxu0  ;;  %15616 = vmatprep.subr.bf16.mxu1 %v15615_v19 }
 0x3a6   :  { %14166 = vmatmul.mubr.msk.f32.gmra.mrb[38].mxu1 %vm512_vm2, %v14101_v10 }
 0x3a7   :  { %14172 = vmatprep.mubr.msk.f32.mxu1 %vm512_vm2, %v1256_v17  ;;  %v14110_v27 = vpop.f32.mrb[48].mxu0 }
 0x3a8   :  { %v1276_v28 = vpop.f32.mrb[49].mxu0 }
 0x3aa   :  { %14173 = vmatmul.mubr.msk.f32.vlgmr.msra.gmra.mrb[36].mxu1 %vm512_vm2, %v14104_v15 }
 0x3ab   :  { %14175 = vmatprep.mubr.msk.f32.mxu1 %vm512_vm2, %v1266_v21  ;;  %15618 = vmatpush3.bf16.msra.mxu1 %v15615_v19  ;;  %v14113_v32 = vpop.f32.mrb[50].mxu0 }
 0x3ac   :  { %v1286_v35 = vpop.f32.mrb[51].mxu0  ;;  %15620 = vmatprep.subr.bf16.mxu1 %v15619_v30 }
 0x3ae   :  { %14176 = vmatmul.mubr.msk.f32.gmra.mrb[38].mxu1 %vm512_vm2, %v14107_v20 }
 0x3af   :  { %14182 = vmatprep.mubr.msk.f32.mxu1 %vm512_vm2, %v1276_v28  ;;  %v14116_v38 = vpop.f32.mrb[52].mxu0 }
 0x3b0   :  { %v1296_v39 = vpop.f32.mrb[53].mxu0 }
 0x3b2   :  { %14183 = vmatmul.mubr.msk.f32.vlgmr.msra.gmra.mrb[36].mxu1 %vm512_vm2, %v14110_v27 }
 0x3b3   :  { %14185 = vmatprep.mubr.msk.f32.mxu1 %vm512_vm2, %v1286_v35  ;;  %15622 = vmatpush3.bf16.msra.mxu1 %v15619_v30  ;;  %v14119_v43 = vpop.f32.mrb[54].mxu0 }
 0x3b4   :  { %v1306_v44 = vpop.f32.mrb[55].mxu0  ;;  %15624 = vmatprep.subr.bf16.mxu1 %v15623_v40 }
 0x3b6   :  { %14186 = vmatmul.mubr.msk.f32.gmra.mrb[38].mxu1 %vm512_vm2, %v14113_v32 }
 0x3b7   :  { %14192 = vmatprep.mubr.msk.f32.mxu1 %vm512_vm2, %v1296_v39  ;;  %v14122_v47 = vpop.f32.mrb[56].mxu0 }
 0x3b8   :  { %v1316_v49 = vpop.f32.mrb[57].mxu0 }
 0x3ba   :  { %14193 = vmatmul.mubr.msk.f32.vlgmr.msra.gmra.mrb[36].mxu1 %vm512_vm2, %v14116_v38 }
 0x3bb   :  { %14195 = vmatprep.mubr.msk.f32.mxu1 %vm512_vm2, %v1306_v44  ;;  %15626 = vmatpush3.bf16.msra.mxu1 %v15623_v40  ;;  %v14125_v2 = vpop.f32.mrb[58].mxu0 }
 0x3bc   :  { %v1326_v11 = vpop.f32.mrb[59].mxu0  ;;  %15628 = vmatprep.subr.bf16.mxu1 %v15627_v62 }
 0x3be   :  { %14196 = vmatmul.mubr.msk.f32.gmra.mrb[38].mxu1 %vm512_vm2, %v14119_v43 }
 0x3bf   :  { %14202 = vmatprep.mubr.msk.f32.mxu1 %vm512_vm2, %v1316_v49  ;;  %v14128_v33 = vpop.f32.mrb[60].mxu0  ;;  %v2294_v49 = vld [vmem:[%s12711_s3] sm:$0x3]  ;;  %s12723_s3 = sld [smem:[%s18388_s0 + %s16486_s30]]   ;;  %s16501_s30 = smov 37  }
 0x3c0   :  { %v1336_v50 = vpop.f32.mrb[61].mxu0 }
 0x3c2   :  { %14203 = vmatmul.mubr.msk.f32.vlgmr.msra.gmra.mrb[36].mxu1 %vm512_vm2, %v14122_v47 }
 0x3c3   :  { %14205 = vmatprep.mubr.msk.f32.mxu1 %vm512_vm2, %v1326_v11  ;;  %15630 = vmatpush3.bf16.msra.mxu1 %v15627_v62  ;;  %v14131_v41 = vpop.f32.mrb[62].mxu0 }
 0x3c4   :  { %v1346_v52 = vpop.f32.mrb[63].mxu0  ;;  %15632 = vmatprep.subr.bf16.mxu1 %v15631_v51 }
 0x3c6   :  { %14206 = vmatmul.mubr.msk.f32.gmra.mrb[38].mxu1 %vm512_vm2, %v14125_v2 }
 0x3c7   :  { %14212 = vmatprep.mubr.msk.f32.mxu1 %vm512_vm2, %v1336_v50  ;;  %v14134_v48 = vpop.f32.mrb[64].mxu0 }
 0x3c8   :  { %v1356_v53 = vpop.f32.mrb[65].mxu0 }
 0x3ca   :  { %14213 = vmatmul.mubr.msk.f32.vlgmr.msra.gmra.mrb[36].mxu1 %vm512_vm2, %v14128_v33 }
 0x3cb   :  { %14215 = vmatprep.mubr.msk.f32.mxu1 %vm512_vm2, %v1346_v52  ;;  %15634 = vmatpush3.bf16.msra.mxu1 %v15631_v51  ;;  %v14137_v55 = vpop.f32.mrb[66].mxu0 }
 0x3cc   :  { %v1366_v54 = vpop.f32.mrb[67].mxu0 }
 0x3ce   :  { %14216 = vmatmul.mubr.msk.f32.gmra.mrb[38].mxu1 %vm512_vm2, %v14131_v41 }
 0x3cf   :  { %14222 = vmatprep.mubr.msk.f32.mxu1 %vm512_vm2, %v1356_v53 }
 0x3d2   :  { %14223 = vmatmul.mubr.msk.f32.vlgmr.msra.gmra.mrb[36].mxu1 %vm512_vm2, %v14134_v48 }
 0x3d3   :  { %14225 = vmatprep.mubr.msk.f32.mxu1 %vm512_vm2, %v1366_v54 }
 0x3d6   :  { %14226 = vmatmul.mubr.msk.f32.gmra.mrb[38].mxu1 %vm512_vm2, %v14137_v55 }
 0x4a5   :  { %v14224_v56 = vpop.f32.mrb[36].mxu1 }
 0x4a6   :  { %v2296_v8 = vsel %vm512_vm2, %v14224_v56, 0.0  ;;  %v2310_v57 = vmul.f32 %v14224_v56, %v14224_v56  ;;  %v2271_v16 = vpop.f32.mrb[37].mxu1 }
 0x4a7   :  { %v2295_v58 = vsel %vm512_vm2, %v2271_v16, 0.0  ;;  %v2309_v24 = vmul.f32 %v2271_v16, %v2271_v16 }
 0x4a8   :  { %v2314_v59 = vsel %vm512_vm2, %v2310_v57, 0.0  ;;  %v2297_v60 = vadd.f32 %v2296_v8, %v2295_v58 }
 0x4a9   :  { %v2313_v34 = vsel %vm512_vm2, %v2309_v24, 0.0  ;;  %v14227_v1 = vpop.f32.mrb[38].mxu1 }
 0x4aa   :  { %v2315_v3 = vadd.f32 %v2314_v59, %v2313_v34  ;;  %v2281_v5 = vpop.f32.mrb[39].mxu1  ;;  %v2312_v7 = vmul.f32 %v14227_v1, %v14227_v1  ;;  %v2300_v13 = vsel %vm512_vm2, %v14227_v1, 0.0  ;;  %v2359_v59 = vld [vmem:[%s16938_s29 + $0x8] sm:$0xff]  ;;  %v2361_v34 = vld [vmem:[%s16938_s29 + $0x18] sm:$0xff] }
 0x4ab   :  { %v2298_v9 = vsel %vm512_vm2, %v2281_v5, 0.0  ;;  %v2311_v10 = vmul.f32 %v2281_v5, %v2281_v5 }
 0x4ac   :  { %v2299_v12 = vadd.f32 %v2298_v9, %v2297_v60  ;;  %v2318_v19 = vsel %vm512_vm2, %v2312_v7, 0.0  ;;  %v2360_v60 = vld [vmem:[%s16938_s29 + $0x10] sm:$0xff]  ;;  %v2365_v7 = vld [vmem:[%s16938_s29 + $0x38] sm:$0xff]  ;;  %v2366_v9 = vld [vmem:[%s16938_s29 + $0x40] sm:$0xff] }
 0x4ad   :  { %v2316_v14 = vsel %vm512_vm2, %v2311_v10, 0.0  ;;  %v2367_v10 = vld [vmem:[%s16938_s29 + $0x48] sm:$0xff] }
 0x4ae   :  { %v2301_v15 = vadd.f32 %v2300_v13, %v2299_v12  ;;  %v2317_v17 = vadd.f32 %v2316_v14, %v2315_v3  ;;  %v2363_v3 = vld [vmem:[%s16938_s29 + $0x28] sm:$0xff]  ;;  %v2368_v12 = vld [vmem:[%s16938_s29 + $0x50] sm:$0xff]  ;;  %v2369_v13 = vld [vmem:[%s16938_s29 + $0x58] sm:$0xff] }
 0x4af   :  { %v2370_v14 = vld [vmem:[%s16938_s29 + $0x60] sm:$0xff] }
 0x4b0   :  { %v2302_v20 = vrot.slane %v2301_v15, 4  ;;  %v2319_v21 = vadd.f32 %v2318_v19, %v2317_v17  ;;  %v2372_v17 = vld [vmem:[%s16938_s29 + $0x70] sm:$0xff]  ;;  %v2373_v19 = vld [vmem:[%s16938_s29 + $0x78] sm:$0xff] }
 0x4b2   :  { %v2303_v22 = vadd.f32 %v2302_v20, %v2301_v15  ;;  %v2320_v26 = vrot.slane %v2319_v21, 4  ;;  %v2371_v15 = vld [vmem:[%s16938_s29 + $0x68] sm:$0xff]  ;;  %v2374_v20 = vld [vmem:[%s16938_s29 + $0x80] sm:$0xff] }
 0x4b4   :  { %v2304_v27 = vrot.slane %v2303_v22, 2  ;;  %v2321_v28 = vadd.f32 %v2320_v26, %v2319_v21  ;;  %v2375_v21 = vld [vmem:[%s16938_s29 + $0x88] sm:$0xff]  ;;  %v2377_v26 = vld [vmem:[%s16938_s29 + $0x98] sm:$0xff] }
 0x4b6   :  { %v2305_v30 = vadd.f32 %v2304_v27, %v2303_v22  ;;  %v2322_v32 = vrot.slane %v2321_v28, 2  ;;  %v2376_v22 = vld [vmem:[%s16938_s29 + $0x90] sm:$0xff]  ;;  %v2378_v27 = vld [vmem:[%s16938_s29 + $0xa0] sm:$0xff] }
 0x4b8   :  { %v2306_v35 = vrot.slane %v2305_v30, 1  ;;  %v2323_v36 = vadd.f32 %v2322_v32, %v2321_v28  ;;  %v2379_v28 = vld [vmem:[%s16938_s29 + $0xa8] sm:$0xff]  ;;  %v2381_v32 = vld [vmem:[%s16938_s29 + $0xb8] sm:$0xff] }
 0x4ba   :  { %v2307_v37 = vadd.f32 %v2306_v35, %v2305_v30  ;;  %v2324_v38 = vrot.slane %v2323_v36, 1  ;;  %v2380_v30 = vld [vmem:[%s16938_s29 + $0xb0] sm:$0xff]  ;;  %v2382_v35 = vld [vmem:[%s16938_s29 + $0xc0] sm:$0xff] }
 0x4bc   :  { %v2308_v39 = vmul.f32 0.03125, %v2307_v37  ;;  %v2325_v40 = vadd.f32 %v2324_v38, %v2323_v36  ;;  %v2383_v36 = vld [vmem:[%s16938_s29 + $0xc8] sm:$0xff]  ;;  %v2384_v37 = vld [vmem:[%s16938_s29 + $0xd0] sm:$0xff]  ;;  %v2385_v38 = vld [vmem:[%s16938_s29 + $0xd8] sm:$0xff] }
 0x4be   :  { %v2326_v43 = vmul.f32 0.03125, %v2325_v40  ;;  %v2327_v44 = vmul.f32 %v2308_v39, %v2308_v39  ;;  %v2387_v40 = vld [vmem:[%s16938_s29 + $0xe8] sm:$0xff] }
 0x4c0   :  { %v2328_v45 = vsub.f32 %v2326_v43, %v2327_v44  ;;  %v2388_v43 = vld [vmem:[%s16938_s29 + $0xf0] sm:$0xff]  ;;  %v2389_v44 = vld [vmem:[%s16938_s29 + $0xf8] sm:$0xff] }
 0x4c2   :  { %v2329_v46 = vmax.f32 %v2328_v45, 0.0  ;;  %v2390_v45 = vld [vmem:[%s16938_s29 + $0x100] sm:$0xff] }
 0x4c4   :  { %v2330_v47 = vadd.f32 1e-05, %v2329_v46  ;;  %v2391_v46 = vld [vmem:[%s16938_s29 + $0x108] sm:$0xff] }
 0x4c6   :  { %16424 = vrsqrt.f32 %v2330_v47  ;;  %v2392_v47 = vld [vmem:[%s16938_s29 + $0x110] sm:$0xff] }
 0x4d0   :  { %v16425_v62 = vpop.eup %16424 }
 0x4d1   :  { %v2332_v2 = vmul.f32 %v16425_v62, %v2294_v49  ;;  %v2749_v62 = vld [vmem:[%s17028_s7 + $0x10] sm:$0xff] }
 0x4d3   :  { %v2336_v11 = vrot.slane %v2332_v2, %v16732_v23  ;;  %v2341_v18 = vmul.f32 %v2332_v2, %v2308_v39  ;;  %v2386_v39 = vld [vmem:[%s16938_s29 + $0xe0] sm:$0xff]  ;;  %v2750_v2 = vld [vmem:[%s17028_s7 + $0x18] sm:$0xff] }
 0x4d5   :  { %v2339_v25 = vmul.f32 %v2336_v11, %v2281_v5  ;;  %v2343_v33 = vrot.slane %v2341_v18, 7  ;;  %v2337_v50 = vmul.f32 %v2336_v11, %v2271_v16  ;;  %v2338_v51 = vmul.f32 %v14224_v56, %v2336_v11  ;;  %v2364_v5 = vld [vmem:[%s16938_s29 + $0x30] sm:$0xff]  ;;  %v2747_v18 = vld [vmem:[%s17028_s7] sm:$0xff] }
 0x4d6   :  { %v2340_v41 = vmul.f32 %v14227_v1, %v2336_v11  ;;  %v2362_v1 = vld [vmem:[%s16938_s29 + $0x20] sm:$0xff]  ;;  %v15643_v11 = vpack.c.bf16 %v2750_v2, %v2749_v62 }
 0x4d7   :  { %v2345_v52 = vsub.f32 %v2294_v49, %v2343_v33  ;;  %v2393_v49 = vld [vmem:[%s16938_s29 + $0x118] sm:$0xff]  ;;  %s17565_s29 = sld [smem:[%s18388_s0 + %s16485_s26]]   ;;  %s16500_s26 = smov 40  }
 0x4d8   :  { %15644 = vmatprep.subr.bf16.mxu1 %v15643_v11 }
 0x4d9   :  { %v2349_v48 = vrot.slane %v2345_v52, %v16735_v31  ;;  %15646 = vmatpush3.bf16.msra.mxu1 %v15643_v11 }
 0x4db   :  { %v2352_v53 = vadd.f32 %v2349_v48, %v2339_v25  ;;  %v2350_v55 = vadd.f32 %v2349_v48, %v2337_v50  ;;  %v2351_v54 = vadd.f32 %v2349_v48, %v2338_v51  ;;  %v2353_v63 = vadd.f32 %v2349_v48, %v2340_v41  ;;  %v2748_v25 = vld [vmem:[%s17028_s7 + $0x8] sm:$0xff]  ;;  %v2945_v48 = vld [vmem:[%s17028_s7 + $0x20] sm:$0xff] }
 0x4dc   :  { %v15647_v33 = vpack.c.bf16 %v2748_v25, %v2747_v18 }
 0x4dd   :  { %v2354_v8 = vmax.f32 %v2350_v55, 0.0  ;;  %v2355_v57 = vmax.f32 %v2351_v54, 0.0  ;;  %v2356_v58 = vmax.f32 %v2352_v53, 0.0  ;;  %v2357_v24 = vmax.f32 %v2353_v63, 0.0  ;;  %v2946_v53 = vld [vmem:[%s17028_s7 + $0x28] sm:$0xff] }
 0x4de   :  { %15648 = vmatprep.subr.bf16.mxu1 %v15647_v33  ;;  %v15651_v63 = vpack.c.bf16 %v2946_v53, %v2945_v48 }
 0x4df   :  { %v15635_v16 = vpack.c.bf16 %v2355_v57, %v2354_v8  ;;  %v15639_v56 = vpack.c.bf16 %v2357_v24, %v2356_v58  ;;  %v3048_v58 = vld [vmem:[%s17028_s7 + $0x30] sm:$0xff]  ;;  %v3049_v24 = vld [vmem:[%s17028_s7 + $0x38] sm:$0xff] }
 0x4e1   :  { %15636 = vmatprep.subr.bf16.mxu0 %v15635_v16 }
 0x4e2   :  { %15638 = vmatpush3.bf16.msra.mxu0 %v15635_v16 }
 0x4e3   :  { %15640 = vmatprep.subr.bf16.mxu0 %v15639_v56 }
 0x4e6   :  { %15642 = vmatpush3.bf16.msra.mxu0 %v15639_v56 }
 0x4e9   :  { %14237 = vmatmul.mubr.msk.f32.vlgmr.msra.gmra.mrb[68].mxu0 %vm1021_vm3, %v2359_v59  ;;  %v15655_v59 = vpack.c.bf16 %v3049_v24, %v3048_v58 }
 0x4ea   :  { %14239 = vmatprep.mubr.msk.f32.mxu0 %vm1021_vm3, %v2360_v60 }
 0x4ed   :  { %14240 = vmatmul.mubr.msk.f32.gmra.mrb[70].mxu0 %vm1021_vm3, %v2361_v34 }
 0x4ee   :  { %14242 = vmatprep.mubr.msk.f32.mxu0 %vm1021_vm3, %v2362_v1  ;;  %v3151_v1 = vld [vmem:[%s17028_s7 + $0x40] sm:$0xff] }
 0x4f1   :  { %14243 = vmatmul.mubr.msk.f32.gmra.mrb[72].mxu0 %vm1021_vm3, %v2363_v3  ;;  %v3152_v3 = vld [vmem:[%s17028_s7 + $0x48] sm:$0xff] }
 0x4f2   :  { %14245 = vmatprep.mubr.msk.f32.mxu0 %vm1021_vm3, %v2364_v5 }
 0x4f5   :  { %14246 = vmatmul.mubr.msk.f32.gmra.mrb[74].mxu0 %vm1021_vm3, %v2365_v7 }
 0x4f6   :  { %14248 = vmatprep.mubr.msk.f32.mxu0 %vm1021_vm3, %v2366_v9  ;;  %v15659_v9 = vpack.c.bf16 %v3152_v3, %v3151_v1 }
 0x4f9   :  { %14249 = vmatmul.mubr.msk.f32.gmra.mrb[76].mxu0 %vm1021_vm3, %v2367_v10 }
 0x4fa   :  { %14251 = vmatprep.mubr.msk.f32.mxu0 %vm1021_vm3, %v2368_v12 }
 0x4fd   :  { %14252 = vmatmul.mubr.msk.f32.gmra.mrb[78].mxu0 %vm1021_vm3, %v2369_v13  ;;  %v3254_v13 = vld [vmem:[%s17028_s7 + $0x50] sm:$0xff] }
 0x4fe   :  { %14254 = vmatprep.mubr.msk.f32.mxu0 %vm1021_vm3, %v2370_v14  ;;  %v3255_v14 = vld [vmem:[%s17028_s7 + $0x58] sm:$0xff] }
 0x501   :  { %14255 = vmatmul.mubr.msk.f32.gmra.mrb[80].mxu0 %vm1021_vm3, %v2371_v15 }
 0x502   :  { %14257 = vmatprep.mubr.msk.f32.mxu0 %vm1021_vm3, %v2372_v17 }
 0x505   :  { %14258 = vmatmul.mubr.msk.f32.gmra.mrb[82].mxu0 %vm1021_vm3, %v2373_v19  ;;  %v15663_v19 = vpack.c.bf16 %v3255_v14, %v3254_v13 }
 0x506   :  { %14260 = vmatprep.mubr.msk.f32.mxu0 %vm1021_vm3, %v2374_v20 }
 0x509   :  { %14261 = vmatmul.mubr.msk.f32.gmra.mrb[84].mxu0 %vm1021_vm3, %v2375_v21 }
 0x50a   :  { %14263 = vmatprep.mubr.msk.f32.mxu0 %vm1021_vm3, %v2376_v22  ;;  %v3357_v22 = vld [vmem:[%s17028_s7 + $0x60] sm:$0xff] }
 0x50d   :  { %14264 = vmatmul.mubr.msk.f32.gmra.mrb[86].mxu0 %vm1021_vm3, %v2377_v26  ;;  %v3358_v26 = vld [vmem:[%s17028_s7 + $0x68] sm:$0xff] }
 0x50e   :  { %14266 = vmatprep.mubr.msk.f32.mxu0 %vm1021_vm3, %v2378_v27 }
 0x511   :  { %14267 = vmatmul.mubr.msk.f32.gmra.mrb[88].mxu0 %vm1021_vm3, %v2379_v28 }
 0x512   :  { %14269 = vmatprep.mubr.msk.f32.mxu0 %vm1021_vm3, %v2380_v30  ;;  %v15667_v30 = vpack.c.bf16 %v3358_v26, %v3357_v22 }
 0x515   :  { %14270 = vmatmul.mubr.msk.f32.gmra.mrb[90].mxu0 %vm1021_vm3, %v2381_v32 }
 0x516   :  { %14272 = vmatprep.mubr.msk.f32.mxu0 %vm1021_vm3, %v2382_v35 }
 0x519   :  { %14273 = vmatmul.mubr.msk.f32.gmra.mrb[92].mxu0 %vm1021_vm3, %v2383_v36  ;;  %v3460_v36 = vld [vmem:[%s17028_s7 + $0x70] sm:$0xff] }
 0x51a   :  { %14275 = vmatprep.mubr.msk.f32.mxu0 %vm1021_vm3, %v2384_v37  ;;  %v3461_v37 = vld [vmem:[%s17028_s7 + $0x78] sm:$0xff] }
 0x51d   :  { %14276 = vmatmul.mubr.msk.f32.gmra.mrb[94].mxu0 %vm1021_vm3, %v2385_v38 }
 0x51e   :  { %14278 = vmatprep.mubr.msk.f32.mxu0 %vm1021_vm3, %v2386_v39 }
 0x521   :  { %14279 = vmatmul.mubr.msk.f32.gmra.mrb[96].mxu0 %vm1021_vm3, %v2387_v40  ;;  %v15671_v40 = vpack.c.bf16 %v3461_v37, %v3460_v36 }
 0x522   :  { %14281 = vmatprep.mubr.msk.f32.mxu0 %vm1021_vm3, %v2388_v43 }
 0x525   :  { %14282 = vmatmul.mubr.msk.f32.gmra.mrb[98].mxu0 %vm1021_vm3, %v2389_v44 }
 0x526   :  { %14284 = vmatprep.mubr.msk.f32.mxu0 %vm1021_vm3, %v2390_v45  ;;  %v3563_v45 = vld [vmem:[%s17028_s7 + $0x80] sm:$0xff] }
 0x529   :  { %14285 = vmatmul.mubr.msk.f32.gmra.mrb[100].mxu0 %vm1021_vm3, %v2391_v46  ;;  %v3564_v46 = vld [vmem:[%s17028_s7 + $0x88] sm:$0xff]  ;;  %s12728_s7 = sld [smem:[%s18388_s0 + %s16487_s4]]   ;;  %s16502_s4 = smov 38  }
 0x52a   :  { %14287 = vmatprep.mubr.msk.f32.mxu0 %vm1021_vm3, %v2392_v47  ;;  %v15675_v62 = vpack.c.bf16 %v3564_v46, %v3563_v45 }
 0x52d   :  { %14288 = vmatmul.mubr.msk.f32.gmra.mrb[102].mxu0 %vm1021_vm3, %v2393_v49 }
 0x5bc   :  { %v14238_v50 = vpop.f32.mrb[68].mxu0 }
 0x5bd   :  { %v2568_v51 = vpop.f32.mrb[69].mxu0 }
 0x5c0   :  { %v14241_v41 = vpop.f32.mrb[70].mxu0 }
 0x5c1   :  { %v2578_v52 = vpop.f32.mrb[71].mxu0 }
 0x5c4   :  { %v14244_v55 = vpop.f32.mrb[72].mxu0 }
 0x5c5   :  { %v2588_v54 = vpop.f32.mrb[73].mxu0 }
 0x5c6   :  { %14294 = vmatprep.mubr.msk.f32.mxu1 %vm512_vm2, %v2588_v54 }
 0x5c7   :  { %14295 = vmatmul.mubr.msk.f32.vlgmr.msra.gmra.mrb[40].mxu1 %vm512_vm2, %v14244_v55 }
 0x5c8   :  { %v14247_v8 = vpop.f32.mrb[74].mxu0  ;;  %15650 = vmatpush3.bf16.msra.mxu1 %v15647_v33 }
 0x5c9   :  { %v2598_v57 = vpop.f32.mrb[75].mxu0  ;;  %15652 = vmatprep.subr.bf16.mxu1 %v15651_v63 }
 0x5ca   :  { %14297 = vmatprep.mubr.msk.f32.mxu1 %vm512_vm2, %v2598_v57 }
 0x5cb   :  { %14298 = vmatmul.mubr.msk.f32.gmra.mrb[42].mxu1 %vm512_vm2, %v14247_v8 }
 0x5cc   :  { %14304 = vmatprep.mubr.msk.f32.mxu1 %vm512_vm2, %v2568_v51  ;;  %v14250_v16 = vpop.f32.mrb[76].mxu0  ;;  %v3734_v51 = vld [vmem:[%s17087_s11] sm:$0xff] }
 0x5cd   :  { %v2608_v56 = vpop.f32.mrb[77].mxu0  ;;  %14388 = vmatprep.mubr.msk.f32.mxu0 %vm1021_vm3, %v3734_v51 }
 0x5cf   :  { %14305 = vmatmul.mubr.msk.f32.vlgmr.msra.gmra.mrb[40].mxu1 %vm512_vm2, %v14238_v50 }
 0x5d0   :  { %14307 = vmatprep.mubr.msk.f32.mxu1 %vm512_vm2, %v2578_v52  ;;  %15654 = vmatpush3.bf16.msra.mxu1 %v15651_v63  ;;  %v14253_v60 = vpop.f32.mrb[78].mxu0 }
 0x5d1   :  { %v2618_v34 = vpop.f32.mrb[79].mxu0  ;;  %15656 = vmatprep.subr.bf16.mxu1 %v15655_v59 }
 0x5d3   :  { %14308 = vmatmul.mubr.msk.f32.gmra.mrb[42].mxu1 %vm512_vm2, %v14241_v41 }
 0x5d4   :  { %14314 = vmatprep.mubr.msk.f32.mxu1 %vm512_vm2, %v2608_v56  ;;  %v14256_v5 = vpop.f32.mrb[80].mxu0 }
 0x5d5   :  { %v2628_v7 = vpop.f32.mrb[81].mxu0 }
 0x5d7   :  { %14315 = vmatmul.mubr.msk.f32.vlgmr.msra.gmra.mrb[40].mxu1 %vm512_vm2, %v14250_v16 }
 0x5d8   :  { %14317 = vmatprep.mubr.msk.f32.mxu1 %vm512_vm2, %v2618_v34  ;;  %15658 = vmatpush3.bf16.msra.mxu1 %v15655_v59  ;;  %v14259_v10 = vpop.f32.mrb[82].mxu0 }
 0x5d9   :  { %v2638_v12 = vpop.f32.mrb[83].mxu0  ;;  %15660 = vmatprep.subr.bf16.mxu1 %v15659_v9 }
 0x5db   :  { %14318 = vmatmul.mubr.msk.f32.gmra.mrb[42].mxu1 %vm512_vm2, %v14253_v60 }
 0x5dc   :  { %14324 = vmatprep.mubr.msk.f32.mxu1 %vm512_vm2, %v2628_v7  ;;  %v14262_v15 = vpop.f32.mrb[84].mxu0 }
 0x5dd   :  { %v2648_v17 = vpop.f32.mrb[85].mxu0 }
 0x5df   :  { %14325 = vmatmul.mubr.msk.f32.vlgmr.msra.gmra.mrb[40].mxu1 %vm512_vm2, %v14256_v5 }
 0x5e0   :  { %14327 = vmatprep.mubr.msk.f32.mxu1 %vm512_vm2, %v2638_v12  ;;  %15662 = vmatpush3.bf16.msra.mxu1 %v15659_v9  ;;  %v14265_v20 = vpop.f32.mrb[86].mxu0 }
 0x5e1   :  { %v2658_v21 = vpop.f32.mrb[87].mxu0  ;;  %15664 = vmatprep.subr.bf16.mxu1 %v15663_v19 }
 0x5e3   :  { %14328 = vmatmul.mubr.msk.f32.gmra.mrb[42].mxu1 %vm512_vm2, %v14259_v10 }
 0x5e4   :  { %14334 = vmatprep.mubr.msk.f32.mxu1 %vm512_vm2, %v2648_v17  ;;  %v14268_v27 = vpop.f32.mrb[88].mxu0 }
 0x5e5   :  { %v2668_v28 = vpop.f32.mrb[89].mxu0 }
 0x5e7   :  { %14335 = vmatmul.mubr.msk.f32.vlgmr.msra.gmra.mrb[40].mxu1 %vm512_vm2, %v14262_v15 }
 0x5e8   :  { %14337 = vmatprep.mubr.msk.f32.mxu1 %vm512_vm2, %v2658_v21  ;;  %15666 = vmatpush3.bf16.msra.mxu1 %v15663_v19  ;;  %v14271_v32 = vpop.f32.mrb[90].mxu0 }
 0x5e9   :  { %v2678_v35 = vpop.f32.mrb[91].mxu0  ;;  %15668 = vmatprep.subr.bf16.mxu1 %v15667_v30 }
 0x5eb   :  { %14338 = vmatmul.mubr.msk.f32.gmra.mrb[42].mxu1 %vm512_vm2, %v14265_v20 }
 0x5ec   :  { %14344 = vmatprep.mubr.msk.f32.mxu1 %vm512_vm2, %v2668_v28  ;;  %v14274_v38 = vpop.f32.mrb[92].mxu0 }
 0x5ed   :  { %v2688_v39 = vpop.f32.mrb[93].mxu0 }
 0x5ef   :  { %14345 = vmatmul.mubr.msk.f32.vlgmr.msra.gmra.mrb[40].mxu1 %vm512_vm2, %v14268_v27 }
 0x5f0   :  { %14347 = vmatprep.mubr.msk.f32.mxu1 %vm512_vm2, %v2678_v35  ;;  %15670 = vmatpush3.bf16.msra.mxu1 %v15667_v30  ;;  %v14277_v43 = vpop.f32.mrb[94].mxu0 }
 0x5f1   :  { %v2698_v44 = vpop.f32.mrb[95].mxu0  ;;  %15672 = vmatprep.subr.bf16.mxu1 %v15671_v40 }
 0x5f3   :  { %14348 = vmatmul.mubr.msk.f32.gmra.mrb[42].mxu1 %vm512_vm2, %v14271_v32 }
 0x5f4   :  { %14354 = vmatprep.mubr.msk.f32.mxu1 %vm512_vm2, %v2688_v39  ;;  %v14280_v47 = vpop.f32.mrb[96].mxu0  ;;  %v3666_v39 = vld [vmem:[%s12713_s15] sm:$0x3]  ;;  %s12727_s15 = sld [smem:[%s18388_s0 + %s16489_s12]]   ;;  %s16504_s12 = smov 44  }
 0x5f5   :  { %v2708_v49 = vpop.f32.mrb[97].mxu0 }
 0x5f7   :  { %14355 = vmatmul.mubr.msk.f32.vlgmr.msra.gmra.mrb[40].mxu1 %vm512_vm2, %v14274_v38 }
 0x5f8   :  { %14357 = vmatprep.mubr.msk.f32.mxu1 %vm512_vm2, %v2698_v44  ;;  %15674 = vmatpush3.bf16.msra.mxu1 %v15671_v40  ;;  %v14283_v2 = vpop.f32.mrb[98].mxu0 }
 0x5f9   :  { %v2718_v11 = vpop.f32.mrb[99].mxu0  ;;  %15676 = vmatprep.subr.bf16.mxu1 %v15675_v62 }
 0x5fb   :  { %14358 = vmatmul.mubr.msk.f32.gmra.mrb[42].mxu1 %vm512_vm2, %v14277_v43 }
 0x5fc   :  { %14364 = vmatprep.mubr.msk.f32.mxu1 %vm512_vm2, %v2708_v49  ;;  %v14286_v18 = vpop.f32.mrb[100].mxu0 }
 0x5fd   :  { %v2728_v25 = vpop.f32.mrb[101].mxu0 }
 0x5ff   :  { %14365 = vmatmul.mubr.msk.f32.vlgmr.msra.gmra.mrb[40].mxu1 %vm512_vm2, %v14280_v47 }
 0x600   :  { %14367 = vmatprep.mubr.msk.f32.mxu1 %vm512_vm2, %v2718_v11  ;;  %15678 = vmatpush3.bf16.msra.mxu1 %v15675_v62  ;;  %v14289_v33 = vpop.f32.mrb[102].mxu0 }
 0x601   :  { %v2738_v50 = vpop.f32.mrb[103].mxu0 }
 0x603   :  { %14368 = vmatmul.mubr.msk.f32.gmra.mrb[42].mxu1 %vm512_vm2, %v14283_v2 }
 0x604   :  { %14374 = vmatprep.mubr.msk.f32.mxu1 %vm512_vm2, %v2728_v25 }
 0x607   :  { %14375 = vmatmul.mubr.msk.f32.vlgmr.msra.gmra.mrb[40].mxu1 %vm512_vm2, %v14286_v18 }
 0x608   :  { %14377 = vmatprep.mubr.msk.f32.mxu1 %vm512_vm2, %v2738_v50 }
 0x60b   :  { %14378 = vmatmul.mubr.msk.f32.gmra.mrb[42].mxu1 %vm512_vm2, %v14289_v33 }
 0x6da   :  { %v14376_v41 = vpop.f32.mrb[40].mxu1 }
 0x6db   :  { %v3668_v52 = vsel %vm512_vm2, %v14376_v41, 0.0  ;;  %v3682_v48 = vmul.f32 %v14376_v41, %v14376_v41  ;;  %v3643_v53 = vpop.f32.mrb[41].mxu1 }
 0x6dc   :  { %v3667_v55 = vsel %vm512_vm2, %v3643_v53, 0.0  ;;  %v3681_v54 = vmul.f32 %v3643_v53, %v3643_v53 }
 0x6dd   :  { %v3686_v63 = vsel %vm512_vm2, %v3682_v48, 0.0  ;;  %v3669_v8 = vadd.f32 %v3668_v52, %v3667_v55 }
 0x6de   :  { %v3685_v57 = vsel %vm512_vm2, %v3681_v54, 0.0  ;;  %v14379_v58 = vpop.f32.mrb[42].mxu1 }
 0x6df   :  { %v3687_v24 = vadd.f32 %v3686_v63, %v3685_v57  ;;  %v3653_v16 = vpop.f32.mrb[43].mxu1  ;;  %v3684_v56 = vmul.f32 %v14379_v58, %v14379_v58  ;;  %v3672_v1 = vsel %vm512_vm2, %v14379_v58, 0.0  ;;  %v3737_v57 = vld [vmem:[%s17087_s11 + $0x18] sm:$0xff] }
 0x6e0   :  { %v3670_v59 = vsel %vm512_vm2, %v3653_v16, 0.0  ;;  %v3683_v60 = vmul.f32 %v3653_v16, %v3653_v16 }
 0x6e1   :  { %v3671_v34 = vadd.f32 %v3670_v59, %v3669_v8  ;;  %v3690_v9 = vsel %vm512_vm2, %v3684_v56, 0.0  ;;  %v3736_v8 = vld [vmem:[%s17087_s11 + $0x10] sm:$0xff]  ;;  %v3741_v56 = vld [vmem:[%s17087_s11 + $0x38] sm:$0xff]  ;;  %v3742_v59 = vld [vmem:[%s17087_s11 + $0x40] sm:$0xff] }
 0x6e2   :  { %v3688_v3 = vsel %vm512_vm2, %v3683_v60, 0.0  ;;  %v3743_v60 = vld [vmem:[%s17087_s11 + $0x48] sm:$0xff] }
 0x6e3   :  { %v3673_v5 = vadd.f32 %v3672_v1, %v3671_v34  ;;  %v3689_v7 = vadd.f32 %v3688_v3, %v3687_v24  ;;  %v3739_v24 = vld [vmem:[%s17087_s11 + $0x28] sm:$0xff]  ;;  %v3744_v34 = vld [vmem:[%s17087_s11 + $0x50] sm:$0xff]  ;;  %v3745_v1 = vld [vmem:[%s17087_s11 + $0x58] sm:$0xff] }
 0x6e4   :  { %v3746_v3 = vld [vmem:[%s17087_s11 + $0x60] sm:$0xff] }
 0x6e5   :  { %v3674_v10 = vrot.slane %v3673_v5, 4  ;;  %v3691_v12 = vadd.f32 %v3690_v9, %v3689_v7  ;;  %v3748_v7 = vld [vmem:[%s17087_s11 + $0x70] sm:$0xff]  ;;  %v3749_v9 = vld [vmem:[%s17087_s11 + $0x78] sm:$0xff] }
 0x6e7   :  { %v3675_v13 = vadd.f32 %v3674_v10, %v3673_v5  ;;  %v3692_v14 = vrot.slane %v3691_v12, 4  ;;  %v3747_v5 = vld [vmem:[%s17087_s11 + $0x68] sm:$0xff]  ;;  %v3750_v10 = vld [vmem:[%s17087_s11 + $0x80] sm:$0xff] }
 0x6e9   :  { %v3676_v15 = vrot.slane %v3675_v13, 2  ;;  %v3693_v17 = vadd.f32 %v3692_v14, %v3691_v12  ;;  %v3751_v12 = vld [vmem:[%s17087_s11 + $0x88] sm:$0xff]  ;;  %v3753_v14 = vld [vmem:[%s17087_s11 + $0x98] sm:$0xff] }
 0x6eb   :  { %v3677_v19 = vadd.f32 %v3676_v15, %v3675_v13  ;;  %v3694_v20 = vrot.slane %v3693_v17, 2  ;;  %v3752_v13 = vld [vmem:[%s17087_s11 + $0x90] sm:$0xff]  ;;  %v3754_v15 = vld [vmem:[%s17087_s11 + $0xa0] sm:$0xff] }
 0x6ed   :  { %v3678_v21 = vrot.slane %v3677_v19, 1  ;;  %v3695_v22 = vadd.f32 %v3694_v20, %v3693_v17  ;;  %v3755_v17 = vld [vmem:[%s17087_s11 + $0xa8] sm:$0xff]  ;;  %v3757_v20 = vld [vmem:[%s17087_s11 + $0xb8] sm:$0xff] }
 0x6ef   :  { %v3679_v26 = vadd.f32 %v3678_v21, %v3677_v19  ;;  %v3696_v27 = vrot.slane %v3695_v22, 1  ;;  %v3756_v19 = vld [vmem:[%s17087_s11 + $0xb0] sm:$0xff]  ;;  %v3758_v21 = vld [vmem:[%s17087_s11 + $0xc0] sm:$0xff] }
 0x6f1   :  { %v3680_v28 = vmul.f32 0.03125, %v3679_v26  ;;  %v3697_v30 = vadd.f32 %v3696_v27, %v3695_v22  ;;  %v3759_v22 = vld [vmem:[%s17087_s11 + $0xc8] sm:$0xff]  ;;  %v3760_v26 = vld [vmem:[%s17087_s11 + $0xd0] sm:$0xff]  ;;  %v3761_v27 = vld [vmem:[%s17087_s11 + $0xd8] sm:$0xff] }
 0x6f3   :  { %v3698_v32 = vmul.f32 0.03125, %v3697_v30  ;;  %v3699_v35 = vmul.f32 %v3680_v28, %v3680_v28  ;;  %v3763_v30 = vld [vmem:[%s17087_s11 + $0xe8] sm:$0xff] }
 0x6f5   :  { %v3700_v36 = vsub.f32 %v3698_v32, %v3699_v35  ;;  %v3764_v32 = vld [vmem:[%s17087_s11 + $0xf0] sm:$0xff]  ;;  %v3765_v35 = vld [vmem:[%s17087_s11 + $0xf8] sm:$0xff] }
 0x6f7   :  { %v3701_v37 = vmax.f32 %v3700_v36, 0.0  ;;  %v3766_v36 = vld [vmem:[%s17087_s11 + $0x100] sm:$0xff] }
 0x6f9   :  { %v3702_v38 = vadd.f32 1e-05, %v3701_v37  ;;  %v3767_v37 = vld [vmem:[%s17087_s11 + $0x108] sm:$0xff] }
 0x6fb   :  { %16426 = vrsqrt.f32 %v3702_v38  ;;  %v3768_v38 = vld [vmem:[%s17087_s11 + $0x110] sm:$0xff] }
 0x705   :  { %v16427_v40 = vpop.eup %16426 }
 0x706   :  { %v3704_v43 = vmul.f32 %v16427_v40, %v3666_v39  ;;  %v4125_v40 = vld [vmem:[%s17201_s19 + $0x10] sm:$0xff] }
 0x708   :  { %v3708_v44 = vrot.slane %v3704_v43, %v16732_v23  ;;  %v3713_v45 = vmul.f32 %v3704_v43, %v3680_v28  ;;  %v3762_v28 = vld [vmem:[%s17087_s11 + $0xe0] sm:$0xff]  ;;  %v4126_v43 = vld [vmem:[%s17201_s19 + $0x18] sm:$0xff] }
 0x70a   :  { %v3711_v46 = vmul.f32 %v3708_v44, %v3653_v16  ;;  %v3715_v47 = vrot.slane %v3713_v45, 7  ;;  %v3709_v49 = vmul.f32 %v3708_v44, %v3643_v53  ;;  %v3710_v62 = vmul.f32 %v14376_v41, %v3708_v44  ;;  %v3740_v16 = vld [vmem:[%s17087_s11 + $0x30] sm:$0xff]  ;;  %v4123_v45 = vld [vmem:[%s17201_s19] sm:$0xff] }
 0x70b   :  { %v3712_v2 = vmul.f32 %v14379_v58, %v3708_v44  ;;  %v3738_v58 = vld [vmem:[%s17087_s11 + $0x20] sm:$0xff]  ;;  %v15687_v44 = vpack.c.bf16 %v4126_v43, %v4125_v40  ;;  %v4940_v43 = vld [vmem:[%s17201_s19 + $0x88] sm:$0xff] }
 0x70c   :  { %v3717_v11 = vsub.f32 %v3666_v39, %v3715_v47  ;;  %v3769_v39 = vld [vmem:[%s17087_s11 + $0x118] sm:$0xff]  ;;  %v4939_v40 = vld [vmem:[%s17201_s19 + $0x80] sm:$0xff] }
 0x70d   :  { %15688 = vmatprep.subr.bf16.mxu1 %v15687_v44 }
 0x70e   :  { %v3721_v18 = vrot.slane %v3717_v11, %v16735_v31  ;;  %15690 = vmatpush3.bf16.msra.mxu1 %v15687_v44 }
 0x710   :  { %v3724_v25 = vadd.f32 %v3721_v18, %v3711_v46  ;;  %v3722_v33 = vadd.f32 %v3721_v18, %v3709_v49  ;;  %v3723_v50 = vadd.f32 %v3721_v18, %v3710_v62  ;;  %v3725_v51 = vadd.f32 %v3721_v18, %v3712_v2  ;;  %v4124_v46 = vld [vmem:[%s17201_s19 + $0x8] sm:$0xff]  ;;  %v4321_v18 = vld [vmem:[%s17201_s19 + $0x20] sm:$0xff] }
 0x711   :  { %v15691_v47 = vpack.c.bf16 %v4124_v46, %v4123_v45  ;;  %v15719_v46 = vpack.c.bf16 %v4940_v43, %v4939_v40  ;;  %v5042_v40 = vld [vmem:[%s12717_s27] sm:$0x3]  ;;  %s12733_s27 = sld [smem:[%s18388_s0 + %s16492_s24]]   ;;  %s16507_s24 = smov 42  }
 0x712   :  { %v17105_v52 = vadd.f32 %v3722_v33, %v16796_v42  ;;  %v17108_v48 = vadd.f32 %v3723_v50, %v16794_v61  ;;  %v17111_v55 = vadd.f32 %v3724_v25, %v16802_v6  ;;  %v17114_v41 = vadd.f32 %v3725_v51, %v16800_v4  ;;  %v3735_v6 = vld [vmem:[%s17087_s11 + $0x8] sm:$0xff]  ;;  %s12729_s11 = sld [smem:[%s18388_s0 + %s16488_s8]]   ;;  %s16503_s8 = smov 33  }
 0x713   :  { %15692 = vmatprep.subr.bf16.mxu1 %v15691_v47  ;;  %v4322_v25 = vld [vmem:[%s17201_s19 + $0x28] sm:$0xff] }
 0x714   :  { %v3730_v53 = vmax.f32 %v17105_v52, 0.0  ;;  %v3731_v54 = vmax.f32 %v17108_v48, 0.0  ;;  %v3732_v63 = vmax.f32 %v17111_v55, 0.0  ;;  %v3733_v42 = vmax.f32 %v17114_v41, 0.0 }
 0x715   :  { %v15695_v51 = vpack.c.bf16 %v4322_v25, %v4321_v18  ;;  %v5106_v25 = vld [vmem:[%s17260_s23] sm:$0xff] }
 0x716   :  { %v15679_v61 = vpack.c.bf16 %v3731_v54, %v3730_v53  ;;  %v15683_v4 = vpack.c.bf16 %v3733_v42, %v3732_v63 }
 0x718   :  { %15680 = vmatprep.subr.bf16.mxu0 %v15679_v61 }
 0x719   :  { %15682 = vmatpush3.bf16.msra.mxu0 %v15679_v61 }
 0x71a   :  { %15684 = vmatprep.subr.bf16.mxu0 %v15683_v4 }
 0x71d   :  { %15686 = vmatpush3.bf16.msra.mxu0 %v15683_v4 }
 0x720   :  { %14389 = vmatmul.mubr.msk.f32.vlgmr.msra.gmra.mrb[104].mxu0 %vm1021_vm3, %v3735_v6  ;;  %v4424_v6 = vld [vmem:[%s17201_s19 + $0x30] sm:$0xff] }
 0x721   :  { %14391 = vmatprep.mubr.msk.f32.mxu0 %vm1021_vm3, %v3736_v8  ;;  %v4425_v8 = vld [vmem:[%s17201_s19 + $0x38] sm:$0xff] }
 0x724   :  { %14392 = vmatmul.mubr.msk.f32.gmra.mrb[106].mxu0 %vm1021_vm3, %v3737_v57 }
 0x725   :  { %14394 = vmatprep.mubr.msk.f32.mxu0 %vm1021_vm3, %v3738_v58 }
 0x728   :  { %14395 = vmatmul.mubr.msk.f32.gmra.mrb[108].mxu0 %vm1021_vm3, %v3739_v24  ;;  %v15699_v24 = vpack.c.bf16 %v4425_v8, %v4424_v6 }
 0x729   :  { %14397 = vmatprep.mubr.msk.f32.mxu0 %vm1021_vm3, %v3740_v16 }
 0x72c   :  { %14398 = vmatmul.mubr.msk.f32.gmra.mrb[110].mxu0 %vm1021_vm3, %v3741_v56 }
 0x72d   :  { %14400 = vmatprep.mubr.msk.f32.mxu0 %vm1021_vm3, %v3742_v59  ;;  %v4527_v59 = vld [vmem:[%s17201_s19 + $0x40] sm:$0xff] }
 0x730   :  { %14401 = vmatmul.mubr.msk.f32.gmra.mrb[112].mxu0 %vm1021_vm3, %v3743_v60  ;;  %v4528_v60 = vld [vmem:[%s17201_s19 + $0x48] sm:$0xff] }
 0x731   :  { %14403 = vmatprep.mubr.msk.f32.mxu0 %vm1021_vm3, %v3744_v34 }
 0x734   :  { %14404 = vmatmul.mubr.msk.f32.gmra.mrb[114].mxu0 %vm1021_vm3, %v3745_v1 }
 0x735   :  { %14406 = vmatprep.mubr.msk.f32.mxu0 %vm1021_vm3, %v3746_v3  ;;  %v15703_v3 = vpack.c.bf16 %v4528_v60, %v4527_v59 }
 0x738   :  { %14407 = vmatmul.mubr.msk.f32.gmra.mrb[116].mxu0 %vm1021_vm3, %v3747_v5 }
 0x739   :  { %14409 = vmatprep.mubr.msk.f32.mxu0 %vm1021_vm3, %v3748_v7 }
 0x73c   :  { %14410 = vmatmul.mubr.msk.f32.gmra.mrb[118].mxu0 %vm1021_vm3, %v3749_v9  ;;  %v4630_v9 = vld [vmem:[%s17201_s19 + $0x50] sm:$0xff] }
 0x73d   :  { %14412 = vmatprep.mubr.msk.f32.mxu0 %vm1021_vm3, %v3750_v10  ;;  %v4631_v10 = vld [vmem:[%s17201_s19 + $0x58] sm:$0xff] }
 0x740   :  { %14413 = vmatmul.mubr.msk.f32.gmra.mrb[120].mxu0 %vm1021_vm3, %v3751_v12 }
 0x741   :  { %14415 = vmatprep.mubr.msk.f32.mxu0 %vm1021_vm3, %v3752_v13 }
 0x744   :  { %14416 = vmatmul.mubr.msk.f32.gmra.mrb[122].mxu0 %vm1021_vm3, %v3753_v14  ;;  %v15707_v14 = vpack.c.bf16 %v4631_v10, %v4630_v9 }
 0x745   :  { %14418 = vmatprep.mubr.msk.f32.mxu0 %vm1021_vm3, %v3754_v15 }
 0x748   :  { %14419 = vmatmul.mubr.msk.f32.gmra.mrb[124].mxu0 %vm1021_vm3, %v3755_v17 }
 0x749   :  { %14421 = vmatprep.mubr.msk.f32.mxu0 %vm1021_vm3, %v3756_v19  ;;  %v4733_v19 = vld [vmem:[%s17201_s19 + $0x60] sm:$0xff] }
 0x74c   :  { %14422 = vmatmul.mubr.msk.f32.gmra.mrb[126].mxu0 %vm1021_vm3, %v3757_v20  ;;  %v4734_v20 = vld [vmem:[%s17201_s19 + $0x68] sm:$0xff] }
 0x74d   :  { %14424 = vmatprep.mubr.msk.f32.mxu0 %vm1021_vm3, %v3758_v21 }
 0x750   :  { %14425 = vmatmul.mubr.msk.f32.gmra.mrb[128].mxu0 %vm1021_vm3, %v3759_v22 }
 0x751   :  { %14427 = vmatprep.mubr.msk.f32.mxu0 %vm1021_vm3, %v3760_v26  ;;  %v15711_v26 = vpack.c.bf16 %v4734_v20, %v4733_v19 }
 0x754   :  { %14428 = vmatmul.mubr.msk.f32.gmra.mrb[130].mxu0 %vm1021_vm3, %v3761_v27 }
 0x755   :  { %14430 = vmatprep.mubr.msk.f32.mxu0 %vm1021_vm3, %v3762_v28 }
 0x758   :  { %14431 = vmatmul.mubr.msk.f32.gmra.mrb[132].mxu0 %vm1021_vm3, %v3763_v30  ;;  %v4836_v30 = vld [vmem:[%s17201_s19 + $0x70] sm:$0xff] }
 0x759   :  { %14433 = vmatprep.mubr.msk.f32.mxu0 %vm1021_vm3, %v3764_v32  ;;  %v4837_v32 = vld [vmem:[%s17201_s19 + $0x78] sm:$0xff]  ;;  %s17718_s19 = sld [smem:[%s18388_s0 + %s16490_s16]]   ;;  %s16505_s16 = smov 41  }
 0x75c   :  { %14434 = vmatmul.mubr.msk.f32.gmra.mrb[134].mxu0 %vm1021_vm3, %v3765_v35 }
 0x75d   :  { %14436 = vmatprep.mubr.msk.f32.mxu0 %vm1021_vm3, %v3766_v36 }
 0x760   :  { %14437 = vmatmul.mubr.msk.f32.gmra.mrb[136].mxu0 %vm1021_vm3, %v3767_v37  ;;  %v15715_v37 = vpack.c.bf16 %v4837_v32, %v4836_v30 }
 0x761   :  { %14439 = vmatprep.mubr.msk.f32.mxu0 %vm1021_vm3, %v3768_v38 }
 0x764   :  { %14440 = vmatmul.mubr.msk.f32.gmra.mrb[138].mxu0 %vm1021_vm3, %v3769_v39 }
 0x765   :  { %14540 = vmatprep.mubr.msk.f32.mxu0 %vm1021_vm3, %v5106_v25 }
 0x7f3   :  { %v14390_v49 = vpop.f32.mrb[104].mxu0 }
 0x7f4   :  { %v3944_v62 = vpop.f32.mrb[105].mxu0 }
 0x7f7   :  { %v14393_v2 = vpop.f32.mrb[106].mxu0 }
 0x7f8   :  { %v3954_v11 = vpop.f32.mrb[107].mxu0 }
 0x7fb   :  { %v14396_v33 = vpop.f32.mrb[108].mxu0 }
 0x7fc   :  { %v3964_v50 = vpop.f32.mrb[109].mxu0 }
 0x7fd   :  { %14446 = vmatprep.mubr.msk.f32.mxu1 %vm512_vm2, %v3964_v50 }
 0x7fe   :  { %14447 = vmatmul.mubr.msk.f32.vlgmr.msra.gmra.mrb[44].mxu1 %vm512_vm2, %v14396_v33 }
 0x7ff   :  { %v14399_v61 = vpop.f32.mrb[110].mxu0  ;;  %15694 = vmatpush3.bf16.msra.mxu1 %v15691_v47 }
 0x800   :  { %v3974_v4 = vpop.f32.mrb[111].mxu0  ;;  %15696 = vmatprep.subr.bf16.mxu1 %v15695_v51 }
 0x801   :  { %14449 = vmatprep.mubr.msk.f32.mxu1 %vm512_vm2, %v3974_v4 }
 0x802   :  { %14450 = vmatmul.mubr.msk.f32.gmra.mrb[46].mxu1 %vm512_vm2, %v14399_v61 }
 0x803   :  { %14456 = vmatprep.mubr.msk.f32.mxu1 %vm512_vm2, %v3944_v62  ;;  %v14402_v57 = vpop.f32.mrb[112].mxu0 }
 0x804   :  { %v3984_v58 = vpop.f32.mrb[113].mxu0 }
 0x806   :  { %14457 = vmatmul.mubr.msk.f32.vlgmr.msra.gmra.mrb[44].mxu1 %vm512_vm2, %v14390_v49 }
 0x807   :  { %14459 = vmatprep.mubr.msk.f32.mxu1 %vm512_vm2, %v3954_v11  ;;  %15698 = vmatpush3.bf16.msra.mxu1 %v15695_v51  ;;  %v14405_v16 = vpop.f32.mrb[114].mxu0 }
 0x808   :  { %v3994_v56 = vpop.f32.mrb[115].mxu0  ;;  %15700 = vmatprep.subr.bf16.mxu1 %v15699_v24 }
 0x80a   :  { %14460 = vmatmul.mubr.msk.f32.gmra.mrb[46].mxu1 %vm512_vm2, %v14393_v2 }
 0x80b   :  { %14466 = vmatprep.mubr.msk.f32.mxu1 %vm512_vm2, %v3984_v58  ;;  %v14408_v34 = vpop.f32.mrb[116].mxu0 }
 0x80c   :  { %v4004_v1 = vpop.f32.mrb[117].mxu0 }
 0x80e   :  { %14467 = vmatmul.mubr.msk.f32.vlgmr.msra.gmra.mrb[44].mxu1 %vm512_vm2, %v14402_v57 }
 0x80f   :  { %14469 = vmatprep.mubr.msk.f32.mxu1 %vm512_vm2, %v3994_v56  ;;  %15702 = vmatpush3.bf16.msra.mxu1 %v15699_v24  ;;  %v14411_v5 = vpop.f32.mrb[118].mxu0 }
 0x810   :  { %v4014_v7 = vpop.f32.mrb[119].mxu0  ;;  %15704 = vmatprep.subr.bf16.mxu1 %v15703_v3 }
 0x812   :  { %14470 = vmatmul.mubr.msk.f32.gmra.mrb[46].mxu1 %vm512_vm2, %v14405_v16 }
 0x813   :  { %14476 = vmatprep.mubr.msk.f32.mxu1 %vm512_vm2, %v4004_v1  ;;  %v14414_v12 = vpop.f32.mrb[120].mxu0 }
 0x814   :  { %v4024_v13 = vpop.f32.mrb[121].mxu0 }
 0x816   :  { %14477 = vmatmul.mubr.msk.f32.vlgmr.msra.gmra.mrb[44].mxu1 %vm512_vm2, %v14408_v34 }
 0x817   :  { %14479 = vmatprep.mubr.msk.f32.mxu1 %vm512_vm2, %v4014_v7  ;;  %15706 = vmatpush3.bf16.msra.mxu1 %v15703_v3  ;;  %v14417_v15 = vpop.f32.mrb[122].mxu0 }
 0x818   :  { %v4034_v17 = vpop.f32.mrb[123].mxu0  ;;  %15708 = vmatprep.subr.bf16.mxu1 %v15707_v14 }
 0x81a   :  { %14480 = vmatmul.mubr.msk.f32.gmra.mrb[46].mxu1 %vm512_vm2, %v14411_v5 }
 0x81b   :  { %14486 = vmatprep.mubr.msk.f32.mxu1 %vm512_vm2, %v4024_v13  ;;  %v14420_v21 = vpop.f32.mrb[124].mxu0 }
 0x81c   :  { %v4044_v22 = vpop.f32.mrb[125].mxu0 }
 0x81e   :  { %14487 = vmatmul.mubr.msk.f32.vlgmr.msra.gmra.mrb[44].mxu1 %vm512_vm2, %v14414_v12 }
 0x81f   :  { %14489 = vmatprep.mubr.msk.f32.mxu1 %vm512_vm2, %v4034_v17  ;;  %15710 = vmatpush3.bf16.msra.mxu1 %v15707_v14  ;;  %v14423_v27 = vpop.f32.mrb[126].mxu0 }
 0x820   :  { %v4054_v28 = vpop.f32.mrb[127].mxu0  ;;  %15712 = vmatprep.subr.bf16.mxu1 %v15711_v26 }
 0x822   :  { %14490 = vmatmul.mubr.msk.f32.gmra.mrb[46].mxu1 %vm512_vm2, %v14417_v15 }
 0x823   :  { %14496 = vmatprep.mubr.msk.f32.mxu1 %vm512_vm2, %v4044_v22  ;;  %v14426_v35 = vpop.f32.mrb[128].mxu0 }
 0x824   :  { %v4064_v36 = vpop.f32.mrb[129].mxu0 }
 0x826   :  { %14497 = vmatmul.mubr.msk.f32.vlgmr.msra.gmra.mrb[44].mxu1 %vm512_vm2, %v14420_v21 }
 0x827   :  { %14499 = vmatprep.mubr.msk.f32.mxu1 %vm512_vm2, %v4054_v28  ;;  %15714 = vmatpush3.bf16.msra.mxu1 %v15711_v26  ;;  %v14429_v38 = vpop.f32.mrb[130].mxu0 }
 0x828   :  { %v4074_v39 = vpop.f32.mrb[131].mxu0  ;;  %15716 = vmatprep.subr.bf16.mxu1 %v15715_v37 }
 0x82a   :  { %14500 = vmatmul.mubr.msk.f32.gmra.mrb[46].mxu1 %vm512_vm2, %v14423_v27 }
 0x82b   :  { %14506 = vmatprep.mubr.msk.f32.mxu1 %vm512_vm2, %v4064_v36  ;;  %v14432_v44 = vpop.f32.mrb[132].mxu0 }
 0x82c   :  { %v4084_v45 = vpop.f32.mrb[133].mxu0 }
 0x82e   :  { %14507 = vmatmul.mubr.msk.f32.vlgmr.msra.gmra.mrb[44].mxu1 %vm512_vm2, %v14426_v35 }
 0x82f   :  { %14509 = vmatprep.mubr.msk.f32.mxu1 %vm512_vm2, %v4074_v39  ;;  %15718 = vmatpush3.bf16.msra.mxu1 %v15715_v37  ;;  %v14435_v47 = vpop.f32.mrb[134].mxu0 }
 0x830   :  { %v4094_v49 = vpop.f32.mrb[135].mxu0  ;;  %15720 = vmatprep.subr.bf16.mxu1 %v15719_v46 }
 0x832   :  { %14510 = vmatmul.mubr.msk.f32.gmra.mrb[46].mxu1 %vm512_vm2, %v14429_v38 }
 0x833   :  { %14516 = vmatprep.mubr.msk.f32.mxu1 %vm512_vm2, %v4084_v45  ;;  %v14438_v62 = vpop.f32.mrb[136].mxu0 }
 0x834   :  { %v4104_v2 = vpop.f32.mrb[137].mxu0 }
 0x836   :  { %14517 = vmatmul.mubr.msk.f32.vlgmr.msra.gmra.mrb[44].mxu1 %vm512_vm2, %v14432_v44 }
 0x837   :  { %14519 = vmatprep.mubr.msk.f32.mxu1 %vm512_vm2, %v4094_v49  ;;  %15722 = vmatpush3.bf16.msra.mxu1 %v15719_v46  ;;  %v14441_v11 = vpop.f32.mrb[138].mxu0 }
 0x838   :  { %v4114_v18 = vpop.f32.mrb[139].mxu0 }
 0x83a   :  { %14520 = vmatmul.mubr.msk.f32.gmra.mrb[46].mxu1 %vm512_vm2, %v14435_v47 }
 0x83b   :  { %14526 = vmatprep.mubr.msk.f32.mxu1 %vm512_vm2, %v4104_v2 }
 0x83e   :  { %14527 = vmatmul.mubr.msk.f32.vlgmr.msra.gmra.mrb[44].mxu1 %vm512_vm2, %v14438_v62 }
 0x83f   :  { %14529 = vmatprep.mubr.msk.f32.mxu1 %vm512_vm2, %v4114_v18 }
 0x842   :  { %14530 = vmatmul.mubr.msk.f32.gmra.mrb[46].mxu1 %vm512_vm2, %v14441_v11 }
 0x911   :  { %v14528_v33 = vpop.f32.mrb[44].mxu1 }
 0x912   :  { %v5044_v50 = vsel %vm512_vm2, %v14528_v33, 0.0  ;;  %v5058_v51 = vmul.f32 %v14528_v33, %v14528_v33  ;;  %v5019_v61 = vpop.f32.mrb[45].mxu1 }
 0x913   :  { %v5043_v4 = vsel %vm512_vm2, %v5019_v61, 0.0  ;;  %v5057_v6 = vmul.f32 %v5019_v61, %v5019_v61 }
 0x914   :  { %v5062_v8 = vsel %vm512_vm2, %v5058_v51, 0.0  ;;  %v5045_v57 = vadd.f32 %v5044_v50, %v5043_v4 }
 0x915   :  { %v5061_v58 = vsel %vm512_vm2, %v5057_v6, 0.0  ;;  %v14531_v24 = vpop.f32.mrb[46].mxu1 }
 0x916   :  { %v5063_v16 = vadd.f32 %v5062_v8, %v5061_v58  ;;  %v5029_v56 = vpop.f32.mrb[47].mxu1  ;;  %v5060_v59 = vmul.f32 %v14531_v24, %v14531_v24  ;;  %v5048_v3 = vsel %vm512_vm2, %v14531_v24, 0.0 }
 0x917   :  { %v5046_v60 = vsel %vm512_vm2, %v5029_v56, 0.0  ;;  %v5059_v34 = vmul.f32 %v5029_v56, %v5029_v56 }
 0x918   :  { %v5047_v1 = vadd.f32 %v5046_v60, %v5045_v57  ;;  %v5066_v10 = vsel %vm512_vm2, %v5060_v59, 0.0  ;;  %v5109_v59 = vld [vmem:[%s17260_s23 + $0x18] sm:$0xff]  ;;  %v5110_v60 = vld [vmem:[%s17260_s23 + $0x20] sm:$0xff] }
 0x919   :  { %v5064_v5 = vsel %vm512_vm2, %v5059_v34, 0.0  ;;  %v5111_v34 = vld [vmem:[%s17260_s23 + $0x28] sm:$0xff] }
 0x91a   :  { %v5049_v7 = vadd.f32 %v5048_v3, %v5047_v1  ;;  %v5065_v9 = vadd.f32 %v5064_v5, %v5063_v16  ;;  %v5112_v1 = vld [vmem:[%s17260_s23 + $0x30] sm:$0xff]  ;;  %v5113_v3 = vld [vmem:[%s17260_s23 + $0x38] sm:$0xff]  ;;  %v5114_v5 = vld [vmem:[%s17260_s23 + $0x40] sm:$0xff] }
 0x91c   :  { %v5050_v12 = vrot.slane %v5049_v7, 4  ;;  %v5067_v13 = vadd.f32 %v5066_v10, %v5065_v9  ;;  %v5116_v9 = vld [vmem:[%s17260_s23 + $0x50] sm:$0xff]  ;;  %v5117_v10 = vld [vmem:[%s17260_s23 + $0x58] sm:$0xff] }
 0x91e   :  { %v5051_v14 = vadd.f32 %v5050_v12, %v5049_v7  ;;  %v5068_v15 = vrot.slane %v5067_v13, 4  ;;  %v5115_v7 = vld [vmem:[%s17260_s23 + $0x48] sm:$0xff]  ;;  %v5118_v12 = vld [vmem:[%s17260_s23 + $0x60] sm:$0xff] }
 0x920   :  { %v5052_v17 = vrot.slane %v5051_v14, 2  ;;  %v5069_v19 = vadd.f32 %v5068_v15, %v5067_v13  ;;  %v5119_v13 = vld [vmem:[%s17260_s23 + $0x68] sm:$0xff]  ;;  %v5121_v15 = vld [vmem:[%s17260_s23 + $0x78] sm:$0xff] }
 0x922   :  { %v5053_v20 = vadd.f32 %v5052_v17, %v5051_v14  ;;  %v5070_v21 = vrot.slane %v5069_v19, 2  ;;  %v5120_v14 = vld [vmem:[%s17260_s23 + $0x70] sm:$0xff]  ;;  %v5122_v17 = vld [vmem:[%s17260_s23 + $0x80] sm:$0xff] }
 0x924   :  { %v5054_v22 = vrot.slane %v5053_v20, 1  ;;  %v5071_v26 = vadd.f32 %v5070_v21, %v5069_v19  ;;  %v5123_v19 = vld [vmem:[%s17260_s23 + $0x88] sm:$0xff]  ;;  %v5125_v21 = vld [vmem:[%s17260_s23 + $0x98] sm:$0xff] }
 0x926   :  { %v5055_v27 = vadd.f32 %v5054_v22, %v5053_v20  ;;  %v5072_v28 = vrot.slane %v5071_v26, 1  ;;  %v5124_v20 = vld [vmem:[%s17260_s23 + $0x90] sm:$0xff]  ;;  %v5126_v22 = vld [vmem:[%s17260_s23 + $0xa0] sm:$0xff] }
 0x928   :  { %v5056_v30 = vmul.f32 0.03125, %v5055_v27  ;;  %v5073_v32 = vadd.f32 %v5072_v28, %v5071_v26  ;;  %v5127_v26 = vld [vmem:[%s17260_s23 + $0xa8] sm:$0xff]  ;;  %v5128_v27 = vld [vmem:[%s17260_s23 + $0xb0] sm:$0xff]  ;;  %v5129_v28 = vld [vmem:[%s17260_s23 + $0xb8] sm:$0xff] }
 0x92a   :  { %v5074_v35 = vmul.f32 0.03125, %v5073_v32  ;;  %v5075_v36 = vmul.f32 %v5056_v30, %v5056_v30  ;;  %v5131_v32 = vld [vmem:[%s17260_s23 + $0xc8] sm:$0xff] }
 0x92c   :  { %v5076_v37 = vsub.f32 %v5074_v35, %v5075_v36  ;;  %v5132_v35 = vld [vmem:[%s17260_s23 + $0xd0] sm:$0xff]  ;;  %v5133_v36 = vld [vmem:[%s17260_s23 + $0xd8] sm:$0xff] }
 0x92e   :  { %v5077_v38 = vmax.f32 %v5076_v37, 0.0  ;;  %v5134_v37 = vld [vmem:[%s17260_s23 + $0xe0] sm:$0xff] }
 0x930   :  { %v5078_v39 = vadd.f32 1e-05, %v5077_v38  ;;  %v5135_v38 = vld [vmem:[%s17260_s23 + $0xe8] sm:$0xff] }
 0x932   :  { %16428 = vrsqrt.f32 %v5078_v39  ;;  %v5136_v39 = vld [vmem:[%s17260_s23 + $0xf0] sm:$0xff] }
 0x93c   :  { %v16429_v43 = vpop.eup %16428 }
 0x93d   :  { %v5080_v44 = vmul.f32 %v16429_v43, %v5042_v40  ;;  %v5138_v43 = vld [vmem:[%s17260_s23 + $0x100] sm:$0xff] }
 0x93f   :  { %v5084_v45 = vrot.slane %v5080_v44, %v16732_v23  ;;  %v5089_v46 = vmul.f32 %v5080_v44, %v5056_v30  ;;  %v5130_v30 = vld [vmem:[%s17260_s23 + $0xc0] sm:$0xff]  ;;  %v5139_v44 = vld [vmem:[%s17260_s23 + $0x108] sm:$0xff] }
 0x941   :  { %v5087_v47 = vmul.f32 %v5084_v45, %v5029_v56  ;;  %v5091_v49 = vrot.slane %v5089_v46, 7  ;;  %v5085_v62 = vmul.f32 %v5084_v45, %v5019_v61  ;;  %v5086_v2 = vmul.f32 %v14528_v33, %v5084_v45  ;;  %v5108_v56 = vld [vmem:[%s17260_s23 + $0x10] sm:$0xff]  ;;  %v5141_v46 = vld [vmem:[%s17260_s23 + $0x118] sm:$0xff] }
 0x942   :  { %v5088_v11 = vmul.f32 %v14531_v24, %v5084_v45  ;;  %v5107_v24 = vld [vmem:[%s17260_s23 + $0x8] sm:$0xff]  ;;  %v5140_v45 = vld [vmem:[%s17260_s23 + $0x110] sm:$0xff] }
 0x943   :  { %v5093_v18 = vsub.f32 %v5042_v40, %v5091_v49  ;;  %v5137_v40 = vld [vmem:[%s17260_s23 + $0xf8] sm:$0xff]  ;;  %s17726_s23 = sld [smem:[%s18388_s0 + %s16491_s20]]   ;;  %s16506_s20 = smov 39  }
 0x944   :  { %v5498_v49 = vld [vmem:[%s17350_s1 + $0x18] sm:$0xff] }
 0x945   :  { %v5097_v25 = vrot.slane %v5093_v18, %v16735_v31 }
 0x947   :  { %v5100_v50 = vadd.f32 %v5097_v25, %v5087_v47  ;;  %v5098_v51 = vadd.f32 %v5097_v25, %v5085_v62  ;;  %v5099_v4 = vadd.f32 %v5097_v25, %v5086_v2  ;;  %v5101_v6 = vadd.f32 %v5097_v25, %v5088_v11  ;;  %v5497_v47 = vld [vmem:[%s17350_s1 + $0x10] sm:$0xff]  ;;  %v5495_v2 = vld [vmem:[%s17350_s1] sm:$0xff]  ;;  %v5496_v11 = vld [vmem:[%s17350_s1 + $0x8] sm:$0xff] }
 0x948   :  { %v15731_v62 = vpack.c.bf16 %v5498_v49, %v5497_v47  ;;  %v15735_v18 = vpack.c.bf16 %v5496_v11, %v5495_v2  ;;  %v6311_v47 = vld [vmem:[%s17350_s1 + $0x80] sm:$0xff]  ;;  %v6312_v49 = vld [vmem:[%s17350_s1 + $0x88] sm:$0xff] }
 0x949   :  { %v5102_v8 = vmax.f32 %v5098_v51, 0.0  ;;  %v5103_v57 = vmax.f32 %v5099_v4, 0.0  ;;  %v5104_v58 = vmax.f32 %v5100_v50, 0.0  ;;  %v5105_v16 = vmax.f32 %v5101_v6, 0.0 }
 0x94a   :  { %16155 = vmatprep.subr.bf16.mxu1 %v15731_v62  ;;  %v15763_v11 = vpack.c.bf16 %v6312_v49, %v6311_v47 }
 0x94b   :  { %v15723_v61 = vpack.c.bf16 %v5103_v57, %v5102_v8  ;;  %v15727_v33 = vpack.c.bf16 %v5105_v16, %v5104_v58  ;;  %16156 = vmatpush3.bf16.msra.mxu1 %v15731_v62  ;;  %v5693_v57 = vld [vmem:[%s17350_s1 + $0x20] sm:$0xff]  ;;  %v5694_v58 = vld [vmem:[%s17350_s1 + $0x28] sm:$0xff] }
 0x94c   :  { %15736 = vmatprep.subr.bf16.mxu1 %v15735_v18 }
 0x94d   :  { %15724 = vmatprep.subr.bf16.mxu0 %v15723_v61 }
 0x94e   :  { %15726 = vmatpush3.bf16.msra.mxu0 %v15723_v61 }
 0x94f   :  { %15728 = vmatprep.subr.bf16.mxu0 %v15727_v33 }
 0x952   :  { %15730 = vmatpush3.bf16.msra.mxu0 %v15727_v33  ;;  %v15739_v33 = vpack.c.bf16 %v5694_v58, %v5693_v57  ;;  %v6483_v57 = vld [vmem:[%s12722_s5 + $0x8] sm:$0xff] }
 0x953   :  { %15732 = vmatprep.subr.bf16.mxu0 %v15731_v62 }
 0x955   :  { %14541 = vmatmul.mubr.msk.f32.vlgmr.msra.gmra.mrb[140].mxu0 %vm1021_vm3, %v5107_v24  ;;  %v5796_v24 = vld [vmem:[%s17350_s1 + $0x30] sm:$0xff] }
 0x956   :  { %14543 = vmatprep.mubr.msk.f32.mxu0 %vm1021_vm3, %v5108_v56  ;;  %15734 = vmatpush3.bf16.msra.mxu0 %v15731_v62  ;;  %v5797_v56 = vld [vmem:[%s17350_s1 + $0x38] sm:$0xff] }
 0x959   :  { %14544 = vmatmul.mubr.msk.f32.gmra.mrb[142].mxu0 %vm1021_vm3, %v5109_v59 }
 0x95a   :  { %14546 = vmatprep.mubr.msk.f32.mxu0 %vm1021_vm3, %v5110_v60 }
 0x95d   :  { %14547 = vmatmul.mubr.msk.f32.gmra.mrb[144].mxu0 %vm1021_vm3, %v5111_v34  ;;  %v15743_v34 = vpack.c.bf16 %v5797_v56, %v5796_v24 }
 0x95e   :  { %14549 = vmatprep.mubr.msk.f32.mxu0 %vm1021_vm3, %v5112_v1 }
 0x961   :  { %14550 = vmatmul.mubr.msk.f32.gmra.mrb[146].mxu0 %vm1021_vm3, %v5113_v3 }
 0x962   :  { %14552 = vmatprep.mubr.msk.f32.mxu0 %vm1021_vm3, %v5114_v5  ;;  %v5899_v5 = vld [vmem:[%s17350_s1 + $0x40] sm:$0xff] }
 0x965   :  { %14553 = vmatmul.mubr.msk.f32.gmra.mrb[148].mxu0 %vm1021_vm3, %v5115_v7  ;;  %v5900_v7 = vld [vmem:[%s17350_s1 + $0x48] sm:$0xff] }
 0x966   :  { %14555 = vmatprep.mubr.msk.f32.mxu0 %vm1021_vm3, %v5116_v9 }
 0x969   :  { %14556 = vmatmul.mubr.msk.f32.gmra.mrb[150].mxu0 %vm1021_vm3, %v5117_v10 }
 0x96a   :  { %14558 = vmatprep.mubr.msk.f32.mxu0 %vm1021_vm3, %v5118_v12  ;;  %v15747_v12 = vpack.c.bf16 %v5900_v7, %v5899_v5 }
 0x96d   :  { %14559 = vmatmul.mubr.msk.f32.gmra.mrb[152].mxu0 %vm1021_vm3, %v5119_v13 }
 0x96e   :  { %14561 = vmatprep.mubr.msk.f32.mxu0 %vm1021_vm3, %v5120_v14 }
 0x971   :  { %14562 = vmatmul.mubr.msk.f32.gmra.mrb[154].mxu0 %vm1021_vm3, %v5121_v15  ;;  %v6002_v15 = vld [vmem:[%s17350_s1 + $0x50] sm:$0xff] }
 0x972   :  { %14564 = vmatprep.mubr.msk.f32.mxu0 %vm1021_vm3, %v5122_v17  ;;  %v6003_v17 = vld [vmem:[%s17350_s1 + $0x58] sm:$0xff] }
 0x975   :  { %14565 = vmatmul.mubr.msk.f32.gmra.mrb[156].mxu0 %vm1021_vm3, %v5123_v19 }
 0x976   :  { %14567 = vmatprep.mubr.msk.f32.mxu0 %vm1021_vm3, %v5124_v20 }
 0x979   :  { %14568 = vmatmul.mubr.msk.f32.gmra.mrb[158].mxu0 %vm1021_vm3, %v5125_v21  ;;  %v15751_v21 = vpack.c.bf16 %v6003_v17, %v6002_v15 }
 0x97a   :  { %14570 = vmatprep.mubr.msk.f32.mxu0 %vm1021_vm3, %v5126_v22 }
 0x97d   :  { %14571 = vmatmul.mubr.msk.f32.gmra.mrb[160].mxu0 %vm1021_vm3, %v5127_v26 }
 0x97e   :  { %14573 = vmatprep.mubr.msk.f32.mxu0 %vm1021_vm3, %v5128_v27  ;;  %v6105_v27 = vld [vmem:[%s17350_s1 + $0x60] sm:$0xff] }
 0x981   :  { %14574 = vmatmul.mubr.msk.f32.gmra.mrb[162].mxu0 %vm1021_vm3, %v5129_v28  ;;  %v6106_v28 = vld [vmem:[%s17350_s1 + $0x68] sm:$0xff] }
 0x982   :  { %14576 = vmatprep.mubr.msk.f32.mxu0 %vm1021_vm3, %v5130_v30 }
 0x985   :  { %14577 = vmatmul.mubr.msk.f32.gmra.mrb[164].mxu0 %vm1021_vm3, %v5131_v32 }
 0x986   :  { %14579 = vmatprep.mubr.msk.f32.mxu0 %vm1021_vm3, %v5132_v35  ;;  %v15755_v35 = vpack.c.bf16 %v6106_v28, %v6105_v27 }
 0x989   :  { %14580 = vmatmul.mubr.msk.f32.gmra.mrb[166].mxu0 %vm1021_vm3, %v5133_v36 }
 0x98a   :  { %14582 = vmatprep.mubr.msk.f32.mxu0 %vm1021_vm3, %v5134_v37 }
 0x98d   :  { %14583 = vmatmul.mubr.msk.f32.gmra.mrb[168].mxu0 %vm1021_vm3, %v5135_v38  ;;  %v6208_v38 = vld [vmem:[%s17350_s1 + $0x70] sm:$0xff] }
 0x98e   :  { %14585 = vmatprep.mubr.msk.f32.mxu0 %vm1021_vm3, %v5136_v39  ;;  %v6209_v39 = vld [vmem:[%s17350_s1 + $0x78] sm:$0xff]  ;;  %s17861_s1 = sld [smem:[%s18388_s0 + %s16493_s28]]   ;;  %s16508_s28 = smov 45  }
 0x991   :  { %14586 = vmatmul.mubr.msk.f32.gmra.mrb[170].mxu0 %vm1021_vm3, %v5137_v40 }
 0x992   :  { %14588 = vmatprep.mubr.msk.f32.mxu0 %vm1021_vm3, %v5138_v43 }
 0x995   :  { %14589 = vmatmul.mubr.msk.f32.gmra.mrb[172].mxu0 %vm1021_vm3, %v5139_v44  ;;  %v15759_v44 = vpack.c.bf16 %v6209_v39, %v6208_v38 }
 0x996   :  { %14591 = vmatprep.mubr.msk.f32.mxu0 %vm1021_vm3, %v5140_v45 }
 0x999   :  { %14592 = vmatmul.mubr.msk.f32.gmra.mrb[174].mxu0 %vm1021_vm3, %v5141_v46 }
 0xa28   :  { %v14542_v25 = vpop.f32.mrb[140].mxu0 }
 0xa29   :  { %v5316_v50 = vpop.f32.mrb[141].mxu0 }
 0xa2c   :  { %v14545_v51 = vpop.f32.mrb[142].mxu0 }
 0xa2d   :  { %v5326_v4 = vpop.f32.mrb[143].mxu0 }
 0xa30   :  { %v14548_v6 = vpop.f32.mrb[144].mxu0 }
 0xa31   :  { %v5336_v8 = vpop.f32.mrb[145].mxu0 }
 0xa32   :  { %14598 = vmatprep.mubr.msk.f32.mxu0 %vm512_vm2, %v5336_v8  ;;  %v6482_v8 = vld [vmem:[%s12722_s5] sm:$0xff]  ;;  %s17867_s5 = sld [smem:[%s18388_s0 + %s16494_s2]]   ;;  %s16509_s2 = smov 46  }
 0xa33   :  { %14599 = vmatmul.mubr.msk.f32.vlgmr.msra.gmra.mrb[176].mxu0 %vm512_vm2, %v14548_v6  ;;  %v15767_v58 = vpack.c.bf16 %v6483_v57, %v6482_v8 }
 0xa34   :  { %v14551_v16 = vpop.f32.mrb[146].mxu0 }
 0xa35   :  { %v5346_v61 = vpop.f32.mrb[147].mxu0  ;;  %15768 = vmatprep.subr.bf16.mxu0 %v15767_v58 }
 0xa36   :  { %14601 = vmatprep.mubr.msk.f32.mxu1 %vm512_vm2, %v5346_v61  ;;  %15770 = vmatpush3.bf16.msra.mxu0 %v15767_v58 }
 0xa37   :  { %14602 = vmatmul.mubr.msk.f32.vlgmr.msra.gmra.mrb[48].mxu1 %vm512_vm2, %v14551_v16  ;;  %15777 = vmatprep.subr.bf16.mxu0 %v16462_v0 }
 0xa38   :  { %15738 = vmatpush3.bf16.msra.mxu1 %v15735_v18  ;;  %14608 = vmatprep.mubr.msk.f32.mxu1 %vm512_vm2, %v5316_v50  ;;  %v14554_v59 = vpop.f32.mrb[148].mxu0 }
 0xa39   :  { %15740 = vmatprep.subr.bf16.mxu1 %v15739_v33  ;;  %v5356_v60 = vpop.f32.mrb[149].mxu0 }
 0xa3b   :  { %14609 = vmatmul.mubr.msk.f32.vlgmr.msra.gmra.mrb[50].mxu1 %vm512_vm2, %v14542_v25 }
 0xa3c   :  { %14611 = vmatprep.mubr.msk.f32.mxu1 %vm512_vm2, %v5326_v4  ;;  %15742 = vmatpush3.bf16.msra.mxu1 %v15739_v33  ;;  %v14557_v1 = vpop.f32.mrb[150].mxu0 }
 0xa3d   :  { %v5366_v3 = vpop.f32.mrb[151].mxu0  ;;  %15744 = vmatprep.subr.bf16.mxu1 %v15743_v34 }
 0xa3f   :  { %14612 = vmatmul.mubr.msk.f32.gmra.mrb[48].mxu1 %vm512_vm2, %v14545_v51 }
 0xa40   :  { %14618 = vmatprep.mubr.msk.f32.mxu1 %vm512_vm2, %v5356_v60  ;;  %v14560_v9 = vpop.f32.mrb[152].mxu0 }
 0xa41   :  { %v5376_v10 = vpop.f32.mrb[153].mxu0 }
 0xa43   :  { %14619 = vmatmul.mubr.msk.f32.vlgmr.msra.gmra.mrb[50].mxu1 %vm512_vm2, %v14554_v59 }
 0xa44   :  { %14621 = vmatprep.mubr.msk.f32.mxu1 %vm512_vm2, %v5366_v3  ;;  %15746 = vmatpush3.bf16.msra.mxu1 %v15743_v34  ;;  %v14563_v13 = vpop.f32.mrb[154].mxu0 }
 0xa45   :  { %v5386_v14 = vpop.f32.mrb[155].mxu0  ;;  %15748 = vmatprep.subr.bf16.mxu1 %v15747_v12 }
 0xa47   :  { %14622 = vmatmul.mubr.msk.f32.gmra.mrb[48].mxu1 %vm512_vm2, %v14557_v1 }
 0xa48   :  { %14628 = vmatprep.mubr.msk.f32.mxu1 %vm512_vm2, %v5376_v10  ;;  %v14566_v19 = vpop.f32.mrb[156].mxu0 }
 0xa49   :  { %v5396_v20 = vpop.f32.mrb[157].mxu0 }
 0xa4b   :  { %14629 = vmatmul.mubr.msk.f32.vlgmr.msra.gmra.mrb[50].mxu1 %vm512_vm2, %v14560_v9 }
 0xa4c   :  { %14631 = vmatprep.mubr.msk.f32.mxu1 %vm512_vm2, %v5386_v14  ;;  %15750 = vmatpush3.bf16.msra.mxu1 %v15747_v12  ;;  %v14569_v22 = vpop.f32.mrb[158].mxu0 }
 0xa4d   :  { %v5406_v26 = vpop.f32.mrb[159].mxu0  ;;  %15752 = vmatprep.subr.bf16.mxu1 %v15751_v21 }
 0xa4f   :  { %14632 = vmatmul.mubr.msk.f32.gmra.mrb[48].mxu1 %vm512_vm2, %v14563_v13 }
 0xa50   :  { %14638 = vmatprep.mubr.msk.f32.mxu1 %vm512_vm2, %v5396_v20  ;;  %v14572_v30 = vpop.f32.mrb[160].mxu0 }
 0xa51   :  { %v5416_v32 = vpop.f32.mrb[161].mxu0 }
 0xa53   :  { %14639 = vmatmul.mubr.msk.f32.vlgmr.msra.gmra.mrb[50].mxu1 %vm512_vm2, %v14566_v19 }
 0xa54   :  { %14641 = vmatprep.mubr.msk.f32.mxu1 %vm512_vm2, %v5406_v26  ;;  %15754 = vmatpush3.bf16.msra.mxu1 %v15751_v21  ;;  %v14575_v36 = vpop.f32.mrb[162].mxu0 }
 0xa55   :  { %v5426_v37 = vpop.f32.mrb[163].mxu0  ;;  %15756 = vmatprep.subr.bf16.mxu1 %v15755_v35 }
 0xa57   :  { %14642 = vmatmul.mubr.msk.f32.gmra.mrb[48].mxu1 %vm512_vm2, %v14569_v22 }
 0xa58   :  { %14648 = vmatprep.mubr.msk.f32.mxu1 %vm512_vm2, %v5416_v32  ;;  %v14578_v40 = vpop.f32.mrb[164].mxu0 }
 0xa59   :  { %v5436_v43 = vpop.f32.mrb[165].mxu0 }
 0xa5b   :  { %14649 = vmatmul.mubr.msk.f32.vlgmr.msra.gmra.mrb[50].mxu1 %vm512_vm2, %v14572_v30 }
 0xa5c   :  { %14651 = vmatprep.mubr.msk.f32.mxu1 %vm512_vm2, %v5426_v37  ;;  %15758 = vmatpush3.bf16.msra.mxu1 %v15755_v35  ;;  %v14581_v45 = vpop.f32.mrb[166].mxu0 }
 0xa5d   :  { %v5446_v46 = vpop.f32.mrb[167].mxu0  ;;  %15760 = vmatprep.subr.bf16.mxu1 %v15759_v44 }
 0xa5f   :  { %14652 = vmatmul.mubr.msk.f32.gmra.mrb[48].mxu1 %vm512_vm2, %v14575_v36 }
 0xa60   :  { %14658 = vmatprep.mubr.msk.f32.mxu1 %vm512_vm2, %v5436_v43  ;;  %v14584_v62 = vpop.f32.mrb[168].mxu0 }
 0xa61   :  { %v5456_v2 = vpop.f32.mrb[169].mxu0 }
 0xa63   :  { %14659 = vmatmul.mubr.msk.f32.vlgmr.msra.gmra.mrb[50].mxu1 %vm512_vm2, %v14578_v40 }
 0xa64   :  { %14661 = vmatprep.mubr.msk.f32.mxu1 %vm512_vm2, %v5446_v46  ;;  %15762 = vmatpush3.bf16.msra.mxu1 %v15759_v44  ;;  %v14587_v18 = vpop.f32.mrb[170].mxu0 }
 0xa65   :  { %v5466_v25 = vpop.f32.mrb[171].mxu0  ;;  %15764 = vmatprep.subr.bf16.mxu1 %v15763_v11 }
 0xa67   :  { %14662 = vmatmul.mubr.msk.f32.gmra.mrb[48].mxu1 %vm512_vm2, %v14581_v45 }
 0xa68   :  { %14668 = vmatprep.mubr.msk.f32.mxu1 %vm512_vm2, %v5456_v2  ;;  %v14590_v50 = vpop.f32.mrb[172].mxu0 }
 0xa69   :  { %v5476_v51 = vpop.f32.mrb[173].mxu0 }
 0xa6b   :  { %14669 = vmatmul.mubr.msk.f32.vlgmr.msra.gmra.mrb[50].mxu1 %vm512_vm2, %v14584_v62 }
 0xa6c   :  { %14671 = vmatprep.mubr.msk.f32.mxu1 %vm512_vm2, %v5466_v25  ;;  %15766 = vmatpush3.bf16.msra.mxu1 %v15763_v11  ;;  %v14593_v4 = vpop.f32.mrb[174].mxu0  ;;  %v6414_v25 = vld [vmem:[%s12719_s9] sm:$0x3]  ;;  %s12738_s9 = sld [smem:[%s18388_s0 + %s16495_s6]]   ;;  %s16510_s6 = smov 43  }
 0xa6d   :  { %v5486_v6 = vpop.f32.mrb[175].mxu0  ;;  %15771 = vmatprep.subr.bf16.mxu1 %v16462_v0 }
 0xa6f   :  { %14672 = vmatmul.mubr.msk.f32.gmra.mrb[48].mxu1 %vm512_vm2, %v14587_v18 }
 0xa70   :  { %14678 = vmatprep.mubr.msk.f32.mxu1 %vm512_vm2, %v5476_v51 }
 0xa73   :  { %14679 = vmatmul.mubr.msk.f32.vlgmr.msra.gmra.mrb[50].mxu1 %vm512_vm2, %v14590_v50 }
 0xa74   :  { %14681 = vmatprep.mubr.msk.f32.mxu1 %vm512_vm2, %v5486_v6 }
 0xa77   :  { %14682 = vmatmul.mubr.msk.f32.gmra.mrb[48].mxu1 %vm512_vm2, %v14593_v4 }
 0xa78   :  { %14702 = vmatprep.mubr.msk.f32.mxu1 %vm16480_vm4, %v16464_v29 }
 0xb06   :  { %v14600_v16 = vpop.f32.mrb[176].mxu0 }
 0xb07   :  { %v5577_v61 = vpop.f32.mrb[177].mxu0 }
 0xb46   :  { %v14680_v33 = vpop.f32.mrb[50].mxu1 }
 0xb47   :  { %v16157_v24 = vadd.f32 %v14680_v33, %v14600_v16  ;;  %v6391_v56 = vpop.f32.mrb[51].mxu1 }
 0xb48   :  { %v16158_v59 = vadd.f32 %v6391_v56, %v5577_v61 }
 0xb49   :  { %v6416_v60 = vsel %vm512_vm2, %v16157_v24, 0.0  ;;  %v6430_v34 = vmul.f32 %v16157_v24, %v16157_v24 }
 0xb4a   :  { %v6415_v1 = vsel %vm512_vm2, %v16158_v59, 0.0  ;;  %v6429_v3 = vmul.f32 %v16158_v59, %v16158_v59  ;;  %v14683_v5 = vpop.f32.mrb[48].mxu1 }
 0xb4b   :  { %v6434_v7 = vsel %vm512_vm2, %v6430_v34, 0.0  ;;  %v6417_v9 = vadd.f32 %v6416_v60, %v6415_v1  ;;  %v6401_v10 = vpop.f32.mrb[49].mxu1  ;;  %v6432_v13 = vmul.f32 %v14683_v5, %v14683_v5  ;;  %v6420_v20 = vsel %vm512_vm2, %v14683_v5, 0.0 }
 0xb4c   :  { %v6433_v12 = vsel %vm512_vm2, %v6429_v3, 0.0  ;;  %v6418_v14 = vsel %vm512_vm2, %v6401_v10, 0.0  ;;  %v6431_v15 = vmul.f32 %v6401_v10, %v6401_v10 }
 0xb4d   :  { %v6435_v17 = vadd.f32 %v6434_v7, %v6433_v12  ;;  %v6419_v19 = vadd.f32 %v6418_v14, %v6417_v9  ;;  %v6438_v27 = vsel %vm512_vm2, %v6432_v13, 0.0  ;;  %v6582_v13 = vld [vmem:[%s17443_s13 + $0x8] sm:$0xff]  ;;  %v6583_v14 = vld [vmem:[%s17443_s13 + $0x10] sm:$0xff] }
 0xb4e   :  { %v6436_v21 = vsel %vm512_vm2, %v6431_v15, 0.0  ;;  %v6584_v15 = vld [vmem:[%s17443_s13 + $0x18] sm:$0xff] }
 0xb4f   :  { %v6421_v22 = vadd.f32 %v6420_v20, %v6419_v19  ;;  %v6437_v26 = vadd.f32 %v6436_v21, %v6435_v17  ;;  %v6585_v17 = vld [vmem:[%s17443_s13 + $0x20] sm:$0xff]  ;;  %v6586_v19 = vld [vmem:[%s17443_s13 + $0x28] sm:$0xff]  ;;  %v6587_v20 = vld [vmem:[%s17443_s13 + $0x30] sm:$0xff] }
 0xb50   :  { %v6588_v21 = vld [vmem:[%s17443_s13 + $0x38] sm:$0xff] }
 0xb51   :  { %v6422_v28 = vrot.slane %v6421_v22, 4  ;;  %v6439_v30 = vadd.f32 %v6438_v27, %v6437_v26  ;;  %v6729_v26 = vld [vmem:[%s17492_s17 + $0x10] sm:$0xff]  ;;  %v6730_v27 = vld [vmem:[%s17492_s17 + $0x18] sm:$0xff] }
 0xb53   :  { %v6423_v32 = vadd.f32 %v6422_v28, %v6421_v22  ;;  %v6440_v35 = vrot.slane %v6439_v30, 4  ;;  %v6589_v22 = vld [vmem:[%s17443_s13 + $0x40] sm:$0xff]  ;;  %v15778_v28 = vpack.c.bf16 %v6730_v27, %v6729_v26 }
 0xb55   :  { %v6424_v36 = vrot.slane %v6423_v32, 2  ;;  %v6441_v37 = vadd.f32 %v6440_v35, %v6439_v30  ;;  %v6727_v30 = vld [vmem:[%s17492_s17] sm:$0xff] }
 0xb57   :  { %v6425_v38 = vadd.f32 %v6424_v36, %v6423_v32  ;;  %v6442_v39 = vrot.slane %v6441_v37, 2  ;;  %v6728_v32 = vld [vmem:[%s17492_s17 + $0x8] sm:$0xff] }
 0xb59   :  { %v6426_v40 = vrot.slane %v6425_v38, 1  ;;  %v6443_v43 = vadd.f32 %v6442_v39, %v6441_v37  ;;  %v15781_v37 = vpack.c.bf16 %v6728_v32, %v6727_v30 }
 0xb5b   :  { %v6427_v44 = vadd.f32 %v6426_v40, %v6425_v38  ;;  %v6444_v45 = vrot.slane %v6443_v43, 1  ;;  %v6877_v40 = vld [vmem:[%s17492_s17 + $0x20] sm:$0xff] }
 0xb5d   :  { %v6428_v46 = vmul.f32 0.03125, %v6427_v44  ;;  %v6445_v47 = vadd.f32 %v6444_v45, %v6443_v43  ;;  %v6878_v43 = vld [vmem:[%s17492_s17 + $0x28] sm:$0xff] }
 0xb5f   :  { %v6446_v49 = vmul.f32 0.03125, %v6445_v47  ;;  %v6447_v62 = vmul.f32 %v6428_v46, %v6428_v46 }
 0xb61   :  { %v6448_v2 = vsub.f32 %v6446_v49, %v6447_v62  ;;  %v6953_v62 = vld [vmem:[%s17492_s17 + $0x30] sm:$0xff] }
 0xb63   :  { %v6449_v11 = vmax.f32 %v6448_v2, 0.0  ;;  %v6954_v2 = vld [vmem:[%s17492_s17 + $0x38] sm:$0xff] }
 0xb65   :  { %v6450_v18 = vadd.f32 1e-05, %v6449_v11 }
 0xb67   :  { %16430 = vrsqrt.f32 %v6450_v18 }
 0xb71   :  { %v16431_v50 = vpop.eup %16430 }
 0xb72   :  { %v6452_v51 = vmul.f32 %v16431_v50, %v6414_v25 }
 0xb74   :  { %v6456_v4 = vrot.slane %v6452_v51, %v16732_v23  ;;  %v6461_v6 = vmul.f32 %v6452_v51, %v6428_v46  ;;  %v15784_v46 = vpack.c.bf16 %v6878_v43, %v6877_v40 }
 0xb76   :  { %v6459_v8 = vmul.f32 %v6456_v4, %v6401_v10  ;;  %v6463_v57 = vrot.slane %v6461_v6, 7  ;;  %v6457_v58 = vmul.f32 %v16158_v59, %v6456_v4  ;;  %v6458_v16 = vmul.f32 %v16157_v24, %v6456_v4  ;;  %v7030_v6 = vld [vmem:[%s17492_s17 + $0x48] sm:$0xff] }
 0xb77   :  { %v6460_v61 = vmul.f32 %v14683_v5, %v6456_v4  ;;  %v7029_v4 = vld [vmem:[%s17492_s17 + $0x40] sm:$0xff] }
 0xb78   :  { %v6465_v33 = vsub.f32 %v6414_v25, %v6463_v57  ;;  %v15787_v25 = vpack.c.bf16 %v6954_v2, %v6953_v62 }
 0xb7a   :  { %v6469_v56 = vrot.slane %v6465_v33, %v16735_v31  ;;  %v7105_v33 = vld [vmem:[%s17492_s17 + $0x50] sm:$0xff] }
 0xb7c   :  { %v6472_v60 = vadd.f32 %v6469_v56, %v6459_v8  ;;  %v6470_v34 = vadd.f32 %v6469_v56, %v6457_v58  ;;  %v6471_v1 = vadd.f32 %v6469_v56, %v6458_v16  ;;  %v6473_v3 = vadd.f32 %v6469_v56, %v6460_v61  ;;  %v7106_v56 = vld [vmem:[%s17492_s17 + $0x58] sm:$0xff] }
 0xb7d   :  { %v15790_v58 = vpack.c.bf16 %v7030_v6, %v7029_v4  ;;  %v7449_v4 = vld [vmem:[%s17565_s29] sm:$0xff]  ;;  %v7450_v6 = vld [vmem:[%s17565_s29 + $0x8] sm:$0xff] }
 0xb7e   :  { %v6476_v7 = vadd.f32 %v6472_v60, %v3732_v63  ;;  %v6474_v9 = vadd.f32 %v6470_v34, %v3730_v53  ;;  %v6475_v10 = vadd.f32 %v6471_v1, %v3731_v54  ;;  %v6477_v24 = vadd.f32 %v6473_v3, %v3733_v42  ;;  %v6581_v42 = vld [vmem:[%s17443_s13] sm:$0xff]  ;;  %s12735_s13 = sld [smem:[%s18388_s0 + %s16496_s10]]   ;;  %s16511_s10 = smov 50  }
 0xb7f   :  { %v15793_v1 = vpack.c.bf16 %v7106_v56, %v7105_v33  ;;  %v7181_v3 = vld [vmem:[%s17492_s17 + $0x60] sm:$0xff]  ;;  %v7602_v56 = vld [vmem:[%s17551_s21 + $0x30] sm:$0xff] }
 0xb80   :  { %v6478_v12 = vmax.f32 %v6474_v9, 0.0  ;;  %v6479_v59 = vmax.f32 %v6475_v10, 0.0  ;;  %v6480_v5 = vmax.f32 %v6476_v7, 0.0  ;;  %v6481_v55 = vmax.f32 %v6477_v24, 0.0  ;;  %v7182_v7 = vld [vmem:[%s17492_s17 + $0x68] sm:$0xff]  ;;  %v7257_v10 = vld [vmem:[%s17492_s17 + $0x70] sm:$0xff] }
 0xb81   :  { %v15796_v9 = vpack.c.bf16 %v7182_v7, %v7181_v3  ;;  %v7333_v24 = vld [vmem:[%s17492_s17 + $0x80] sm:$0xff]  ;;  %v8410_v3 = vld [vmem:[%s12728_s7 + $0x8] sm:$0xff] }
 0xb82   :  { %14688 = vmatprep.mubr.msk.f32.mxu0 %vm512_vm2, %v6478_v12  ;;  %v7258_v12 = vld [vmem:[%s17492_s17 + $0x78] sm:$0xff]  ;;  %v8335_v33 = vld [vmem:[%s12723_s3] sm:$0xff]  ;;  %s12741_s3 = sld [smem:[%s18388_s0 + %s16501_s30]]   ;;  %s16516_s30 = smov 56  }
 0xb83   :  { %14689 = vmatmul.mubr.msk.f32.vlgmr.msra.gmra.mrb[178].mxu0 %vm512_vm2, %v6479_v59  ;;  %v15799_v59 = vpack.c.bf16 %v7258_v12, %v7257_v10  ;;  %v7597_v10 = vld [vmem:[%s17551_s21 + $0x8] sm:$0xff] }
 0xb84   :  { %14691 = vmatprep.mubr.msk.f32.mxu0 %vm512_vm2, %v6480_v5  ;;  %15779 = vmatpush3.bf16.msra.mxu0 %v15778_v28  ;;  %v7334_v5 = vld [vmem:[%s17492_s17 + $0x88] sm:$0xff]  ;;  %s12736_s17 = sld [smem:[%s18388_s0 + %s16497_s14]]   ;;  %s16512_s14 = smov 47  }
 0xb85   :  { %15780 = vmatprep.subr.bf16.mxu0 %v16462_v0 }
 0xb87   :  { %14692 = vmatmul.mubr.msk.f32.gmra.mrb[180].mxu0 %vm512_vm2, %v6481_v55  ;;  %v15802_v55 = vpack.c.bf16 %v7334_v5, %v7333_v24  ;;  %v7598_v5 = vld [vmem:[%s17551_s21 + $0x10] sm:$0xff] }
 0xb88   :  { %14733 = vmatprep.mubr.msk.f32.mxu0 %vm16480_vm4, %v16464_v29 }
 0xc56   :  { %v14690_v52 = vpop.f32.mrb[178].mxu0 }
 0xc57   :  { %v6562_v48 = vpop.f32.mrb[179].mxu0 }
 0xc58   :  { %v17445_v41 = vpack.c.bf16 %v14690_v52, %v6562_v48  ;;  %v7600_v52 = vld [vmem:[%s17551_s21 + $0x20] sm:$0xff]  ;;  %v7601_v48 = vld [vmem:[%s17551_s21 + $0x28] sm:$0xff] }
 0xc5a   :  { %v14693_v53 = vpop.f32.mrb[180].mxu0  ;;  %15773 = vmatpush3.bf16.msra.mxu1 %v17445_v41 }
 0xc5b   :  { %v6572_v54 = vpop.f32.mrb[181].mxu0  ;;  %15774 = vmatprep.subr.bf16.mxu1 %v16462_v0 }
 0xc5c   :  { %v17449_v63 = vpack.c.bf16 %v14693_v53, %v6572_v54  ;;  %v15805_v53 = vpack.c.bf16 %v7601_v48, %v7600_v52 }
 0xc5e   :  { %15776 = vmatpush3.bf16.msra.mxu1 %v17449_v63 }
 0xc5f   :  { %14792 = vmatprep.subr.mxu1 %v16464_v29 }
 0xc61   :  { %14703 = vmatmul.mubr.msk.f32.vlgmr.msra.gmra.mrb[52].mxu1 %vm1021_vm3, %v6581_v42 }
 0xc62   :  { %14705 = vmatprep.mubr.msk.f32.mxu1 %vm16480_vm4, %v16464_v29 }
 0xc65   :  { %14706 = vmatmul.mubr.msk.f32.gmra.mrb[54].mxu1 %vm1021_vm3, %v6582_v13 }
 0xc66   :  { %14708 = vmatprep.mubr.msk.f32.mxu1 %vm16480_vm4, %v16464_v29 }
 0xc69   :  { %14709 = vmatmul.mubr.msk.f32.gmra.mrb[56].mxu1 %vm1021_vm3, %v6583_v14 }
 0xc6a   :  { %14711 = vmatprep.mubr.msk.f32.mxu1 %vm16480_vm4, %v16464_v29 }
 0xc6d   :  { %14712 = vmatmul.mubr.msk.f32.gmra.mrb[58].mxu1 %vm1021_vm3, %v6584_v15 }
 0xc6e   :  { %14714 = vmatprep.mubr.msk.f32.mxu1 %vm16480_vm4, %v16464_v29 }
 0xc71   :  { %14715 = vmatmul.mubr.msk.f32.gmra.mrb[60].mxu1 %vm1021_vm3, %v6585_v17 }
 0xc72   :  { %14717 = vmatprep.mubr.msk.f32.mxu1 %vm16480_vm4, %v16464_v29 }
 0xc75   :  { %14718 = vmatmul.mubr.msk.f32.gmra.mrb[62].mxu1 %vm1021_vm3, %v6586_v19 }
 0xc76   :  { %14720 = vmatprep.mubr.msk.f32.mxu1 %vm16480_vm4, %v16464_v29 }
 0xc79   :  { %14721 = vmatmul.mubr.msk.f32.gmra.mrb[64].mxu1 %vm1021_vm3, %v6587_v20 }
 0xc7a   :  { %14723 = vmatprep.mubr.msk.f32.mxu1 %vm16480_vm4, %v16464_v29 }
 0xc7d   :  { %14724 = vmatmul.mubr.msk.f32.gmra.mrb[66].mxu1 %vm1021_vm3, %v6588_v21 }
 0xc7e   :  { %14726 = vmatprep.mubr.msk.f32.mxu1 %vm16480_vm4, %v16464_v29 }
 0xc81   :  { %14727 = vmatmul.mubr.msk.f32.gmra.mrb[68].mxu1 %vm1021_vm3, %v6589_v22 }
 0xc82   :  { %14794 = vmatprep.mubr.msk.f32.mxu1 %vm16480_vm4, %v16464_v29 }
 0xd34   :  { %v6683_v35 = vpop.f32.mrb[52].mxu1 }
 0xd35   :  { %v14704_v36 = vpop.f32.mrb[53].mxu1 }
 0xd38   :  { %v6688_v38 = vpop.f32.mrb[54].mxu1 }
 0xd39   :  { %14734 = vmatmul.mubr.msk.f32.vlgmr.msra.gmra.mrb[182].mxu0 %vm512_vm2, %v6688_v38  ;;  %v14707_v39 = vpop.f32.mrb[55].mxu1 }
 0xd3a   :  { %15782 = vmatpush3.bf16.msra.mxu0 %v15781_v37  ;;  %14740 = vmatprep.mubr.msk.f32.mxu0 %vm16480_vm4, %v16464_v29 }
 0xd3b   :  { %15783 = vmatprep.subr.bf16.mxu0 %v16462_v0 }
 0xd3c   :  { %v6693_v44 = vpop.f32.mrb[56].mxu1 }
 0xd3d   :  { %v14710_v45 = vpop.f32.mrb[57].mxu1 }
 0xd3e   :  { %v7409_v45 = vld [vmem:[%s12725_s25] sm:$0x3]  ;;  %s12739_s25 = sld [smem:[%s18388_s0 + %s16499_s22]]   ;;  %s16514_s22 = smov 48  }
 0xd40   :  { %v6698_v47 = vpop.f32.mrb[58].mxu1 }
 0xd41   :  { %14741 = vmatmul.mubr.msk.f32.vlgmr.msra.gmra.mrb[182].mxu0 %vm512_vm2, %v6683_v35  ;;  %v14713_v49 = vpop.f32.mrb[59].mxu1 }
 0xd42   :  { %15785 = vmatpush3.bf16.msra.mxu0 %v15784_v46  ;;  %14747 = vmatprep.mubr.msk.f32.mxu0 %vm16480_vm4, %v16464_v29 }
 0xd43   :  { %15786 = vmatprep.subr.bf16.mxu0 %v16462_v0 }
 0xd44   :  { %v6703_v11 = vpop.f32.mrb[60].mxu1 }
 0xd45   :  { %v14716_v18 = vpop.f32.mrb[61].mxu1 }
 0xd48   :  { %v6708_v50 = vpop.f32.mrb[62].mxu1 }
 0xd49   :  { %14748 = vmatmul.mubr.msk.f32.vlgmr.msra.gmra.mrb[182].mxu0 %vm512_vm2, %v6693_v44  ;;  %v14719_v51 = vpop.f32.mrb[63].mxu1 }
 0xd4a   :  { %15788 = vmatpush3.bf16.msra.mxu0 %v15787_v25  ;;  %14754 = vmatprep.mubr.msk.f32.mxu0 %vm16480_vm4, %v16464_v29 }
 0xd4b   :  { %15789 = vmatprep.subr.bf16.mxu0 %v16462_v0 }
 0xd4c   :  { %v6713_v8 = vpop.f32.mrb[64].mxu1 }
 0xd4d   :  { %v14722_v57 = vpop.f32.mrb[65].mxu1 }
 0xd4e   :  { %v7454_v57 = vld [vmem:[%s17565_s29 + $0x28] sm:$0xff] }
 0xd50   :  { %v6718_v16 = vpop.f32.mrb[66].mxu1 }
 0xd51   :  { %14755 = vmatmul.mubr.msk.f32.vlgmr.msra.gmra.mrb[182].mxu0 %vm512_vm2, %v6698_v47  ;;  %v14725_v61 = vpop.f32.mrb[67].mxu1 }
 0xd52   :  { %15791 = vmatpush3.bf16.msra.mxu0 %v15790_v58  ;;  %14761 = vmatprep.mubr.msk.f32.mxu0 %vm16480_vm4, %v16464_v29  ;;  %v7455_v58 = vld [vmem:[%s17565_s29 + $0x30] sm:$0xff]  ;;  %v7457_v61 = vld [vmem:[%s17565_s29 + $0x40] sm:$0xff] }
 0xd53   :  { %15792 = vmatprep.subr.bf16.mxu0 %v16462_v0 }
 0xd54   :  { %v6723_v60 = vpop.f32.mrb[68].mxu1 }
 0xd55   :  { %v14728_v34 = vpop.f32.mrb[69].mxu1 }
 0xd59   :  { %14762 = vmatmul.mubr.msk.f32.vlgmr.msra.gmra.mrb[182].mxu0 %vm512_vm2, %v6703_v11 }
 0xd5a   :  { %15794 = vmatpush3.bf16.msra.mxu0 %v15793_v1  ;;  %14768 = vmatprep.mubr.msk.f32.mxu0 %vm16480_vm4, %v16464_v29  ;;  %v8409_v1 = vld [vmem:[%s12728_s7] sm:$0xff]  ;;  %s18073_s7 = sld [smem:[%s18388_s0 + %s16502_s4]]   ;;  %s16517_s4 = smov 53  }
 0xd5b   :  { %15795 = vmatprep.subr.bf16.mxu0 %v16462_v0  ;;  %v15865_v7 = vpack.c.bf16 %v8410_v3, %v8409_v1  ;;  %v8141_v1 = vld [vmem:[%s17551_s21 + $0xe8] sm:$0xff] }
 0xd61   :  { %14769 = vmatmul.mubr.msk.f32.vlgmr.msra.gmra.mrb[182].mxu0 %vm512_vm2, %v6708_v50 }
 0xd62   :  { %15797 = vmatpush3.bf16.msra.mxu0 %v15796_v9  ;;  %14775 = vmatprep.mubr.msk.f32.mxu0 %vm16480_vm4, %v16464_v29  ;;  %v7596_v9 = vld [vmem:[%s17551_s21] sm:$0xff] }
 0xd63   :  { %15798 = vmatprep.subr.bf16.mxu0 %v16462_v0  ;;  %v15811_v24 = vpack.c.bf16 %v7597_v10, %v7596_v9  ;;  %v8143_v9 = vld [vmem:[%s17551_s21 + $0xf8] sm:$0xff] }
 0xd69   :  { %14776 = vmatmul.mubr.msk.f32.vlgmr.msra.gmra.mrb[182].mxu0 %vm512_vm2, %v6713_v8  ;;  %v7451_v8 = vld [vmem:[%s17565_s29 + $0x10] sm:$0xff] }
 0xd6a   :  { %15800 = vmatpush3.bf16.msra.mxu0 %v15799_v59  ;;  %14782 = vmatprep.mubr.msk.f32.mxu0 %vm16480_vm4, %v16464_v29 }
 0xd6b   :  { %15801 = vmatprep.subr.bf16.mxu0 %v16462_v0 }
 0xd71   :  { %14783 = vmatmul.mubr.msk.f32.vlgmr.msra.gmra.mrb[182].mxu0 %vm512_vm2, %v6718_v16  ;;  %v7456_v16 = vld [vmem:[%s17565_s29 + $0x38] sm:$0xff] }
 0xd72   :  { %15803 = vmatpush3.bf16.msra.mxu0 %v15802_v55  ;;  %14789 = vmatprep.mubr.msk.f32.mxu0 %vm16480_vm4, %v16464_v29  ;;  %v7599_v55 = vld [vmem:[%s17551_s21 + $0x18] sm:$0xff] }
 0xd73   :  { %15804 = vmatprep.subr.bf16.mxu0 %v16462_v0 }
 0xd79   :  { %14790 = vmatmul.mubr.msk.f32.vlgmr.msra.gmra.mrb[182].mxu0 %vm512_vm2, %v6723_v60  ;;  %v7603_v60 = vld [vmem:[%s17551_s21 + $0x38] sm:$0xff] }
 0xd7a   :  { %14829 = vmatprep.mubr.msk.f32.mxu0 %vm16480_vm4, %v16464_v29  ;;  %15806 = vmatpush3.bf16.msra.mxu0 %v15805_v53  ;;  %v15808_v34 = vpack.c.bf16 %v7603_v60, %v7602_v56  ;;  %v15814_v53 = vpack.c.bf16 %v7599_v55, %v7598_v5  ;;  %v8065_v56 = vld [vmem:[%s17551_s21 + $0xd8] sm:$0xff]  ;;  %v8220_v5 = vld [vmem:[%s17551_s21 + $0x110] sm:$0xff] }
 0xd7b   :  { %15807 = vmatprep.subr.bf16.mxu0 %v16462_v0  ;;  %v8221_v55 = vld [vmem:[%s17551_s21 + $0x118] sm:$0xff] }
 0xd7e   :  { %15809 = vmatpush3.bf16.msra.mxu0 %v15808_v34  ;;  %v8140_v34 = vld [vmem:[%s17551_s21 + $0xe0] sm:$0xff] }
 0xd7f   :  { %15810 = vmatprep.subr.bf16.mxu0 %v16462_v0  ;;  %v15847_v3 = vpack.c.bf16 %v8141_v1, %v8140_v34 }
 0xe4c   :  { %v7404_v54 = vpop.f32.mrb[182].mxu0 }
 0xe4d   :  { %v7410_v42 = vsel %vm1021_vm3, %v7404_v54, 0.0  ;;  %v7418_v13 = vmul.f32 %v7404_v54, %v7404_v54  ;;  %v14791_v14 = vpop.f32.mrb[183].mxu0 }
 0xe4e   :  { %v7411_v15 = vrot.slane %v7410_v42, 4 }
 0xe4f   :  { %v7419_v17 = vsel %vm1021_vm3, %v7418_v13, 0.0 }
 0xe50   :  { %v7412_v19 = vadd.f32 %v7411_v15, %v7410_v42  ;;  %v7420_v20 = vrot.slane %v7419_v17, 4  ;;  %v7751_v42 = vld [vmem:[%s17551_s21 + $0x48] sm:$0xff] }
 0xe52   :  { %v7413_v21 = vrot.slane %v7412_v19, 2  ;;  %v7421_v22 = vadd.f32 %v7420_v20, %v7419_v17  ;;  %v7752_v17 = vld [vmem:[%s17551_s21 + $0x50] sm:$0xff] }
 0xe54   :  { %v7414_v26 = vadd.f32 %v7413_v21, %v7412_v19  ;;  %v7422_v27 = vrot.slane %v7421_v22, 2  ;;  %v7753_v19 = vld [vmem:[%s17551_s21 + $0x58] sm:$0xff] }
 0xe56   :  { %v7415_v28 = vrot.slane %v7414_v26, 1  ;;  %v7423_v30 = vadd.f32 %v7422_v27, %v7421_v22  ;;  %v15820_v22 = vpack.c.bf16 %v7753_v19, %v7752_v17  ;;  %v7829_v27 = vld [vmem:[%s17551_s21 + $0x68] sm:$0xff] }
 0xe58   :  { %v7416_v32 = vadd.f32 %v7415_v28, %v7414_v26  ;;  %v7424_v35 = vrot.slane %v7423_v30, 1  ;;  %v7828_v26 = vld [vmem:[%s17551_s21 + $0x60] sm:$0xff] }
 0xe5a   :  { %v7417_v36 = vmul.f32 0.125, %v7416_v32  ;;  %v7425_v37 = vadd.f32 %v7424_v35, %v7423_v30  ;;  %v15823_v32 = vpack.c.bf16 %v7829_v27, %v7828_v26  ;;  %v7830_v35 = vld [vmem:[%s17551_s21 + $0x70] sm:$0xff] }
 0xe5c   :  { %v7426_v38 = vmul.f32 0.125, %v7425_v37  ;;  %v7427_v39 = vmul.f32 %v7417_v36, %v7417_v36 }
 0xe5e   :  { %v7428_v40 = vsub.f32 %v7426_v38, %v7427_v39 }
 0xe60   :  { %v7429_v43 = vmax.f32 %v7428_v40, 0.0  ;;  %v7906_v40 = vld [vmem:[%s17551_s21 + $0x80] sm:$0xff] }
 0xe62   :  { %v7430_v44 = vadd.f32 1e-05, %v7429_v43  ;;  %v7907_v43 = vld [vmem:[%s17551_s21 + $0x88] sm:$0xff] }
 0xe64   :  { %16432 = vrsqrt.f32 %v7430_v44 }
 0xe6e   :  { %v16433_v46 = vpop.eup %16432 }
 0xe6f   :  { %v7432_v47 = vmul.f32 %v16433_v46, %v7409_v45  ;;  %v15829_v46 = vpack.c.bf16 %v7907_v43, %v7906_v40 }
 0xe71   :  { %v7438_v49 = vmul.f32 %v7432_v47, %v7417_v36  ;;  %v7436_v62 = vrot.slane %v7432_v47, %v16732_v23  ;;  %v7831_v36 = vld [vmem:[%s17551_s21 + $0x78] sm:$0xff]  ;;  %v7908_v47 = vld [vmem:[%s17551_s21 + $0x90] sm:$0xff] }
 0xe72   :  { %v15826_v39 = vpack.c.bf16 %v7831_v36, %v7830_v35 }
 0xe73   :  { %v7440_v2 = vrot.slane %v7438_v49, 7  ;;  %v7437_v18 = vmul.f32 %v7436_v62, %v7404_v54  ;;  %v7750_v54 = vld [vmem:[%s17551_s21 + $0x40] sm:$0xff]  ;;  %v7909_v49 = vld [vmem:[%s17551_s21 + $0x98] sm:$0xff] }
 0xe74   :  { %v15817_v15 = vpack.c.bf16 %v7751_v42, %v7750_v54 }
 0xe75   :  { %v7442_v11 = vsub.f32 %v7409_v45, %v7440_v2 }
 0xe77   :  { %v7446_v25 = vrot.slane %v7442_v11, %v16735_v31  ;;  %v15832_v11 = vpack.c.bf16 %v7909_v49, %v7908_v47 }
 0xe79   :  { %v7447_v50 = vadd.f32 %v7446_v25, %v7437_v18  ;;  %v7984_v18 = vld [vmem:[%s17551_s21 + $0xa0] sm:$0xff]  ;;  %v7985_v25 = vld [vmem:[%s17551_s21 + $0xa8] sm:$0xff] }
 0xe7b   :  { %v7448_v51 = vmax.f32 %v7447_v50, 0.0 }
 0xe7d   :  { %14793 = vmatpush3.msra.mxu1 %v7448_v51 }
 0xe7e   :  { %14795 = vmatmul.mubr.msk.f32.vlgmr.msra.gmra.mrb[70].mxu1 %vm7458_vm5, %v7449_v4  ;;  %15858 = vmatprep.subr.bf16.mxu1 %v16462_v0  ;;  %v15835_v4 = vpack.c.bf16 %v7985_v25, %v7984_v18 }
 0xe7f   :  { %15860 = vmatpush3.bf16.msra.mxu1 %v17445_v41  ;;  %14797 = vmatprep.mubr.msk.f32.mxu1 %vm16480_vm4, %v16464_v29  ;;  %v7452_v41 = vld [vmem:[%s17565_s29 + $0x18] sm:$0xff] }
 0xe80   :  { %15861 = vmatprep.subr.bf16.mxu1 %v16462_v0 }
 0xe82   :  { %14798 = vmatmul.mubr.msk.f32.gmra.mrb[72].mxu1 %vm7458_vm5, %v7450_v6  ;;  %v7986_v6 = vld [vmem:[%s17551_s21 + $0xb0] sm:$0xff] }
 0xe83   :  { %15863 = vmatpush3.bf16.msra.mxu1 %v17449_v63  ;;  %14800 = vmatprep.mubr.msk.f32.mxu1 %vm16480_vm4, %v16464_v29  ;;  %v7453_v63 = vld [vmem:[%s17565_s29 + $0x20] sm:$0xff]  ;;  %s12744_s29 = sld [smem:[%s18388_s0 + %s16500_s26]]   ;;  %s16515_s26 = smov 51  }
 0xe84   :  { %15864 = vmatprep.subr.bf16.mxu1 %v16462_v0 }
 0xe86   :  { %14801 = vmatmul.mubr.msk.f32.gmra.mrb[74].mxu1 %vm7458_vm5, %v7451_v8  ;;  %v7987_v8 = vld [vmem:[%s17551_s21 + $0xb8] sm:$0xff] }
 0xe87   :  { %14803 = vmatprep.mubr.msk.f32.mxu1 %vm16480_vm4, %v16464_v29 }
 0xe8a   :  { %14804 = vmatmul.mubr.msk.f32.gmra.mrb[76].mxu1 %vm7458_vm5, %v7452_v41 }
 0xe8b   :  { %14806 = vmatprep.mubr.msk.f32.mxu1 %vm16480_vm4, %v16464_v29 }
 0xe8e   :  { %14807 = vmatmul.mubr.msk.f32.gmra.mrb[78].mxu1 %vm7458_vm5, %v7453_v63 }
 0xe8f   :  { %14809 = vmatprep.mubr.msk.f32.mxu1 %vm16480_vm4, %v16464_v29 }
 0xe92   :  { %14810 = vmatmul.mubr.msk.f32.gmra.mrb[80].mxu1 %vm7458_vm5, %v7454_v57  ;;  %v15838_v57 = vpack.c.bf16 %v7987_v8, %v7986_v6 }
 0xe93   :  { %14812 = vmatprep.mubr.msk.f32.mxu1 %vm16480_vm4, %v16464_v29 }
 0xe96   :  { %14813 = vmatmul.mubr.msk.f32.gmra.mrb[82].mxu1 %vm7458_vm5, %v7455_v58  ;;  %v8062_v58 = vld [vmem:[%s17551_s21 + $0xc0] sm:$0xff] }
 0xe97   :  { %14815 = vmatprep.mubr.msk.f32.mxu1 %vm16480_vm4, %v16464_v29 }
 0xe9a   :  { %14816 = vmatmul.mubr.msk.f32.gmra.mrb[84].mxu1 %vm7458_vm5, %v7456_v16  ;;  %v8063_v16 = vld [vmem:[%s17551_s21 + $0xc8] sm:$0xff] }
 0xe9b   :  { %14818 = vmatprep.mubr.msk.f32.mxu1 %vm16480_vm4, %v16464_v29 }
 0xe9e   :  { %14819 = vmatmul.mubr.msk.f32.gmra.mrb[86].mxu1 %vm7458_vm5, %v7457_v61  ;;  %v15841_v61 = vpack.c.bf16 %v8063_v16, %v8062_v58 }
 0xe9f   :  { %14928 = vmatprep.mubr.msk.f32.mxu1 %vm16480_vm4, %v16464_v29 }
 0xea2   :  { %14929 = vmatmul.mubr.msk.f32.vlgmr.msra.gmra.mrb[88].mxu1 %vm1021_vm3, %v8335_v33  ;;  %v8064_v33 = vld [vmem:[%s17551_s21 + $0xd0] sm:$0xff] }
 0xea3   :  { %14935 = vmatprep.mubr.msk.f32.mxu1 %vm16480_vm4, %v16464_v29  ;;  %15866 = vmatpush3.bf16.msra.mxu1 %v15865_v7  ;;  %v15844_v60 = vpack.c.bf16 %v8065_v56, %v8064_v33  ;;  %v8142_v7 = vld [vmem:[%s17551_s21 + $0xf0] sm:$0xff] }
 0xea4   :  { %14938 = vmatprep.subr.mxu1 %v16464_v29  ;;  %v15850_v10 = vpack.c.bf16 %v8143_v9, %v8142_v7 }
 0xf51   :  { %v7552_v12 = vpop.f32.mrb[70].mxu1 }
 0xf52   :  { %v14796_v59 = vpop.f32.mrb[71].mxu1 }
 0xf53   :  { %v8219_v59 = vld [vmem:[%s17551_s21 + $0x108] sm:$0xff] }
 0xf55   :  { %v7557_v52 = vpop.f32.mrb[72].mxu1 }
 0xf56   :  { %14830 = vmatmul.mubr.msk.f32.vlgmr.msra.gmra.mrb[184].mxu0 %vm1021_vm3, %v7557_v52  ;;  %v14799_v48 = vpop.f32.mrb[73].mxu1  ;;  %v15856_v52 = vpack.c.bf16 %v8221_v55, %v8220_v5 }
 0xf57   :  { %15812 = vmatpush3.bf16.msra.mxu0 %v15811_v24  ;;  %14840 = vmatprep.mubr.msk.f32.mxu0 %vm16480_vm4, %v16464_v29 }
 0xf58   :  { %15813 = vmatprep.subr.bf16.mxu0 %v16462_v0 }
 0xf59   :  { %v7562_v13 = vpop.f32.mrb[74].mxu1 }
 0xf5a   :  { %v14802_v14 = vpop.f32.mrb[75].mxu1 }
 0xf5b   :  { %15815 = vmatpush3.bf16.msra.mxu0 %v15814_v53 }
 0xf5c   :  { %15816 = vmatprep.subr.bf16.mxu0 %v16462_v0 }
 0xf5d   :  { %v7567_v20 = vpop.f32.mrb[76].mxu1 }
 0xf5e   :  { %14841 = vmatmul.mubr.msk.f32.vlgmr.msra.gmra.mrb[184].mxu0 %vm1021_vm3, %v7552_v12  ;;  %v14805_v21 = vpop.f32.mrb[77].mxu1  ;;  %v8218_v12 = vld [vmem:[%s17551_s21 + $0x100] sm:$0xff]  ;;  %s18009_s21 = sld [smem:[%s18388_s0 + %s16498_s18]]   ;;  %s16513_s18 = smov 52  }
 0xf5f   :  { %15818 = vmatpush3.bf16.msra.mxu0 %v15817_v15  ;;  %14851 = vmatprep.mubr.msk.f32.mxu0 %vm16480_vm4, %v16464_v29  ;;  %v15853_v24 = vpack.c.bf16 %v8219_v59, %v8218_v12 }
 0xf60   :  { %15819 = vmatprep.subr.bf16.mxu0 %v16462_v0 }
 0xf61   :  { %v7572_v28 = vpop.f32.mrb[78].mxu1 }
 0xf62   :  { %v14808_v30 = vpop.f32.mrb[79].mxu1 }
 0xf63   :  { %15821 = vmatpush3.bf16.msra.mxu0 %v15820_v22 }
 0xf64   :  { %15822 = vmatprep.subr.bf16.mxu0 %v16462_v0 }
 0xf65   :  { %v7577_v37 = vpop.f32.mrb[80].mxu1 }
 0xf66   :  { %14852 = vmatmul.mubr.msk.f32.vlgmr.msra.gmra.mrb[184].mxu0 %vm1021_vm3, %v7562_v13  ;;  %v14811_v38 = vpop.f32.mrb[81].mxu1 }
 0xf67   :  { %15824 = vmatpush3.bf16.msra.mxu0 %v15823_v32  ;;  %14862 = vmatprep.mubr.msk.f32.mxu0 %vm16480_vm4, %v16464_v29 }
 0xf68   :  { %15825 = vmatprep.subr.bf16.mxu0 %v16462_v0 }
 0xf69   :  { %v7582_v44 = vpop.f32.mrb[82].mxu1 }
 0xf6a   :  { %v14814_v45 = vpop.f32.mrb[83].mxu1 }
 0xf6b   :  { %15827 = vmatpush3.bf16.msra.mxu0 %v15826_v39 }
 0xf6c   :  { %15828 = vmatprep.subr.bf16.mxu0 %v16462_v0 }
 0xf6d   :  { %v7587_v62 = vpop.f32.mrb[84].mxu1 }
 0xf6e   :  { %14863 = vmatmul.mubr.msk.f32.vlgmr.msra.gmra.mrb[184].mxu0 %vm1021_vm3, %v7567_v20  ;;  %v14817_v2 = vpop.f32.mrb[85].mxu1 }
 0xf6f   :  { %15830 = vmatpush3.bf16.msra.mxu0 %v15829_v46  ;;  %14873 = vmatprep.mubr.msk.f32.mxu0 %vm16480_vm4, %v16464_v29 }
 0xf70   :  { %15831 = vmatprep.subr.bf16.mxu0 %v16462_v0 }
 0xf71   :  { %v7592_v50 = vpop.f32.mrb[86].mxu1 }
 0xf72   :  { %v14820_v51 = vpop.f32.mrb[87].mxu1 }
 0xf73   :  { %15833 = vmatpush3.bf16.msra.mxu0 %v15832_v11 }
 0xf74   :  { %15834 = vmatprep.subr.bf16.mxu0 %v16462_v0 }
 0xf75   :  { %v8405_v41 = vpop.f32.mrb[88].mxu1 }
 0xf76   :  { %14874 = vmatmul.mubr.msk.f32.vlgmr.msra.gmra.mrb[184].mxu0 %vm1021_vm3, %v7572_v28  ;;  %14936 = vmatmul.mubr.msk.f32.vlgmr.msra.gmra.mrb[90].mxu1 %vm512_vm2, %v8405_v41  ;;  %v14930_v63 = vpop.f32.mrb[89].mxu1 }
 0xf77   :  { %15836 = vmatpush3.bf16.msra.mxu0 %v15835_v4  ;;  %14884 = vmatprep.mubr.msk.f32.mxu0 %vm16480_vm4, %v16464_v29 }
 0xf78   :  { %15837 = vmatprep.subr.bf16.mxu0 %v16462_v0  ;;  %14940 = vmatprep.mubr.msk.f32.mxu1 %vm16480_vm4, %v16464_v29 }
 0xf7b   :  { %15839 = vmatpush3.bf16.msra.mxu0 %v15838_v57 }
 0xf7c   :  { %15840 = vmatprep.subr.bf16.mxu0 %v16462_v0 }
 0xf7e   :  { %14885 = vmatmul.mubr.msk.f32.vlgmr.msra.gmra.mrb[184].mxu0 %vm1021_vm3, %v7577_v37 }
 0xf7f   :  { %15842 = vmatpush3.bf16.msra.mxu0 %v15841_v61  ;;  %14895 = vmatprep.mubr.msk.f32.mxu0 %vm16480_vm4, %v16464_v29 }
 0xf80   :  { %15843 = vmatprep.subr.bf16.mxu0 %v16462_v0 }
 0xf83   :  { %15845 = vmatpush3.bf16.msra.mxu0 %v15844_v60  ;;  %v8484_v60 = vld [vmem:[%s12729_s11] sm:$0x3]  ;;  %s12737_s11 = sld [smem:[%s18388_s0 + %s16503_s8]]   ;;  %s16518_s8 = smov 54  }
 0xf84   :  { %15846 = vmatprep.subr.bf16.mxu0 %v16462_v0 }
 0xf86   :  { %14896 = vmatmul.mubr.msk.f32.vlgmr.msra.gmra.mrb[184].mxu0 %vm1021_vm3, %v7582_v44 }
 0xf87   :  { %15848 = vmatpush3.bf16.msra.mxu0 %v15847_v3  ;;  %14906 = vmatprep.mubr.msk.f32.mxu0 %vm16480_vm4, %v16464_v29  ;;  %v8296_v3 = vld [vmem:[%s12727_s15] sm:$0x3]  ;;  %s12748_s15 = sld [smem:[%s18388_s0 + %s16504_s12]]   ;;  %s16519_s12 = smov 49  }
 0xf88   :  { %15849 = vmatprep.subr.bf16.mxu0 %v16462_v0 }
 0xf8b   :  { %15851 = vmatpush3.bf16.msra.mxu0 %v15850_v10 }
 0xf8c   :  { %15852 = vmatprep.subr.bf16.mxu0 %v16462_v0 }
 0xf8e   :  { %14907 = vmatmul.mubr.msk.f32.vlgmr.msra.gmra.mrb[184].mxu0 %vm1021_vm3, %v7587_v62 }
 0xf8f   :  { %15854 = vmatpush3.bf16.msra.mxu0 %v15853_v24  ;;  %14917 = vmatprep.mubr.msk.f32.mxu0 %vm16480_vm4, %v16464_v29 }
 0xf90   :  { %15855 = vmatprep.subr.bf16.mxu0 %v16462_v0 }
 0xf93   :  { %15857 = vmatpush3.bf16.msra.mxu0 %v15856_v52 }
 0xf94   :  { %15066 = vmatprep.subr.mxu0 %v16464_v29 }
 0xf96   :  { %14918 = vmatmul.mubr.msk.f32.vlgmr.msra.gmra.mrb[184].mxu0 %vm1021_vm3, %v7592_v50 }
 0xf97   :  { %15068 = vmatprep.mubr.msk.f32.mxu0 %vm16480_vm4, %v16464_v29 }
0x1049   :  { %v17700_v48 = vpop.f32.mrb[90].mxu1 }
0x104a   :  { %v8485_v53 = vsel %vm1021_vm3, %v17700_v48, 0.0  ;;  %v8493_v54 = vmul.f32 %v17700_v48, %v17700_v48  ;;  %v14937_v42 = vpop.f32.mrb[91].mxu1 }
0x104b   :  { %v8486_v13 = vrot.slane %v8485_v53, 4 }
0x104c   :  { %v8494_v14 = vsel %vm1021_vm3, %v8493_v54, 0.0 }
0x104d   :  { %v8487_v15 = vadd.f32 %v8486_v13, %v8485_v53  ;;  %v8495_v17 = vrot.slane %v8494_v14, 4 }
0x104f   :  { %v8488_v19 = vrot.slane %v8487_v15, 2  ;;  %v8496_v20 = vadd.f32 %v8495_v17, %v8494_v14  ;;  %v8675_v17 = vld [vmem:[%s17718_s19 + $0x20] sm:$0xff] }
0x1051   :  { %v8489_v21 = vadd.f32 %v8488_v19, %v8487_v15  ;;  %v8497_v22 = vrot.slane %v8496_v20, 2  ;;  %v8676_v19 = vld [vmem:[%s17718_s19 + $0x28] sm:$0xff] }
0x1053   :  { %v8490_v26 = vrot.slane %v8489_v21, 1  ;;  %v8498_v27 = vadd.f32 %v8497_v22, %v8496_v20  ;;  %v8525_v22 = vld [vmem:[%s17726_s23] sm:$0xff] }
0x1055   :  { %v8491_v28 = vadd.f32 %v8490_v26, %v8489_v21  ;;  %v8499_v30 = vrot.slane %v8498_v27, 1  ;;  %v15868_v26 = vpack.c.bf16 %v8676_v19, %v8675_v17 }
0x1057   :  { %v8492_v32 = vmul.f32 0.125, %v8491_v28  ;;  %v8500_v35 = vadd.f32 %v8499_v30, %v8498_v27  ;;  %v8527_v27 = vld [vmem:[%s17726_s23 + $0x10] sm:$0xff]  ;;  %v8528_v28 = vld [vmem:[%s17726_s23 + $0x18] sm:$0xff]  ;;  %v8529_v30 = vld [vmem:[%s17726_s23 + $0x20] sm:$0xff] }
0x1059   :  { %v8501_v36 = vmul.f32 0.125, %v8500_v35  ;;  %v8502_v37 = vmul.f32 %v8492_v32, %v8492_v32  ;;  %v8531_v35 = vld [vmem:[%s17726_s23 + $0x30] sm:$0xff] }
0x105b   :  { %v8503_v39 = vsub.f32 %v8501_v36, %v8502_v37  ;;  %v8532_v36 = vld [vmem:[%s17726_s23 + $0x38] sm:$0xff]  ;;  %v8533_v37 = vld [vmem:[%s17726_s23 + $0x40] sm:$0xff] }
0x105d   :  { %v8504_v62 = vmax.f32 %v8503_v39, 0.0  ;;  %v8678_v39 = vld [vmem:[%s17718_s19 + $0x38] sm:$0xff] }
0x105f   :  { %v8505_v50 = vadd.f32 1e-05, %v8504_v62  ;;  %v8674_v62 = vld [vmem:[%s17718_s19 + $0x18] sm:$0xff] }
0x1061   :  { %16434 = vrsqrt.f32 %v8505_v50  ;;  %v8826_v50 = vld [vmem:[%s17718_s19 + $0x48] sm:$0xff] }
0x1069   :  { %v8291_v38 = vpop.f32.mrb[184].mxu0 }
0x106a   :  { %v8297_v40 = vsel %vm1021_vm3, %v8291_v38, 0.0  ;;  %v8305_v43 = vmul.f32 %v8291_v38, %v8291_v38  ;;  %v14919_v44 = vpop.f32.mrb[185].mxu0 }
0x106b   :  { %v8298_v45 = vrot.slane %v8297_v40, 4  ;;  %v16435_v33 = vpop.eup %16434  ;;  %v8672_v44 = vld [vmem:[%s17718_s19 + $0x8] sm:$0xff] }
0x106c   :  { %v8306_v46 = vsel %vm1021_vm3, %v8305_v43, 0.0  ;;  %v8507_v34 = vmul.f32 %v16435_v33, %v8484_v60  ;;  %v8671_v43 = vld [vmem:[%s17718_s19] sm:$0xff] }
0x106d   :  { %v8299_v47 = vadd.f32 %v8298_v45, %v8297_v40  ;;  %v8307_v49 = vrot.slane %v8306_v46, 4 }
0x106e   :  { %v8513_v1 = vmul.f32 %v8507_v34, %v8492_v32  ;;  %v8511_v55 = vrot.slane %v8507_v34, %v16732_v23  ;;  %v8530_v32 = vld [vmem:[%s17726_s23 + $0x28] sm:$0xff]  ;;  %v8905_v34 = vld [vmem:[%s17718_s19 + $0x70] sm:$0xff] }
0x106f   :  { %v8300_v2 = vrot.slane %v8299_v47, 2  ;;  %v8308_v11 = vadd.f32 %v8307_v49, %v8306_v46  ;;  %v8673_v49 = vld [vmem:[%s17718_s19 + $0x10] sm:$0xff] }
0x1070   :  { %v8515_v7 = vrot.slane %v8513_v1, 7  ;;  %v8512_v13 = vmul.f32 %v8511_v55, %v17700_v48  ;;  %v8526_v48 = vld [vmem:[%s17726_s23 + $0x8] sm:$0xff]  ;;  %v8906_v1 = vld [vmem:[%s17718_s19 + $0x78] sm:$0xff]  ;;  %v8983_v55 = vld [vmem:[%s17718_s19 + $0x90] sm:$0xff]  ;;  %s12743_s23 = sld [smem:[%s18388_s0 + %s16506_s20]]   ;;  %s16521_s20 = smov 55  }
0x1071   :  { %v8301_v18 = vadd.f32 %v8300_v2, %v8299_v47  ;;  %v8309_v25 = vrot.slane %v8308_v11, 2  ;;  %v15874_v47 = vpack.c.bf16 %v8672_v44, %v8671_v43  ;;  %v9218_v43 = vld [vmem:[%s17718_s19 + $0xf8] sm:$0xff] }
0x1072   :  { %v8517_v59 = vsub.f32 %v8484_v60, %v8515_v7 }
0x1073   :  { %v8302_v51 = vrot.slane %v8301_v18, 1  ;;  %v8310_v4 = vadd.f32 %v8309_v25, %v8308_v11  ;;  %v8825_v25 = vld [vmem:[%s17718_s19 + $0x40] sm:$0xff] }
0x1074   :  { %v8521_v53 = vrot.slane %v8517_v59, %v16735_v31 }
0x1075   :  { %v8303_v6 = vadd.f32 %v8302_v51, %v8301_v18  ;;  %v8311_v8 = vrot.slane %v8310_v4, 1  ;;  %v15877_v18 = vpack.c.bf16 %v8674_v62, %v8673_v49  ;;  %v9295_v49 = vld [vmem:[%s17718_s19 + $0x110] sm:$0xff]  ;;  %v9296_v62 = vld [vmem:[%s17718_s19 + $0x118] sm:$0xff] }
0x1076   :  { %v8522_v15 = vadd.f32 %v8521_v53, %v8512_v13  ;;  %v9059_v13 = vld [vmem:[%s17718_s19 + $0xa0] sm:$0xff] }
0x1077   :  { %v8304_v41 = vmul.f32 0.125, %v8303_v6  ;;  %v8312_v63 = vadd.f32 %v8311_v8, %v8310_v4  ;;  %v15880_v6 = vpack.c.bf16 %v8826_v50, %v8825_v25  ;;  %v8827_v8 = vld [vmem:[%s17718_s19 + $0x50] sm:$0xff] }
0x1079   :  { %v8313_v57 = vmul.f32 0.125, %v8312_v63  ;;  %v8314_v58 = vmul.f32 %v8304_v41, %v8304_v41 }
0x107b   :  { %v8315_v16 = vsub.f32 %v8313_v57, %v8314_v58 }
0x107d   :  { %v8316_v61 = vmax.f32 %v8315_v16, 0.0  ;;  %v8903_v16 = vld [vmem:[%s17718_s19 + $0x60] sm:$0xff] }
0x107f   :  { %v8317_v56 = vadd.f32 1e-05, %v8316_v61  ;;  %v8904_v61 = vld [vmem:[%s17718_s19 + $0x68] sm:$0xff] }
0x1080   :  { %v15886_v60 = vpack.c.bf16 %v8904_v61, %v8903_v16 }
0x1081   :  { %16436 = vrsqrt.f32 %v8317_v56 }
0x108b   :  { %v16437_v9 = vpop.eup %16436 }
0x108c   :  { %v8319_v10 = vmul.f32 %v16437_v9, %v8296_v3  ;;  %v15889_v9 = vpack.c.bf16 %v8906_v1, %v8905_v34 }
0x108e   :  { %v8325_v12 = vmul.f32 %v8319_v10, %v8304_v41  ;;  %v8323_v24 = vrot.slane %v8319_v10, %v16732_v23  ;;  %v8828_v41 = vld [vmem:[%s17718_s19 + $0x58] sm:$0xff]  ;;  %v8981_v10 = vld [vmem:[%s17718_s19 + $0x80] sm:$0xff] }
0x108f   :  { %v15883_v58 = vpack.c.bf16 %v8828_v41, %v8827_v8 }
0x1090   :  { %v8327_v5 = vrot.slane %v8325_v12, 7  ;;  %v8324_v54 = vmul.f32 %v8323_v24, %v8291_v38  ;;  %v8677_v38 = vld [vmem:[%s17718_s19 + $0x30] sm:$0xff]  ;;  %v8982_v12 = vld [vmem:[%s17718_s19 + $0x88] sm:$0xff] }
0x1091   :  { %v15871_v40 = vpack.c.bf16 %v8678_v39, %v8677_v38  ;;  %v9216_v38 = vld [vmem:[%s17718_s19 + $0xe8] sm:$0xff] }
0x1092   :  { %v8329_v52 = vsub.f32 %v8296_v3, %v8327_v5  ;;  %v15892_v5 = vpack.c.bf16 %v8982_v12, %v8981_v10  ;;  %v9371_v12 = vld [vmem:[%s12733_s27] sm:$0x3]  ;;  %s12746_s27 = sld [smem:[%s18388_s0 + %s16507_s24]]   ;;  %s16522_s24 = smov 60  }
0x1094   :  { %v8333_v42 = vrot.slane %v8329_v52, %v16735_v31  ;;  %v8984_v52 = vld [vmem:[%s17718_s19 + $0x98] sm:$0xff] }
0x1096   :  { %v8334_v14 = vadd.f32 %v8333_v42, %v8324_v54  ;;  %v15895_v42 = vpack.c.bf16 %v8984_v52, %v8983_v55 }
0x1098   :  { %v17732_v20 = vadd.f32 %v8522_v15, %v8334_v14  ;;  %v9060_v14 = vld [vmem:[%s17718_s19 + $0xa8] sm:$0xff] }
0x1099   :  { %v15898_v19 = vpack.c.bf16 %v9060_v14, %v9059_v13  ;;  %v9561_v13 = vld [vmem:[%s17861_s1 + $0x20] sm:$0xff]  ;;  %v9562_v14 = vld [vmem:[%s17861_s1 + $0x28] sm:$0xff] }
0x109a   :  { %v8524_v21 = vmax.f32 %v17732_v20, 0.0  ;;  %v10480_v20 = vld [vmem:[%s18009_s21 + $0xa0] sm:$0xff] }
0x109c   :  { %14939 = vmatpush3.msra.mxu1 %v8524_v21 }
0x109d   :  { %14941 = vmatmul.mubr.msk.f32.vlgmr.msra.gmra.mrb[92].mxu1 %vm7458_vm5, %v8525_v22  ;;  %15867 = vmatprep.subr.bf16.mxu1 %v16462_v0  ;;  %v9061_v22 = vld [vmem:[%s17718_s19 + $0xb0] sm:$0xff] }
0x109e   :  { %14943 = vmatprep.mubr.msk.f32.mxu1 %vm16480_vm4, %v16464_v29  ;;  %15869 = vmatpush3.bf16.msra.mxu1 %v15868_v26  ;;  %v9062_v26 = vld [vmem:[%s17718_s19 + $0xb8] sm:$0xff] }
0x109f   :  { %15870 = vmatprep.subr.bf16.mxu1 %v16462_v0 }
0x10a1   :  { %14944 = vmatmul.mubr.msk.f32.gmra.mrb[94].mxu1 %vm7458_vm5, %v8526_v48  ;;  %v15901_v48 = vpack.c.bf16 %v9062_v26, %v9061_v22  ;;  %v15922_v22 = vpack.c.bf16 %v9562_v14, %v9561_v13  ;;  %v9412_v26 = vld [vmem:[%s17867_s5 + $0x8] sm:$0xff] }
0x10a2   :  { %14946 = vmatprep.mubr.msk.f32.mxu1 %vm16480_vm4, %v16464_v29  ;;  %15872 = vmatpush3.bf16.msra.mxu1 %v15871_v40  ;;  %v9217_v40 = vld [vmem:[%s17718_s19 + $0xf0] sm:$0xff]  ;;  %v9946_v13 = vld [vmem:[%s17861_s1 + $0xa8] sm:$0xff] }
0x10a3   :  { %15873 = vmatprep.subr.bf16.mxu1 %v16462_v0  ;;  %v15913_v44 = vpack.c.bf16 %v9218_v43, %v9217_v40  ;;  %v9557_v40 = vld [vmem:[%s17861_s1] sm:$0xff]  ;;  %v9558_v43 = vld [vmem:[%s17861_s1 + $0x8] sm:$0xff] }
0x10a5   :  { %14947 = vmatmul.mubr.msk.f32.gmra.mrb[96].mxu1 %vm7458_vm5, %v8527_v27  ;;  %v9137_v27 = vld [vmem:[%s17718_s19 + $0xc0] sm:$0xff] }
0x10a6   :  { %14949 = vmatprep.mubr.msk.f32.mxu1 %vm16480_vm4, %v16464_v29 }
0x10a9   :  { %14950 = vmatmul.mubr.msk.f32.gmra.mrb[98].mxu1 %vm7458_vm5, %v8528_v28  ;;  %v9138_v28 = vld [vmem:[%s17718_s19 + $0xc8] sm:$0xff] }
0x10aa   :  { %14952 = vmatprep.mubr.msk.f32.mxu1 %vm16480_vm4, %v16464_v29 }
0x10ad   :  { %14953 = vmatmul.mubr.msk.f32.gmra.mrb[100].mxu1 %vm7458_vm5, %v8529_v30  ;;  %v15904_v30 = vpack.c.bf16 %v9138_v28, %v9137_v27  ;;  %v9414_v27 = vld [vmem:[%s17867_s5 + $0x18] sm:$0xff]  ;;  %v9415_v28 = vld [vmem:[%s17867_s5 + $0x20] sm:$0xff] }
0x10ae   :  { %14955 = vmatprep.mubr.msk.f32.mxu1 %vm16480_vm4, %v16464_v29 }
0x10b1   :  { %14956 = vmatmul.mubr.msk.f32.gmra.mrb[102].mxu1 %vm7458_vm5, %v8530_v32  ;;  %v9139_v32 = vld [vmem:[%s17718_s19 + $0xd0] sm:$0xff] }
0x10b2   :  { %14958 = vmatprep.mubr.msk.f32.mxu1 %vm16480_vm4, %v16464_v29 }
0x10b5   :  { %14959 = vmatmul.mubr.msk.f32.gmra.mrb[104].mxu1 %vm7458_vm5, %v8531_v35  ;;  %v9140_v35 = vld [vmem:[%s17718_s19 + $0xd8] sm:$0xff] }
0x10b6   :  { %14961 = vmatprep.mubr.msk.f32.mxu1 %vm16480_vm4, %v16464_v29 }
0x10b9   :  { %14962 = vmatmul.mubr.msk.f32.gmra.mrb[106].mxu1 %vm7458_vm5, %v8532_v36  ;;  %v15907_v36 = vpack.c.bf16 %v9140_v35, %v9139_v32  ;;  %v9417_v32 = vld [vmem:[%s17867_s5 + $0x30] sm:$0xff]  ;;  %v9418_v35 = vld [vmem:[%s17867_s5 + $0x38] sm:$0xff] }
0x10ba   :  { %14964 = vmatprep.mubr.msk.f32.mxu1 %vm16480_vm4, %v16464_v29 }
0x10bd   :  { %14965 = vmatmul.mubr.msk.f32.gmra.mrb[108].mxu1 %vm7458_vm5, %v8533_v37  ;;  %v9215_v37 = vld [vmem:[%s17718_s19 + $0xe0] sm:$0xff] }
0x10be   :  { %14975 = vmatprep.mubr.msk.f32.mxu1 %vm16480_vm4, %v16464_v29  ;;  %v15910_v39 = vpack.c.bf16 %v9216_v38, %v9215_v37  ;;  %v9563_v37 = vld [vmem:[%s17861_s1 + $0x30] sm:$0xff]  ;;  %v9564_v38 = vld [vmem:[%s17861_s1 + $0x38] sm:$0xff] }
0x1170   :  { %v8627_v45 = vpop.f32.mrb[92].mxu1 }
0x1171   :  { %v14942_v46 = vpop.f32.mrb[93].mxu1 }
0x1172   :  { %v9294_v46 = vld [vmem:[%s17718_s19 + $0x108] sm:$0xff] }
0x1174   :  { %v8632_v2 = vpop.f32.mrb[94].mxu1 }
0x1175   :  { %14976 = vmatmul.mubr.msk.f32.vlgmr.msra.gmra.mrb[110].mxu1 %vm1021_vm3, %v8632_v2  ;;  %v14945_v11 = vpop.f32.mrb[95].mxu1  ;;  %v15919_v2 = vpack.c.bf16 %v9296_v62, %v9295_v49  ;;  %v9560_v49 = vld [vmem:[%s17861_s1 + $0x18] sm:$0xff] }
0x1176   :  { %15875 = vmatpush3.bf16.msra.mxu1 %v15874_v47  ;;  %14986 = vmatprep.mubr.msk.f32.mxu1 %vm16480_vm4, %v16464_v29 }
0x1177   :  { %15876 = vmatprep.subr.bf16.mxu1 %v16462_v0 }
0x1178   :  { %v8637_v51 = vpop.f32.mrb[96].mxu1 }
0x1179   :  { %v14948_v4 = vpop.f32.mrb[97].mxu1 }
0x117a   :  { %15878 = vmatpush3.bf16.msra.mxu1 %v15877_v18 }
0x117b   :  { %15879 = vmatprep.subr.bf16.mxu1 %v16462_v0 }
0x117c   :  { %v8642_v63 = vpop.f32.mrb[98].mxu1 }
0x117d   :  { %14987 = vmatmul.mubr.msk.f32.vlgmr.msra.gmra.mrb[110].mxu1 %vm1021_vm3, %v8627_v45  ;;  %v14951_v57 = vpop.f32.mrb[99].mxu1  ;;  %v9293_v45 = vld [vmem:[%s17718_s19 + $0x100] sm:$0xff]  ;;  %s12745_s19 = sld [smem:[%s18388_s0 + %s16505_s16]]   ;;  %s16520_s16 = smov 57  }
0x117e   :  { %15881 = vmatpush3.bf16.msra.mxu1 %v15880_v6  ;;  %14997 = vmatprep.mubr.msk.f32.mxu1 %vm16480_vm4, %v16464_v29  ;;  %v15916_v47 = vpack.c.bf16 %v9294_v46, %v9293_v45  ;;  %v15928_v46 = vpack.c.bf16 %v9558_v43, %v9557_v40  ;;  %v10104_v40 = vld [vmem:[%s17861_s1 + $0xf8] sm:$0xff] }
0x117f   :  { %15882 = vmatprep.subr.bf16.mxu1 %v16462_v0 }
0x1180   :  { %v8647_v33 = vpop.f32.mrb[100].mxu1 }
0x1181   :  { %v14954_v56 = vpop.f32.mrb[101].mxu1 }
0x1182   :  { %15884 = vmatpush3.bf16.msra.mxu1 %v15883_v58 }
0x1183   :  { %15885 = vmatprep.subr.bf16.mxu1 %v16462_v0 }
0x1184   :  { %v8652_v3 = vpop.f32.mrb[102].mxu1 }
0x1185   :  { %14998 = vmatmul.mubr.msk.f32.vlgmr.msra.gmra.mrb[110].mxu1 %vm1021_vm3, %v8637_v51  ;;  %v14957_v7 = vpop.f32.mrb[103].mxu1 }
0x1186   :  { %15887 = vmatpush3.bf16.msra.mxu1 %v15886_v60  ;;  %15008 = vmatprep.mubr.msk.f32.mxu1 %vm16480_vm4, %v16464_v29 }
0x1187   :  { %15888 = vmatprep.subr.bf16.mxu1 %v16462_v0 }
0x1188   :  { %v8657_v59 = vpop.f32.mrb[104].mxu1 }
0x1189   :  { %v14960_v24 = vpop.f32.mrb[105].mxu1 }
0x118a   :  { %15890 = vmatpush3.bf16.msra.mxu1 %v15889_v9 }
0x118b   :  { %15891 = vmatprep.subr.bf16.mxu1 %v16462_v0 }
0x118c   :  { %v8662_v53 = vpop.f32.mrb[106].mxu1 }
0x118d   :  { %15009 = vmatmul.mubr.msk.f32.vlgmr.msra.gmra.mrb[110].mxu1 %vm1021_vm3, %v8642_v63  ;;  %v14963_v54 = vpop.f32.mrb[107].mxu1 }
0x118e   :  { %15893 = vmatpush3.bf16.msra.mxu1 %v15892_v5  ;;  %15019 = vmatprep.mubr.msk.f32.mxu1 %vm16480_vm4, %v16464_v29 }
0x118f   :  { %15894 = vmatprep.subr.bf16.mxu1 %v16462_v0 }
0x1190   :  { %v8667_v15 = vpop.f32.mrb[108].mxu1 }
0x1191   :  { %v14966_v17 = vpop.f32.mrb[109].mxu1 }
0x1192   :  { %15896 = vmatpush3.bf16.msra.mxu1 %v15895_v42 }
0x1193   :  { %15897 = vmatprep.subr.bf16.mxu1 %v16462_v0 }
0x1195   :  { %15020 = vmatmul.mubr.msk.f32.vlgmr.msra.gmra.mrb[110].mxu1 %vm1021_vm3, %v8647_v33 }
0x1196   :  { %15899 = vmatpush3.bf16.msra.mxu1 %v15898_v19  ;;  %15030 = vmatprep.mubr.msk.f32.mxu1 %vm16480_vm4, %v16464_v29  ;;  %v9411_v19 = vld [vmem:[%s17867_s5] sm:$0xff] }
0x1197   :  { %15900 = vmatprep.subr.bf16.mxu1 %v16462_v0 }
0x119a   :  { %15902 = vmatpush3.bf16.msra.mxu1 %v15901_v48  ;;  %v9413_v48 = vld [vmem:[%s17867_s5 + $0x10] sm:$0xff] }
0x119b   :  { %15903 = vmatprep.subr.bf16.mxu1 %v16462_v0 }
0x119d   :  { %15031 = vmatmul.mubr.msk.f32.vlgmr.msra.gmra.mrb[110].mxu1 %vm1021_vm3, %v8652_v3 }
0x119e   :  { %15905 = vmatpush3.bf16.msra.mxu1 %v15904_v30  ;;  %15041 = vmatprep.mubr.msk.f32.mxu1 %vm16480_vm4, %v16464_v29  ;;  %v9416_v30 = vld [vmem:[%s17867_s5 + $0x28] sm:$0xff] }
0x119f   :  { %15906 = vmatprep.subr.bf16.mxu1 %v16462_v0 }
0x11a2   :  { %15908 = vmatpush3.bf16.msra.mxu1 %v15907_v36  ;;  %v9419_v36 = vld [vmem:[%s17867_s5 + $0x40] sm:$0xff]  ;;  %s12750_s5 = sld [smem:[%s18388_s0 + %s16509_s2]]   ;;  %s16524_s2 = smov 61  }
0x11a3   :  { %15909 = vmatprep.subr.bf16.mxu1 %v16462_v0 }
0x11a5   :  { %15042 = vmatmul.mubr.msk.f32.vlgmr.msra.gmra.mrb[110].mxu1 %vm1021_vm3, %v8657_v59 }
0x11a6   :  { %15911 = vmatpush3.bf16.msra.mxu1 %v15910_v39  ;;  %15052 = vmatprep.mubr.msk.f32.mxu1 %vm16480_vm4, %v16464_v29  ;;  %v15925_v39 = vpack.c.bf16 %v9564_v38, %v9563_v37  ;;  %v10102_v37 = vld [vmem:[%s17861_s1 + $0xe8] sm:$0xff] }
0x11a7   :  { %15912 = vmatprep.subr.bf16.mxu1 %v16462_v0 }
0x11aa   :  { %15914 = vmatpush3.bf16.msra.mxu1 %v15913_v44 }
0x11ab   :  { %15915 = vmatprep.subr.bf16.mxu1 %v16462_v0 }
0x11ad   :  { %15053 = vmatmul.mubr.msk.f32.vlgmr.msra.gmra.mrb[110].mxu1 %vm1021_vm3, %v8662_v53 }
0x11ae   :  { %15917 = vmatpush3.bf16.msra.mxu1 %v15916_v47  ;;  %15063 = vmatprep.mubr.msk.f32.mxu1 %vm16480_vm4, %v16464_v29  ;;  %v9559_v47 = vld [vmem:[%s17861_s1 + $0x10] sm:$0xff] }
0x11af   :  { %15918 = vmatprep.subr.bf16.mxu1 %v16462_v0 }
0x11b2   :  { %15920 = vmatpush3.bf16.msra.mxu1 %v15919_v2 }
0x11b3   :  { %15975 = vmatprep.subr.bf16.mxu1 %v16462_v0 }
0x11b5   :  { %15064 = vmatmul.mubr.msk.f32.vlgmr.msra.gmra.mrb[110].mxu1 %vm1021_vm3, %v8667_v15 }
0x11b6   :  { %15202 = vmatprep.mubr.msk.f32.mxu1 %vm16480_vm4, %v16464_v29 }
0x1288   :  { %v9366_v11 = vpop.f32.mrb[110].mxu1 }
0x1289   :  { %v9372_v18 = vsel %vm1021_vm3, %v9366_v11, 0.0  ;;  %v9380_v25 = vmul.f32 %v9366_v11, %v9366_v11  ;;  %v15065_v50 = vpop.f32.mrb[111].mxu1 }
0x128a   :  { %v9373_v51 = vrot.slane %v9372_v18, 4 }
0x128b   :  { %v9381_v4 = vsel %vm1021_vm3, %v9380_v25, 0.0  ;;  %v9712_v25 = vld [vmem:[%s17861_s1 + $0x48] sm:$0xff] }
0x128c   :  { %v9374_v6 = vadd.f32 %v9373_v51, %v9372_v18  ;;  %v9382_v8 = vrot.slane %v9381_v4, 4  ;;  %v9711_v18 = vld [vmem:[%s17861_s1 + $0x40] sm:$0xff] }
0x128e   :  { %v9375_v41 = vrot.slane %v9374_v6, 2  ;;  %v9383_v63 = vadd.f32 %v9382_v8, %v9381_v4  ;;  %v15934_v4 = vpack.c.bf16 %v9712_v25, %v9711_v18  ;;  %v9714_v8 = vld [vmem:[%s17861_s1 + $0x58] sm:$0xff]  ;;  %v10300_v25 = vld [vmem:[%s12738_s9 + $0x10] sm:$0xff] }
0x1290   :  { %v9376_v57 = vadd.f32 %v9375_v41, %v9374_v6  ;;  %v9384_v58 = vrot.slane %v9383_v63, 2  ;;  %v9713_v6 = vld [vmem:[%s17861_s1 + $0x50] sm:$0xff] }
0x1292   :  { %v9377_v16 = vrot.slane %v9376_v57, 1  ;;  %v9385_v61 = vadd.f32 %v9384_v58, %v9383_v63  ;;  %v9789_v58 = vld [vmem:[%s17861_s1 + $0x60] sm:$0xff] }
0x1294   :  { %v9378_v33 = vadd.f32 %v9377_v16, %v9376_v57  ;;  %v9386_v56 = vrot.slane %v9385_v61, 1  ;;  %v15937_v57 = vpack.c.bf16 %v9714_v8, %v9713_v6  ;;  %v9790_v16 = vld [vmem:[%s17861_s1 + $0x68] sm:$0xff] }
0x1296   :  { %v9379_v60 = vmul.f32 0.125, %v9378_v33  ;;  %v9387_v34 = vadd.f32 %v9386_v56, %v9385_v61  ;;  %v15940_v56 = vpack.c.bf16 %v9790_v16, %v9789_v58 }
0x1298   :  { %v9388_v1 = vmul.f32 0.125, %v9387_v34  ;;  %v9389_v3 = vmul.f32 %v9379_v60, %v9379_v60  ;;  %v9792_v34 = vld [vmem:[%s17861_s1 + $0x78] sm:$0xff] }
0x129a   :  { %v9390_v7 = vsub.f32 %v9388_v1, %v9389_v3 }
0x129c   :  { %v9391_v9 = vmax.f32 %v9390_v7, 0.0 }
0x129e   :  { %v9392_v10 = vadd.f32 1e-05, %v9391_v9  ;;  %v9867_v9 = vld [vmem:[%s17861_s1 + $0x80] sm:$0xff] }
0x12a0   :  { %16438 = vrsqrt.f32 %v9392_v10  ;;  %v9868_v10 = vld [vmem:[%s17861_s1 + $0x88] sm:$0xff] }
0x12aa   :  { %v16439_v59 = vpop.eup %16438 }
0x12ab   :  { %v9394_v24 = vmul.f32 %v16439_v59, %v9371_v12 }
0x12ad   :  { %v9400_v5 = vmul.f32 %v9394_v24, %v9379_v60  ;;  %v9398_v55 = vrot.slane %v9394_v24, %v16732_v23  ;;  %v9791_v60 = vld [vmem:[%s17861_s1 + $0x70] sm:$0xff]  ;;  %v15946_v24 = vpack.c.bf16 %v9868_v10, %v9867_v9 }
0x12ae   :  { %v15943_v7 = vpack.c.bf16 %v9792_v34, %v9791_v60 }
0x12af   :  { %v9402_v52 = vrot.slane %v9400_v5, 7  ;;  %v9399_v54 = vmul.f32 %v9398_v55, %v9366_v11  ;;  %v15931_v11 = vpack.c.bf16 %v9560_v49, %v9559_v47  ;;  %v9869_v5 = vld [vmem:[%s17861_s1 + $0x90] sm:$0xff]  ;;  %v9870_v55 = vld [vmem:[%s17861_s1 + $0x98] sm:$0xff] }
0x12b0   :  { %v10181_v47 = vld [vmem:[%s17861_s1 + $0x110] sm:$0xff]  ;;  %v10182_v49 = vld [vmem:[%s17861_s1 + $0x118] sm:$0xff] }
0x12b1   :  { %v9404_v53 = vsub.f32 %v9371_v12, %v9402_v52 }
0x12b3   :  { %v9408_v42 = vrot.slane %v9404_v53, %v16735_v31 }
0x12b5   :  { %v9409_v15 = vadd.f32 %v9408_v42, %v9399_v54  ;;  %v15949_v54 = vpack.c.bf16 %v9870_v55, %v9869_v5  ;;  %v9945_v42 = vld [vmem:[%s17861_s1 + $0xa0] sm:$0xff] }
0x12b7   :  { %v9410_v17 = vmax.f32 %v9409_v15, 0.0 }
0x12b9   :  { %15067 = vmatpush3.msra.mxu0 %v9410_v17  ;;  %v15952_v17 = vpack.c.bf16 %v9946_v13, %v9945_v42 }
0x12ba   :  { %15069 = vmatmul.mubr.msk.f32.vlgmr.msra.gmra.mrb[186].mxu0 %vm7458_vm5, %v9411_v19  ;;  %15921 = vmatprep.subr.bf16.mxu0 %v16462_v0  ;;  %v9947_v19 = vld [vmem:[%s17861_s1 + $0xb0] sm:$0xff] }
0x12bb   :  { %15071 = vmatprep.mubr.msk.f32.mxu0 %vm16480_vm4, %v16464_v29  ;;  %15923 = vmatpush3.bf16.msra.mxu0 %v15922_v22  ;;  %v9948_v22 = vld [vmem:[%s17861_s1 + $0xb8] sm:$0xff] }
0x12bc   :  { %15924 = vmatprep.subr.bf16.mxu0 %v16462_v0 }
0x12be   :  { %15072 = vmatmul.mubr.msk.f32.gmra.mrb[188].mxu0 %vm7458_vm5, %v9412_v26  ;;  %v15955_v26 = vpack.c.bf16 %v9948_v22, %v9947_v19 }
0x12bf   :  { %15074 = vmatprep.mubr.msk.f32.mxu0 %vm16480_vm4, %v16464_v29  ;;  %15926 = vmatpush3.bf16.msra.mxu0 %v15925_v39  ;;  %v10103_v39 = vld [vmem:[%s17861_s1 + $0xf0] sm:$0xff] }
0x12c0   :  { %15927 = vmatprep.subr.bf16.mxu0 %v16462_v0  ;;  %v15967_v43 = vpack.c.bf16 %v10104_v40, %v10103_v39  ;;  %v10378_v39 = vld [vmem:[%s12736_s17 + $0x18] sm:$0xff] }
0x12c2   :  { %15075 = vmatmul.mubr.msk.f32.gmra.mrb[190].mxu0 %vm7458_vm5, %v9413_v48  ;;  %v10023_v48 = vld [vmem:[%s17861_s1 + $0xc0] sm:$0xff] }
0x12c3   :  { %15077 = vmatprep.mubr.msk.f32.mxu0 %vm16480_vm4, %v16464_v29 }
0x12c6   :  { %15078 = vmatmul.mubr.msk.f32.gmra.mrb[192].mxu0 %vm7458_vm5, %v9414_v27  ;;  %v10024_v27 = vld [vmem:[%s17861_s1 + $0xc8] sm:$0xff] }
0x12c7   :  { %15080 = vmatprep.mubr.msk.f32.mxu0 %vm16480_vm4, %v16464_v29 }
0x12ca   :  { %15081 = vmatmul.mubr.msk.f32.gmra.mrb[194].mxu0 %vm7458_vm5, %v9415_v28  ;;  %v15958_v28 = vpack.c.bf16 %v10024_v27, %v10023_v48  ;;  %v10375_v27 = vld [vmem:[%s12736_s17] sm:$0xff] }
0x12cb   :  { %15083 = vmatprep.mubr.msk.f32.mxu0 %vm16480_vm4, %v16464_v29 }
0x12ce   :  { %15084 = vmatmul.mubr.msk.f32.gmra.mrb[196].mxu0 %vm7458_vm5, %v9416_v30  ;;  %v10025_v30 = vld [vmem:[%s17861_s1 + $0xd0] sm:$0xff] }
0x12cf   :  { %15086 = vmatprep.mubr.msk.f32.mxu0 %vm16480_vm4, %v16464_v29 }
0x12d2   :  { %15087 = vmatmul.mubr.msk.f32.gmra.mrb[198].mxu0 %vm7458_vm5, %v9417_v32  ;;  %v10026_v32 = vld [vmem:[%s17861_s1 + $0xd8] sm:$0xff] }
0x12d3   :  { %15089 = vmatprep.mubr.msk.f32.mxu0 %vm16480_vm4, %v16464_v29 }
0x12d6   :  { %15090 = vmatmul.mubr.msk.f32.gmra.mrb[200].mxu0 %vm7458_vm5, %v9418_v35  ;;  %v15961_v35 = vpack.c.bf16 %v10026_v32, %v10025_v30  ;;  %v10376_v30 = vld [vmem:[%s12736_s17 + $0x8] sm:$0xff] }
0x12d7   :  { %15092 = vmatprep.mubr.msk.f32.mxu0 %vm16480_vm4, %v16464_v29 }
0x12da   :  { %15093 = vmatmul.mubr.msk.f32.gmra.mrb[202].mxu0 %vm7458_vm5, %v9419_v36  ;;  %v10101_v36 = vld [vmem:[%s17861_s1 + $0xe0] sm:$0xff] }
0x12db   :  { %15103 = vmatprep.mubr.msk.f32.mxu0 %vm16480_vm4, %v16464_v29  ;;  %v15964_v38 = vpack.c.bf16 %v10102_v37, %v10101_v36  ;;  %v10377_v36 = vld [vmem:[%s12736_s17 + $0x10] sm:$0xff]  ;;  %s12751_s17 = sld [smem:[%s18388_s0 + %s16512_s14]]   ;;  %s16527_s14 = smov 63  }
0x12dc   :  { %v10482_v37 = vld [vmem:[%s18009_s21 + $0xb0] sm:$0xff] }
0x138d   :  { %v9513_v44 = vpop.f32.mrb[186].mxu0 }
0x138e   :  { %v15070_v45 = vpop.f32.mrb[187].mxu0 }
0x138f   :  { %v10180_v45 = vld [vmem:[%s17861_s1 + $0x108] sm:$0xff] }
0x1391   :  { %v9518_v62 = vpop.f32.mrb[188].mxu0 }
0x1392   :  { %15104 = vmatmul.mubr.msk.f32.vlgmr.msra.gmra.mrb[204].mxu0 %vm1021_vm3, %v9518_v62  ;;  %v15073_v2 = vpop.f32.mrb[189].mxu0  ;;  %v15973_v62 = vpack.c.bf16 %v10182_v49, %v10181_v47  ;;  %v10479_v47 = vld [vmem:[%s18009_s21 + $0x98] sm:$0xff] }
0x1393   :  { %15929 = vmatpush3.bf16.msra.mxu0 %v15928_v46  ;;  %15114 = vmatprep.mubr.msk.f32.mxu0 %vm16480_vm4, %v16464_v29  ;;  %v10298_v2 = vld [vmem:[%s12738_s9] sm:$0xff] }
0x1394   :  { %15930 = vmatprep.subr.bf16.mxu0 %v16462_v0 }
0x1395   :  { %v9523_v50 = vpop.f32.mrb[190].mxu0 }
0x1396   :  { %v15076_v51 = vpop.f32.mrb[191].mxu0 }
0x1397   :  { %15932 = vmatpush3.bf16.msra.mxu0 %v15931_v11  ;;  %v10299_v11 = vld [vmem:[%s12738_s9 + $0x8] sm:$0xff] }
0x1398   :  { %15933 = vmatprep.subr.bf16.mxu0 %v16462_v0  ;;  %v15976_v18 = vpack.c.bf16 %v10299_v11, %v10298_v2  ;;  %v10630_v11 = vld [vmem:[%s18009_s21 + $0xe0] sm:$0xff] }
0x1399   :  { %v9528_v41 = vpop.f32.mrb[192].mxu0 }
0x139a   :  { %15115 = vmatmul.mubr.msk.f32.vlgmr.msra.gmra.mrb[204].mxu0 %vm1021_vm3, %v9513_v44  ;;  %v15079_v63 = vpop.f32.mrb[193].mxu0  ;;  %v10179_v44 = vld [vmem:[%s17861_s1 + $0x100] sm:$0xff]  ;;  %15977 = vmatpush3.bf16.msra.mxu1 %v15976_v18  ;;  %v10631_v18 = vld [vmem:[%s18009_s21 + $0xe8] sm:$0xff]  ;;  %s12749_s1 = sld [smem:[%s18388_s0 + %s16508_s28]]   ;;  %s16523_s28 = smov 58  }
0x139b   :  { %15935 = vmatpush3.bf16.msra.mxu0 %v15934_v4  ;;  %15125 = vmatprep.mubr.msk.f32.mxu0 %vm16480_vm4, %v16464_v29  ;;  %v15970_v46 = vpack.c.bf16 %v10180_v45, %v10179_v44  ;;  %v10477_v44 = vld [vmem:[%s18009_s21 + $0x88] sm:$0xff] }
0x139c   :  { %15936 = vmatprep.subr.bf16.mxu0 %v16462_v0  ;;  %15978 = vmatprep.subr.bf16.mxu1 %v16462_v0 }
0x139d   :  { %v9533_v61 = vpop.f32.mrb[194].mxu0 }
0x139e   :  { %v15082_v33 = vpop.f32.mrb[195].mxu0 }
0x139f   :  { %15938 = vmatpush3.bf16.msra.mxu0 %v15937_v57 }
0x13a0   :  { %15939 = vmatprep.subr.bf16.mxu0 %v16462_v0 }
0x13a1   :  { %v9538_v1 = vpop.f32.mrb[196].mxu0 }
0x13a2   :  { %15126 = vmatmul.mubr.msk.f32.vlgmr.msra.gmra.mrb[204].mxu0 %vm1021_vm3, %v9523_v50  ;;  %v15085_v3 = vpop.f32.mrb[197].mxu0  ;;  %v10301_v50 = vld [vmem:[%s12738_s9 + $0x18] sm:$0xff]  ;;  %s12747_s9 = sld [smem:[%s18388_s0 + %s16510_s6]]   ;;  %s16525_s6 = smov 62  }
0x13a3   :  { %15941 = vmatpush3.bf16.msra.mxu0 %v15940_v56  ;;  %15136 = vmatprep.mubr.msk.f32.mxu0 %vm16480_vm4, %v16464_v29  ;;  %v15979_v51 = vpack.c.bf16 %v10301_v50, %v10300_v25 }
0x13a4   :  { %15942 = vmatprep.subr.bf16.mxu0 %v16462_v0 }
0x13a5   :  { %v9543_v12 = vpop.f32.mrb[198].mxu0  ;;  %15980 = vmatpush3.bf16.msra.mxu1 %v15979_v51  ;;  %v15994_v51 = vpack.c.bf16 %v10631_v18, %v10630_v11  ;;  %v10909_v11 = vld [vmem:[%s18073_s7 + $0x118] sm:$0xff] }
0x13a6   :  { %v15088_v59 = vpop.f32.mrb[199].mxu0 }
0x13a7   :  { %15944 = vmatpush3.bf16.msra.mxu0 %v15943_v7 }
0x13a8   :  { %15945 = vmatprep.subr.bf16.mxu0 %v16462_v0 }
0x13a9   :  { %v9548_v52 = vpop.f32.mrb[200].mxu0 }
0x13aa   :  { %15137 = vmatmul.mubr.msk.f32.vlgmr.msra.gmra.mrb[204].mxu0 %vm1021_vm3, %v9528_v41  ;;  %v15091_v53 = vpop.f32.mrb[201].mxu0 }
0x13ab   :  { %15947 = vmatpush3.bf16.msra.mxu0 %v15946_v24  ;;  %15147 = vmatprep.mubr.msk.f32.mxu0 %vm16480_vm4, %v16464_v29 }
0x13ac   :  { %15948 = vmatprep.subr.bf16.mxu0 %v16462_v0 }
0x13ad   :  { %v9553_v14 = vpop.f32.mrb[202].mxu0 }
0x13ae   :  { %v15094_v15 = vpop.f32.mrb[203].mxu0 }
0x13af   :  { %15950 = vmatpush3.bf16.msra.mxu0 %v15949_v54 }
0x13b0   :  { %15951 = vmatprep.subr.bf16.mxu0 %v16462_v0 }
0x13b2   :  { %15148 = vmatmul.mubr.msk.f32.vlgmr.msra.gmra.mrb[204].mxu0 %vm1021_vm3, %v9533_v61 }
0x13b3   :  { %15953 = vmatpush3.bf16.msra.mxu0 %v15952_v17  ;;  %15158 = vmatprep.mubr.msk.f32.mxu0 %vm16480_vm4, %v16464_v29 }
0x13b4   :  { %15954 = vmatprep.subr.bf16.mxu0 %v16462_v0 }
0x13b7   :  { %15956 = vmatpush3.bf16.msra.mxu0 %v15955_v26 }
0x13b8   :  { %15957 = vmatprep.subr.bf16.mxu0 %v16462_v0 }
0x13ba   :  { %15159 = vmatmul.mubr.msk.f32.vlgmr.msra.gmra.mrb[204].mxu0 %vm1021_vm3, %v9538_v1 }
0x13bb   :  { %15959 = vmatpush3.bf16.msra.mxu0 %v15958_v28  ;;  %15169 = vmatprep.mubr.msk.f32.mxu0 %vm16480_vm4, %v16464_v29 }
0x13bc   :  { %15960 = vmatprep.subr.bf16.mxu0 %v16462_v0 }
0x13bf   :  { %15962 = vmatpush3.bf16.msra.mxu0 %v15961_v35 }
0x13c0   :  { %15963 = vmatprep.subr.bf16.mxu0 %v16462_v0 }
0x13c2   :  { %15170 = vmatmul.mubr.msk.f32.vlgmr.msra.gmra.mrb[204].mxu0 %vm1021_vm3, %v9543_v12 }
0x13c3   :  { %15965 = vmatpush3.bf16.msra.mxu0 %v15964_v38  ;;  %15180 = vmatprep.mubr.msk.f32.mxu0 %vm16480_vm4, %v16464_v29  ;;  %v10483_v38 = vld [vmem:[%s18009_s21 + $0xb8] sm:$0xff] }
0x13c4   :  { %15966 = vmatprep.subr.bf16.mxu0 %v16462_v0  ;;  %v15985_v40 = vpack.c.bf16 %v10483_v38, %v10482_v37 }
0x13c7   :  { %15968 = vmatpush3.bf16.msra.mxu0 %v15967_v43  ;;  %v10476_v43 = vld [vmem:[%s18009_s21 + $0x80] sm:$0xff] }
0x13c8   :  { %15969 = vmatprep.subr.bf16.mxu0 %v16462_v0  ;;  %v15988_v45 = vpack.c.bf16 %v10477_v44, %v10476_v43  ;;  %v10906_v44 = vld [vmem:[%s18073_s7 + $0x100] sm:$0xff] }
0x13ca   :  { %15181 = vmatmul.mubr.msk.f32.vlgmr.msra.gmra.mrb[204].mxu0 %vm1021_vm3, %v9548_v52  ;;  %v10257_v52 = vld [vmem:[%s12735_s13] sm:$0x3]  ;;  %s12754_s13 = sld [smem:[%s18388_s0 + %s16511_s10]]   ;;  %s16526_s10 = smov 59  }
0x13cb   :  { %15971 = vmatpush3.bf16.msra.mxu0 %v15970_v46  ;;  %15191 = vmatprep.mubr.msk.f32.mxu0 %vm16480_vm4, %v16464_v29  ;;  %v10478_v46 = vld [vmem:[%s18009_s21 + $0x90] sm:$0xff] }
0x13cc   :  { %15972 = vmatprep.subr.bf16.mxu0 %v16462_v0  ;;  %v15991_v2 = vpack.c.bf16 %v10479_v47, %v10478_v46 }
0x13cf   :  { %15974 = vmatpush3.bf16.msra.mxu0 %v15973_v62 }
0x13d0   :  { %15257 = vmatprep.subr.mxu0 %v16464_v29 }
0x13d2   :  { %15192 = vmatmul.mubr.msk.f32.vlgmr.msra.gmra.mrb[204].mxu0 %vm1021_vm3, %v9553_v14 }
0x13d3   :  { %15259 = vmatprep.mubr.msk.f32.mxu0 %vm16480_vm4, %v16464_v29 }
0x14a5   :  { %v10252_v4 = vpop.f32.mrb[204].mxu0 }
0x14a6   :  { %v10258_v6 = vsel %vm1021_vm3, %v10252_v4, 0.0  ;;  %v10266_v8 = vmul.f32 %v10252_v4, %v10252_v4  ;;  %v15193_v41 = vpop.f32.mrb[205].mxu0 }
0x14a7   :  { %v10259_v63 = vrot.slane %v10258_v6, 4  ;;  %v10708_v41 = vld [vmem:[%s18009_s21 + $0x100] sm:$0xff] }
0x14a8   :  { %v10267_v57 = vsel %vm1021_vm3, %v10266_v8, 0.0 }
0x14a9   :  { %v10260_v58 = vadd.f32 %v10259_v63, %v10258_v6  ;;  %v10268_v16 = vrot.slane %v10267_v57, 4  ;;  %v10633_v6 = vld [vmem:[%s18009_s21 + $0xf8] sm:$0xff]  ;;  %v10709_v63 = vld [vmem:[%s18009_s21 + $0x108] sm:$0xff] }
0x14ab   :  { %v10261_v61 = vrot.slane %v10260_v58, 2  ;;  %v10269_v33 = vadd.f32 %v10268_v16, %v10267_v57  ;;  %v16000_v57 = vpack.c.bf16 %v10709_v63, %v10708_v41  ;;  %v10711_v16 = vld [vmem:[%s18009_s21 + $0x118] sm:$0xff] }
0x14ad   :  { %v10262_v56 = vadd.f32 %v10261_v61, %v10260_v58  ;;  %v10270_v60 = vrot.slane %v10269_v33, 2  ;;  %v10710_v58 = vld [vmem:[%s18009_s21 + $0x110] sm:$0xff] }
0x14ae   :  { %v16003_v61 = vpack.c.bf16 %v10711_v16, %v10710_v58 }
0x14af   :  { %v10263_v34 = vrot.slane %v10262_v56, 1  ;;  %v10271_v1 = vadd.f32 %v10270_v60, %v10269_v33  ;;  %v11027_v33 = vld [vmem:[%s12739_s25] sm:$0x3]  ;;  %v11102_v60 = vld [vmem:[%s12744_s29 + $0x8] sm:$0xff]  ;;  %s12752_s25 = sld [smem:[%s18388_s0 + %s16514_s22]]  }
0x14b1   :  { %v10264_v3 = vadd.f32 %v10263_v34, %v10262_v56  ;;  %v10272_v7 = vrot.slane %v10271_v1, 1  ;;  %v11101_v56 = vld [vmem:[%s12744_s29] sm:$0xff]  ;;  %v11103_v34 = vld [vmem:[%s12744_s29 + $0x10] sm:$0xff] }
0x14b3   :  { %v10265_v9 = vmul.f32 0.125, %v10264_v3  ;;  %v10273_v10 = vadd.f32 %v10272_v7, %v10271_v1  ;;  %v16018_v1 = vpack.c.bf16 %v11102_v60, %v11101_v56  ;;  %v11104_v3 = vld [vmem:[%s12744_s29 + $0x18] sm:$0xff]  ;;  %v11297_v56 = vld [vmem:[%s12748_s15 + $0x108] sm:$0xff]  ;;  %v11298_v60 = vld [vmem:[%s12748_s15 + $0x110] sm:$0xff]  ;;  %s12755_s29 = sld [smem:[%s18388_s0 + %s16515_s26]]  }
0x14b4   :  { %v16021_v7 = vpack.c.bf16 %v11104_v3, %v11103_v34 }
0x14b5   :  { %v10274_v12 = vmul.f32 0.125, %v10273_v10  ;;  %v10275_v59 = vmul.f32 %v10265_v9, %v10265_v9 }
0x14b7   :  { %v10276_v24 = vsub.f32 %v10274_v12, %v10275_v59 }
0x14b9   :  { %v10277_v5 = vmax.f32 %v10276_v24, 0.0 }
0x14bb   :  { %v10278_v55 = vadd.f32 1e-05, %v10277_v5 }
0x14bd   :  { %16440 = vrsqrt.f32 %v10278_v55 }
0x14c7   :  { %v16441_v53 = vpop.eup %16440 }
0x14c8   :  { %v10280_v54 = vmul.f32 %v16441_v53, %v10257_v52 }
0x14ca   :  { %v10286_v42 = vmul.f32 %v10280_v54, %v10265_v9  ;;  %v10284_v13 = vrot.slane %v10280_v54, %v16732_v23 }
0x14cc   :  { %v10288_v14 = vrot.slane %v10286_v42, 7  ;;  %v10285_v17 = vmul.f32 %v10284_v13, %v10252_v4  ;;  %v10632_v4 = vld [vmem:[%s18009_s21 + $0xf0] sm:$0xff] }
0x14cd   :  { %v15997_v8 = vpack.c.bf16 %v10633_v6, %v10632_v4  ;;  %v10912_v4 = vld [vmem:[%s18073_s7 + $0x130] sm:$0xff]  ;;  %v10913_v6 = vld [vmem:[%s18073_s7 + $0x138] sm:$0xff] }
0x14ce   :  { %v10290_v15 = vsub.f32 %v10257_v52, %v10288_v14 }
0x14d0   :  { %v10294_v19 = vrot.slane %v10290_v15, %v16735_v31 }
0x14d2   :  { %v10295_v22 = vadd.f32 %v10294_v19, %v10285_v17 }
0x14d4   :  { %v10296_v26 = vadd.f32 %v10295_v22, %v8524_v21  ;;  %v10481_v21 = vld [vmem:[%s18009_s21 + $0xa8] sm:$0xff]  ;;  %s12756_s21 = sld [smem:[%s18388_s0 + %s16513_s18]]   ;;  %s16528_s18 = smov 64  }
0x14d5   :  { %v15982_v32 = vpack.c.bf16 %v10481_v21, %v10480_v20 }
0x14d6   :  { %v10297_v48 = vmax.f32 %v10296_v26, 0.0 }
0x14d8   :  { %15203 = vmatmul.mubr.msk.f32.vlgmr.msra.gmra.mrb[112].mxu1 %vm1021_vm3, %v10297_v48 }
0x14d9   :  { %15207 = vmatprep.mubr.msk.f32.mxu1 %vm7458_vm5, %v10375_v27 }
0x15ab   :  { %v10371_v28 = vpop.f32.mrb[112].mxu1 }
0x15ac   :  { %v15204_v35 = vpop.f32.mrb[113].mxu1  ;;  %15205 = vmatprep.subr.mxu1 %v10371_v28 }
0x15ad   :  { %15206 = vmatpush3.msra.mxu1 %v10371_v28 }
0x15ae   :  { %15208 = vmatmul.mubr.msk.f32.vlgmr.msra.gmra.mrb[114].mxu1 %vm7458_vm5, %v10376_v30  ;;  %15981 = vmatprep.subr.bf16.mxu1 %v16462_v0  ;;  %v10786_v30 = vld [vmem:[%s12741_s3] sm:$0x3]  ;;  %s12760_s3 = sld [smem:[%s18388_s0 + %s16516_s30]]  }
0x15af   :  { %15210 = vmatprep.mubr.msk.f32.mxu1 %vm7458_vm5, %v10377_v36  ;;  %15983 = vmatpush3.bf16.msra.mxu1 %v15982_v32 }
0x15b0   :  { %15984 = vmatprep.subr.bf16.mxu1 %v16462_v0 }
0x15b2   :  { %15211 = vmatmul.mubr.msk.f32.gmra.mrb[116].mxu1 %vm7458_vm5, %v10378_v39 }
0x15b3   :  { %15986 = vmatpush3.bf16.msra.mxu1 %v15985_v40  ;;  %15221 = vmatprep.mubr.msk.f32.mxu1 %vm16480_vm4, %v16464_v29 }
0x15b4   :  { %15987 = vmatprep.subr.bf16.mxu1 %v16462_v0 }
0x1681   :  { %v15209_v49 = vpop.f32.mrb[114].mxu1 }
0x1682   :  { %15222 = vmatmul.mubr.msk.f32.vlgmr.msra.gmra.mrb[118].mxu1 %vm1021_vm3, %v15209_v49  ;;  %v10457_v62 = vpop.f32.mrb[115].mxu1  ;;  %v10827_v49 = vld [vmem:[%s12737_s11] sm:$0xff]  ;;  %s18231_s11 = sld [smem:[%s18388_s0 + %s16518_s8]]  }
0x1683   :  { %15989 = vmatpush3.bf16.msra.mxu1 %v15988_v45  ;;  %15232 = vmatprep.mubr.msk.f32.mxu1 %vm16480_vm4, %v16464_v29  ;;  %v10907_v45 = vld [vmem:[%s18073_s7 + $0x108] sm:$0xff] }
0x1684   :  { %15990 = vmatprep.subr.bf16.mxu1 %v16462_v0 }
0x1685   :  { %v15212_v25 = vpop.f32.mrb[116].mxu1 }
0x1686   :  { %v10467_v50 = vpop.f32.mrb[117].mxu1 }
0x1687   :  { %15992 = vmatpush3.bf16.msra.mxu1 %v15991_v2  ;;  %v10908_v2 = vld [vmem:[%s18073_s7 + $0x110] sm:$0xff] }
0x1688   :  { %15993 = vmatprep.subr.bf16.mxu1 %v16462_v0  ;;  %v16009_v18 = vpack.c.bf16 %v10909_v11, %v10908_v2 }
0x168a   :  { %15233 = vmatmul.mubr.msk.f32.vlgmr.msra.gmra.mrb[118].mxu1 %vm1021_vm3, %v10457_v62  ;;  %v16006_v62 = vpack.c.bf16 %v10907_v45, %v10906_v44 }
0x168b   :  { %15995 = vmatpush3.bf16.msra.mxu1 %v15994_v51  ;;  %15243 = vmatprep.mubr.msk.f32.mxu1 %vm16480_vm4, %v16464_v29 }
0x168c   :  { %15996 = vmatprep.subr.bf16.mxu1 %v16462_v0 }
0x168f   :  { %15998 = vmatpush3.bf16.msra.mxu1 %v15997_v8  ;;  %v16015_v8 = vpack.c.bf16 %v10913_v6, %v10912_v4 }
0x1690   :  { %15999 = vmatprep.subr.bf16.mxu1 %v16462_v0 }
0x1692   :  { %15244 = vmatmul.mubr.msk.f32.vlgmr.msra.gmra.mrb[118].mxu1 %vm1021_vm3, %v10467_v50  ;;  %v10911_v50 = vld [vmem:[%s18073_s7 + $0x128] sm:$0xff] }
0x1693   :  { %16001 = vmatpush3.bf16.msra.mxu1 %v16000_v57  ;;  %15254 = vmatprep.mubr.msk.f32.mxu1 %vm16480_vm4, %v16464_v29 }
0x1694   :  { %16002 = vmatprep.subr.bf16.mxu1 %v16462_v0 }
0x1697   :  { %16004 = vmatpush3.bf16.msra.mxu1 %v16003_v61 }
0x1698   :  { %15281 = vmatprep.subr.mxu1 %v16464_v29 }
0x169a   :  { %15255 = vmatmul.mubr.msk.f32.vlgmr.msra.gmra.mrb[118].mxu1 %vm1021_vm3, %v15212_v25  ;;  %v10910_v25 = vld [vmem:[%s18073_s7 + $0x120] sm:$0xff]  ;;  %s12757_s7 = sld [smem:[%s18388_s0 + %s16517_s4]]  }
0x169b   :  { %15282 = vmatpush3.msra.mxu1 %v10371_v28  ;;  %15283 = vmatprep.mubr.msk.f32.mxu1 %vm16480_vm4, %v16464_v29  ;;  %v16012_v51 = vpack.c.bf16 %v10911_v50, %v10910_v25 }
0x169c   :  { %16017 = vmatprep.subr.bf16.mxu1 %v16462_v0 }
0x169e   :  { %15284 = vmatmul.mubr.msk.f32.vlgmr.msra.gmra.mrb[120].mxu1 %vm7458_vm5, %v11027_v33  ;;  %v11296_v33 = vld [vmem:[%s12748_s15 + $0x100] sm:$0xff] }
0x169f   :  { %15294 = vmatprep.mubr.msk.f32.mxu1 %vm16480_vm4, %v16464_v29  ;;  %16019 = vmatpush3.bf16.msra.mxu1 %v16018_v1  ;;  %v16024_v34 = vpack.c.bf16 %v11297_v56, %v11296_v33  ;;  %v11299_v1 = vld [vmem:[%s12748_s15 + $0x118] sm:$0xff]  ;;  %v10988_v56 = vld [vmem:[%s12743_s23] sm:$0x3]  ;;  %s12759_s23 = sld [smem:[%s18388_s0 + %s16521_s20]]  }
0x16a0   :  { %16020 = vmatprep.subr.bf16.mxu1 %v16462_v0  ;;  %v16027_v3 = vpack.c.bf16 %v11299_v1, %v11298_v60 }
0x16a3   :  { %16022 = vmatpush3.bf16.msra.mxu1 %v16021_v7  ;;  %v11300_v7 = vld [vmem:[%s12748_s15 + $0x120] sm:$0xff] }
0x16a4   :  { %16023 = vmatprep.subr.bf16.mxu1 %v16462_v0 }
0x176d   :  { %v10781_v9 = vpop.f32.mrb[118].mxu1 }
0x176e   :  { %v10788_v10 = vsel %vm10787_vm6, %v10781_v9, 0.0  ;;  %v10796_v12 = vmul.f32 %v10781_v9, %v10781_v9  ;;  %v15256_v59 = vpop.f32.mrb[119].mxu1 }
0x176f   :  { %v10789_v24 = vrot.slane %v10788_v10, 4  ;;  %v11303_v59 = vld [vmem:[%s12748_s15 + $0x138] sm:$0xff] }
0x1770   :  { %v10797_v5 = vsel %vm10787_vm6, %v10796_v12, 0.0  ;;  %v11302_v12 = vld [vmem:[%s12748_s15 + $0x130] sm:$0xff] }
0x1771   :  { %v10790_v55 = vadd.f32 %v10789_v24, %v10788_v10  ;;  %v10798_v52 = vrot.slane %v10797_v5, 4  ;;  %v11097_v41 = vpop.f32.mrb[120].mxu1  ;;  %v16033_v24 = vpack.c.bf16 %v11303_v59, %v11302_v12 }
0x1772   :  { %15295 = vmatmul.mubr.msk.f32.vlgmr.msra.gmra.mrb[122].mxu1 %vm1021_vm3, %v11097_v41  ;;  %v15285_v63 = vpop.f32.mrb[121].mxu1 }
0x1773   :  { %v10791_v53 = vrot.slane %v10790_v55, 2  ;;  %v10799_v54 = vadd.f32 %v10798_v52, %v10797_v5  ;;  %15318 = vmatprep.mubr.msk.f32.mxu1 %vm16480_vm4, %v16464_v29  ;;  %16025 = vmatpush3.bf16.msra.mxu1 %v16024_v34 }
0x1774   :  { %16026 = vmatprep.subr.bf16.mxu1 %v16462_v0 }
0x1775   :  { %v10792_v42 = vadd.f32 %v10791_v53, %v10790_v55  ;;  %v10800_v13 = vrot.slane %v10799_v54, 2 }
0x1777   :  { %v10793_v14 = vrot.slane %v10792_v42, 1  ;;  %v10801_v15 = vadd.f32 %v10800_v13, %v10799_v54  ;;  %16028 = vmatpush3.bf16.msra.mxu1 %v16027_v3 }
0x1778   :  { %16029 = vmatprep.subr.bf16.mxu1 %v16462_v0 }
0x1779   :  { %v10794_v17 = vadd.f32 %v10793_v14, %v10792_v42  ;;  %v10802_v19 = vrot.slane %v10801_v15, 1 }
0x177b   :  { %v10795_v22 = vmul.f32 0.5, %v10794_v17  ;;  %v10803_v26 = vadd.f32 %v10802_v19, %v10801_v15 }
0x177d   :  { %v10804_v48 = vmul.f32 0.5, %v10803_v26  ;;  %v10805_v27 = vmul.f32 %v10795_v22, %v10795_v22 }
0x177f   :  { %v10806_v20 = vsub.f32 %v10804_v48, %v10805_v27 }
0x1781   :  { %v10807_v21 = vmax.f32 %v10806_v20, 0.0 }
0x1783   :  { %v10808_v28 = vadd.f32 1e-05, %v10807_v21 }
0x1785   :  { %16442 = vrsqrt.f32 %v10808_v28 }
0x178f   :  { %v16443_v32 = vpop.eup %16442 }
0x1790   :  { %v10810_v35 = vmul.f32 %v16443_v32, %v10786_v30 }
0x1792   :  { %v10816_v36 = vmul.f32 %v10810_v35, %v10795_v22  ;;  %v10814_v37 = vrot.slane %v10810_v35, %v16732_v23 }
0x1794   :  { %v10818_v38 = vrot.slane %v10816_v36, 7  ;;  %v10815_v40 = vmul.f32 %v10814_v37, %v10781_v9  ;;  %v11301_v9 = vld [vmem:[%s12748_s15 + $0x128] sm:$0xff]  ;;  %s12753_s15 = sld [smem:[%s18388_s0 + %s16519_s12]]  }
0x1795   :  { %v16030_v10 = vpack.c.bf16 %v11301_v9, %v11300_v7 }
0x1796   :  { %v10820_v39 = vsub.f32 %v10786_v30, %v10818_v38 }
0x1797   :  { %16031 = vmatpush3.bf16.msra.mxu1 %v16030_v10 }
0x1798   :  { %v10824_v43 = vrot.slane %v10820_v39, %v16735_v31  ;;  %16032 = vmatprep.subr.bf16.mxu1 %v16462_v0 }
0x179a   :  { %v10825_v46 = vadd.f32 %v10824_v43, %v10815_v40 }
0x179b   :  { %16034 = vmatpush3.bf16.msra.mxu1 %v16033_v24 }
0x179c   :  { %v10826_v47 = vmax.f32 %v10825_v46, 0.0  ;;  %16047 = vmatprep.subr.bf16.mxu1 %v16462_v0 }
0x179e   :  { %15258 = vmatpush3.msk.msra.mxu0 %vm10832_vm7, %v10826_v47 }
0x179f   :  { %15260 = vmatmul.mubr.msk.f32.vlgmr.msra.gmra.mrb[206].mxu0 %vm10828_vm8, %v10827_v49  ;;  %16005 = vmatprep.subr.bf16.mxu0 %v16462_v0 }
0x17a0   :  { %16007 = vmatpush3.bf16.msra.mxu0 %v16006_v62  ;;  %15278 = vmatprep.mubr.msk.f32.mxu0 %vm16480_vm4, %v16464_v29 }
0x17a1   :  { %16008 = vmatprep.subr.bf16.mxu0 %v16462_v0 }
0x17a4   :  { %16010 = vmatpush3.bf16.msra.mxu0 %v16009_v18 }
0x17a5   :  { %16011 = vmatprep.subr.bf16.mxu0 %v16462_v0 }
0x17a8   :  { %16013 = vmatpush3.bf16.msra.mxu0 %v16012_v51 }
0x17a9   :  { %16014 = vmatprep.subr.bf16.mxu0 %v16462_v0 }
0x17ac   :  { %16016 = vmatpush3.bf16.msra.mxu0 %v16015_v8 }
0x17ad   :  { %15297 = vmatprep.subr.mxu0 %v16464_v29 }
0x1845   :  { %v18103_v16 = vpop.f32.mrb[122].mxu1 }
0x1846   :  { %v15296_v61 = vpop.f32.mrb[123].mxu1  ;;  %v11179_v5 = vsel %vm10787_vm6, %v18103_v16, 0.0  ;;  %v11187_v55 = vmul.f32 %v18103_v16, %v18103_v16 }
0x1847   :  { %v11180_v52 = vrot.slane %v11179_v5, 4 }
0x1848   :  { %v11188_v53 = vsel %vm10787_vm6, %v11187_v55, 0.0 }
0x1849   :  { %v11181_v54 = vadd.f32 %v11180_v52, %v11179_v5  ;;  %v11189_v42 = vrot.slane %v11188_v53, 4 }
0x184b   :  { %v11182_v13 = vrot.slane %v11181_v54, 2  ;;  %v11190_v14 = vadd.f32 %v11189_v42, %v11188_v53 }
0x184d   :  { %v11183_v15 = vadd.f32 %v11182_v13, %v11181_v54  ;;  %v11191_v17 = vrot.slane %v11190_v14, 2 }
0x184f   :  { %v11184_v19 = vrot.slane %v11183_v15, 1  ;;  %v11192_v22 = vadd.f32 %v11191_v17, %v11190_v14  ;;  %v11219_v14 = vld [vmem:[%s12746_s27] sm:$0xff]  ;;  %s18291_s27 = sld [smem:[%s18388_s0 + %s16522_s24]]  }
0x1851   :  { %v11185_v26 = vadd.f32 %v11184_v19, %v11183_v15  ;;  %v11193_v48 = vrot.slane %v11192_v22, 1 }
0x1853   :  { %v11186_v27 = vmul.f32 0.5, %v11185_v26  ;;  %v11194_v20 = vadd.f32 %v11193_v48, %v11192_v22 }
0x1855   :  { %v11195_v21 = vmul.f32 0.5, %v11194_v20  ;;  %v11196_v28 = vmul.f32 %v11186_v27, %v11186_v27 }
0x1857   :  { %v11197_v32 = vsub.f32 %v11195_v21, %v11196_v28 }
0x1859   :  { %v11198_v44 = vmax.f32 %v11197_v32, 0.0 }
0x185b   :  { %v11199_v62 = vadd.f32 1e-05, %v11198_v44 }
0x185d   :  { %16444 = vrsqrt.f32 %v11199_v62  ;;  %v11377_v62 = vld [vmem:[%s12749_s1] sm:$0x3]  ;;  %s12762_s1 = sld [smem:[%s18388_s0 + %s16523_s28]]  }
0x1867   :  { %v16445_v63 = vpop.eup %16444 }
0x1872   :  { %v10902_v57 = vpop.f32.mrb[206].mxu0 }
0x1873   :  { %15279 = vmatmul.mubr.msk.f32.vlgmr.msra.gmra.mrb[208].mxu0 %vm10914_vm9, %v10902_v57  ;;  %v15261_v58 = vpop.f32.mrb[207].mxu0 }
0x1874   :  { %15299 = vmatprep.mubr.msk.f32.mxu0 %vm16480_vm4, %v16464_v29  ;;  %v11178_v58 = vld [vmem:[%s12745_s19] sm:$0x3]  ;;  %s12761_s19 = sld [smem:[%s18388_s0 + %s16520_s16]]  }
0x1875   :  { %v11201_v61 = vmul.f32 %v16445_v63, %v11178_v58 }
0x1877   :  { %v11207_v33 = vmul.f32 %v11201_v61, %v11186_v27  ;;  %v11205_v7 = vrot.slane %v11201_v61, %v16732_v23 }
0x1879   :  { %v11209_v60 = vrot.slane %v11207_v33, 7  ;;  %v11206_v24 = vmul.f32 %v11205_v7, %v18103_v16  ;;  %v11496_v33 = vld [vmem:[%s12750_s5 + $0x110] sm:$0xff] }
0x187a   :  { %v11500_v7 = vld [vmem:[%s12750_s5 + $0x130] sm:$0xff] }
0x187b   :  { %v11211_v9 = vsub.f32 %v11178_v58, %v11209_v60  ;;  %v11417_v58 = vld [vmem:[%s12747_s9] sm:$0xff]  ;;  %s18341_s9 = sld [smem:[%s18388_s0 + %s16525_s6]]  }
0x187d   :  { %v11215_v5 = vrot.slane %v11211_v9, %v16735_v31  ;;  %v11501_v9 = vld [vmem:[%s12750_s5 + $0x138] sm:$0xff] }
0x187f   :  { %v11216_v54 = vadd.f32 %v11215_v5, %v11206_v24  ;;  %v11616_v24 = vld [vmem:[%s12754_s13] sm:$0xff]  ;;  %v11617_v5 = vld [vmem:[%s12754_s13 + $0x8] sm:$0xff] }
0x1946   :  { %v10984_v30 = vpop.f32.mrb[208].mxu0 }
0x1947   :  { %v10989_v35 = vsel %vm10787_vm6, %v10984_v30, 0.0  ;;  %v10997_v36 = vmul.f32 %v10984_v30, %v10984_v30  ;;  %v15280_v37 = vpop.f32.mrb[209].mxu0 }
0x1948   :  { %v10990_v38 = vrot.slane %v10989_v35, 4 }
0x1949   :  { %v10998_v39 = vsel %vm10787_vm6, %v10997_v36, 0.0 }
0x194a   :  { %v10991_v40 = vadd.f32 %v10990_v38, %v10989_v35  ;;  %v10999_v43 = vrot.slane %v10998_v39, 4 }
0x194c   :  { %v10992_v45 = vrot.slane %v10991_v40, 2  ;;  %v11000_v46 = vadd.f32 %v10999_v43, %v10998_v39 }
0x194e   :  { %v10993_v47 = vadd.f32 %v10992_v45, %v10991_v40  ;;  %v11001_v49 = vrot.slane %v11000_v46, 2 }
0x1950   :  { %v10994_v2 = vrot.slane %v10993_v47, 1  ;;  %v11002_v11 = vadd.f32 %v11001_v49, %v11000_v46 }
0x1952   :  { %v10995_v18 = vadd.f32 %v10994_v2, %v10993_v47  ;;  %v11003_v25 = vrot.slane %v11002_v11, 1 }
0x1954   :  { %v10996_v50 = vmul.f32 0.5, %v10995_v18  ;;  %v11004_v51 = vadd.f32 %v11003_v25, %v11002_v11 }
0x1956   :  { %v11005_v4 = vmul.f32 0.5, %v11004_v51  ;;  %v11006_v6 = vmul.f32 %v10996_v50, %v10996_v50 }
0x1958   :  { %v11007_v8 = vsub.f32 %v11005_v4, %v11006_v6 }
0x195a   :  { %v11008_v41 = vmax.f32 %v11007_v8, 0.0  ;;  %v11494_v8 = vld [vmem:[%s12750_s5 + $0x100] sm:$0xff] }
0x195c   :  { %v11009_v57 = vadd.f32 1e-05, %v11008_v41  ;;  %v11495_v41 = vld [vmem:[%s12750_s5 + $0x108] sm:$0xff] }
0x195d   :  { %v16036_v61 = vpack.c.bf16 %v11495_v41, %v11494_v8 }
0x195e   :  { %16446 = vrsqrt.f32 %v11009_v57 }
0x1968   :  { %v16447_v34 = vpop.eup %16446 }
0x1969   :  { %v11011_v1 = vmul.f32 %v16447_v34, %v10988_v56  ;;  %v11498_v34 = vld [vmem:[%s12750_s5 + $0x120] sm:$0xff] }
0x196b   :  { %v11017_v3 = vmul.f32 %v11011_v1, %v10996_v50  ;;  %v11015_v10 = vrot.slane %v11011_v1, %v16732_v23  ;;  %v11499_v1 = vld [vmem:[%s12750_s5 + $0x128] sm:$0xff] }
0x196d   :  { %v11019_v12 = vrot.slane %v11017_v3, 7  ;;  %v11016_v55 = vmul.f32 %v11015_v10, %v10984_v30  ;;  %v16042_v3 = vpack.c.bf16 %v11499_v1, %v11498_v34  ;;  %v16045_v10 = vpack.c.bf16 %v11501_v9, %v11500_v7  ;;  %v11776_v34 = vld [vmem:[%s12756_s21 + $0x110] sm:$0xff]  ;;  %v11777_v1 = vld [vmem:[%s12756_s21 + $0x118] sm:$0xff]  ;;  %v11778_v9 = vld [vmem:[%s12756_s21 + $0x120] sm:$0xff] }
0x196e   :  { %v16063_v7 = vpack.c.bf16 %v11777_v1, %v11776_v34  ;;  %v11895_v1 = vld [vmem:[%s12753_s15] sm:$0xff] }
0x196f   :  { %v11021_v59 = vsub.f32 %v10988_v56, %v11019_v12  ;;  %v11497_v56 = vld [vmem:[%s12750_s5 + $0x118] sm:$0xff]  ;;  %s12765_s5 = sld [smem:[%s18388_s0 + %s16524_s2]]  }
0x1970   :  { %v16039_v60 = vpack.c.bf16 %v11497_v56, %v11496_v33  ;;  %v11774_v33 = vld [vmem:[%s12756_s21 + $0x100] sm:$0xff]  ;;  %v11775_v56 = vld [vmem:[%s12756_s21 + $0x108] sm:$0xff] }
0x1971   :  { %v11025_v52 = vrot.slane %v11021_v59, %v16735_v31 }
0x1973   :  { %v11026_v53 = vadd.f32 %v11025_v52, %v11016_v55  ;;  %v16048_v55 = vpack.c.bf16 %v11617_v5, %v11616_v24  ;;  %v11618_v52 = vld [vmem:[%s12754_s13 + $0x10] sm:$0xff]  ;;  %v11781_v24 = vld [vmem:[%s12756_s21 + $0x138] sm:$0xff] }
0x1975   :  { %v18133_v42 = vadd.f32 %v11216_v54, %v11026_v53  ;;  %v11619_v53 = vld [vmem:[%s12754_s13 + $0x18] sm:$0xff] }
0x1976   :  { %v16051_v54 = vpack.c.bf16 %v11619_v53, %v11618_v52  ;;  %v12097_v53 = vld [vmem:[%s12755_s29] sm:$0x3] }
0x1977   :  { %v11218_v13 = vmax.f32 %v18133_v42, 0.0  ;;  %v11697_v42 = vld [vmem:[%s12752_s25] sm:$0xff] }
0x1979   :  { %15298 = vmatpush3.msk.msra.mxu0 %vm10832_vm7, %v11218_v13 }
0x197a   :  { %15300 = vmatmul.mubr.msk.f32.vlgmr.msra.gmra.mrb[210].mxu0 %vm10828_vm8, %v11219_v14  ;;  %15321 = vmatprep.subr.mxu0 %v16464_v29  ;;  %v11620_v14 = vld [vmem:[%s12754_s13 + $0x20] sm:$0xff] }
0x197b   :  { %15323 = vmatprep.mubr.msk.f32.mxu0 %vm16480_vm4, %v16464_v29 }
0x1a4d   :  { %v11292_v16 = vpop.f32.mrb[210].mxu0 }
0x1a4e   :  { %15319 = vmatmul.mubr.msk.f32.vlgmr.msra.gmra.mrb[124].mxu1 %vm10914_vm9, %v11292_v16  ;;  %v15301_v15 = vpop.f32.mrb[211].mxu0  ;;  %v11621_v16 = vld [vmem:[%s12754_s13 + $0x28] sm:$0xff] }
0x1a4f   :  { %15361 = vmatprep.mubr.msk.f32.mxu1 %vm16480_vm4, %v16464_v29  ;;  %16049 = vmatpush3.bf16.msra.mxu1 %v16048_v55  ;;  %v16054_v15 = vpack.c.bf16 %v11621_v16, %v11620_v14  ;;  %v12172_v14 = vld [vmem:[%s12760_s3 + $0x8] sm:$0xff]  ;;  %v12173_v16 = vld [vmem:[%s12760_s3 + $0x10] sm:$0xff] }
0x1a50   :  { %16050 = vmatprep.subr.bf16.mxu1 %v16462_v0 }
0x1a53   :  { %16052 = vmatpush3.bf16.msra.mxu1 %v16051_v54  ;;  %v12171_v54 = vld [vmem:[%s12760_s3] sm:$0xff] }
0x1a54   :  { %16053 = vmatprep.subr.bf16.mxu1 %v16462_v0 }
0x1a57   :  { %16055 = vmatpush3.bf16.msra.mxu1 %v16054_v15  ;;  %v16096_v15 = vpack.c.bf16 %v12172_v14, %v12171_v54  ;;  %v11981_v54 = vld [vmem:[%s18231_s11 + $0x248] sm:$0xff] }
0x1a58   :  { %16056 = vmatprep.subr.bf16.mxu1 %v16462_v0 }
0x1b21   :  { %v11373_v17 = vpop.f32.mrb[124].mxu1 }
0x1b22   :  { %v11378_v19 = vsel %vm10787_vm6, %v11373_v17, 0.0  ;;  %v11386_v22 = vmul.f32 %v11373_v17, %v11373_v17  ;;  %v15320_v26 = vpop.f32.mrb[125].mxu1 }
0x1b23   :  { %v11379_v48 = vrot.slane %v11378_v19, 4 }
0x1b24   :  { %v11387_v27 = vsel %vm10787_vm6, %v11386_v22, 0.0 }
0x1b25   :  { %v11380_v20 = vadd.f32 %v11379_v48, %v11378_v19  ;;  %v11388_v21 = vrot.slane %v11387_v27, 4  ;;  %v11623_v19 = vld [vmem:[%s12754_s13 + $0x38] sm:$0xff] }
0x1b27   :  { %v11381_v28 = vrot.slane %v11380_v20, 2  ;;  %v11389_v30 = vadd.f32 %v11388_v21, %v11387_v27 }
0x1b29   :  { %v11382_v32 = vadd.f32 %v11381_v28, %v11380_v20  ;;  %v11390_v35 = vrot.slane %v11389_v30, 2 }
0x1b2b   :  { %v11383_v36 = vrot.slane %v11382_v32, 1  ;;  %v11391_v37 = vadd.f32 %v11390_v35, %v11389_v30 }
0x1b2d   :  { %v11384_v38 = vadd.f32 %v11383_v36, %v11382_v32  ;;  %v11392_v39 = vrot.slane %v11391_v37, 1 }
0x1b2f   :  { %v11385_v40 = vmul.f32 0.5, %v11384_v38  ;;  %v11393_v43 = vadd.f32 %v11392_v39, %v11391_v37 }
0x1b31   :  { %v11394_v44 = vmul.f32 0.5, %v11393_v43  ;;  %v11395_v45 = vmul.f32 %v11385_v40, %v11385_v40 }
0x1b33   :  { %v11396_v46 = vsub.f32 %v11394_v44, %v11395_v45 }
0x1b35   :  { %v11397_v47 = vmax.f32 %v11396_v46, 0.0 }
0x1b37   :  { %v11398_v49 = vadd.f32 1e-05, %v11397_v47 }
0x1b39   :  { %16448 = vrsqrt.f32 %v11398_v49 }
0x1b43   :  { %v16449_v2 = vpop.eup %16448 }
0x1b44   :  { %v11400_v11 = vmul.f32 %v16449_v2, %v11377_v62 }
0x1b46   :  { %v11406_v18 = vmul.f32 %v11400_v11, %v11385_v40  ;;  %v11404_v25 = vrot.slane %v11400_v11, %v16732_v23 }
0x1b48   :  { %v11408_v50 = vrot.slane %v11406_v18, 7  ;;  %v11405_v4 = vmul.f32 %v11404_v25, %v11373_v17  ;;  %v11622_v17 = vld [vmem:[%s12754_s13 + $0x30] sm:$0xff]  ;;  %v11575_v18 = vld [vmem:[%s12751_s17] sm:$0x3]  ;;  %s12763_s13 = sld [smem:[%s18388_s0 + %s16526_s10]]  }
0x1b49   :  { %v16057_v22 = vpack.c.bf16 %v11623_v19, %v11622_v17  ;;  %v12174_v17 = vld [vmem:[%s12760_s3 + $0x18] sm:$0xff]  ;;  %s12767_s17 = sld [smem:[%s18388_s0 + %s16527_s14]]  }
0x1b4a   :  { %v11410_v51 = vsub.f32 %v11377_v62, %v11408_v50  ;;  %v16099_v19 = vpack.c.bf16 %v12174_v17, %v12173_v16  ;;  %v11982_v16 = vld [vmem:[%s18231_s11 + $0x250] sm:$0xff] }
0x1b4b   :  { %16058 = vmatpush3.bf16.msra.mxu1 %v16057_v22  ;;  %v12175_v22 = vld [vmem:[%s12760_s3 + $0x20] sm:$0xff] }
0x1b4c   :  { %v11414_v6 = vrot.slane %v11410_v51, %v16735_v31  ;;  %15388 = vmatprep.subr.mxu1 %v16464_v29 }
0x1b4e   :  { %v11415_v63 = vadd.f32 %v11414_v6, %v11405_v4 }
0x1b50   :  { %v11416_v57 = vmax.f32 %v11415_v63, 0.0 }
0x1b52   :  { %15322 = vmatpush3.msk.msra.mxu0 %vm10832_vm7, %v11416_v57 }
0x1b53   :  { %15324 = vmatmul.mubr.msk.f32.vlgmr.msra.gmra.mrb[212].mxu0 %vm10828_vm8, %v11417_v58  ;;  %16035 = vmatprep.subr.bf16.mxu0 %v16462_v0 }
0x1b54   :  { %16037 = vmatpush3.bf16.msra.mxu0 %v16036_v61  ;;  %15342 = vmatprep.mubr.msk.f32.mxu0 %vm16480_vm4, %v16464_v29 }
0x1b55   :  { %16038 = vmatprep.subr.bf16.mxu0 %v16462_v0 }
0x1b58   :  { %16040 = vmatpush3.bf16.msra.mxu0 %v16039_v60 }
0x1b59   :  { %16041 = vmatprep.subr.bf16.mxu0 %v16462_v0 }
0x1b5c   :  { %16043 = vmatpush3.bf16.msra.mxu0 %v16042_v3 }
0x1b5d   :  { %16044 = vmatprep.subr.bf16.mxu0 %v16462_v0 }
0x1b60   :  { %16046 = vmatpush3.bf16.msra.mxu0 %v16045_v10  ;;  %v11779_v10 = vld [vmem:[%s12756_s21 + $0x128] sm:$0xff] }
0x1b61   :  { %15364 = vmatprep.subr.mxu0 %v16464_v29 }
0x1c26   :  { %v11490_v12 = vpop.f32.mrb[212].mxu0 }
0x1c27   :  { %15343 = vmatmul.mubr.msk.f32.vlgmr.msra.gmra.mrb[214].mxu0 %vm10914_vm9, %v11490_v12  ;;  %v15325_v59 = vpop.f32.mrb[213].mxu0  ;;  %v16066_v12 = vpack.c.bf16 %v11779_v10, %v11778_v9  ;;  %v11975_v9 = vld [vmem:[%s18231_s11 + $0x218] sm:$0xff] }
0x1c28   :  { %15366 = vmatprep.mubr.msk.f32.mxu0 %vm16480_vm4, %v16464_v29  ;;  %v11780_v59 = vld [vmem:[%s12756_s21 + $0x130] sm:$0xff]  ;;  %s12768_s21 = sld [smem:[%s18388_s0 + %s16528_s18]]  }
0x1c29   :  { %v16069_v5 = vpack.c.bf16 %v11781_v24, %v11780_v59  ;;  %v11977_v59 = vld [vmem:[%s18231_s11 + $0x228] sm:$0xff] }
0x1cfa   :  { %v11571_v26 = vpop.f32.mrb[214].mxu0 }
0x1cfb   :  { %v11576_v48 = vsel %vm10787_vm6, %v11571_v26, 0.0  ;;  %v11584_v27 = vmul.f32 %v11571_v26, %v11571_v26  ;;  %v15344_v20 = vpop.f32.mrb[215].mxu0 }
0x1cfc   :  { %v11577_v21 = vrot.slane %v11576_v48, 4  ;;  %v12178_v20 = vld [vmem:[%s12760_s3 + $0x38] sm:$0xff] }
0x1cfd   :  { %v11585_v28 = vsel %vm10787_vm6, %v11584_v27, 0.0  ;;  %v12177_v27 = vld [vmem:[%s12760_s3 + $0x30] sm:$0xff] }
0x1cfe   :  { %v11578_v30 = vadd.f32 %v11577_v21, %v11576_v48  ;;  %v11586_v32 = vrot.slane %v11585_v28, 4  ;;  %v16105_v21 = vpack.c.bf16 %v12178_v20, %v12177_v27  ;;  %v11987_v27 = vld [vmem:[%s18231_s11 + $0x278] sm:$0xff] }
0x1d00   :  { %v11579_v35 = vrot.slane %v11578_v30, 2  ;;  %v11587_v36 = vadd.f32 %v11586_v32, %v11585_v28 }
0x1d02   :  { %v11580_v37 = vadd.f32 %v11579_v35, %v11578_v30  ;;  %v11588_v38 = vrot.slane %v11587_v36, 2 }
0x1d04   :  { %v11581_v39 = vrot.slane %v11580_v37, 1  ;;  %v11589_v40 = vadd.f32 %v11588_v38, %v11587_v36 }
0x1d06   :  { %v11582_v43 = vadd.f32 %v11581_v39, %v11580_v37  ;;  %v11590_v44 = vrot.slane %v11589_v40, 1 }
0x1d08   :  { %v11583_v45 = vmul.f32 0.5, %v11582_v43  ;;  %v11591_v46 = vadd.f32 %v11590_v44, %v11589_v40 }
0x1d0a   :  { %v11592_v47 = vmul.f32 0.5, %v11591_v46  ;;  %v11593_v49 = vmul.f32 %v11583_v45, %v11583_v45 }
0x1d0c   :  { %v11594_v62 = vsub.f32 %v11592_v47, %v11593_v49 }
0x1d0e   :  { %v11595_v2 = vmax.f32 %v11594_v62, 0.0 }
0x1d10   :  { %v11596_v11 = vadd.f32 1e-05, %v11595_v2 }
0x1d12   :  { %16450 = vrsqrt.f32 %v11596_v11 }
0x1d1c   :  { %v16451_v25 = vpop.eup %16450 }
0x1d1d   :  { %v11598_v50 = vmul.f32 %v16451_v25, %v11575_v18 }
0x1d1f   :  { %v11604_v51 = vmul.f32 %v11598_v50, %v11583_v45  ;;  %v11602_v4 = vrot.slane %v11598_v50, %v16732_v23 }
0x1d21   :  { %v11606_v6 = vrot.slane %v11604_v51, 7  ;;  %v11603_v41 = vmul.f32 %v11602_v4, %v11571_v26  ;;  %v12176_v26 = vld [vmem:[%s12760_s3 + $0x28] sm:$0xff] }
0x1d22   :  { %v16102_v48 = vpack.c.bf16 %v12176_v26, %v12175_v22  ;;  %v11985_v22 = vld [vmem:[%s18231_s11 + $0x268] sm:$0xff] }
0x1d23   :  { %v11608_v8 = vsub.f32 %v11575_v18, %v11606_v6  ;;  %v11855_v6 = vld [vmem:[%s12757_s7] sm:$0x3] }
0x1d25   :  { %v11612_v63 = vrot.slane %v11608_v8, %v16735_v31 }
0x1d27   :  { %v11613_v57 = vadd.f32 %v11612_v63, %v11603_v41 }
0x1d29   :  { %v11614_v58 = vadd.f32 %v11613_v57, %v11218_v13  ;;  %v16060_v13 = vpack.c.bf16 %v11775_v56, %v11774_v33 }
0x1d2b   :  { %v11615_v61 = vmax.f32 %v11614_v58, 0.0 }
0x1d2d   :  { %15362 = vmatmul.mubr.msk.f32.vlgmr.msra.gmra.mrb[126].mxu1 %vm10914_vm9, %v11615_v61 }
0x1d2e   :  { %15390 = vmatprep.mubr.msk.f32.mxu1 %vm16480_vm4, %v16464_v29 }
0x1e00   :  { %v11693_v60 = vpop.f32.mrb[126].mxu1 }
0x1e01   :  { %v15363_v3 = vpop.f32.mrb[127].mxu1  ;;  %15365 = vmatpush3.msk.msra.mxu0 %vm10832_vm7, %v11693_v60 }
0x1e02   :  { %15367 = vmatmul.mubr.msk.f32.vlgmr.msra.gmra.mrb[216].mxu0 %vm10828_vm8, %v11697_v42  ;;  %16059 = vmatprep.subr.bf16.mxu0 %v16462_v0  ;;  %v11972_v42 = vld [vmem:[%s18231_s11 + $0x200] sm:$0xff] }
0x1e03   :  { %16061 = vmatpush3.bf16.msra.mxu0 %v16060_v13  ;;  %15385 = vmatprep.mubr.msk.f32.mxu0 %vm16480_vm4, %v16464_v29  ;;  %v11973_v13 = vld [vmem:[%s18231_s11 + $0x208] sm:$0xff] }
0x1e04   :  { %16062 = vmatprep.subr.bf16.mxu0 %v16462_v0  ;;  %v16072_v3 = vpack.c.bf16 %v11973_v13, %v11972_v42 }
0x1e07   :  { %16064 = vmatpush3.bf16.msra.mxu0 %v16063_v7  ;;  %v11974_v7 = vld [vmem:[%s18231_s11 + $0x210] sm:$0xff] }
0x1e08   :  { %16065 = vmatprep.subr.bf16.mxu0 %v16462_v0  ;;  %v16075_v10 = vpack.c.bf16 %v11975_v9, %v11974_v7 }
0x1e0b   :  { %16067 = vmatpush3.bf16.msra.mxu0 %v16066_v12  ;;  %v11976_v12 = vld [vmem:[%s18231_s11 + $0x220] sm:$0xff] }
0x1e0c   :  { %16068 = vmatprep.subr.bf16.mxu0 %v16462_v0  ;;  %v16078_v24 = vpack.c.bf16 %v11977_v59, %v11976_v12 }
0x1e0f   :  { %16070 = vmatpush3.bf16.msra.mxu0 %v16069_v5  ;;  %v11978_v5 = vld [vmem:[%s18231_s11 + $0x230] sm:$0xff] }
0x1e10   :  { %15428 = vmatprep.subr.mxu0 %v16464_v29 }
0x1ed5   :  { %v11770_v55 = vpop.f32.mrb[216].mxu0 }
0x1ed6   :  { %15386 = vmatmul.mubr.msk.f32.vlgmr.msra.gmra.mrb[218].mxu0 %vm10914_vm9, %v11770_v55  ;;  %v15368_v52 = vpop.f32.mrb[217].mxu0  ;;  %v11979_v55 = vld [vmem:[%s18231_s11 + $0x238] sm:$0xff] }
0x1ed7   :  { %15429 = vmatpush3.msk.msra.mxu0 %vm10832_vm7, %v11693_v60  ;;  %15430 = vmatprep.mubr.msk.f32.mxu0 %vm16480_vm4, %v16464_v29  ;;  %v16081_v52 = vpack.c.bf16 %v11979_v55, %v11978_v5 }
0x1ed8   :  { %16095 = vmatprep.subr.bf16.mxu0 %v16462_v0 }
0x1eda   :  { %15431 = vmatmul.mubr.msk.f32.vlgmr.msra.gmra.mrb[220].mxu0 %vm10828_vm8, %v12097_v53  ;;  %v11980_v53 = vld [vmem:[%s18231_s11 + $0x240] sm:$0xff] }
0x1edb   :  { %15449 = vmatprep.mubr.msk.f32.mxu0 %vm16480_vm4, %v16464_v29  ;;  %16097 = vmatpush3.bf16.msra.mxu0 %v16096_v15  ;;  %v16084_v14 = vpack.c.bf16 %v11981_v54, %v11980_v53  ;;  %v11983_v15 = vld [vmem:[%s18231_s11 + $0x258] sm:$0xff] }
0x1edc   :  { %16098 = vmatprep.subr.bf16.mxu0 %v16462_v0  ;;  %v16087_v17 = vpack.c.bf16 %v11983_v15, %v11982_v16  ;;  %v12252_v16 = vld [vmem:[%s12761_s19] sm:$0x3] }
0x1edf   :  { %16100 = vmatpush3.bf16.msra.mxu0 %v16099_v19  ;;  %v11984_v19 = vld [vmem:[%s18231_s11 + $0x260] sm:$0xff] }
0x1ee0   :  { %16101 = vmatprep.subr.bf16.mxu0 %v16462_v0  ;;  %v16090_v26 = vpack.c.bf16 %v11985_v22, %v11984_v19  ;;  %v12058_v19 = vld [vmem:[%s12759_s23] sm:$0x3] }
0x1ee3   :  { %16103 = vmatpush3.bf16.msra.mxu0 %v16102_v48  ;;  %v11986_v48 = vld [vmem:[%s18231_s11 + $0x270] sm:$0xff] }
0x1ee4   :  { %16104 = vmatprep.subr.bf16.mxu0 %v16462_v0  ;;  %v16093_v20 = vpack.c.bf16 %v11987_v27, %v11986_v48 }
0x1ee7   :  { %16106 = vmatpush3.bf16.msra.mxu0 %v16105_v21 }
0x1ee8   :  { %15452 = vmatprep.subr.mxu0 %v16464_v29 }
0x1fa9   :  { %v11851_v28 = vpop.f32.mrb[218].mxu0 }
0x1faa   :  { %v11856_v30 = vsel %vm10832_vm7, %v11851_v28, 0.0  ;;  %v11864_v32 = vmul.f32 %v11851_v28, %v11851_v28  ;;  %v15387_v35 = vpop.f32.mrb[219].mxu0 }
0x1fab   :  { %v11857_v36 = vrot.slane %v11856_v30, 4 }
0x1fac   :  { %v11865_v37 = vsel %vm10832_vm7, %v11864_v32, 0.0 }
0x1fad   :  { %v11858_v38 = vadd.f32 %v11857_v36, %v11856_v30  ;;  %v11866_v39 = vrot.slane %v11865_v37, 4  ;;  %v12167_v21 = vpop.f32.mrb[220].mxu0 }
0x1fae   :  { %15450 = vmatmul.mubr.msk.f32.vlgmr.msra.gmra.mrb[222].mxu0 %vm10914_vm9, %v12167_v21 }
0x1faf   :  { %v11859_v40 = vrot.slane %v11858_v38, 2  ;;  %v11867_v43 = vadd.f32 %v11866_v39, %v11865_v37  ;;  %15454 = vmatprep.mubr.msk.f32.mxu0 %vm16480_vm4, %v16464_v29 }
0x1fb1   :  { %v11860_v44 = vadd.f32 %v11859_v40, %v11858_v38  ;;  %v11868_v45 = vrot.slane %v11867_v43, 2 }
0x1fb3   :  { %v11861_v46 = vrot.slane %v11860_v44, 1  ;;  %v11869_v47 = vadd.f32 %v11868_v45, %v11867_v43 }
0x1fb5   :  { %v11862_v49 = vadd.f32 %v11861_v46, %v11860_v44  ;;  %v11870_v62 = vrot.slane %v11869_v47, 1 }
0x1fb7   :  { %v11863_v2 = vmul.f32 0.5, %v11862_v49  ;;  %v11871_v11 = vadd.f32 %v11870_v62, %v11869_v47 }
0x1fb9   :  { %v11872_v18 = vmul.f32 0.5, %v11871_v11  ;;  %v11873_v25 = vmul.f32 %v11863_v2, %v11863_v2 }
0x1fbb   :  { %v11874_v50 = vsub.f32 %v11872_v18, %v11873_v25 }
0x1fbd   :  { %v11875_v51 = vmax.f32 %v11874_v50, 0.0 }
0x1fbf   :  { %v11876_v4 = vadd.f32 1e-05, %v11875_v51 }
0x1fc1   :  { %16452 = vrsqrt.f32 %v11876_v4 }
0x1fcb   :  { %v16453_v8 = vpop.eup %16452 }
0x1fcc   :  { %v11878_v41 = vmul.f32 %v16453_v8, %v11855_v6 }
0x1fce   :  { %v11884_v63 = vmul.f32 %v11878_v41, %v11863_v2  ;;  %v11882_v57 = vrot.slane %v11878_v41, %v16732_v23 }
0x1fd0   :  { %v11886_v58 = vrot.slane %v11884_v63, 7  ;;  %v11883_v33 = vmul.f32 %v11882_v57, %v11851_v28  ;;  %v15432_v28 = vpop.f32.mrb[221].mxu0 }
0x1fd2   :  { %v11888_v61 = vsub.f32 %v11855_v6, %v11886_v58 }
0x1fd4   :  { %v11892_v56 = vrot.slane %v11888_v61, %v16735_v31 }
0x1fd6   :  { %v11893_v60 = vadd.f32 %v11892_v56, %v11883_v33 }
0x1fd8   :  { %v11894_v34 = vmax.f32 %v11893_v60, 0.0 }
0x1fda   :  { %15389 = vmatpush3.msk.msra.mxu1 %vm10832_vm7, %v11894_v34 }
0x1fdb   :  { %15391 = vmatmul.mubr.msk.f32.vlgmr.msra.gmra.mrb[128].mxu1 %vm10828_vm8, %v11895_v1  ;;  %16071 = vmatprep.subr.bf16.mxu1 %v16462_v0 }
0x1fdc   :  { %16073 = vmatpush3.bf16.msra.mxu1 %v16072_v3  ;;  %15425 = vmatprep.mubr.msk.f32.mxu1 %vm16480_vm4, %v16464_v29 }
0x1fdd   :  { %16074 = vmatprep.subr.bf16.mxu1 %v16462_v0 }
0x1fe0   :  { %16076 = vmatpush3.bf16.msra.mxu1 %v16075_v10 }
0x1fe1   :  { %16077 = vmatprep.subr.bf16.mxu1 %v16462_v0 }
0x1fe4   :  { %16079 = vmatpush3.bf16.msra.mxu1 %v16078_v24 }
0x1fe5   :  { %16080 = vmatprep.subr.bf16.mxu1 %v16462_v0 }
0x1fe8   :  { %16082 = vmatpush3.bf16.msra.mxu1 %v16081_v52 }
0x1fe9   :  { %16083 = vmatprep.subr.bf16.mxu1 %v16462_v0 }
0x1fec   :  { %16085 = vmatpush3.bf16.msra.mxu1 %v16084_v14 }
0x1fed   :  { %16086 = vmatprep.subr.bf16.mxu1 %v16462_v0 }
0x1ff0   :  { %16088 = vmatpush3.bf16.msra.mxu1 %v16087_v17 }
0x1ff1   :  { %16089 = vmatprep.subr.bf16.mxu1 %v16462_v0 }
0x1ff4   :  { %16091 = vmatpush3.bf16.msra.mxu1 %v16090_v26 }
0x1ff5   :  { %16092 = vmatprep.subr.bf16.mxu1 %v16462_v0 }
0x1ff8   :  { %16094 = vmatpush3.bf16.msra.mxu1 %v16093_v20 }
0x1ff9   :  { %15492 = vmatprep.subr.mxu1 %v16464_v29 }
0x2081   :  { %v18272_v35 = vpop.f32.mrb[222].mxu0 }
0x2082   :  { %v15451_v36 = vpop.f32.mrb[223].mxu0  ;;  %v12253_v37 = vsel %vm10832_vm7, %v18272_v35, 0.0  ;;  %v12261_v38 = vmul.f32 %v18272_v35, %v18272_v35 }
0x2083   :  { %v12254_v39 = vrot.slane %v12253_v37, 4 }
0x2084   :  { %v12262_v40 = vsel %vm10832_vm7, %v12261_v38, 0.0 }
0x2085   :  { %v12255_v43 = vadd.f32 %v12254_v39, %v12253_v37  ;;  %v12263_v44 = vrot.slane %v12262_v40, 4 }
0x2087   :  { %v12256_v45 = vrot.slane %v12255_v43, 2  ;;  %v12264_v46 = vadd.f32 %v12263_v44, %v12262_v40  ;;  %v12370_v44 = vld [vmem:[%s18291_s27 + $0x200] sm:$0xff] }
0x2089   :  { %v12257_v47 = vadd.f32 %v12256_v45, %v12255_v43  ;;  %v12265_v49 = vrot.slane %v12264_v46, 2  ;;  %v12371_v45 = vld [vmem:[%s18291_s27 + $0x208] sm:$0xff] }
0x208b   :  { %v12258_v62 = vrot.slane %v12257_v47, 1  ;;  %v12266_v2 = vadd.f32 %v12265_v49, %v12264_v46  ;;  %v16108_v49 = vpack.c.bf16 %v12371_v45, %v12370_v44  ;;  %v12573_v45 = vld [vmem:[%s18341_s9 + $0x200] sm:$0xff] }
0x208d   :  { %v12259_v11 = vadd.f32 %v12258_v62, %v12257_v47  ;;  %v12267_v18 = vrot.slane %v12266_v2, 1  ;;  %v12293_v47 = vld [vmem:[%s12762_s1] sm:$0xff]  ;;  %v12372_v62 = vld [vmem:[%s18291_s27 + $0x210] sm:$0xff] }
0x208f   :  { %v12260_v25 = vmul.f32 0.5, %v12259_v11  ;;  %v12268_v50 = vadd.f32 %v12267_v18, %v12266_v2  ;;  %v12373_v2 = vld [vmem:[%s18291_s27 + $0x218] sm:$0xff]  ;;  %v12374_v18 = vld [vmem:[%s18291_s27 + $0x220] sm:$0xff] }
0x2090   :  { %v16111_v11 = vpack.c.bf16 %v12373_v2, %v12372_v62  ;;  %v12496_v2 = vld [vmem:[%s12763_s13] sm:$0xff] }
0x2091   :  { %v12269_v51 = vmul.f32 0.5, %v12268_v50  ;;  %v12270_v4 = vmul.f32 %v12260_v25, %v12260_v25 }
0x2093   :  { %v12271_v8 = vsub.f32 %v12269_v51, %v12270_v4  ;;  %v12376_v51 = vld [vmem:[%s18291_s27 + $0x230] sm:$0xff]  ;;  %v12377_v4 = vld [vmem:[%s18291_s27 + $0x238] sm:$0xff] }
0x2095   :  { %v12272_v42 = vmax.f32 %v12271_v8, 0.0  ;;  %v12378_v8 = vld [vmem:[%s18291_s27 + $0x240] sm:$0xff] }
0x2097   :  { %v12273_v3 = vadd.f32 1e-05, %v12272_v42 }
0x2099   :  { %16454 = vrsqrt.f32 %v12273_v3 }
0x20a3   :  { %v16455_v54 = vpop.eup %16454 }
0x20a4   :  { %v12275_v15 = vmul.f32 %v16455_v54, %v12252_v16 }
0x20a6   :  { %v12281_v17 = vmul.f32 %v12275_v15, %v12260_v25  ;;  %v12279_v20 = vrot.slane %v12275_v15, %v16732_v23  ;;  %v12375_v25 = vld [vmem:[%s18291_s27 + $0x228] sm:$0xff] }
0x20a7   :  { %v16114_v50 = vpack.c.bf16 %v12375_v25, %v12374_v18  ;;  %v12575_v18 = vld [vmem:[%s18341_s9 + $0x210] sm:$0xff]  ;;  %v12576_v25 = vld [vmem:[%s18341_s9 + $0x218] sm:$0xff] }
0x20a8   :  { %v12283_v22 = vrot.slane %v12281_v17, 7  ;;  %v12280_v36 = vmul.f32 %v12279_v20, %v18272_v35 }
0x20aa   :  { %v12285_v21 = vsub.f32 %v12252_v16, %v12283_v22 }
0x20ac   :  { %v12289_v37 = vrot.slane %v12285_v21, %v16735_v31 }
0x20ae   :  { %v11968_v30 = vpop.f32.mrb[128].mxu1  ;;  %v12290_v43 = vadd.f32 %v12289_v37, %v12280_v36 }
0x20af   :  { %15426 = vmatmul.mubr.f32.vlgmr.msra.gmra.mrb[130].mxu1 %v11968_v30  ;;  %v15392_v32 = vpop.f32.mrb[129].mxu1 }
0x20b0   :  { %15494 = vmatprep.mubr.msk.f32.mxu1 %vm16480_vm4, %v16464_v29 }
0x2182   :  { %v12054_v6 = vpop.f32.mrb[130].mxu1 }
0x2183   :  { %v12059_v41 = vsel %vm10832_vm7, %v12054_v6, 0.0  ;;  %v12067_v63 = vmul.f32 %v12054_v6, %v12054_v6  ;;  %v15427_v57 = vpop.f32.mrb[131].mxu1 }
0x2184   :  { %v12060_v58 = vrot.slane %v12059_v41, 4  ;;  %v12380_v57 = vld [vmem:[%s18291_s27 + $0x250] sm:$0xff] }
0x2185   :  { %v12068_v61 = vsel %vm10832_vm7, %v12067_v63, 0.0 }
0x2186   :  { %v12061_v33 = vadd.f32 %v12060_v58, %v12059_v41  ;;  %v12069_v56 = vrot.slane %v12068_v61, 4  ;;  %v12379_v41 = vld [vmem:[%s18291_s27 + $0x248] sm:$0xff]  ;;  %v12381_v58 = vld [vmem:[%s18291_s27 + $0x258] sm:$0xff] }
0x2187   :  { %v16120_v63 = vpack.c.bf16 %v12379_v41, %v12378_v8  ;;  %v12579_v8 = vld [vmem:[%s18341_s9 + $0x230] sm:$0xff]  ;;  %v12580_v41 = vld [vmem:[%s18341_s9 + $0x238] sm:$0xff] }
0x2188   :  { %v12062_v13 = vrot.slane %v12061_v33, 2  ;;  %v12070_v60 = vadd.f32 %v12069_v56, %v12068_v61  ;;  %v16123_v61 = vpack.c.bf16 %v12381_v58, %v12380_v57  ;;  %v12383_v56 = vld [vmem:[%s18291_s27 + $0x268] sm:$0xff] }
0x2189   :  { %v12582_v57 = vld [vmem:[%s18341_s9 + $0x248] sm:$0xff] }
0x218a   :  { %v12063_v34 = vadd.f32 %v12062_v13, %v12061_v33  ;;  %v12071_v1 = vrot.slane %v12070_v60, 2  ;;  %v12382_v33 = vld [vmem:[%s18291_s27 + $0x260] sm:$0xff]  ;;  %v12384_v13 = vld [vmem:[%s18291_s27 + $0x270] sm:$0xff] }
0x218b   :  { %v16126_v42 = vpack.c.bf16 %v12383_v56, %v12382_v33  ;;  %v12584_v33 = vld [vmem:[%s18341_s9 + $0x258] sm:$0xff] }
0x218c   :  { %v12064_v7 = vrot.slane %v12063_v34, 1  ;;  %v12072_v9 = vadd.f32 %v12071_v1, %v12070_v60  ;;  %v12385_v60 = vld [vmem:[%s18291_s27 + $0x278] sm:$0xff] }
0x218e   :  { %v12065_v10 = vadd.f32 %v12064_v7, %v12063_v34  ;;  %v12073_v12 = vrot.slane %v12072_v9, 1  ;;  %v16129_v34 = vpack.c.bf16 %v12385_v60, %v12384_v13  ;;  %v12586_v13 = vld [vmem:[%s18341_s9 + $0x268] sm:$0xff] }
0x2190   :  { %v12066_v59 = vmul.f32 0.5, %v12065_v10  ;;  %v12074_v24 = vadd.f32 %v12073_v12, %v12072_v9 }
0x2192   :  { %v12075_v5 = vmul.f32 0.5, %v12074_v24  ;;  %v12076_v55 = vmul.f32 %v12066_v59, %v12066_v59 }
0x2194   :  { %v12077_v52 = vsub.f32 %v12075_v5, %v12076_v55 }
0x2196   :  { %v12078_v53 = vmax.f32 %v12077_v52, 0.0 }
0x2198   :  { %v12079_v14 = vadd.f32 1e-05, %v12078_v53 }
0x219a   :  { %16456 = vrsqrt.f32 %v12079_v14 }
0x21a4   :  { %v16457_v26 = vpop.eup %16456 }
0x21a5   :  { %v12081_v48 = vmul.f32 %v16457_v26, %v12058_v19 }
0x21a7   :  { %v12087_v27 = vmul.f32 %v12081_v48, %v12066_v59  ;;  %v12085_v28 = vrot.slane %v12081_v48, %v16732_v23 }
0x21a9   :  { %v12089_v30 = vrot.slane %v12087_v27, 7  ;;  %v12086_v38 = vmul.f32 %v12085_v28, %v12054_v6  ;;  %v16117_v6 = vpack.c.bf16 %v12377_v4, %v12376_v51  ;;  %v12577_v51 = vld [vmem:[%s18341_s9 + $0x220] sm:$0xff]  ;;  %v12578_v4 = vld [vmem:[%s18341_s9 + $0x228] sm:$0xff] }
0x21ab   :  { %v12091_v32 = vsub.f32 %v12058_v19, %v12089_v30  ;;  %v12456_v30 = vld [vmem:[%s12765_s5] sm:$0x3] }
0x21ad   :  { %v12095_v39 = vrot.slane %v12091_v32, %v16735_v31 }
0x21af   :  { %v12096_v40 = vadd.f32 %v12095_v39, %v12086_v38 }
0x21b1   :  { %v18302_v46 = vadd.f32 %v12290_v43, %v12096_v40 }
0x21b3   :  { %v12292_v35 = vmax.f32 %v18302_v46, 0.0 }
0x21b5   :  { %15453 = vmatpush3.msk.msra.mxu0 %vm10832_vm7, %v12292_v35 }
0x21b6   :  { %15455 = vmatmul.mubr.msk.f32.vlgmr.msra.gmra.mrb[224].mxu0 %vm10828_vm8, %v12293_v47  ;;  %16107 = vmatprep.subr.bf16.mxu0 %v16462_v0  ;;  %v12574_v47 = vld [vmem:[%s18341_s9 + $0x208] sm:$0xff] }
0x21b7   :  { %16109 = vmatpush3.bf16.msra.mxu0 %v16108_v49  ;;  %15489 = vmatprep.mubr.msk.f32.mxu0 %vm16480_vm4, %v16464_v29 }
0x21b8   :  { %16110 = vmatprep.subr.bf16.mxu0 %v16462_v0 }
0x21bb   :  { %16112 = vmatpush3.bf16.msra.mxu0 %v16111_v11  ;;  %v16132_v11 = vpack.c.bf16 %v12574_v47, %v12573_v45 }
0x21bc   :  { %16113 = vmatprep.subr.bf16.mxu0 %v16462_v0 }
0x21bf   :  { %16115 = vmatpush3.bf16.msra.mxu0 %v16114_v50  ;;  %v16135_v50 = vpack.c.bf16 %v12576_v25, %v12575_v18 }
0x21c0   :  { %16116 = vmatprep.subr.bf16.mxu0 %v16462_v0 }
0x21c3   :  { %16118 = vmatpush3.bf16.msra.mxu0 %v16117_v6  ;;  %v16138_v6 = vpack.c.bf16 %v12578_v4, %v12577_v51 }
0x21c4   :  { %16119 = vmatprep.subr.bf16.mxu0 %v16462_v0 }
0x21c7   :  { %16121 = vmatpush3.bf16.msra.mxu0 %v16120_v63  ;;  %v16141_v63 = vpack.c.bf16 %v12580_v41, %v12579_v8 }
0x21c8   :  { %16122 = vmatprep.subr.bf16.mxu0 %v16462_v0 }
0x21cb   :  { %16124 = vmatpush3.bf16.msra.mxu0 %v16123_v61  ;;  %v12583_v61 = vld [vmem:[%s18341_s9 + $0x250] sm:$0xff] }
0x21cc   :  { %16125 = vmatprep.subr.bf16.mxu0 %v16462_v0  ;;  %v16147_v56 = vpack.c.bf16 %v12584_v33, %v12583_v61 }
0x21cf   :  { %16127 = vmatpush3.bf16.msra.mxu0 %v16126_v42  ;;  %v12585_v42 = vld [vmem:[%s18341_s9 + $0x260] sm:$0xff] }
0x21d0   :  { %16128 = vmatprep.subr.bf16.mxu0 %v16462_v0  ;;  %v16150_v60 = vpack.c.bf16 %v12586_v13, %v12585_v42 }
0x21d3   :  { %16130 = vmatpush3.bf16.msra.mxu0 %v16129_v34  ;;  %v12587_v34 = vld [vmem:[%s18341_s9 + $0x270] sm:$0xff] }
0x2289   :  { %v12366_v1 = vpop.f32.mrb[224].mxu0 }
0x228a   :  { %15490 = vmatmul.mubr.f32.vlgmr.msra.gmra.mrb[226].mxu0 %v12366_v1  ;;  %v15456_v3 = vpop.f32.mrb[225].mxu0  ;;  %v12588_v1 = vld [vmem:[%s18341_s9 + $0x278] sm:$0xff] }
0x228b   :  { %v16153_v3 = vpack.c.bf16 %v12588_v1, %v12587_v34 }
0x235d   :  { %v12452_v7 = vpop.f32.mrb[226].mxu0 }
0x235e   :  { %v12457_v9 = vsel %vm10832_vm7, %v12452_v7, 0.0  ;;  %v12465_v10 = vmul.f32 %v12452_v7, %v12452_v7  ;;  %v15491_v12 = vpop.f32.mrb[227].mxu0 }
0x235f   :  { %v12458_v59 = vrot.slane %v12457_v9, 4 }
0x2360   :  { %v12466_v24 = vsel %vm10832_vm7, %v12465_v10, 0.0 }
0x2361   :  { %v12459_v5 = vadd.f32 %v12458_v59, %v12457_v9  ;;  %v12467_v55 = vrot.slane %v12466_v24, 4 }
0x2363   :  { %v12460_v52 = vrot.slane %v12459_v5, 2  ;;  %v12468_v53 = vadd.f32 %v12467_v55, %v12466_v24 }
0x2365   :  { %v12461_v54 = vadd.f32 %v12460_v52, %v12459_v5  ;;  %v12469_v14 = vrot.slane %v12468_v53, 2 }
0x2367   :  { %v12462_v16 = vrot.slane %v12461_v54, 1  ;;  %v12470_v15 = vadd.f32 %v12469_v14, %v12468_v53 }
0x2369   :  { %v12463_v17 = vadd.f32 %v12462_v16, %v12461_v54  ;;  %v12471_v19 = vrot.slane %v12470_v15, 1 }
0x236b   :  { %v12464_v22 = vmul.f32 0.5, %v12463_v17  ;;  %v12472_v26 = vadd.f32 %v12471_v19, %v12470_v15 }
0x236d   :  { %v12473_v48 = vmul.f32 0.5, %v12472_v26  ;;  %v12474_v27 = vmul.f32 %v12464_v22, %v12464_v22 }
0x236f   :  { %v12475_v20 = vsub.f32 %v12473_v48, %v12474_v27 }
0x2371   :  { %v12476_v21 = vmax.f32 %v12475_v20, 0.0 }
0x2373   :  { %v12477_v28 = vadd.f32 1e-05, %v12476_v21 }
0x2375   :  { %16458 = vrsqrt.f32 %v12477_v28 }
0x237f   :  { %v16459_v32 = vpop.eup %16458 }
0x2380   :  { %v12479_v36 = vmul.f32 %v16459_v32, %v12456_v30  ;;  %v12659_v32 = vld [vmem:[%s12767_s17] sm:$0x3] }
0x2382   :  { %v12485_v37 = vmul.f32 %v12479_v36, %v12464_v22  ;;  %v12483_v38 = vrot.slane %v12479_v36, %v16732_v23 }
0x2384   :  { %v12487_v39 = vrot.slane %v12485_v37, 7  ;;  %v12484_v43 = vmul.f32 %v12483_v38, %v12452_v7 }
0x2386   :  { %v12489_v40 = vsub.f32 %v12456_v30, %v12487_v39 }
0x2388   :  { %v12493_v44 = vrot.slane %v12489_v40, %v16735_v31 }
0x238a   :  { %v12494_v49 = vadd.f32 %v12493_v44, %v12484_v43 }
0x238c   :  { %v12495_v62 = vmax.f32 %v12494_v49, 0.0 }
0x238e   :  { %15493 = vmatpush3.msk.msra.mxu1 %vm10832_vm7, %v12495_v62 }
0x238f   :  { %15495 = vmatmul.mubr.msk.f32.vlgmr.msra.gmra.mrb[132].mxu1 %vm10828_vm8, %v12496_v2  ;;  %16131 = vmatprep.subr.bf16.mxu1 %v16462_v0 }
0x2390   :  { %16133 = vmatpush3.bf16.msra.mxu1 %v16132_v11  ;;  %15529 = vmatprep.mubr.msk.f32.mxu1 %vm16480_vm4, %v16464_v29  ;;  %v12581_v29 = vld [vmem:[%s18341_s9 + $0x240] sm:$0xff] }
0x2391   :  { %16134 = vmatprep.subr.bf16.mxu1 %v16462_v0  ;;  %v16144_v58 = vpack.c.bf16 %v12582_v57, %v12581_v29 }
0x2394   :  { %16136 = vmatpush3.bf16.msra.mxu1 %v16135_v50 }
0x2395   :  { %16137 = vmatprep.subr.bf16.mxu1 %v16462_v0 }
0x2398   :  { %16139 = vmatpush3.bf16.msra.mxu1 %v16138_v6 }
0x2399   :  { %16140 = vmatprep.subr.bf16.mxu1 %v16462_v0 }
0x239c   :  { %16142 = vmatpush3.bf16.msra.mxu1 %v16141_v63 }
0x239d   :  { %16143 = vmatprep.subr.bf16.mxu1 %v16462_v0 }
0x23a0   :  { %16145 = vmatpush3.bf16.msra.mxu1 %v16144_v58 }
0x23a1   :  { %16146 = vmatprep.subr.bf16.mxu1 %v16462_v0 }
0x23a4   :  { %16148 = vmatpush3.bf16.msra.mxu1 %v16147_v56 }
0x23a5   :  { %16149 = vmatprep.subr.bf16.mxu1 %v16462_v0 }
0x23a8   :  { %16151 = vmatpush3.bf16.msra.mxu1 %v16150_v60 }
0x23a9   :  { %16152 = vmatprep.subr.bf16.mxu1 %v16462_v0 }
0x23ac   :  { %16154 = vmatpush3.bf16.msra.mxu1 %v16153_v3 }
0x2462   :  { %v12569_v7 = vpop.f32.mrb[132].mxu1 }
0x2463   :  { %15530 = vmatmul.mubr.f32.vlgmr.msra.gmra.mrb[134].mxu1 %v12569_v7  ;;  %v15496_v9 = vpop.f32.mrb[133].mxu1 }
0x2536   :  { %v12655_v10 = vpop.f32.mrb[134].mxu1 }
0x2537   :  { %v12660_v12 = vsel %vm10832_vm7, %v12655_v10, 0.0  ;;  %v12668_v59 = vmul.f32 %v12655_v10, %v12655_v10  ;;  %v15531_v24 = vpop.f32.mrb[135].mxu1 }
0x2538   :  { %v12661_v5 = vrot.slane %v12660_v12, 4 }
0x2539   :  { %v12669_v55 = vsel %vm10832_vm7, %v12668_v59, 0.0 }
0x253a   :  { %v12662_v52 = vadd.f32 %v12661_v5, %v12660_v12  ;;  %v12670_v53 = vrot.slane %v12669_v55, 4 }
0x253c   :  { %v12663_v54 = vrot.slane %v12662_v52, 2  ;;  %v12671_v14 = vadd.f32 %v12670_v53, %v12669_v55 }
0x253e   :  { %v12664_v16 = vadd.f32 %v12663_v54, %v12662_v52  ;;  %v12672_v15 = vrot.slane %v12671_v14, 2 }
0x2540   :  { %v12665_v17 = vrot.slane %v12664_v16, 1  ;;  %v12673_v0 = vadd.f32 %v12672_v15, %v12671_v14 }
0x2542   :  { %v12666_v19 = vadd.f32 %v12665_v17, %v12664_v16  ;;  %v12674_v22 = vrot.slane %v12673_v0, 1 }
0x2544   :  { %v12667_v26 = vmul.f32 0.5, %v12666_v19  ;;  %v12675_v48 = vadd.f32 %v12674_v22, %v12673_v0 }
0x2546   :  { %v12676_v27 = vmul.f32 0.5, %v12675_v48  ;;  %v12677_v20 = vmul.f32 %v12667_v26, %v12667_v26 }
0x2548   :  { %v12678_v21 = vsub.f32 %v12676_v27, %v12677_v20 }
0x254a   :  { %v12679_v28 = vmax.f32 %v12678_v21, 0.0 }
0x254c   :  { %v12680_v30 = vadd.f32 1e-05, %v12679_v28 }
0x254e   :  { %16460 = vrsqrt.f32 %v12680_v30 }
0x2558   :  { %v16461_v36 = vpop.eup %16460 }
0x2559   :  { %v12682_v37 = vmul.f32 %v16461_v36, %v12659_v32 }
0x255b   :  { %v12688_v38 = vmul.f32 %v12682_v37, %v12667_v26  ;;  %v12686_v39 = vrot.slane %v12682_v37, %v16732_v23 }
0x255d   :  { %v12690_v40 = vrot.slane %v12688_v38, 7  ;;  %v12687_v44 = vmul.f32 %v12686_v39, %v12655_v10 }
0x255f   :  { %v12692_v43 = vsub.f32 %v12659_v32, %v12690_v40 }
0x2561   :  { %v12696_v45 = vrot.slane %v12692_v43, %v16735_v31 }
0x2563   :  { %v12697_v47 = vadd.f32 %v12696_v45, %v12687_v44 }
0x2565   :  { %v12698_v49 = vadd.f32 %v12697_v47, %v12292_v35 }
0x2567   :  { %v12699_v62 = vmax.f32 %v12698_v49, 0.0 }
0x2569   :  { %12700 = vst [vmem:[%s12768_s21] sm:$0x3] %v12699_v62 }

</bundles_post_ra>
